<compile_context>
chip_gen: v7x
topology: tpu7x:2x2x1
jax: 0.10.0
libtpu: 0.0.40
codegen_flags: <defaults>
</compile_context>

<pallas_src>
import functools
import math

import jax
import jax.numpy as jnp
from jax import lax
from jax.experimental import pallas as pl
from jax.experimental.pallas import tpu as pltpu


# --------------------------------------------------------------------------- helpers
def build_norm_adj(edge_index, num_nodes):
    """Dense GCNConv-style normalized adjacency (add remaining self loops + sym norm)."""
    src = edge_index[0]
    dst = edge_index[1]
    a = jnp.zeros((num_nodes, num_nodes), jnp.float32).at[dst, src].add(1.0)
    diag = jnp.diagonal(a)
    a = a + jnp.diag(jnp.where(diag > 0, 0.0, 1.0))          # add_remaining_self_loops
    deg = jnp.sum(a, axis=1)
    dinv = jnp.where(deg > 0, 1.0 / jnp.sqrt(deg), 0.0)
    return dinv[:, None] * a * dinv[None, :]


# --------------------------------------------------------------------------- fused kernel
def fused_forward_kernel(*refs, T, J, H, nh, L):
    (xs_ref, xt_ref, jcd_ref,
     a_joint_ref, a_spat_ref, a_jcd_ref,
     sksp_w1, sk_b1, sp_b1, sk_w2, sk_b2, sp_w2, sp_b2,
     wqkv, bqkv, wo_r, bo, ln1_g, ln1_b,
     ff_w1, ff_b1, ff_w2, ff_b2, ln2_g, ln2_b,
     j_w1, j_b1, j_w2, j_b2,
     tc1_w, tc1_b, tc2_w, tc2_b,
     fsk_w, fj_w, ft_w, fsp_w, fu_b1, fu_g, fu_be, fu_w2, fu_b2,
     gru_wih, gru_whh, gru_bih, gru_bhh,
     fc_w, fc_b,
     out_ref) = refs

    f32 = jnp.float32
    bf16 = jnp.bfloat16
    R = T * J
    hd = H // nh
    H2 = 2 * H

    def mm(a, b):
        # MXU matmuls take bf16 operands; accumulation stays f32.
        return jnp.dot(a.astype(bf16), b.astype(bf16), preferred_element_type=f32)

    def layernorm(y, g, b):
        mu = jnp.mean(y, axis=-1, keepdims=True)
        var = jnp.mean((y - mu) ** 2, axis=-1, keepdims=True)
        return (y - mu) * lax.rsqrt(var + 1e-5) * g + b

    # Literal PyTorch flattening: the joint-indexed edge_index only touches the
    # first J rows of the globally flattened node set (batch 0); every other
    # row is a pure (normalized) self loop.  Gate the rank-J update on batch.
    gmask = (pl.program_id(0) == 0).astype(f32)

    def apply_adj(h, a_ref):
        # h -> blockdiag(A_JJ, I) @ h, with (A_JJ - I) passed in a_ref.
        top = h[:J, :]
        delta = mm(a_ref[...], top) * gmask
        return jnp.concatenate([top + delta, h[J:, :]], axis=0)

    def gcn_layer(z, w_ref, a_ref, b_ref):
        return jnp.maximum(apply_adj(mm(z, w_ref[...]), a_ref) + b_ref[...], 0.0)

    # ---------------- skeleton + spatial GCN stacks (shared input) -------------
    xs = xs_ref[...]                                          # (R, F)
    h12 = mm(xs, sksp_w1[...])                                # fused first layer (R, 2H)
    sk = jnp.maximum(apply_adj(h12[:, :H], a_joint_ref) + sk_b1[...], 0.0)
    sp = jnp.maximum(apply_adj(h12[:, H:], a_spat_ref) + sp_b1[...], 0.0)
    sk = gcn_layer(sk, sk_w2, a_joint_ref, sk_b2)             # (R, H)
    sp = gcn_layer(sp, sp_w2, a_spat_ref, sp_b2)              # (R, H)
    # TODO(synk): HyperComputeModule is not defined in the reference; identity passthrough.

    # ---------------- transformer encoder layer over joints --------------------
    qkv = mm(sk, wqkv[...]) + bqkv[...]                       # fused QKV (R, 3H)
    q3 = qkv[:, 0 * H:1 * H].reshape(T, J, H)
    k3 = qkv[:, 1 * H:2 * H].reshape(T, J, H)
    v3 = qkv[:, 2 * H:3 * H].reshape(T, J, H)
    scale = 1.0 / math.sqrt(hd)
    attn = jnp.zeros((R, H), f32) + bo[...]
    for i in range(nh):
        qh = q3[:, :, i * hd:(i + 1) * hd].astype(bf16)
        kh = k3[:, :, i * hd:(i + 1) * hd].astype(bf16)
        vh = v3[:, :, i * hd:(i + 1) * hd].astype(bf16)
        s = jnp.einsum('sjd,skd->sjk', qh, kh, preferred_element_type=f32) * scale
        s = s - jnp.max(s, axis=-1, keepdims=True)
        e = jnp.exp(s)
        p = e * pl.reciprocal(jnp.sum(e, axis=-1, keepdims=True), approx=True)
        o = jnp.einsum('sjk,skd->sjd', p.astype(bf16), vh, preferred_element_type=f32)
        # fold the head concat into the output projection (no lane-axis concat)
        attn = attn + mm(o.reshape(R, hd), wo_r[i])
    x1 = layernorm(sk + attn, ln1_g[...], ln1_b[...])         # post-norm layer
    ff = jnp.maximum(mm(x1, ff_w1[...]) + ff_b1[...], 0.0)
    ff = mm(ff, ff_w2[...]) + ff_b2[...]
    sk_out = layernorm(x1 + ff, ln2_g[...], ln2_b[...])       # (R, H)

    # ---------------- jcd stream ------------------------------------------------
    jf = jcd_ref[...]                                         # (T, D)
    jcd_feat = gcn_layer(gcn_layer(jf, j_w1, a_jcd_ref, j_b1), j_w2, a_jcd_ref, j_b2)

    # ---------------- temporal stream: 2x Conv1d(k=3, pad=1) + ReLU -------------
    def temporal_conv(x2, w_ref, b_ref):
        zr = jnp.zeros((1, x2.shape[1]), f32)
        x_prev = jnp.concatenate([zr, x2[:T - 1, :]], axis=0)   # x[t-1], zero at t=0
        x_next = jnp.concatenate([x2[1:, :], zr], axis=0)       # x[t+1], zero at t=T-1
        acc = mm(x_prev, w_ref[0]) + mm(x2, w_ref[1]) + mm(x_next, w_ref[2])
        return jnp.maximum(acc + b_ref[...], 0.0)

    temp_feat = temporal_conv(temporal_conv(xt_ref[...], tc1_w, tc1_b), tc2_w, tc2_b)

    # ---------------- spatial stream: mean over joints --------------------------
    spat_feat = jnp.sum(sp.reshape(T, J, H), axis=1) * (1.0 / J)    # (T, H)

    # ---------------- fusion MLP (concat-free) ----------------------------------
    pre = (fu_b1[...] + mm(jcd_feat, fj_w[...]) + mm(temp_feat, ft_w[...])
           + mm(spat_feat, fsp_w[...]))                       # (T, 2H)
    sk3 = sk_out.reshape(T, J, H)
    jidx = lax.broadcasted_iota(jnp.int32, (T, J, 1), 1)
    acc_nodes = jnp.zeros((R, H2), f32)
    for j in range(J):                                        # row n keeps W_{n mod J}
        masked = (sk3 * (jidx == j).astype(f32)).reshape(R, H)
        acc_nodes = acc_nodes + mm(masked, fsk_w[j])
    pre = pre + jnp.sum(acc_nodes.reshape(T, J, H2), axis=1)  # group-sum over joints
    hmid = jnp.maximum(layernorm(pre, fu_g[...], fu_be[...]), 0.0)
    fused = mm(hmid, fu_w2[...]) + fu_b2[...]                 # (T, H), time-major

    # ---------------- multi-layer GRU (fully unrolled) + classifier -------------
    x_seq = fused
    h = jnp.zeros((1, H), f32)
    for l in range(L):
        gx_all = mm(x_seq, gru_wih[l]) + gru_bih[l]           # hoisted input matmul (T, 3H)
        whh_l = gru_whh[l]
        bhh_l = gru_bhh[l]
        h = jnp.zeros((1, H), f32)
        outs = []
        for t in range(T):                                    # serial, latency-bound: unroll
            gx = gx_all[t:t + 1, :]                           # (1, 3H) static slice
            gh = mm(h, whh_l) + bhh_l
            rz = jax.nn.sigmoid(gx[:, :H2] + gh[:, :H2])      # fused r,z gates
            r = rz[:, :H]
            z = rz[:, H:]
            n = jnp.tanh(gx[:, H2:] + r * gh[:, H2:])
            h = (1.0 - z) * n + z * h
            if l < L - 1:
                outs.append(h)
        if l < L - 1:                                         # last layer: no sequence writeback
            x_seq = jnp.concatenate(outs, axis=0)             # (T, H)

    out_ref[...] = mm(h, fc_w[...]) + fc_b[...]               # (1, O)


# --------------------------------------------------------------------------- parameters
def init_params(key, *, J, F, H, D, L, O):
    keys = iter(jax.random.split(key, 64))

    def w(shape, scale=0.1):
        return (scale * jax.random.normal(next(keys), shape)).astype(jnp.float32)

    p = {}
    # skeleton GCNs
    p['sk_w1'], p['sk_b1'] = w((F, H)), w((1, H))
    p['sk_w2'], p['sk_b2'] = w((H, H)), w((1, H))
    # transformer encoder layer (fused QKV, out proj)
    p['wqkv'], p['bqkv'] = w((H, 3 * H)), w((1, 3 * H))
    p['wo'], p['bo'] = w((H, H)), w((1, H))
    p['tg1'], p['tb1'] = jnp.ones((1, H), jnp.float32), jnp.zeros((1, H), jnp.float32)
    p['tw1'], p['tbf1'] = w((H, 4 * H)), w((1, 4 * H))
    p['tw2'], p['tbf2'] = w((4 * H, H)), w((1, H))
    p['tg2'], p['tb2'] = jnp.ones((1, H), jnp.float32), jnp.zeros((1, H), jnp.float32)
    # jcd GCNs
    p['j_w1'], p['j_b1'] = w((D, H)), w((1, H))
    p['j_w2'], p['j_b2'] = w((H, H)), w((1, H))
    # temporal convs (stored as (K, Cin, Cout) for channels-last matmul taps)
    p['tc1_w'], p['tc1_b'] = w((3, J * F, H)), w((1, H))
    p['tc2_w'], p['tc2_b'] = w((3, H, H)), w((1, H))
    # spatial GCNs
    p['sp_w1'], p['sp_b1'] = w((F, H)), w((1, H))
    p['sp_w2'], p['sp_b2'] = w((H, H)), w((1, H))
    # fusion first Linear, pre-split by stream (row blocks of the concat weight)
    p['fu_w1_sk'] = w((J, H, 2 * H))
    p['fu_w1_jcd'] = w((H, 2 * H))
    p['fu_w1_temp'] = w((H, 2 * H))
    p['fu_w1_sp'] = w((H, 2 * H))
    p['fu_b1'] = w((1, 2 * H))
    p['fu_g'], p['fu_be'] = jnp.ones((1, 2 * H), jnp.float32), jnp.zeros((1, 2 * H), jnp.float32)
    p['fu_w2'], p['fu_b2'] = w((2 * H, H)), w((1, H))
    # GRU (weights pre-transposed to (H, 3H); gate order r, z, n)
    p['gru_wih'], p['gru_whh'] = w((L, H, 3 * H)), w((L, H, 3 * H))
    p['gru_bih'], p['gru_bhh'] = w((L, 1, 3 * H)), w((L, 1, 3 * H))
    # classifier
    p['fc_w'], p['fc_b'] = w((H, O)), w((1, O))
    return p


# --------------------------------------------------------------------------- forward
def forward(params, x, edge_index, jcd, jcd_edge_index=None, *,
            hidden, num_layers, output_dim, nhead=4):
    B, T, J, F = x.shape
    H = hidden
    O = output_dim
    L = num_layers
    if jcd_edge_index is None:
        jcd_edge_index = edge_index

    # Literal PyTorch semantics: edge_index carries joint indices (< J) while
    # GCNConv runs over B*T*J (or B*T) flattened nodes -> only the first J
    # global rows are mixed, everything else is a self loop.  We pass the tiny
    # (J,J) normalized adjacency minus I and apply it as a rank-J update.
    # (Per-batch blocking assumes J <= T for the jcd stream, true here.)
    eye_j = jnp.eye(J, dtype=jnp.float32)
    a_joint_d = build_norm_adj(edge_index, J) - eye_j
    a_jcd_d = build_norm_adj(jcd_edge_index, J) - eye_j
    ii = jnp.repeat(jnp.arange(J, dtype=jnp.int32), J)
    jj = jnp.tile(jnp.arange(J, dtype=jnp.int32), J)
    a_spat_d = build_norm_adj(jnp.stack([ii, jj], axis=0), J) - eye_j

    xs = x.reshape(B, T * J, F)       # per-batch node-major view (skeleton/spatial)
    xt = x.reshape(B, T, J * F)       # per-batch frame-major view (temporal conv)
    jcd3 = jcd.reshape(B, T, -1)
    Dj = jcd3.shape[-1]

    p = params
    bf = lambda a: a.astype(jnp.bfloat16)
    sksp_w1 = bf(jnp.concatenate([p['sk_w1'], p['sp_w1']], axis=1))   # (F, 2H) shared-input fuse
    wo_r = bf(p['wo'].reshape(nhead, H // nhead, H))                  # per-head row blocks of W_o

    batched = (xs, xt, jcd3)
    static = (a_joint_d, a_spat_d, a_jcd_d,
              sksp_w1, p['sk_b1'], p['sp_b1'],
              bf(p['sk_w2']), p['sk_b2'], bf(p['sp_w2']), p['sp_b2'],
              bf(p['wqkv']), p['bqkv'], wo_r, p['bo'], p['tg1'], p['tb1'],
              bf(p['tw1']), p['tbf1'], bf(p['tw2']), p['tbf2'], p['tg2'], p['tb2'],
              bf(p['j_w1']), p['j_b1'], bf(p['j_w2']), p['j_b2'],
              bf(p['tc1_w']), p['tc1_b'], bf(p['tc2_w']), p['tc2_b'],
              bf(p['fu_w1_sk']), bf(p['fu_w1_jcd']), bf(p['fu_w1_temp']), bf(p['fu_w1_sp']),
              p['fu_b1'], p['fu_g'], p['fu_be'], bf(p['fu_w2']), p['fu_b2'],
              bf(p['gru_wih']), bf(p['gru_whh']), p['gru_bih'], p['gru_bhh'],
              bf(p['fc_w']), p['fc_b'])

    sq = pl.Squeezed()

    def batched_spec(arr):
        nd = arr.ndim
        return pl.BlockSpec((sq,) + tuple(arr.shape[1:]),
                            lambda b, _nd=nd: (b,) + (0,) * (_nd - 1))

    def full_spec(arr):
        nd = arr.ndim
        return pl.BlockSpec(tuple(arr.shape), lambda b, _nd=nd: (0,) * _nd)

    in_specs = [batched_spec(a) for a in batched] + [full_spec(a) for a in static]
    out_spec = pl.BlockSpec((sq, 1, O), lambda b: (b, 0, 0))

    R = T * J
    flops = int(2 * B * (
        R * F * 2 * H + 2 * R * H * H + 6 * J * J * H          # GCN stacks
        + R * H * 3 * H + R * H * H + 2 * T * J * J * H        # attention
        + 2 * R * H * 4 * H                                    # transformer FFN
        + T * Dj * H + T * H * H                               # jcd GCNs
        + 3 * T * (J * F) * H + 3 * T * H * H                  # temporal convs
        + J * R * H * 2 * H + 3 * T * H * 2 * H + T * 2 * H * H  # fusion MLP
        + 2 * L * T * H * 3 * H + T * H * O))                  # GRU + classifier
    transcendentals = int(B * (nhead * T * J * J + L * T * 3 * H + R * H))
    bytes_accessed = int(sum(a.size * a.dtype.itemsize for a in batched + static)
                         + B * O * 4)

    kernel = functools.partial(fused_forward_kernel, T=T, J=J, H=H, nh=nhead, L=L)
    out3 = pl.pallas_call(
        kernel,
        out_shape=jax.ShapeDtypeStruct((B, 1, O), jnp.float32),
        grid=(B,),
        in_specs=in_specs,
        out_specs=out_spec,
        compiler_params=pltpu.CompilerParams(
            dimension_semantics=("parallel",),
            vmem_limit_bytes=32 * 1024 * 1024),
        cost_estimate=pl.CostEstimate(flops=flops,
                                      transcendentals=transcendentals,
                                      bytes_accessed=bytes_accessed),
    )(*batched, *static)
    return out3.reshape(B, O)


# --------------------------------------------------------------------------- main
if __name__ == "__main__":
    B, T, J, F = 2, 8, 4, 3          # batch, time_step, num_joints, num_features
    H = 32                           # hidden_dim
    L = 2                            # GRU num_layers
    O = 5                            # output_dim
    D = 6                            # feat_d (jcd feature size)

    key = jax.random.PRNGKey(0)
    k1, k2, k3 = jax.random.split(key, 3)
    x = jax.random.normal(k1, (B, T, J, F), jnp.float32)
    jcd = jax.random.normal(k2, (B, T, D), jnp.float32)
    # skeleton chain graph over joints (both directions)
    edge_index = jnp.array([[0, 1, 1, 2, 2, 3],
                            [1, 0, 2, 1, 3, 2]], dtype=jnp.int32)

    params = init_params(k3, J=J, F=F, H=H, D=D, L=L, O=O)
    fwd = jax.jit(functools.partial(forward, hidden=H, num_layers=L,
                                    output_dim=O, nhead=4))
    out = fwd(params, x, edge_index, jcd)
    jax.block_until_ready(out)
    assert out.shape == (B, O), out.shape
    print("KERNEL_OK")
</pallas_src>

<mosaic_0001>
module attributes {stable_mosaic.version = 11 : i64} {
  func.func private @main(%arg0: i32) attributes {dimension_semantics = [#tpu.dimension_semantics<core_parallel>], iteration_bounds = array<i64: 2>, tpu.core_type = #tpu.core_type<sc_scalar_subcore>, window_params = []} {
    return
  }
}

module attributes {stable_mosaic.version = 11 : i64} {
  func.func private @main(%arg0: i32) attributes {dimension_semantics = [#tpu.dimension_semantics<core_parallel>], iteration_bounds = array<i64: 2>, tpu.core_type = #tpu.core_type<sc_scalar_subcore>, window_params = []} {
    return
  }
}

module attributes {stable_mosaic.version = 11 : i64} {
  func.func @fused_forward_kernel(%arg0: i32, %arg1: memref<1x32x3xf32, #tpu.memory_space<vmem>>, %arg2: memref<1x8x12xf32, #tpu.memory_space<vmem>>, %arg3: memref<1x8x6xf32, #tpu.memory_space<vmem>>, %arg4: memref<4x4xf32, #tpu.memory_space<vmem>>, %arg5: memref<4x4xf32, #tpu.memory_space<vmem>>, %arg6: memref<4x4xf32, #tpu.memory_space<vmem>>, %arg7: memref<3x64xbf16, #tpu.memory_space<vmem>>, %arg8: memref<1x32xf32, #tpu.memory_space<vmem>>, %arg9: memref<1x32xf32, #tpu.memory_space<vmem>>, %arg10: memref<32x32xbf16, #tpu.memory_space<vmem>>, %arg11: memref<1x32xf32, #tpu.memory_space<vmem>>, %arg12: memref<32x32xbf16, #tpu.memory_space<vmem>>, %arg13: memref<1x32xf32, #tpu.memory_space<vmem>>, %arg14: memref<32x96xbf16, #tpu.memory_space<vmem>>, %arg15: memref<1x96xf32, #tpu.memory_space<vmem>>, %arg16: memref<4x8x32xbf16, #tpu.memory_space<vmem>>, %arg17: memref<1x32xf32, #tpu.memory_space<vmem>>, %arg18: memref<1x32xf32, #tpu.memory_space<vmem>>, %arg19: memref<1x32xf32, #tpu.memory_space<vmem>>, %arg20: memref<32x128xbf16, #tpu.memory_space<vmem>>, %arg21: memref<1x128xf32, #tpu.memory_space<vmem>>, %arg22: memref<128x32xbf16, #tpu.memory_space<vmem>>, %arg23: memref<1x32xf32, #tpu.memory_space<vmem>>, %arg24: memref<1x32xf32, #tpu.memory_space<vmem>>, %arg25: memref<1x32xf32, #tpu.memory_space<vmem>>, %arg26: memref<6x32xbf16, #tpu.memory_space<vmem>>, %arg27: memref<1x32xf32, #tpu.memory_space<vmem>>, %arg28: memref<32x32xbf16, #tpu.memory_space<vmem>>, %arg29: memref<1x32xf32, #tpu.memory_space<vmem>>, %arg30: memref<3x12x32xbf16, #tpu.memory_space<vmem>>, %arg31: memref<1x32xf32, #tpu.memory_space<vmem>>, %arg32: memref<3x32x32xbf16, #tpu.memory_space<vmem>>, %arg33: memref<1x32xf32, #tpu.memory_space<vmem>>, %arg34: memref<4x32x64xbf16, #tpu.memory_space<vmem>>, %arg35: memref<32x64xbf16, #tpu.memory_space<vmem>>, %arg36: memref<32x64xbf16, #tpu.memory_space<vmem>>, %arg37: memref<32x64xbf16, #tpu.memory_space<vmem>>, %arg38: memref<1x64xf32, #tpu.memory_space<vmem>>, %arg39: memref<1x64xf32, #tpu.memory_space<vmem>>, %arg40: memref<1x64xf32, #tpu.memory_space<vmem>>, %arg41: memref<64x32xbf16, #tpu.memory_space<vmem>>, %arg42: memref<1x32xf32, #tpu.memory_space<vmem>>, %arg43: memref<2x32x96xbf16, #tpu.memory_space<vmem>>, %arg44: memref<2x32x96xbf16, #tpu.memory_space<vmem>>, %arg45: memref<2x1x96xf32, #tpu.memory_space<vmem>>, %arg46: memref<2x1x96xf32, #tpu.memory_space<vmem>>, %arg47: memref<32x5xbf16, #tpu.memory_space<vmem>>, %arg48: memref<1x5xf32, #tpu.memory_space<vmem>>, %arg49: memref<1x1x5xf32, #tpu.memory_space<vmem>>) attributes {dimension_semantics = [#tpu.dimension_semantics<parallel>], iteration_bounds = array<i64: 2>, scalar_prefetch = 0 : i64, scratch_operands = 0 : i64, tpu.core_type = #tpu.core_type<tc>, window_params = [{transform_indices = @transform_0, window_bounds = array<i64: 1, 32, 3>}, {transform_indices = @transform_1, window_bounds = array<i64: 1, 8, 12>}, {transform_indices = @transform_2, window_bounds = array<i64: 1, 8, 6>}, {pipeline_mode = #tpu.pipeline_mode<synchronous>, transform_indices = @transform_3, window_bounds = array<i64: 4, 4>}, {pipeline_mode = #tpu.pipeline_mode<synchronous>, transform_indices = @transform_4, window_bounds = array<i64: 4, 4>}, {pipeline_mode = #tpu.pipeline_mode<synchronous>, transform_indices = @transform_5, window_bounds = array<i64: 4, 4>}, {pipeline_mode = #tpu.pipeline_mode<synchronous>, transform_indices = @transform_6, window_bounds = array<i64: 3, 64>}, {pipeline_mode = #tpu.pipeline_mode<synchronous>, transform_indices = @transform_7, window_bounds = array<i64: 1, 32>}, {pipeline_mode = #tpu.pipeline_mode<synchronous>, transform_indices = @transform_8, window_bounds = array<i64: 1, 32>}, {pipeline_mode = #tpu.pipeline_mode<synchronous>, transform_indices = @transform_9, window_bounds = array<i64: 32, 32>}, {pipeline_mode = #tpu.pipeline_mode<synchronous>, transform_indices = @transform_10, window_bounds = array<i64: 1, 32>}, {pipeline_mode = #tpu.pipeline_mode<synchronous>, transform_indices = @transform_11, window_bounds = array<i64: 32, 32>}, {pipeline_mode = #tpu.pipeline_mode<synchronous>, transform_indices = @transform_12, window_bounds = array<i64: 1, 32>}, {pipeline_mode = #tpu.pipeline_mode<synchronous>, transform_indices = @transform_13, window_bounds = array<i64: 32, 96>}, {pipeline_mode = #tpu.pipeline_mode<synchronous>, transform_indices = @transform_14, window_bounds = array<i64: 1, 96>}, {pipeline_mode = #tpu.pipeline_mode<synchronous>, transform_indices = @transform_15, window_bounds = array<i64: 4, 8, 32>}, {pipeline_mode = #tpu.pipeline_mode<synchronous>, transform_indices = @transform_16, window_bounds = array<i64: 1, 32>}, {pipeline_mode = #tpu.pipeline_mode<synchronous>, transform_indices = @transform_17, window_bounds = array<i64: 1, 32>}, {pipeline_mode = #tpu.pipeline_mode<synchronous>, transform_indices = @transform_18, window_bounds = array<i64: 1, 32>}, {pipeline_mode = #tpu.pipeline_mode<synchronous>, transform_indices = @transform_19, window_bounds = array<i64: 32, 128>}, {pipeline_mode = #tpu.pipeline_mode<synchronous>, transform_indices = @transform_20, window_bounds = array<i64: 1, 128>}, {pipeline_mode = #tpu.pipeline_mode<synchronous>, transform_indices = @transform_21, window_bounds = array<i64: 128, 32>}, {pipeline_mode = #tpu.pipeline_mode<synchronous>, transform_indices = @transform_22, window_bounds = array<i64: 1, 32>}, {pipeline_mode = #tpu.pipeline_mode<synchronous>, transform_indices = @transform_23, window_bounds = array<i64: 1, 32>}, {pipeline_mode = #tpu.pipeline_mode<synchronous>, transform_indices = @transform_24, window_bounds = array<i64: 1, 32>}, {pipeline_mode = #tpu.pipeline_mode<synchronous>, transform_indices = @transform_25, window_bounds = array<i64: 6, 32>}, {pipeline_mode = #tpu.pipeline_mode<synchronous>, transform_indices = @transform_26, window_bounds = array<i64: 1, 32>}, {pipeline_mode = #tpu.pipeline_mode<synchronous>, transform_indices = @transform_27, window_bounds = array<i64: 32, 32>}, {pipeline_mode = #tpu.pipeline_mode<synchronous>, transform_indices = @transform_28, window_bounds = array<i64: 1, 32>}, {pipeline_mode = #tpu.pipeline_mode<synchronous>, transform_indices = @transform_29, window_bounds = array<i64: 3, 12, 32>}, {pipeline_mode = #tpu.pipeline_mode<synchronous>, transform_indices = @transform_30, window_bounds = array<i64: 1, 32>}, {pipeline_mode = #tpu.pipeline_mode<synchronous>, transform_indices = @transform_31, window_bounds = array<i64: 3, 32, 32>}, {pipeline_mode = #tpu.pipeline_mode<synchronous>, transform_indices = @transform_32, window_bounds = array<i64: 1, 32>}, {pipeline_mode = #tpu.pipeline_mode<synchronous>, transform_indices = @transform_33, window_bounds = array<i64: 4, 32, 64>}, {pipeline_mode = #tpu.pipeline_mode<synchronous>, transform_indices = @transform_34, window_bounds = array<i64: 32, 64>}, {pipeline_mode = #tpu.pipeline_mode<synchronous>, transform_indices = @transform_35, window_bounds = array<i64: 32, 64>}, {pipeline_mode = #tpu.pipeline_mode<synchronous>, transform_indices = @transform_36, window_bounds = array<i64: 32, 64>}, {pipeline_mode = #tpu.pipeline_mode<synchronous>, transform_indices = @transform_37, window_bounds = array<i64: 1, 64>}, {pipeline_mode = #tpu.pipeline_mode<synchronous>, transform_indices = @transform_38, window_bounds = array<i64: 1, 64>}, {pipeline_mode = #tpu.pipeline_mode<synchronous>, transform_indices = @transform_39, window_bounds = array<i64: 1, 64>}, {pipeline_mode = #tpu.pipeline_mode<synchronous>, transform_indices = @transform_40, window_bounds = array<i64: 64, 32>}, {pipeline_mode = #tpu.pipeline_mode<synchronous>, transform_indices = @transform_41, window_bounds = array<i64: 1, 32>}, {pipeline_mode = #tpu.pipeline_mode<synchronous>, transform_indices = @transform_42, window_bounds = array<i64: 2, 32, 96>}, {pipeline_mode = #tpu.pipeline_mode<synchronous>, transform_indices = @transform_43, window_bounds = array<i64: 2, 32, 96>}, {pipeline_mode = #tpu.pipeline_mode<synchronous>, transform_indices = @transform_44, window_bounds = array<i64: 2, 1, 96>}, {pipeline_mode = #tpu.pipeline_mode<synchronous>, transform_indices = @transform_45, window_bounds = array<i64: 2, 1, 96>}, {pipeline_mode = #tpu.pipeline_mode<synchronous>, transform_indices = @transform_46, window_bounds = array<i64: 32, 5>}, {pipeline_mode = #tpu.pipeline_mode<synchronous>, transform_indices = @transform_47, window_bounds = array<i64: 1, 5>}, {transform_indices = @transform_48, window_bounds = array<i64: 1, 1, 5>}]} {
    %c0_i32 = arith.constant 0 : i32
    %0 = arith.cmpi eq, %arg0, %c0_i32 : i32
    %1 = arith.extui %0 : i1 to i32
    %2 = arith.sitofp %1 : i32 to f32
    %c0 = arith.constant 0 : index
    %c0_0 = arith.constant 0 : index
    %c0_1 = arith.constant 0 : index
    %3 = vector.load %arg1[%c0, %c0_0, %c0_1] : memref<1x32x3xf32, #tpu.memory_space<vmem>>, vector<1x32x3xf32>
    %4 = vector.shape_cast %3 : vector<1x32x3xf32> to vector<32x3xf32>
    %c0_2 = arith.constant 0 : index
    %c0_3 = arith.constant 0 : index
    %5 = vector.load %arg7[%c0_2, %c0_3] : memref<3x64xbf16, #tpu.memory_space<vmem>>, vector<3x64xbf16>
    %6 = arith.truncf %4 : vector<32x3xf32> to vector<32x3xbf16>
    %cst = arith.constant dense<0.000000e+00> : vector<32x64xf32>
    %7 = tpu.matmul %6, %5, %cst {dimension_numbers = #tpu.dot_dimension_numbers<[1], [0], [0], [1], [0, 0, 1, 1], [], []>} : vector<32x3xbf16>, vector<3x64xbf16>, vector<32x64xf32> -> vector<32x64xf32>
    %8 = vector.extract_strided_slice %7 {offsets = [0, 0], sizes = [32, 32], strides = [1, 1]} : vector<32x64xf32> to vector<32x32xf32>
    %9 = vector.extract_strided_slice %8 {offsets = [0, 0], sizes = [4, 32], strides = [1, 1]} : vector<32x32xf32> to vector<4x32xf32>
    %c0_4 = arith.constant 0 : index
    %c0_5 = arith.constant 0 : index
    %10 = vector.load %arg4[%c0_4, %c0_5] : memref<4x4xf32, #tpu.memory_space<vmem>>, vector<4x4xf32>
    %11 = arith.truncf %10 : vector<4x4xf32> to vector<4x4xbf16>
    %12 = arith.truncf %9 : vector<4x32xf32> to vector<4x32xbf16>
    %cst_6 = arith.constant dense<0.000000e+00> : vector<4x32xf32>
    %13 = tpu.matmul %11, %12, %cst_6 {dimension_numbers = #tpu.dot_dimension_numbers<[1], [0], [0], [1], [0, 0, 1, 1], [], []>} : vector<4x4xbf16>, vector<4x32xbf16>, vector<4x32xf32> -> vector<4x32xf32>
    %14 = vector.broadcast %2 : f32 to vector<4x32xf32>
    %15 = arith.mulf %13, %14 : vector<4x32xf32>
    %16 = arith.addf %9, %15 : vector<4x32xf32>
    %17 = vector.extract_strided_slice %8 {offsets = [4, 0], sizes = [28, 32], strides = [1, 1]} : vector<32x32xf32> to vector<28x32xf32>
    %18 = tpu.concatenate %16, %17 in 0 : vector<4x32xf32>, vector<28x32xf32> -> vector<32x32xf32>
    %c0_7 = arith.constant 0 : index
    %c0_8 = arith.constant 0 : index
    %19 = vector.load %arg8[%c0_7, %c0_8] : memref<1x32xf32, #tpu.memory_space<vmem>>, vector<1x32xf32>
    %20 = vector.broadcast %19 : vector<1x32xf32> to vector<32x32xf32>
    %21 = arith.addf %18, %20 : vector<32x32xf32>
    %cst_9 = arith.constant 0.000000e+00 : f32
    %22 = vector.broadcast %cst_9 : f32 to vector<32x32xf32>
    %23 = arith.maximumf %21, %22 : vector<32x32xf32>
    %24 = vector.extract_strided_slice %7 {offsets = [0, 32], sizes = [32, 32], strides = [1, 1]} : vector<32x64xf32> to vector<32x32xf32>
    %25 = vector.extract_strided_slice %24 {offsets = [0, 0], sizes = [4, 32], strides = [1, 1]} : vector<32x32xf32> to vector<4x32xf32>
    %c0_10 = arith.constant 0 : index
    %c0_11 = arith.constant 0 : index
    %26 = vector.load %arg5[%c0_10, %c0_11] : memref<4x4xf32, #tpu.memory_space<vmem>>, vector<4x4xf32>
    %27 = arith.truncf %26 : vector<4x4xf32> to vector<4x4xbf16>
    %28 = arith.truncf %25 : vector<4x32xf32> to vector<4x32xbf16>
    %cst_12 = arith.constant dense<0.000000e+00> : vector<4x32xf32>
    %29 = tpu.matmul %27, %28, %cst_12 {dimension_numbers = #tpu.dot_dimension_numbers<[1], [0], [0], [1], [0, 0, 1, 1], [], []>} : vector<4x4xbf16>, vector<4x32xbf16>, vector<4x32xf32> -> vector<4x32xf32>
    %30 = vector.broadcast %2 : f32 to vector<4x32xf32>
    %31 = arith.mulf %29, %30 : vector<4x32xf32>
    %32 = arith.addf %25, %31 : vector<4x32xf32>
    %33 = vector.extract_strided_slice %24 {offsets = [4, 0], sizes = [28, 32], strides = [1, 1]} : vector<32x32xf32> to vector<28x32xf32>
    %34 = tpu.concatenate %32, %33 in 0 : vector<4x32xf32>, vector<28x32xf32> -> vector<32x32xf32>
    %c0_13 = arith.constant 0 : index
    %c0_14 = arith.constant 0 : index
    %35 = vector.load %arg9[%c0_13, %c0_14] : memref<1x32xf32, #tpu.memory_space<vmem>>, vector<1x32xf32>
    %36 = vector.broadcast %35 : vector<1x32xf32> to vector<32x32xf32>
    %37 = arith.addf %34, %36 : vector<32x32xf32>
    %cst_15 = arith.constant 0.000000e+00 : f32
    %38 = vector.broadcast %cst_15 : f32 to vector<32x32xf32>
    %39 = arith.maximumf %37, %38 : vector<32x32xf32>
    %c0_16 = arith.constant 0 : index
    %c0_17 = arith.constant 0 : index
    %40 = vector.load %arg10[%c0_16, %c0_17] : memref<32x32xbf16, #tpu.memory_space<vmem>>, vector<32x32xbf16>
    %41 = arith.truncf %23 : vector<32x32xf32> to vector<32x32xbf16>
    %cst_18 = arith.constant dense<0.000000e+00> : vector<32x32xf32>
    %42 = tpu.matmul %41, %40, %cst_18 {dimension_numbers = #tpu.dot_dimension_numbers<[1], [0], [0], [1], [0, 0, 1, 1], [], []>} : vector<32x32xbf16>, vector<32x32xbf16>, vector<32x32xf32> -> vector<32x32xf32>
    %43 = vector.extract_strided_slice %42 {offsets = [0, 0], sizes = [4, 32], strides = [1, 1]} : vector<32x32xf32> to vector<4x32xf32>
    %c0_19 = arith.constant 0 : index
    %c0_20 = arith.constant 0 : index
    %44 = vector.load %arg4[%c0_19, %c0_20] : memref<4x4xf32, #tpu.memory_space<vmem>>, vector<4x4xf32>
    %45 = arith.truncf %44 : vector<4x4xf32> to vector<4x4xbf16>
    %46 = arith.truncf %43 : vector<4x32xf32> to vector<4x32xbf16>
    %cst_21 = arith.constant dense<0.000000e+00> : vector<4x32xf32>
    %47 = tpu.matmul %45, %46, %cst_21 {dimension_numbers = #tpu.dot_dimension_numbers<[1], [0], [0], [1], [0, 0, 1, 1], [], []>} : vector<4x4xbf16>, vector<4x32xbf16>, vector<4x32xf32> -> vector<4x32xf32>
    %48 = vector.broadcast %2 : f32 to vector<4x32xf32>
    %49 = arith.mulf %47, %48 : vector<4x32xf32>
    %50 = arith.addf %43, %49 : vector<4x32xf32>
    %51 = vector.extract_strided_slice %42 {offsets = [4, 0], sizes = [28, 32], strides = [1, 1]} : vector<32x32xf32> to vector<28x32xf32>
    %52 = tpu.concatenate %50, %51 in 0 : vector<4x32xf32>, vector<28x32xf32> -> vector<32x32xf32>
    %c0_22 = arith.constant 0 : index
    %c0_23 = arith.constant 0 : index
    %53 = vector.load %arg11[%c0_22, %c0_23] : memref<1x32xf32, #tpu.memory_space<vmem>>, vector<1x32xf32>
    %54 = vector.broadcast %53 : vector<1x32xf32> to vector<32x32xf32>
    %55 = arith.addf %52, %54 : vector<32x32xf32>
    %cst_24 = arith.constant 0.000000e+00 : f32
    %56 = vector.broadcast %cst_24 : f32 to vector<32x32xf32>
    %57 = arith.maximumf %55, %56 : vector<32x32xf32>
    %c0_25 = arith.constant 0 : index
    %c0_26 = arith.constant 0 : index
    %58 = vector.load %arg12[%c0_25, %c0_26] : memref<32x32xbf16, #tpu.memory_space<vmem>>, vector<32x32xbf16>
    %59 = arith.truncf %39 : vector<32x32xf32> to vector<32x32xbf16>
    %cst_27 = arith.constant dense<0.000000e+00> : vector<32x32xf32>
    %60 = tpu.matmul %59, %58, %cst_27 {dimension_numbers = #tpu.dot_dimension_numbers<[1], [0], [0], [1], [0, 0, 1, 1], [], []>} : vector<32x32xbf16>, vector<32x32xbf16>, vector<32x32xf32> -> vector<32x32xf32>
    %61 = vector.extract_strided_slice %60 {offsets = [0, 0], sizes = [4, 32], strides = [1, 1]} : vector<32x32xf32> to vector<4x32xf32>
    %c0_28 = arith.constant 0 : index
    %c0_29 = arith.constant 0 : index
    %62 = vector.load %arg5[%c0_28, %c0_29] : memref<4x4xf32, #tpu.memory_space<vmem>>, vector<4x4xf32>
    %63 = arith.truncf %62 : vector<4x4xf32> to vector<4x4xbf16>
    %64 = arith.truncf %61 : vector<4x32xf32> to vector<4x32xbf16>
    %cst_30 = arith.constant dense<0.000000e+00> : vector<4x32xf32>
    %65 = tpu.matmul %63, %64, %cst_30 {dimension_numbers = #tpu.dot_dimension_numbers<[1], [0], [0], [1], [0, 0, 1, 1], [], []>} : vector<4x4xbf16>, vector<4x32xbf16>, vector<4x32xf32> -> vector<4x32xf32>
    %66 = vector.broadcast %2 : f32 to vector<4x32xf32>
    %67 = arith.mulf %65, %66 : vector<4x32xf32>
    %68 = arith.addf %61, %67 : vector<4x32xf32>
    %69 = vector.extract_strided_slice %60 {offsets = [4, 0], sizes = [28, 32], strides = [1, 1]} : vector<32x32xf32> to vector<28x32xf32>
    %70 = tpu.concatenate %68, %69 in 0 : vector<4x32xf32>, vector<28x32xf32> -> vector<32x32xf32>
    %c0_31 = arith.constant 0 : index
    %c0_32 = arith.constant 0 : index
    %71 = vector.load %arg13[%c0_31, %c0_32] : memref<1x32xf32, #tpu.memory_space<vmem>>, vector<1x32xf32>
    %72 = vector.broadcast %71 : vector<1x32xf32> to vector<32x32xf32>
    %73 = arith.addf %70, %72 : vector<32x32xf32>
    %cst_33 = arith.constant 0.000000e+00 : f32
    %74 = vector.broadcast %cst_33 : f32 to vector<32x32xf32>
    %75 = arith.maximumf %73, %74 : vector<32x32xf32>
    %c0_34 = arith.constant 0 : index
    %c0_35 = arith.constant 0 : index
    %76 = vector.load %arg14[%c0_34, %c0_35] : memref<32x96xbf16, #tpu.memory_space<vmem>>, vector<32x96xbf16>
    %77 = arith.truncf %57 : vector<32x32xf32> to vector<32x32xbf16>
    %cst_36 = arith.constant dense<0.000000e+00> : vector<32x96xf32>
    %78 = tpu.matmul %77, %76, %cst_36 {dimension_numbers = #tpu.dot_dimension_numbers<[1], [0], [0], [1], [0, 0, 1, 1], [], []>} : vector<32x32xbf16>, vector<32x96xbf16>, vector<32x96xf32> -> vector<32x96xf32>
    %c0_37 = arith.constant 0 : index
    %c0_38 = arith.constant 0 : index
    %79 = vector.load %arg15[%c0_37, %c0_38] : memref<1x96xf32, #tpu.memory_space<vmem>>, vector<1x96xf32>
    %80 = vector.broadcast %79 : vector<1x96xf32> to vector<32x96xf32>
    %81 = arith.addf %78, %80 : vector<32x96xf32>
    %82 = vector.extract_strided_slice %81 {offsets = [0, 0], sizes = [32, 32], strides = [1, 1]} : vector<32x96xf32> to vector<32x32xf32>
    %83 = vector.shape_cast %82 : vector<32x32xf32> to vector<8x4x32xf32>
    %84 = vector.extract_strided_slice %81 {offsets = [0, 32], sizes = [32, 32], strides = [1, 1]} : vector<32x96xf32> to vector<32x32xf32>
    %85 = vector.shape_cast %84 : vector<32x32xf32> to vector<8x4x32xf32>
    %86 = vector.extract_strided_slice %81 {offsets = [0, 64], sizes = [32, 32], strides = [1, 1]} : vector<32x96xf32> to vector<32x32xf32>
    %87 = vector.shape_cast %86 : vector<32x32xf32> to vector<8x4x32xf32>
    %cst_39 = arith.constant 0.000000e+00 : f32
    %88 = vector.broadcast %cst_39 : f32 to vector<32x32xf32>
    %c0_40 = arith.constant 0 : index
    %c0_41 = arith.constant 0 : index
    %89 = vector.load %arg17[%c0_40, %c0_41] : memref<1x32xf32, #tpu.memory_space<vmem>>, vector<1x32xf32>
    %90 = vector.broadcast %89 : vector<1x32xf32> to vector<32x32xf32>
    %91 = arith.addf %88, %90 : vector<32x32xf32>
    %92 = vector.extract_strided_slice %83 {offsets = [0, 0, 0], sizes = [8, 4, 8], strides = [1, 1, 1]} : vector<8x4x32xf32> to vector<8x4x8xf32>
    %93 = arith.truncf %92 : vector<8x4x8xf32> to vector<8x4x8xbf16>
    %94 = vector.extract_strided_slice %85 {offsets = [0, 0, 0], sizes = [8, 4, 8], strides = [1, 1, 1]} : vector<8x4x32xf32> to vector<8x4x8xf32>
    %95 = arith.truncf %94 : vector<8x4x8xf32> to vector<8x4x8xbf16>
    %96 = vector.extract_strided_slice %87 {offsets = [0, 0, 0], sizes = [8, 4, 8], strides = [1, 1, 1]} : vector<8x4x32xf32> to vector<8x4x8xf32>
    %97 = arith.truncf %96 : vector<8x4x8xf32> to vector<8x4x8xbf16>
    "tpu.trace_start"() <{level = 10 : i32, message = "sjd,skd->sjk"}> : () -> ()
    %cst_42 = arith.constant dense<0.000000e+00> : vector<8x4x4xf32>
    %98 = tpu.matmul %93, %95, %cst_42 {dimension_numbers = #tpu.dot_dimension_numbers<[2], [2], [1], [1], [0, 0, 0, 1, 1, 1], [0], [0]>} : vector<8x4x8xbf16>, vector<8x4x8xbf16>, vector<8x4x4xf32> -> vector<8x4x4xf32>
    "tpu.trace_stop"() : () -> ()
    %cst_43 = arith.constant 0.353553385 : f32
    %99 = vector.broadcast %cst_43 : f32 to vector<8x4x4xf32>
    %100 = arith.mulf %98, %99 : vector<8x4x4xf32>
    %cst_44 = arith.constant dense<0xFF800000> : vector<8x4xf32>
    %101 = vector.multi_reduction <maximumf>, %100, %cst_44 [2] : vector<8x4x4xf32> to vector<8x4xf32>
    %102 = vector.shape_cast %101 : vector<8x4xf32> to vector<8x4x1xf32>
    %103 = vector.broadcast %102 : vector<8x4x1xf32> to vector<8x4x4xf32>
    %104 = arith.subf %100, %103 : vector<8x4x4xf32>
    %105 = math.exp %104 : vector<8x4x4xf32>
    %cst_45 = arith.constant dense<0.000000e+00> : vector<8x4xf32>
    %106 = vector.multi_reduction <add>, %105, %cst_45 [2] : vector<8x4x4xf32> to vector<8x4xf32>
    %107 = vector.shape_cast %106 : vector<8x4xf32> to vector<8x4x1xf32>
    %108 = tpu.reciprocal %107 {approx = true} : vector<8x4x1xf32> -> vector<8x4x1xf32>
    %109 = vector.broadcast %108 : vector<8x4x1xf32> to vector<8x4x4xf32>
    %110 = arith.mulf %105, %109 : vector<8x4x4xf32>
    %111 = arith.truncf %110 : vector<8x4x4xf32> to vector<8x4x4xbf16>
    "tpu.trace_start"() <{level = 10 : i32, message = "sjk,skd->sjd"}> : () -> ()
    %cst_46 = arith.constant dense<0.000000e+00> : vector<8x4x8xf32>
    %112 = tpu.matmul %111, %97, %cst_46 {dimension_numbers = #tpu.dot_dimension_numbers<[2], [1], [1], [2], [0, 0, 0, 1, 1, 2], [0], [0]>} : vector<8x4x4xbf16>, vector<8x4x8xbf16>, vector<8x4x8xf32> -> vector<8x4x8xf32>
    "tpu.trace_stop"() : () -> ()
    %113 = vector.shape_cast %112 : vector<8x4x8xf32> to vector<32x8xf32>
    %c0_47 = arith.constant 0 : index
    %c0_48 = arith.constant 0 : index
    %c0_49 = arith.constant 0 : index
    %114 = vector.load %arg16[%c0_47, %c0_48, %c0_49] : memref<4x8x32xbf16, #tpu.memory_space<vmem>>, vector<1x8x32xbf16>
    %115 = vector.shape_cast %114 : vector<1x8x32xbf16> to vector<8x32xbf16>
    %116 = arith.truncf %113 : vector<32x8xf32> to vector<32x8xbf16>
    %cst_50 = arith.constant dense<0.000000e+00> : vector<32x32xf32>
    %117 = tpu.matmul %116, %115, %cst_50 {dimension_numbers = #tpu.dot_dimension_numbers<[1], [0], [0], [1], [0, 0, 1, 1], [], []>} : vector<32x8xbf16>, vector<8x32xbf16>, vector<32x32xf32> -> vector<32x32xf32>
    %118 = arith.addf %91, %117 : vector<32x32xf32>
    %119 = vector.extract_strided_slice %83 {offsets = [0, 0, 8], sizes = [8, 4, 8], strides = [1, 1, 1]} : vector<8x4x32xf32> to vector<8x4x8xf32>
    %120 = arith.truncf %119 : vector<8x4x8xf32> to vector<8x4x8xbf16>
    %121 = vector.extract_strided_slice %85 {offsets = [0, 0, 8], sizes = [8, 4, 8], strides = [1, 1, 1]} : vector<8x4x32xf32> to vector<8x4x8xf32>
    %122 = arith.truncf %121 : vector<8x4x8xf32> to vector<8x4x8xbf16>
    %123 = vector.extract_strided_slice %87 {offsets = [0, 0, 8], sizes = [8, 4, 8], strides = [1, 1, 1]} : vector<8x4x32xf32> to vector<8x4x8xf32>
    %124 = arith.truncf %123 : vector<8x4x8xf32> to vector<8x4x8xbf16>
    "tpu.trace_start"() <{level = 10 : i32, message = "sjd,skd->sjk"}> : () -> ()
    %cst_51 = arith.constant dense<0.000000e+00> : vector<8x4x4xf32>
    %125 = tpu.matmul %120, %122, %cst_51 {dimension_numbers = #tpu.dot_dimension_numbers<[2], [2], [1], [1], [0, 0, 0, 1, 1, 1], [0], [0]>} : vector<8x4x8xbf16>, vector<8x4x8xbf16>, vector<8x4x4xf32> -> vector<8x4x4xf32>
    "tpu.trace_stop"() : () -> ()
    %cst_52 = arith.constant 0.353553385 : f32
    %126 = vector.broadcast %cst_52 : f32 to vector<8x4x4xf32>
    %127 = arith.mulf %125, %126 : vector<8x4x4xf32>
    %cst_53 = arith.constant dense<0xFF800000> : vector<8x4xf32>
    %128 = vector.multi_reduction <maximumf>, %127, %cst_53 [2] : vector<8x4x4xf32> to vector<8x4xf32>
    %129 = vector.shape_cast %128 : vector<8x4xf32> to vector<8x4x1xf32>
    %130 = vector.broadcast %129 : vector<8x4x1xf32> to vector<8x4x4xf32>
    %131 = arith.subf %127, %130 : vector<8x4x4xf32>
    %132 = math.exp %131 : vector<8x4x4xf32>
    %cst_54 = arith.constant dense<0.000000e+00> : vector<8x4xf32>
    %133 = vector.multi_reduction <add>, %132, %cst_54 [2] : vector<8x4x4xf32> to vector<8x4xf32>
    %134 = vector.shape_cast %133 : vector<8x4xf32> to vector<8x4x1xf32>
    %135 = tpu.reciprocal %134 {approx = true} : vector<8x4x1xf32> -> vector<8x4x1xf32>
    %136 = vector.broadcast %135 : vector<8x4x1xf32> to vector<8x4x4xf32>
    %137 = arith.mulf %132, %136 : vector<8x4x4xf32>
    %138 = arith.truncf %137 : vector<8x4x4xf32> to vector<8x4x4xbf16>
    "tpu.trace_start"() <{level = 10 : i32, message = "sjk,skd->sjd"}> : () -> ()
    %cst_55 = arith.constant dense<0.000000e+00> : vector<8x4x8xf32>
    %139 = tpu.matmul %138, %124, %cst_55 {dimension_numbers = #tpu.dot_dimension_numbers<[2], [1], [1], [2], [0, 0, 0, 1, 1, 2], [0], [0]>} : vector<8x4x4xbf16>, vector<8x4x8xbf16>, vector<8x4x8xf32> -> vector<8x4x8xf32>
    "tpu.trace_stop"() : () -> ()
    %140 = vector.shape_cast %139 : vector<8x4x8xf32> to vector<32x8xf32>
    %c1 = arith.constant 1 : index
    %c0_56 = arith.constant 0 : index
    %c0_57 = arith.constant 0 : index
    %141 = vector.load %arg16[%c1, %c0_56, %c0_57] : memref<4x8x32xbf16, #tpu.memory_space<vmem>>, vector<1x8x32xbf16>
    %142 = vector.shape_cast %141 : vector<1x8x32xbf16> to vector<8x32xbf16>
    %143 = arith.truncf %140 : vector<32x8xf32> to vector<32x8xbf16>
    %cst_58 = arith.constant dense<0.000000e+00> : vector<32x32xf32>
    %144 = tpu.matmul %143, %142, %cst_58 {dimension_numbers = #tpu.dot_dimension_numbers<[1], [0], [0], [1], [0, 0, 1, 1], [], []>} : vector<32x8xbf16>, vector<8x32xbf16>, vector<32x32xf32> -> vector<32x32xf32>
    %145 = arith.addf %118, %144 : vector<32x32xf32>
    %146 = vector.extract_strided_slice %83 {offsets = [0, 0, 16], sizes = [8, 4, 8], strides = [1, 1, 1]} : vector<8x4x32xf32> to vector<8x4x8xf32>
    %147 = arith.truncf %146 : vector<8x4x8xf32> to vector<8x4x8xbf16>
    %148 = vector.extract_strided_slice %85 {offsets = [0, 0, 16], sizes = [8, 4, 8], strides = [1, 1, 1]} : vector<8x4x32xf32> to vector<8x4x8xf32>
    %149 = arith.truncf %148 : vector<8x4x8xf32> to vector<8x4x8xbf16>
    %150 = vector.extract_strided_slice %87 {offsets = [0, 0, 16], sizes = [8, 4, 8], strides = [1, 1, 1]} : vector<8x4x32xf32> to vector<8x4x8xf32>
    %151 = arith.truncf %150 : vector<8x4x8xf32> to vector<8x4x8xbf16>
    "tpu.trace_start"() <{level = 10 : i32, message = "sjd,skd->sjk"}> : () -> ()
    %cst_59 = arith.constant dense<0.000000e+00> : vector<8x4x4xf32>
    %152 = tpu.matmul %147, %149, %cst_59 {dimension_numbers = #tpu.dot_dimension_numbers<[2], [2], [1], [1], [0, 0, 0, 1, 1, 1], [0], [0]>} : vector<8x4x8xbf16>, vector<8x4x8xbf16>, vector<8x4x4xf32> -> vector<8x4x4xf32>
    "tpu.trace_stop"() : () -> ()
    %cst_60 = arith.constant 0.353553385 : f32
    %153 = vector.broadcast %cst_60 : f32 to vector<8x4x4xf32>
    %154 = arith.mulf %152, %153 : vector<8x4x4xf32>
    %cst_61 = arith.constant dense<0xFF800000> : vector<8x4xf32>
    %155 = vector.multi_reduction <maximumf>, %154, %cst_61 [2] : vector<8x4x4xf32> to vector<8x4xf32>
    %156 = vector.shape_cast %155 : vector<8x4xf32> to vector<8x4x1xf32>
    %157 = vector.broadcast %156 : vector<8x4x1xf32> to vector<8x4x4xf32>
    %158 = arith.subf %154, %157 : vector<8x4x4xf32>
    %159 = math.exp %158 : vector<8x4x4xf32>
    %cst_62 = arith.constant dense<0.000000e+00> : vector<8x4xf32>
    %160 = vector.multi_reduction <add>, %159, %cst_62 [2] : vector<8x4x4xf32> to vector<8x4xf32>
    %161 = vector.shape_cast %160 : vector<8x4xf32> to vector<8x4x1xf32>
    %162 = tpu.reciprocal %161 {approx = true} : vector<8x4x1xf32> -> vector<8x4x1xf32>
    %163 = vector.broadcast %162 : vector<8x4x1xf32> to vector<8x4x4xf32>
    %164 = arith.mulf %159, %163 : vector<8x4x4xf32>
    %165 = arith.truncf %164 : vector<8x4x4xf32> to vector<8x4x4xbf16>
    "tpu.trace_start"() <{level = 10 : i32, message = "sjk,skd->sjd"}> : () -> ()
    %cst_63 = arith.constant dense<0.000000e+00> : vector<8x4x8xf32>
    %166 = tpu.matmul %165, %151, %cst_63 {dimension_numbers = #tpu.dot_dimension_numbers<[2], [1], [1], [2], [0, 0, 0, 1, 1, 2], [0], [0]>} : vector<8x4x4xbf16>, vector<8x4x8xbf16>, vector<8x4x8xf32> -> vector<8x4x8xf32>
    "tpu.trace_stop"() : () -> ()
    %167 = vector.shape_cast %166 : vector<8x4x8xf32> to vector<32x8xf32>
    %c2 = arith.constant 2 : index
    %c0_64 = arith.constant 0 : index
    %c0_65 = arith.constant 0 : index
    %168 = vector.load %arg16[%c2, %c0_64, %c0_65] : memref<4x8x32xbf16, #tpu.memory_space<vmem>>, vector<1x8x32xbf16>
    %169 = vector.shape_cast %168 : vector<1x8x32xbf16> to vector<8x32xbf16>
    %170 = arith.truncf %167 : vector<32x8xf32> to vector<32x8xbf16>
    %cst_66 = arith.constant dense<0.000000e+00> : vector<32x32xf32>
    %171 = tpu.matmul %170, %169, %cst_66 {dimension_numbers = #tpu.dot_dimension_numbers<[1], [0], [0], [1], [0, 0, 1, 1], [], []>} : vector<32x8xbf16>, vector<8x32xbf16>, vector<32x32xf32> -> vector<32x32xf32>
    %172 = arith.addf %145, %171 : vector<32x32xf32>
    %173 = vector.extract_strided_slice %83 {offsets = [0, 0, 24], sizes = [8, 4, 8], strides = [1, 1, 1]} : vector<8x4x32xf32> to vector<8x4x8xf32>
    %174 = arith.truncf %173 : vector<8x4x8xf32> to vector<8x4x8xbf16>
    %175 = vector.extract_strided_slice %85 {offsets = [0, 0, 24], sizes = [8, 4, 8], strides = [1, 1, 1]} : vector<8x4x32xf32> to vector<8x4x8xf32>
    %176 = arith.truncf %175 : vector<8x4x8xf32> to vector<8x4x8xbf16>
    %177 = vector.extract_strided_slice %87 {offsets = [0, 0, 24], sizes = [8, 4, 8], strides = [1, 1, 1]} : vector<8x4x32xf32> to vector<8x4x8xf32>
    %178 = arith.truncf %177 : vector<8x4x8xf32> to vector<8x4x8xbf16>
    "tpu.trace_start"() <{level = 10 : i32, message = "sjd,skd->sjk"}> : () -> ()
    %cst_67 = arith.constant dense<0.000000e+00> : vector<8x4x4xf32>
    %179 = tpu.matmul %174, %176, %cst_67 {dimension_numbers = #tpu.dot_dimension_numbers<[2], [2], [1], [1], [0, 0, 0, 1, 1, 1], [0], [0]>} : vector<8x4x8xbf16>, vector<8x4x8xbf16>, vector<8x4x4xf32> -> vector<8x4x4xf32>
    "tpu.trace_stop"() : () -> ()
    %cst_68 = arith.constant 0.353553385 : f32
    %180 = vector.broadcast %cst_68 : f32 to vector<8x4x4xf32>
    %181 = arith.mulf %179, %180 : vector<8x4x4xf32>
    %cst_69 = arith.constant dense<0xFF800000> : vector<8x4xf32>
    %182 = vector.multi_reduction <maximumf>, %181, %cst_69 [2] : vector<8x4x4xf32> to vector<8x4xf32>
    %183 = vector.shape_cast %182 : vector<8x4xf32> to vector<8x4x1xf32>
    %184 = vector.broadcast %183 : vector<8x4x1xf32> to vector<8x4x4xf32>
    %185 = arith.subf %181, %184 : vector<8x4x4xf32>
    %186 = math.exp %185 : vector<8x4x4xf32>
    %cst_70 = arith.constant dense<0.000000e+00> : vector<8x4xf32>
    %187 = vector.multi_reduction <add>, %186, %cst_70 [2] : vector<8x4x4xf32> to vector<8x4xf32>
    %188 = vector.shape_cast %187 : vector<8x4xf32> to vector<8x4x1xf32>
    %189 = tpu.reciprocal %188 {approx = true} : vector<8x4x1xf32> -> vector<8x4x1xf32>
    %190 = vector.broadcast %189 : vector<8x4x1xf32> to vector<8x4x4xf32>
    %191 = arith.mulf %186, %190 : vector<8x4x4xf32>
    %192 = arith.truncf %191 : vector<8x4x4xf32> to vector<8x4x4xbf16>
    "tpu.trace_start"() <{level = 10 : i32, message = "sjk,skd->sjd"}> : () -> ()
    %cst_71 = arith.constant dense<0.000000e+00> : vector<8x4x8xf32>
    %193 = tpu.matmul %192, %178, %cst_71 {dimension_numbers = #tpu.dot_dimension_numbers<[2], [1], [1], [2], [0, 0, 0, 1, 1, 2], [0], [0]>} : vector<8x4x4xbf16>, vector<8x4x8xbf16>, vector<8x4x8xf32> -> vector<8x4x8xf32>
    "tpu.trace_stop"() : () -> ()
    %194 = vector.shape_cast %193 : vector<8x4x8xf32> to vector<32x8xf32>
    %c3 = arith.constant 3 : index
    %c0_72 = arith.constant 0 : index
    %c0_73 = arith.constant 0 : index
    %195 = vector.load %arg16[%c3, %c0_72, %c0_73] : memref<4x8x32xbf16, #tpu.memory_space<vmem>>, vector<1x8x32xbf16>
    %196 = vector.shape_cast %195 : vector<1x8x32xbf16> to vector<8x32xbf16>
    %197 = arith.truncf %194 : vector<32x8xf32> to vector<32x8xbf16>
    %cst_74 = arith.constant dense<0.000000e+00> : vector<32x32xf32>
    %198 = tpu.matmul %197, %196, %cst_74 {dimension_numbers = #tpu.dot_dimension_numbers<[1], [0], [0], [1], [0, 0, 1, 1], [], []>} : vector<32x8xbf16>, vector<8x32xbf16>, vector<32x32xf32> -> vector<32x32xf32>
    %199 = arith.addf %172, %198 : vector<32x32xf32>
    %200 = arith.addf %57, %199 : vector<32x32xf32>
    %c0_75 = arith.constant 0 : index
    %c0_76 = arith.constant 0 : index
    %201 = vector.load %arg18[%c0_75, %c0_76] : memref<1x32xf32, #tpu.memory_space<vmem>>, vector<1x32xf32>
    %c0_77 = arith.constant 0 : index
    %c0_78 = arith.constant 0 : index
    %202 = vector.load %arg19[%c0_77, %c0_78] : memref<1x32xf32, #tpu.memory_space<vmem>>, vector<1x32xf32>
    %cst_79 = arith.constant dense<0.000000e+00> : vector<32xf32>
    %203 = vector.multi_reduction <add>, %200, %cst_79 [1] : vector<32x32xf32> to vector<32xf32>
    %204 = vector.shape_cast %203 : vector<32xf32> to vector<32x1xf32>
    %cst_80 = arith.constant 3.200000e+01 : f32
    %205 = vector.broadcast %cst_80 : f32 to vector<32x1xf32>
    %206 = arith.divf %204, %205 : vector<32x1xf32>
    %207 = vector.broadcast %206 : vector<32x1xf32> to vector<32x32xf32>
    %208 = arith.subf %200, %207 : vector<32x32xf32>
    %209 = arith.mulf %208, %208 : vector<32x32xf32>
    %cst_81 = arith.constant dense<0.000000e+00> : vector<32xf32>
    %210 = vector.multi_reduction <add>, %209, %cst_81 [1] : vector<32x32xf32> to vector<32xf32>
    %211 = vector.shape_cast %210 : vector<32xf32> to vector<32x1xf32>
    %cst_82 = arith.constant 3.200000e+01 : f32
    %212 = vector.broadcast %cst_82 : f32 to vector<32x1xf32>
    %213 = arith.divf %211, %212 : vector<32x1xf32>
    %214 = vector.broadcast %206 : vector<32x1xf32> to vector<32x32xf32>
    %215 = arith.subf %200, %214 : vector<32x32xf32>
    %cst_83 = arith.constant 9.99999974E-6 : f32
    %216 = vector.broadcast %cst_83 : f32 to vector<32x1xf32>
    %217 = arith.addf %213, %216 : vector<32x1xf32>
    %218 = math.rsqrt %217 : vector<32x1xf32>
    %219 = vector.broadcast %218 : vector<32x1xf32> to vector<32x32xf32>
    %220 = arith.mulf %215, %219 : vector<32x32xf32>
    %221 = vector.broadcast %201 : vector<1x32xf32> to vector<32x32xf32>
    %222 = arith.mulf %220, %221 : vector<32x32xf32>
    %223 = vector.broadcast %202 : vector<1x32xf32> to vector<32x32xf32>
    %224 = arith.addf %222, %223 : vector<32x32xf32>
    %c0_84 = arith.constant 0 : index
    %c0_85 = arith.constant 0 : index
    %225 = vector.load %arg20[%c0_84, %c0_85] : memref<32x128xbf16, #tpu.memory_space<vmem>>, vector<32x128xbf16>
    %226 = arith.truncf %224 : vector<32x32xf32> to vector<32x32xbf16>
    %cst_86 = arith.constant dense<0.000000e+00> : vector<32x128xf32>
    %227 = tpu.matmul %226, %225, %cst_86 {dimension_numbers = #tpu.dot_dimension_numbers<[1], [0], [0], [1], [0, 0, 1, 1], [], []>} : vector<32x32xbf16>, vector<32x128xbf16>, vector<32x128xf32> -> vector<32x128xf32>
    %c0_87 = arith.constant 0 : index
    %c0_88 = arith.constant 0 : index
    %228 = vector.load %arg21[%c0_87, %c0_88] : memref<1x128xf32, #tpu.memory_space<vmem>>, vector<1x128xf32>
    %229 = vector.broadcast %228 : vector<1x128xf32> to vector<32x128xf32>
    %230 = arith.addf %227, %229 : vector<32x128xf32>
    %cst_89 = arith.constant 0.000000e+00 : f32
    %231 = vector.broadcast %cst_89 : f32 to vector<32x128xf32>
    %232 = arith.maximumf %230, %231 : vector<32x128xf32>
    %c0_90 = arith.constant 0 : index
    %c0_91 = arith.constant 0 : index
    %233 = vector.load %arg22[%c0_90, %c0_91] : memref<128x32xbf16, #tpu.memory_space<vmem>>, vector<128x32xbf16>
    %234 = arith.truncf %232 : vector<32x128xf32> to vector<32x128xbf16>
    %cst_92 = arith.constant dense<0.000000e+00> : vector<32x32xf32>
    %235 = tpu.matmul %234, %233, %cst_92 {dimension_numbers = #tpu.dot_dimension_numbers<[1], [0], [0], [1], [0, 0, 1, 1], [], []>} : vector<32x128xbf16>, vector<128x32xbf16>, vector<32x32xf32> -> vector<32x32xf32>
    %c0_93 = arith.constant 0 : index
    %c0_94 = arith.constant 0 : index
    %236 = vector.load %arg23[%c0_93, %c0_94] : memref<1x32xf32, #tpu.memory_space<vmem>>, vector<1x32xf32>
    %237 = vector.broadcast %236 : vector<1x32xf32> to vector<32x32xf32>
    %238 = arith.addf %235, %237 : vector<32x32xf32>
    %239 = arith.addf %224, %238 : vector<32x32xf32>
    %c0_95 = arith.constant 0 : index
    %c0_96 = arith.constant 0 : index
    %240 = vector.load %arg24[%c0_95, %c0_96] : memref<1x32xf32, #tpu.memory_space<vmem>>, vector<1x32xf32>
    %c0_97 = arith.constant 0 : index
    %c0_98 = arith.constant 0 : index
    %241 = vector.load %arg25[%c0_97, %c0_98] : memref<1x32xf32, #tpu.memory_space<vmem>>, vector<1x32xf32>
    %cst_99 = arith.constant dense<0.000000e+00> : vector<32xf32>
    %242 = vector.multi_reduction <add>, %239, %cst_99 [1] : vector<32x32xf32> to vector<32xf32>
    %243 = vector.shape_cast %242 : vector<32xf32> to vector<32x1xf32>
    %cst_100 = arith.constant 3.200000e+01 : f32
    %244 = vector.broadcast %cst_100 : f32 to vector<32x1xf32>
    %245 = arith.divf %243, %244 : vector<32x1xf32>
    %246 = vector.broadcast %245 : vector<32x1xf32> to vector<32x32xf32>
    %247 = arith.subf %239, %246 : vector<32x32xf32>
    %248 = arith.mulf %247, %247 : vector<32x32xf32>
    %cst_101 = arith.constant dense<0.000000e+00> : vector<32xf32>
    %249 = vector.multi_reduction <add>, %248, %cst_101 [1] : vector<32x32xf32> to vector<32xf32>
    %250 = vector.shape_cast %249 : vector<32xf32> to vector<32x1xf32>
    %cst_102 = arith.constant 3.200000e+01 : f32
    %251 = vector.broadcast %cst_102 : f32 to vector<32x1xf32>
    %252 = arith.divf %250, %251 : vector<32x1xf32>
    %253 = vector.broadcast %245 : vector<32x1xf32> to vector<32x32xf32>
    %254 = arith.subf %239, %253 : vector<32x32xf32>
    %cst_103 = arith.constant 9.99999974E-6 : f32
    %255 = vector.broadcast %cst_103 : f32 to vector<32x1xf32>
    %256 = arith.addf %252, %255 : vector<32x1xf32>
    %257 = math.rsqrt %256 : vector<32x1xf32>
    %258 = vector.broadcast %257 : vector<32x1xf32> to vector<32x32xf32>
    %259 = arith.mulf %254, %258 : vector<32x32xf32>
    %260 = vector.broadcast %240 : vector<1x32xf32> to vector<32x32xf32>
    %261 = arith.mulf %259, %260 : vector<32x32xf32>
    %262 = vector.broadcast %241 : vector<1x32xf32> to vector<32x32xf32>
    %263 = arith.addf %261, %262 : vector<32x32xf32>
    %c0_104 = arith.constant 0 : index
    %c0_105 = arith.constant 0 : index
    %c0_106 = arith.constant 0 : index
    %264 = vector.load %arg3[%c0_104, %c0_105, %c0_106] : memref<1x8x6xf32, #tpu.memory_space<vmem>>, vector<1x8x6xf32>
    %265 = vector.shape_cast %264 : vector<1x8x6xf32> to vector<8x6xf32>
    %c0_107 = arith.constant 0 : index
    %c0_108 = arith.constant 0 : index
    %266 = vector.load %arg26[%c0_107, %c0_108] : memref<6x32xbf16, #tpu.memory_space<vmem>>, vector<6x32xbf16>
    %267 = arith.truncf %265 : vector<8x6xf32> to vector<8x6xbf16>
    %cst_109 = arith.constant dense<0.000000e+00> : vector<8x32xf32>
    %268 = tpu.matmul %267, %266, %cst_109 {dimension_numbers = #tpu.dot_dimension_numbers<[1], [0], [0], [1], [0, 0, 1, 1], [], []>} : vector<8x6xbf16>, vector<6x32xbf16>, vector<8x32xf32> -> vector<8x32xf32>
    %269 = vector.extract_strided_slice %268 {offsets = [0, 0], sizes = [4, 32], strides = [1, 1]} : vector<8x32xf32> to vector<4x32xf32>
    %c0_110 = arith.constant 0 : index
    %c0_111 = arith.constant 0 : index
    %270 = vector.load %arg6[%c0_110, %c0_111] : memref<4x4xf32, #tpu.memory_space<vmem>>, vector<4x4xf32>
    %271 = arith.truncf %270 : vector<4x4xf32> to vector<4x4xbf16>
    %272 = arith.truncf %269 : vector<4x32xf32> to vector<4x32xbf16>
    %cst_112 = arith.constant dense<0.000000e+00> : vector<4x32xf32>
    %273 = tpu.matmul %271, %272, %cst_112 {dimension_numbers = #tpu.dot_dimension_numbers<[1], [0], [0], [1], [0, 0, 1, 1], [], []>} : vector<4x4xbf16>, vector<4x32xbf16>, vector<4x32xf32> -> vector<4x32xf32>
    %274 = vector.broadcast %2 : f32 to vector<4x32xf32>
    %275 = arith.mulf %273, %274 : vector<4x32xf32>
    %276 = arith.addf %269, %275 : vector<4x32xf32>
    %277 = vector.extract_strided_slice %268 {offsets = [4, 0], sizes = [4, 32], strides = [1, 1]} : vector<8x32xf32> to vector<4x32xf32>
    %278 = tpu.concatenate %276, %277 in 0 : vector<4x32xf32>, vector<4x32xf32> -> vector<8x32xf32>
    %c0_113 = arith.constant 0 : index
    %c0_114 = arith.constant 0 : index
    %279 = vector.load %arg27[%c0_113, %c0_114] : memref<1x32xf32, #tpu.memory_space<vmem>>, vector<1x32xf32>
    %280 = vector.broadcast %279 : vector<1x32xf32> to vector<8x32xf32>
    %281 = arith.addf %278, %280 : vector<8x32xf32>
    %cst_115 = arith.constant 0.000000e+00 : f32
    %282 = vector.broadcast %cst_115 : f32 to vector<8x32xf32>
    %283 = arith.maximumf %281, %282 : vector<8x32xf32>
    %c0_116 = arith.constant 0 : index
    %c0_117 = arith.constant 0 : index
    %284 = vector.load %arg28[%c0_116, %c0_117] : memref<32x32xbf16, #tpu.memory_space<vmem>>, vector<32x32xbf16>
    %285 = arith.truncf %283 : vector<8x32xf32> to vector<8x32xbf16>
    %cst_118 = arith.constant dense<0.000000e+00> : vector<8x32xf32>
    %286 = tpu.matmul %285, %284, %cst_118 {dimension_numbers = #tpu.dot_dimension_numbers<[1], [0], [0], [1], [0, 0, 1, 1], [], []>} : vector<8x32xbf16>, vector<32x32xbf16>, vector<8x32xf32> -> vector<8x32xf32>
    %287 = vector.extract_strided_slice %286 {offsets = [0, 0], sizes = [4, 32], strides = [1, 1]} : vector<8x32xf32> to vector<4x32xf32>
    %c0_119 = arith.constant 0 : index
    %c0_120 = arith.constant 0 : index
    %288 = vector.load %arg6[%c0_119, %c0_120] : memref<4x4xf32, #tpu.memory_space<vmem>>, vector<4x4xf32>
    %289 = arith.truncf %288 : vector<4x4xf32> to vector<4x4xbf16>
    %290 = arith.truncf %287 : vector<4x32xf32> to vector<4x32xbf16>
    %cst_121 = arith.constant dense<0.000000e+00> : vector<4x32xf32>
    %291 = tpu.matmul %289, %290, %cst_121 {dimension_numbers = #tpu.dot_dimension_numbers<[1], [0], [0], [1], [0, 0, 1, 1], [], []>} : vector<4x4xbf16>, vector<4x32xbf16>, vector<4x32xf32> -> vector<4x32xf32>
    %292 = vector.broadcast %2 : f32 to vector<4x32xf32>
    %293 = arith.mulf %291, %292 : vector<4x32xf32>
    %294 = arith.addf %287, %293 : vector<4x32xf32>
    %295 = vector.extract_strided_slice %286 {offsets = [4, 0], sizes = [4, 32], strides = [1, 1]} : vector<8x32xf32> to vector<4x32xf32>
    %296 = tpu.concatenate %294, %295 in 0 : vector<4x32xf32>, vector<4x32xf32> -> vector<8x32xf32>
    %c0_122 = arith.constant 0 : index
    %c0_123 = arith.constant 0 : index
    %297 = vector.load %arg29[%c0_122, %c0_123] : memref<1x32xf32, #tpu.memory_space<vmem>>, vector<1x32xf32>
    %298 = vector.broadcast %297 : vector<1x32xf32> to vector<8x32xf32>
    %299 = arith.addf %296, %298 : vector<8x32xf32>
    %cst_124 = arith.constant 0.000000e+00 : f32
    %300 = vector.broadcast %cst_124 : f32 to vector<8x32xf32>
    %301 = arith.maximumf %299, %300 : vector<8x32xf32>
    %c0_125 = arith.constant 0 : index
    %c0_126 = arith.constant 0 : index
    %c0_127 = arith.constant 0 : index
    %302 = vector.load %arg2[%c0_125, %c0_126, %c0_127] : memref<1x8x12xf32, #tpu.memory_space<vmem>>, vector<1x8x12xf32>
    %303 = vector.shape_cast %302 : vector<1x8x12xf32> to vector<8x12xf32>
    %cst_128 = arith.constant 0.000000e+00 : f32
    %304 = vector.broadcast %cst_128 : f32 to vector<1x12xf32>
    %305 = vector.extract_strided_slice %303 {offsets = [0, 0], sizes = [7, 12], strides = [1, 1]} : vector<8x12xf32> to vector<7x12xf32>
    %306 = tpu.concatenate %304, %305 in 0 : vector<1x12xf32>, vector<7x12xf32> -> vector<8x12xf32>
    %307 = vector.extract_strided_slice %303 {offsets = [1, 0], sizes = [7, 12], strides = [1, 1]} : vector<8x12xf32> to vector<7x12xf32>
    %308 = tpu.concatenate %307, %304 in 0 : vector<7x12xf32>, vector<1x12xf32> -> vector<8x12xf32>
    %c0_129 = arith.constant 0 : index
    %c0_130 = arith.constant 0 : index
    %c0_131 = arith.constant 0 : index
    %309 = vector.load %arg30[%c0_129, %c0_130, %c0_131] : memref<3x12x32xbf16, #tpu.memory_space<vmem>>, vector<1x12x32xbf16>
    %310 = vector.shape_cast %309 : vector<1x12x32xbf16> to vector<12x32xbf16>
    %311 = arith.truncf %306 : vector<8x12xf32> to vector<8x12xbf16>
    %cst_132 = arith.constant dense<0.000000e+00> : vector<8x32xf32>
    %312 = tpu.matmul %311, %310, %cst_132 {dimension_numbers = #tpu.dot_dimension_numbers<[1], [0], [0], [1], [0, 0, 1, 1], [], []>} : vector<8x12xbf16>, vector<12x32xbf16>, vector<8x32xf32> -> vector<8x32xf32>
    %c1_133 = arith.constant 1 : index
    %c0_134 = arith.constant 0 : index
    %c0_135 = arith.constant 0 : index
    %313 = vector.load %arg30[%c1_133, %c0_134, %c0_135] : memref<3x12x32xbf16, #tpu.memory_space<vmem>>, vector<1x12x32xbf16>
    %314 = vector.shape_cast %313 : vector<1x12x32xbf16> to vector<12x32xbf16>
    %315 = arith.truncf %303 : vector<8x12xf32> to vector<8x12xbf16>
    %cst_136 = arith.constant dense<0.000000e+00> : vector<8x32xf32>
    %316 = tpu.matmul %315, %314, %cst_136 {dimension_numbers = #tpu.dot_dimension_numbers<[1], [0], [0], [1], [0, 0, 1, 1], [], []>} : vector<8x12xbf16>, vector<12x32xbf16>, vector<8x32xf32> -> vector<8x32xf32>
    %317 = arith.addf %312, %316 : vector<8x32xf32>
    %c2_137 = arith.constant 2 : index
    %c0_138 = arith.constant 0 : index
    %c0_139 = arith.constant 0 : index
    %318 = vector.load %arg30[%c2_137, %c0_138, %c0_139] : memref<3x12x32xbf16, #tpu.memory_space<vmem>>, vector<1x12x32xbf16>
    %319 = vector.shape_cast %318 : vector<1x12x32xbf16> to vector<12x32xbf16>
    %320 = arith.truncf %308 : vector<8x12xf32> to vector<8x12xbf16>
    %cst_140 = arith.constant dense<0.000000e+00> : vector<8x32xf32>
    %321 = tpu.matmul %320, %319, %cst_140 {dimension_numbers = #tpu.dot_dimension_numbers<[1], [0], [0], [1], [0, 0, 1, 1], [], []>} : vector<8x12xbf16>, vector<12x32xbf16>, vector<8x32xf32> -> vector<8x32xf32>
    %322 = arith.addf %317, %321 : vector<8x32xf32>
    %c0_141 = arith.constant 0 : index
    %c0_142 = arith.constant 0 : index
    %323 = vector.load %arg31[%c0_141, %c0_142] : memref<1x32xf32, #tpu.memory_space<vmem>>, vector<1x32xf32>
    %324 = vector.broadcast %323 : vector<1x32xf32> to vector<8x32xf32>
    %325 = arith.addf %322, %324 : vector<8x32xf32>
    %cst_143 = arith.constant 0.000000e+00 : f32
    %326 = vector.broadcast %cst_143 : f32 to vector<8x32xf32>
    %327 = arith.maximumf %325, %326 : vector<8x32xf32>
    %cst_144 = arith.constant 0.000000e+00 : f32
    %328 = vector.broadcast %cst_144 : f32 to vector<1x32xf32>
    %329 = vector.extract_strided_slice %327 {offsets = [0, 0], sizes = [7, 32], strides = [1, 1]} : vector<8x32xf32> to vector<7x32xf32>
    %330 = tpu.concatenate %328, %329 in 0 : vector<1x32xf32>, vector<7x32xf32> -> vector<8x32xf32>
    %331 = vector.extract_strided_slice %327 {offsets = [1, 0], sizes = [7, 32], strides = [1, 1]} : vector<8x32xf32> to vector<7x32xf32>
    %332 = tpu.concatenate %331, %328 in 0 : vector<7x32xf32>, vector<1x32xf32> -> vector<8x32xf32>
    %c0_145 = arith.constant 0 : index
    %c0_146 = arith.constant 0 : index
    %c0_147 = arith.constant 0 : index
    %333 = vector.load %arg32[%c0_145, %c0_146, %c0_147] : memref<3x32x32xbf16, #tpu.memory_space<vmem>>, vector<1x32x32xbf16>
    %334 = vector.shape_cast %333 : vector<1x32x32xbf16> to vector<32x32xbf16>
    %335 = arith.truncf %330 : vector<8x32xf32> to vector<8x32xbf16>
    %cst_148 = arith.constant dense<0.000000e+00> : vector<8x32xf32>
    %336 = tpu.matmul %335, %334, %cst_148 {dimension_numbers = #tpu.dot_dimension_numbers<[1], [0], [0], [1], [0, 0, 1, 1], [], []>} : vector<8x32xbf16>, vector<32x32xbf16>, vector<8x32xf32> -> vector<8x32xf32>
    %c1_149 = arith.constant 1 : index
    %c0_150 = arith.constant 0 : index
    %c0_151 = arith.constant 0 : index
    %337 = vector.load %arg32[%c1_149, %c0_150, %c0_151] : memref<3x32x32xbf16, #tpu.memory_space<vmem>>, vector<1x32x32xbf16>
    %338 = vector.shape_cast %337 : vector<1x32x32xbf16> to vector<32x32xbf16>
    %339 = arith.truncf %327 : vector<8x32xf32> to vector<8x32xbf16>
    %cst_152 = arith.constant dense<0.000000e+00> : vector<8x32xf32>
    %340 = tpu.matmul %339, %338, %cst_152 {dimension_numbers = #tpu.dot_dimension_numbers<[1], [0], [0], [1], [0, 0, 1, 1], [], []>} : vector<8x32xbf16>, vector<32x32xbf16>, vector<8x32xf32> -> vector<8x32xf32>
    %341 = arith.addf %336, %340 : vector<8x32xf32>
    %c2_153 = arith.constant 2 : index
    %c0_154 = arith.constant 0 : index
    %c0_155 = arith.constant 0 : index
    %342 = vector.load %arg32[%c2_153, %c0_154, %c0_155] : memref<3x32x32xbf16, #tpu.memory_space<vmem>>, vector<1x32x32xbf16>
    %343 = vector.shape_cast %342 : vector<1x32x32xbf16> to vector<32x32xbf16>
    %344 = arith.truncf %332 : vector<8x32xf32> to vector<8x32xbf16>
    %cst_156 = arith.constant dense<0.000000e+00> : vector<8x32xf32>
    %345 = tpu.matmul %344, %343, %cst_156 {dimension_numbers = #tpu.dot_dimension_numbers<[1], [0], [0], [1], [0, 0, 1, 1], [], []>} : vector<8x32xbf16>, vector<32x32xbf16>, vector<8x32xf32> -> vector<8x32xf32>
    %346 = arith.addf %341, %345 : vector<8x32xf32>
    %c0_157 = arith.constant 0 : index
    %c0_158 = arith.constant 0 : index
    %347 = vector.load %arg33[%c0_157, %c0_158] : memref<1x32xf32, #tpu.memory_space<vmem>>, vector<1x32xf32>
    %348 = vector.broadcast %347 : vector<1x32xf32> to vector<8x32xf32>
    %349 = arith.addf %346, %348 : vector<8x32xf32>
    %cst_159 = arith.constant 0.000000e+00 : f32
    %350 = vector.broadcast %cst_159 : f32 to vector<8x32xf32>
    %351 = arith.maximumf %349, %350 : vector<8x32xf32>
    %352 = vector.shape_cast %75 : vector<32x32xf32> to vector<8x4x32xf32>
    %cst_160 = arith.constant dense<0.000000e+00> : vector<8x32xf32>
    %353 = vector.multi_reduction <add>, %352, %cst_160 [1] : vector<8x4x32xf32> to vector<8x32xf32>
    %cst_161 = arith.constant 2.500000e-01 : f32
    %354 = vector.broadcast %cst_161 : f32 to vector<8x32xf32>
    %355 = arith.mulf %353, %354 : vector<8x32xf32>
    %c0_162 = arith.constant 0 : index
    %c0_163 = arith.constant 0 : index
    %356 = vector.load %arg38[%c0_162, %c0_163] : memref<1x64xf32, #tpu.memory_space<vmem>>, vector<1x64xf32>
    %c0_164 = arith.constant 0 : index
    %c0_165 = arith.constant 0 : index
    %357 = vector.load %arg35[%c0_164, %c0_165] : memref<32x64xbf16, #tpu.memory_space<vmem>>, vector<32x64xbf16>
    %358 = arith.truncf %301 : vector<8x32xf32> to vector<8x32xbf16>
    %cst_166 = arith.constant dense<0.000000e+00> : vector<8x64xf32>
    %359 = tpu.matmul %358, %357, %cst_166 {dimension_numbers = #tpu.dot_dimension_numbers<[1], [0], [0], [1], [0, 0, 1, 1], [], []>} : vector<8x32xbf16>, vector<32x64xbf16>, vector<8x64xf32> -> vector<8x64xf32>
    %360 = vector.broadcast %356 : vector<1x64xf32> to vector<8x64xf32>
    %361 = arith.addf %360, %359 : vector<8x64xf32>
    %c0_167 = arith.constant 0 : index
    %c0_168 = arith.constant 0 : index
    %362 = vector.load %arg36[%c0_167, %c0_168] : memref<32x64xbf16, #tpu.memory_space<vmem>>, vector<32x64xbf16>
    %363 = arith.truncf %351 : vector<8x32xf32> to vector<8x32xbf16>
    %cst_169 = arith.constant dense<0.000000e+00> : vector<8x64xf32>
    %364 = tpu.matmul %363, %362, %cst_169 {dimension_numbers = #tpu.dot_dimension_numbers<[1], [0], [0], [1], [0, 0, 1, 1], [], []>} : vector<8x32xbf16>, vector<32x64xbf16>, vector<8x64xf32> -> vector<8x64xf32>
    %365 = arith.addf %361, %364 : vector<8x64xf32>
    %c0_170 = arith.constant 0 : index
    %c0_171 = arith.constant 0 : index
    %366 = vector.load %arg37[%c0_170, %c0_171] : memref<32x64xbf16, #tpu.memory_space<vmem>>, vector<32x64xbf16>
    %367 = arith.truncf %355 : vector<8x32xf32> to vector<8x32xbf16>
    %cst_172 = arith.constant dense<0.000000e+00> : vector<8x64xf32>
    %368 = tpu.matmul %367, %366, %cst_172 {dimension_numbers = #tpu.dot_dimension_numbers<[1], [0], [0], [1], [0, 0, 1, 1], [], []>} : vector<8x32xbf16>, vector<32x64xbf16>, vector<8x64xf32> -> vector<8x64xf32>
    %369 = arith.addf %365, %368 : vector<8x64xf32>
    %370 = vector.shape_cast %263 : vector<32x32xf32> to vector<8x4x32xf32>
    %371 = tpu.iota {dimensions = array<i32: 1>} : vector<8x4x1xi32>
    %cst_173 = arith.constant 0.000000e+00 : f32
    %372 = vector.broadcast %cst_173 : f32 to vector<32x64xf32>
    %c0_i32_174 = arith.constant 0 : i32
    %373 = vector.broadcast %c0_i32_174 : i32 to vector<8x4x1xi32>
    %374 = arith.cmpi eq, %371, %373 : vector<8x4x1xi32>
    %375 = arith.extui %374 : vector<8x4x1xi1> to vector<8x4x1xi32>
    %376 = arith.sitofp %375 : vector<8x4x1xi32> to vector<8x4x1xf32>
    %377 = vector.broadcast %376 : vector<8x4x1xf32> to vector<8x4x32xf32>
    %378 = arith.mulf %370, %377 : vector<8x4x32xf32>
    %379 = vector.shape_cast %378 : vector<8x4x32xf32> to vector<32x32xf32>
    %c0_175 = arith.constant 0 : index
    %c0_176 = arith.constant 0 : index
    %c0_177 = arith.constant 0 : index
    %380 = vector.load %arg34[%c0_175, %c0_176, %c0_177] : memref<4x32x64xbf16, #tpu.memory_space<vmem>>, vector<1x32x64xbf16>
    %381 = vector.shape_cast %380 : vector<1x32x64xbf16> to vector<32x64xbf16>
    %382 = arith.truncf %379 : vector<32x32xf32> to vector<32x32xbf16>
    %cst_178 = arith.constant dense<0.000000e+00> : vector<32x64xf32>
    %383 = tpu.matmul %382, %381, %cst_178 {dimension_numbers = #tpu.dot_dimension_numbers<[1], [0], [0], [1], [0, 0, 1, 1], [], []>} : vector<32x32xbf16>, vector<32x64xbf16>, vector<32x64xf32> -> vector<32x64xf32>
    %384 = arith.addf %372, %383 : vector<32x64xf32>
    %c1_i32 = arith.constant 1 : i32
    %385 = vector.broadcast %c1_i32 : i32 to vector<8x4x1xi32>
    %386 = arith.cmpi eq, %371, %385 : vector<8x4x1xi32>
    %387 = arith.extui %386 : vector<8x4x1xi1> to vector<8x4x1xi32>
    %388 = arith.sitofp %387 : vector<8x4x1xi32> to vector<8x4x1xf32>
    %389 = vector.broadcast %388 : vector<8x4x1xf32> to vector<8x4x32xf32>
    %390 = arith.mulf %370, %389 : vector<8x4x32xf32>
    %391 = vector.shape_cast %390 : vector<8x4x32xf32> to vector<32x32xf32>
    %c1_179 = arith.constant 1 : index
    %c0_180 = arith.constant 0 : index
    %c0_181 = arith.constant 0 : index
    %392 = vector.load %arg34[%c1_179, %c0_180, %c0_181] : memref<4x32x64xbf16, #tpu.memory_space<vmem>>, vector<1x32x64xbf16>
    %393 = vector.shape_cast %392 : vector<1x32x64xbf16> to vector<32x64xbf16>
    %394 = arith.truncf %391 : vector<32x32xf32> to vector<32x32xbf16>
    %cst_182 = arith.constant dense<0.000000e+00> : vector<32x64xf32>
    %395 = tpu.matmul %394, %393, %cst_182 {dimension_numbers = #tpu.dot_dimension_numbers<[1], [0], [0], [1], [0, 0, 1, 1], [], []>} : vector<32x32xbf16>, vector<32x64xbf16>, vector<32x64xf32> -> vector<32x64xf32>
    %396 = arith.addf %384, %395 : vector<32x64xf32>
    %c2_i32 = arith.constant 2 : i32
    %397 = vector.broadcast %c2_i32 : i32 to vector<8x4x1xi32>
    %398 = arith.cmpi eq, %371, %397 : vector<8x4x1xi32>
    %399 = arith.extui %398 : vector<8x4x1xi1> to vector<8x4x1xi32>
    %400 = arith.sitofp %399 : vector<8x4x1xi32> to vector<8x4x1xf32>
    %401 = vector.broadcast %400 : vector<8x4x1xf32> to vector<8x4x32xf32>
    %402 = arith.mulf %370, %401 : vector<8x4x32xf32>
    %403 = vector.shape_cast %402 : vector<8x4x32xf32> to vector<32x32xf32>
    %c2_183 = arith.constant 2 : index
    %c0_184 = arith.constant 0 : index
    %c0_185 = arith.constant 0 : index
    %404 = vector.load %arg34[%c2_183, %c0_184, %c0_185] : memref<4x32x64xbf16, #tpu.memory_space<vmem>>, vector<1x32x64xbf16>
    %405 = vector.shape_cast %404 : vector<1x32x64xbf16> to vector<32x64xbf16>
    %406 = arith.truncf %403 : vector<32x32xf32> to vector<32x32xbf16>
    %cst_186 = arith.constant dense<0.000000e+00> : vector<32x64xf32>
    %407 = tpu.matmul %406, %405, %cst_186 {dimension_numbers = #tpu.dot_dimension_numbers<[1], [0], [0], [1], [0, 0, 1, 1], [], []>} : vector<32x32xbf16>, vector<32x64xbf16>, vector<32x64xf32> -> vector<32x64xf32>
    %408 = arith.addf %396, %407 : vector<32x64xf32>
    %c3_i32 = arith.constant 3 : i32
    %409 = vector.broadcast %c3_i32 : i32 to vector<8x4x1xi32>
    %410 = arith.cmpi eq, %371, %409 : vector<8x4x1xi32>
    %411 = arith.extui %410 : vector<8x4x1xi1> to vector<8x4x1xi32>
    %412 = arith.sitofp %411 : vector<8x4x1xi32> to vector<8x4x1xf32>
    %413 = vector.broadcast %412 : vector<8x4x1xf32> to vector<8x4x32xf32>
    %414 = arith.mulf %370, %413 : vector<8x4x32xf32>
    %415 = vector.shape_cast %414 : vector<8x4x32xf32> to vector<32x32xf32>
    %c3_187 = arith.constant 3 : index
    %c0_188 = arith.constant 0 : index
    %c0_189 = arith.constant 0 : index
    %416 = vector.load %arg34[%c3_187, %c0_188, %c0_189] : memref<4x32x64xbf16, #tpu.memory_space<vmem>>, vector<1x32x64xbf16>
    %417 = vector.shape_cast %416 : vector<1x32x64xbf16> to vector<32x64xbf16>
    %418 = arith.truncf %415 : vector<32x32xf32> to vector<32x32xbf16>
    %cst_190 = arith.constant dense<0.000000e+00> : vector<32x64xf32>
    %419 = tpu.matmul %418, %417, %cst_190 {dimension_numbers = #tpu.dot_dimension_numbers<[1], [0], [0], [1], [0, 0, 1, 1], [], []>} : vector<32x32xbf16>, vector<32x64xbf16>, vector<32x64xf32> -> vector<32x64xf32>
    %420 = arith.addf %408, %419 : vector<32x64xf32>
    %421 = vector.shape_cast %420 : vector<32x64xf32> to vector<8x4x64xf32>
    %cst_191 = arith.constant dense<0.000000e+00> : vector<8x64xf32>
    %422 = vector.multi_reduction <add>, %421, %cst_191 [1] : vector<8x4x64xf32> to vector<8x64xf32>
    %423 = arith.addf %369, %422 : vector<8x64xf32>
    %c0_192 = arith.constant 0 : index
    %c0_193 = arith.constant 0 : index
    %424 = vector.load %arg39[%c0_192, %c0_193] : memref<1x64xf32, #tpu.memory_space<vmem>>, vector<1x64xf32>
    %c0_194 = arith.constant 0 : index
    %c0_195 = arith.constant 0 : index
    %425 = vector.load %arg40[%c0_194, %c0_195] : memref<1x64xf32, #tpu.memory_space<vmem>>, vector<1x64xf32>
    %cst_196 = arith.constant dense<0.000000e+00> : vector<8xf32>
    %426 = vector.multi_reduction <add>, %423, %cst_196 [1] : vector<8x64xf32> to vector<8xf32>
    %427 = vector.shape_cast %426 : vector<8xf32> to vector<8x1xf32>
    %cst_197 = arith.constant 6.400000e+01 : f32
    %428 = vector.broadcast %cst_197 : f32 to vector<8x1xf32>
    %429 = arith.divf %427, %428 : vector<8x1xf32>
    %430 = vector.broadcast %429 : vector<8x1xf32> to vector<8x64xf32>
    %431 = arith.subf %423, %430 : vector<8x64xf32>
    %432 = arith.mulf %431, %431 : vector<8x64xf32>
    %cst_198 = arith.constant dense<0.000000e+00> : vector<8xf32>
    %433 = vector.multi_reduction <add>, %432, %cst_198 [1] : vector<8x64xf32> to vector<8xf32>
    %434 = vector.shape_cast %433 : vector<8xf32> to vector<8x1xf32>
    %cst_199 = arith.constant 6.400000e+01 : f32
    %435 = vector.broadcast %cst_199 : f32 to vector<8x1xf32>
    %436 = arith.divf %434, %435 : vector<8x1xf32>
    %437 = vector.broadcast %429 : vector<8x1xf32> to vector<8x64xf32>
    %438 = arith.subf %423, %437 : vector<8x64xf32>
    %cst_200 = arith.constant 9.99999974E-6 : f32
    %439 = vector.broadcast %cst_200 : f32 to vector<8x1xf32>
    %440 = arith.addf %436, %439 : vector<8x1xf32>
    %441 = math.rsqrt %440 : vector<8x1xf32>
    %442 = vector.broadcast %441 : vector<8x1xf32> to vector<8x64xf32>
    %443 = arith.mulf %438, %442 : vector<8x64xf32>
    %444 = vector.broadcast %424 : vector<1x64xf32> to vector<8x64xf32>
    %445 = arith.mulf %443, %444 : vector<8x64xf32>
    %446 = vector.broadcast %425 : vector<1x64xf32> to vector<8x64xf32>
    %447 = arith.addf %445, %446 : vector<8x64xf32>
    %cst_201 = arith.constant 0.000000e+00 : f32
    %448 = vector.broadcast %cst_201 : f32 to vector<8x64xf32>
    %449 = arith.maximumf %447, %448 : vector<8x64xf32>
    %c0_202 = arith.constant 0 : index
    %c0_203 = arith.constant 0 : index
    %450 = vector.load %arg41[%c0_202, %c0_203] : memref<64x32xbf16, #tpu.memory_space<vmem>>, vector<64x32xbf16>
    %451 = arith.truncf %449 : vector<8x64xf32> to vector<8x64xbf16>
    %cst_204 = arith.constant dense<0.000000e+00> : vector<8x32xf32>
    %452 = tpu.matmul %451, %450, %cst_204 {dimension_numbers = #tpu.dot_dimension_numbers<[1], [0], [0], [1], [0, 0, 1, 1], [], []>} : vector<8x64xbf16>, vector<64x32xbf16>, vector<8x32xf32> -> vector<8x32xf32>
    %c0_205 = arith.constant 0 : index
    %c0_206 = arith.constant 0 : index
    %453 = vector.load %arg42[%c0_205, %c0_206] : memref<1x32xf32, #tpu.memory_space<vmem>>, vector<1x32xf32>
    %454 = vector.broadcast %453 : vector<1x32xf32> to vector<8x32xf32>
    %455 = arith.addf %452, %454 : vector<8x32xf32>
    %c0_207 = arith.constant 0 : index
    %c0_208 = arith.constant 0 : index
    %c0_209 = arith.constant 0 : index
    %456 = vector.load %arg43[%c0_207, %c0_208, %c0_209] : memref<2x32x96xbf16, #tpu.memory_space<vmem>>, vector<1x32x96xbf16>
    %457 = vector.shape_cast %456 : vector<1x32x96xbf16> to vector<32x96xbf16>
    %458 = arith.truncf %455 : vector<8x32xf32> to vector<8x32xbf16>
    %cst_210 = arith.constant dense<0.000000e+00> : vector<8x96xf32>
    %459 = tpu.matmul %458, %457, %cst_210 {dimension_numbers = #tpu.dot_dimension_numbers<[1], [0], [0], [1], [0, 0, 1, 1], [], []>} : vector<8x32xbf16>, vector<32x96xbf16>, vector<8x96xf32> -> vector<8x96xf32>
    %c0_211 = arith.constant 0 : index
    %c0_212 = arith.constant 0 : index
    %c0_213 = arith.constant 0 : index
    %460 = vector.load %arg45[%c0_211, %c0_212, %c0_213] : memref<2x1x96xf32, #tpu.memory_space<vmem>>, vector<1x1x96xf32>
    %461 = vector.shape_cast %460 : vector<1x1x96xf32> to vector<1x96xf32>
    %462 = vector.broadcast %461 : vector<1x96xf32> to vector<8x96xf32>
    %463 = arith.addf %459, %462 : vector<8x96xf32>
    %c0_214 = arith.constant 0 : index
    %c0_215 = arith.constant 0 : index
    %c0_216 = arith.constant 0 : index
    %464 = vector.load %arg44[%c0_214, %c0_215, %c0_216] : memref<2x32x96xbf16, #tpu.memory_space<vmem>>, vector<1x32x96xbf16>
    %465 = vector.shape_cast %464 : vector<1x32x96xbf16> to vector<32x96xbf16>
    %c0_217 = arith.constant 0 : index
    %c0_218 = arith.constant 0 : index
    %c0_219 = arith.constant 0 : index
    %466 = vector.load %arg46[%c0_217, %c0_218, %c0_219] : memref<2x1x96xf32, #tpu.memory_space<vmem>>, vector<1x1x96xf32>
    %467 = vector.shape_cast %466 : vector<1x1x96xf32> to vector<1x96xf32>
    %cst_220 = arith.constant 0.000000e+00 : f32
    %468 = vector.broadcast %cst_220 : f32 to vector<1x32xf32>
    %469 = vector.extract_strided_slice %463 {offsets = [0, 0], sizes = [1, 96], strides = [1, 1]} : vector<8x96xf32> to vector<1x96xf32>
    %470 = arith.truncf %468 : vector<1x32xf32> to vector<1x32xbf16>
    %cst_221 = arith.constant dense<0.000000e+00> : vector<1x96xf32>
    %471 = tpu.matmul %470, %465, %cst_221 {dimension_numbers = #tpu.dot_dimension_numbers<[1], [0], [0], [1], [0, 0, 1, 1], [], []>} : vector<1x32xbf16>, vector<32x96xbf16>, vector<1x96xf32> -> vector<1x96xf32>
    %472 = arith.addf %471, %467 : vector<1x96xf32>
    %473 = vector.extract_strided_slice %469 {offsets = [0, 0], sizes = [1, 64], strides = [1, 1]} : vector<1x96xf32> to vector<1x64xf32>
    %474 = vector.extract_strided_slice %472 {offsets = [0, 0], sizes = [1, 64], strides = [1, 1]} : vector<1x96xf32> to vector<1x64xf32>
    %475 = arith.addf %473, %474 : vector<1x64xf32>
    %476 = arith.negf %475 : vector<1x64xf32>
    %477 = math.exp %476 : vector<1x64xf32>
    %cst_222 = arith.constant 1.000000e+00 : f32
    %478 = vector.broadcast %cst_222 : f32 to vector<1x64xf32>
    %479 = arith.addf %478, %477 : vector<1x64xf32>
    %480 = arith.divf %478, %479 : vector<1x64xf32>
    %481 = vector.extract_strided_slice %480 {offsets = [0, 0], sizes = [1, 32], strides = [1, 1]} : vector<1x64xf32> to vector<1x32xf32>
    %482 = vector.extract_strided_slice %480 {offsets = [0, 32], sizes = [1, 32], strides = [1, 1]} : vector<1x64xf32> to vector<1x32xf32>
    %483 = vector.extract_strided_slice %469 {offsets = [0, 64], sizes = [1, 32], strides = [1, 1]} : vector<1x96xf32> to vector<1x32xf32>
    %484 = vector.extract_strided_slice %472 {offsets = [0, 64], sizes = [1, 32], strides = [1, 1]} : vector<1x96xf32> to vector<1x32xf32>
    %485 = arith.mulf %481, %484 : vector<1x32xf32>
    %486 = arith.addf %483, %485 : vector<1x32xf32>
    %487 = math.tanh %486 : vector<1x32xf32>
    %cst_223 = arith.constant 1.000000e+00 : f32
    %488 = vector.broadcast %cst_223 : f32 to vector<1x32xf32>
    %489 = arith.subf %488, %482 : vector<1x32xf32>
    %490 = arith.mulf %489, %487 : vector<1x32xf32>
    %491 = arith.mulf %482, %468 : vector<1x32xf32>
    %492 = arith.addf %490, %491 : vector<1x32xf32>
    %493 = vector.extract_strided_slice %463 {offsets = [1, 0], sizes = [1, 96], strides = [1, 1]} : vector<8x96xf32> to vector<1x96xf32>
    %494 = arith.truncf %492 : vector<1x32xf32> to vector<1x32xbf16>
    %cst_224 = arith.constant dense<0.000000e+00> : vector<1x96xf32>
    %495 = tpu.matmul %494, %465, %cst_224 {dimension_numbers = #tpu.dot_dimension_numbers<[1], [0], [0], [1], [0, 0, 1, 1], [], []>} : vector<1x32xbf16>, vector<32x96xbf16>, vector<1x96xf32> -> vector<1x96xf32>
    %496 = arith.addf %495, %467 : vector<1x96xf32>
    %497 = vector.extract_strided_slice %493 {offsets = [0, 0], sizes = [1, 64], strides = [1, 1]} : vector<1x96xf32> to vector<1x64xf32>
    %498 = vector.extract_strided_slice %496 {offsets = [0, 0], sizes = [1, 64], strides = [1, 1]} : vector<1x96xf32> to vector<1x64xf32>
    %499 = arith.addf %497, %498 : vector<1x64xf32>
    %500 = arith.negf %499 : vector<1x64xf32>
    %501 = math.exp %500 : vector<1x64xf32>
    %cst_225 = arith.constant 1.000000e+00 : f32
    %502 = vector.broadcast %cst_225 : f32 to vector<1x64xf32>
    %503 = arith.addf %502, %501 : vector<1x64xf32>
    %504 = arith.divf %502, %503 : vector<1x64xf32>
    %505 = vector.extract_strided_slice %504 {offsets = [0, 0], sizes = [1, 32], strides = [1, 1]} : vector<1x64xf32> to vector<1x32xf32>
    %506 = vector.extract_strided_slice %504 {offsets = [0, 32], sizes = [1, 32], strides = [1, 1]} : vector<1x64xf32> to vector<1x32xf32>
    %507 = vector.extract_strided_slice %493 {offsets = [0, 64], sizes = [1, 32], strides = [1, 1]} : vector<1x96xf32> to vector<1x32xf32>
    %508 = vector.extract_strided_slice %496 {offsets = [0, 64], sizes = [1, 32], strides = [1, 1]} : vector<1x96xf32> to vector<1x32xf32>
    %509 = arith.mulf %505, %508 : vector<1x32xf32>
    %510 = arith.addf %507, %509 : vector<1x32xf32>
    %511 = math.tanh %510 : vector<1x32xf32>
    %cst_226 = arith.constant 1.000000e+00 : f32
    %512 = vector.broadcast %cst_226 : f32 to vector<1x32xf32>
    %513 = arith.subf %512, %506 : vector<1x32xf32>
    %514 = arith.mulf %513, %511 : vector<1x32xf32>
    %515 = arith.mulf %506, %492 : vector<1x32xf32>
    %516 = arith.addf %514, %515 : vector<1x32xf32>
    %517 = vector.extract_strided_slice %463 {offsets = [2, 0], sizes = [1, 96], strides = [1, 1]} : vector<8x96xf32> to vector<1x96xf32>
    %518 = arith.truncf %516 : vector<1x32xf32> to vector<1x32xbf16>
    %cst_227 = arith.constant dense<0.000000e+00> : vector<1x96xf32>
    %519 = tpu.matmul %518, %465, %cst_227 {dimension_numbers = #tpu.dot_dimension_numbers<[1], [0], [0], [1], [0, 0, 1, 1], [], []>} : vector<1x32xbf16>, vector<32x96xbf16>, vector<1x96xf32> -> vector<1x96xf32>
    %520 = arith.addf %519, %467 : vector<1x96xf32>
    %521 = vector.extract_strided_slice %517 {offsets = [0, 0], sizes = [1, 64], strides = [1, 1]} : vector<1x96xf32> to vector<1x64xf32>
    %522 = vector.extract_strided_slice %520 {offsets = [0, 0], sizes = [1, 64], strides = [1, 1]} : vector<1x96xf32> to vector<1x64xf32>
    %523 = arith.addf %521, %522 : vector<1x64xf32>
    %524 = arith.negf %523 : vector<1x64xf32>
    %525 = math.exp %524 : vector<1x64xf32>
    %cst_228 = arith.constant 1.000000e+00 : f32
    %526 = vector.broadcast %cst_228 : f32 to vector<1x64xf32>
    %527 = arith.addf %526, %525 : vector<1x64xf32>
    %528 = arith.divf %526, %527 : vector<1x64xf32>
    %529 = vector.extract_strided_slice %528 {offsets = [0, 0], sizes = [1, 32], strides = [1, 1]} : vector<1x64xf32> to vector<1x32xf32>
    %530 = vector.extract_strided_slice %528 {offsets = [0, 32], sizes = [1, 32], strides = [1, 1]} : vector<1x64xf32> to vector<1x32xf32>
    %531 = vector.extract_strided_slice %517 {offsets = [0, 64], sizes = [1, 32], strides = [1, 1]} : vector<1x96xf32> to vector<1x32xf32>
    %532 = vector.extract_strided_slice %520 {offsets = [0, 64], sizes = [1, 32], strides = [1, 1]} : vector<1x96xf32> to vector<1x32xf32>
    %533 = arith.mulf %529, %532 : vector<1x32xf32>
    %534 = arith.addf %531, %533 : vector<1x32xf32>
    %535 = math.tanh %534 : vector<1x32xf32>
    %cst_229 = arith.constant 1.000000e+00 : f32
    %536 = vector.broadcast %cst_229 : f32 to vector<1x32xf32>
    %537 = arith.subf %536, %530 : vector<1x32xf32>
    %538 = arith.mulf %537, %535 : vector<1x32xf32>
    %539 = arith.mulf %530, %516 : vector<1x32xf32>
    %540 = arith.addf %538, %539 : vector<1x32xf32>
    %541 = vector.extract_strided_slice %463 {offsets = [3, 0], sizes = [1, 96], strides = [1, 1]} : vector<8x96xf32> to vector<1x96xf32>
    %542 = arith.truncf %540 : vector<1x32xf32> to vector<1x32xbf16>
    %cst_230 = arith.constant dense<0.000000e+00> : vector<1x96xf32>
    %543 = tpu.matmul %542, %465, %cst_230 {dimension_numbers = #tpu.dot_dimension_numbers<[1], [0], [0], [1], [0, 0, 1, 1], [], []>} : vector<1x32xbf16>, vector<32x96xbf16>, vector<1x96xf32> -> vector<1x96xf32>
    %544 = arith.addf %543, %467 : vector<1x96xf32>
    %545 = vector.extract_strided_slice %541 {offsets = [0, 0], sizes = [1, 64], strides = [1, 1]} : vector<1x96xf32> to vector<1x64xf32>
    %546 = vector.extract_strided_slice %544 {offsets = [0, 0], sizes = [1, 64], strides = [1, 1]} : vector<1x96xf32> to vector<1x64xf32>
    %547 = arith.addf %545, %546 : vector<1x64xf32>
    %548 = arith.negf %547 : vector<1x64xf32>
    %549 = math.exp %548 : vector<1x64xf32>
    %cst_231 = arith.constant 1.000000e+00 : f32
    %550 = vector.broadcast %cst_231 : f32 to vector<1x64xf32>
    %551 = arith.addf %550, %549 : vector<1x64xf32>
    %552 = arith.divf %550, %551 : vector<1x64xf32>
    %553 = vector.extract_strided_slice %552 {offsets = [0, 0], sizes = [1, 32], strides = [1, 1]} : vector<1x64xf32> to vector<1x32xf32>
    %554 = vector.extract_strided_slice %552 {offsets = [0, 32], sizes = [1, 32], strides = [1, 1]} : vector<1x64xf32> to vector<1x32xf32>
    %555 = vector.extract_strided_slice %541 {offsets = [0, 64], sizes = [1, 32], strides = [1, 1]} : vector<1x96xf32> to vector<1x32xf32>
    %556 = vector.extract_strided_slice %544 {offsets = [0, 64], sizes = [1, 32], strides = [1, 1]} : vector<1x96xf32> to vector<1x32xf32>
    %557 = arith.mulf %553, %556 : vector<1x32xf32>
    %558 = arith.addf %555, %557 : vector<1x32xf32>
    %559 = math.tanh %558 : vector<1x32xf32>
    %cst_232 = arith.constant 1.000000e+00 : f32
    %560 = vector.broadcast %cst_232 : f32 to vector<1x32xf32>
    %561 = arith.subf %560, %554 : vector<1x32xf32>
    %562 = arith.mulf %561, %559 : vector<1x32xf32>
    %563 = arith.mulf %554, %540 : vector<1x32xf32>
    %564 = arith.addf %562, %563 : vector<1x32xf32>
    %565 = vector.extract_strided_slice %463 {offsets = [4, 0], sizes = [1, 96], strides = [1, 1]} : vector<8x96xf32> to vector<1x96xf32>
    %566 = arith.truncf %564 : vector<1x32xf32> to vector<1x32xbf16>
    %cst_233 = arith.constant dense<0.000000e+00> : vector<1x96xf32>
    %567 = tpu.matmul %566, %465, %cst_233 {dimension_numbers = #tpu.dot_dimension_numbers<[1], [0], [0], [1], [0, 0, 1, 1], [], []>} : vector<1x32xbf16>, vector<32x96xbf16>, vector<1x96xf32> -> vector<1x96xf32>
    %568 = arith.addf %567, %467 : vector<1x96xf32>
    %569 = vector.extract_strided_slice %565 {offsets = [0, 0], sizes = [1, 64], strides = [1, 1]} : vector<1x96xf32> to vector<1x64xf32>
    %570 = vector.extract_strided_slice %568 {offsets = [0, 0], sizes = [1, 64], strides = [1, 1]} : vector<1x96xf32> to vector<1x64xf32>
    %571 = arith.addf %569, %570 : vector<1x64xf32>
    %572 = arith.negf %571 : vector<1x64xf32>
    %573 = math.exp %572 : vector<1x64xf32>
    %cst_234 = arith.constant 1.000000e+00 : f32
    %574 = vector.broadcast %cst_234 : f32 to vector<1x64xf32>
    %575 = arith.addf %574, %573 : vector<1x64xf32>
    %576 = arith.divf %574, %575 : vector<1x64xf32>
    %577 = vector.extract_strided_slice %576 {offsets = [0, 0], sizes = [1, 32], strides = [1, 1]} : vector<1x64xf32> to vector<1x32xf32>
    %578 = vector.extract_strided_slice %576 {offsets = [0, 32], sizes = [1, 32], strides = [1, 1]} : vector<1x64xf32> to vector<1x32xf32>
    %579 = vector.extract_strided_slice %565 {offsets = [0, 64], sizes = [1, 32], strides = [1, 1]} : vector<1x96xf32> to vector<1x32xf32>
    %580 = vector.extract_strided_slice %568 {offsets = [0, 64], sizes = [1, 32], strides = [1, 1]} : vector<1x96xf32> to vector<1x32xf32>
    %581 = arith.mulf %577, %580 : vector<1x32xf32>
    %582 = arith.addf %579, %581 : vector<1x32xf32>
    %583 = math.tanh %582 : vector<1x32xf32>
    %cst_235 = arith.constant 1.000000e+00 : f32
    %584 = vector.broadcast %cst_235 : f32 to vector<1x32xf32>
    %585 = arith.subf %584, %578 : vector<1x32xf32>
    %586 = arith.mulf %585, %583 : vector<1x32xf32>
    %587 = arith.mulf %578, %564 : vector<1x32xf32>
    %588 = arith.addf %586, %587 : vector<1x32xf32>
    %589 = vector.extract_strided_slice %463 {offsets = [5, 0], sizes = [1, 96], strides = [1, 1]} : vector<8x96xf32> to vector<1x96xf32>
    %590 = arith.truncf %588 : vector<1x32xf32> to vector<1x32xbf16>
    %cst_236 = arith.constant dense<0.000000e+00> : vector<1x96xf32>
    %591 = tpu.matmul %590, %465, %cst_236 {dimension_numbers = #tpu.dot_dimension_numbers<[1], [0], [0], [1], [0, 0, 1, 1], [], []>} : vector<1x32xbf16>, vector<32x96xbf16>, vector<1x96xf32> -> vector<1x96xf32>
    %592 = arith.addf %591, %467 : vector<1x96xf32>
    %593 = vector.extract_strided_slice %589 {offsets = [0, 0], sizes = [1, 64], strides = [1, 1]} : vector<1x96xf32> to vector<1x64xf32>
    %594 = vector.extract_strided_slice %592 {offsets = [0, 0], sizes = [1, 64], strides = [1, 1]} : vector<1x96xf32> to vector<1x64xf32>
    %595 = arith.addf %593, %594 : vector<1x64xf32>
    %596 = arith.negf %595 : vector<1x64xf32>
    %597 = math.exp %596 : vector<1x64xf32>
    %cst_237 = arith.constant 1.000000e+00 : f32
    %598 = vector.broadcast %cst_237 : f32 to vector<1x64xf32>
    %599 = arith.addf %598, %597 : vector<1x64xf32>
    %600 = arith.divf %598, %599 : vector<1x64xf32>
    %601 = vector.extract_strided_slice %600 {offsets = [0, 0], sizes = [1, 32], strides = [1, 1]} : vector<1x64xf32> to vector<1x32xf32>
    %602 = vector.extract_strided_slice %600 {offsets = [0, 32], sizes = [1, 32], strides = [1, 1]} : vector<1x64xf32> to vector<1x32xf32>
    %603 = vector.extract_strided_slice %589 {offsets = [0, 64], sizes = [1, 32], strides = [1, 1]} : vector<1x96xf32> to vector<1x32xf32>
    %604 = vector.extract_strided_slice %592 {offsets = [0, 64], sizes = [1, 32], strides = [1, 1]} : vector<1x96xf32> to vector<1x32xf32>
    %605 = arith.mulf %601, %604 : vector<1x32xf32>
    %606 = arith.addf %603, %605 : vector<1x32xf32>
    %607 = math.tanh %606 : vector<1x32xf32>
    %cst_238 = arith.constant 1.000000e+00 : f32
    %608 = vector.broadcast %cst_238 : f32 to vector<1x32xf32>
    %609 = arith.subf %608, %602 : vector<1x32xf32>
    %610 = arith.mulf %609, %607 : vector<1x32xf32>
    %611 = arith.mulf %602, %588 : vector<1x32xf32>
    %612 = arith.addf %610, %611 : vector<1x32xf32>
    %613 = vector.extract_strided_slice %463 {offsets = [6, 0], sizes = [1, 96], strides = [1, 1]} : vector<8x96xf32> to vector<1x96xf32>
    %614 = arith.truncf %612 : vector<1x32xf32> to vector<1x32xbf16>
    %cst_239 = arith.constant dense<0.000000e+00> : vector<1x96xf32>
    %615 = tpu.matmul %614, %465, %cst_239 {dimension_numbers = #tpu.dot_dimension_numbers<[1], [0], [0], [1], [0, 0, 1, 1], [], []>} : vector<1x32xbf16>, vector<32x96xbf16>, vector<1x96xf32> -> vector<1x96xf32>
    %616 = arith.addf %615, %467 : vector<1x96xf32>
    %617 = vector.extract_strided_slice %613 {offsets = [0, 0], sizes = [1, 64], strides = [1, 1]} : vector<1x96xf32> to vector<1x64xf32>
    %618 = vector.extract_strided_slice %616 {offsets = [0, 0], sizes = [1, 64], strides = [1, 1]} : vector<1x96xf32> to vector<1x64xf32>
    %619 = arith.addf %617, %618 : vector<1x64xf32>
    %620 = arith.negf %619 : vector<1x64xf32>
    %621 = math.exp %620 : vector<1x64xf32>
    %cst_240 = arith.constant 1.000000e+00 : f32
    %622 = vector.broadcast %cst_240 : f32 to vector<1x64xf32>
    %623 = arith.addf %622, %621 : vector<1x64xf32>
    %624 = arith.divf %622, %623 : vector<1x64xf32>
    %625 = vector.extract_strided_slice %624 {offsets = [0, 0], sizes = [1, 32], strides = [1, 1]} : vector<1x64xf32> to vector<1x32xf32>
    %626 = vector.extract_strided_slice %624 {offsets = [0, 32], sizes = [1, 32], strides = [1, 1]} : vector<1x64xf32> to vector<1x32xf32>
    %627 = vector.extract_strided_slice %613 {offsets = [0, 64], sizes = [1, 32], strides = [1, 1]} : vector<1x96xf32> to vector<1x32xf32>
    %628 = vector.extract_strided_slice %616 {offsets = [0, 64], sizes = [1, 32], strides = [1, 1]} : vector<1x96xf32> to vector<1x32xf32>
    %629 = arith.mulf %625, %628 : vector<1x32xf32>
    %630 = arith.addf %627, %629 : vector<1x32xf32>
    %631 = math.tanh %630 : vector<1x32xf32>
    %cst_241 = arith.constant 1.000000e+00 : f32
    %632 = vector.broadcast %cst_241 : f32 to vector<1x32xf32>
    %633 = arith.subf %632, %626 : vector<1x32xf32>
    %634 = arith.mulf %633, %631 : vector<1x32xf32>
    %635 = arith.mulf %626, %612 : vector<1x32xf32>
    %636 = arith.addf %634, %635 : vector<1x32xf32>
    %637 = vector.extract_strided_slice %463 {offsets = [7, 0], sizes = [1, 96], strides = [1, 1]} : vector<8x96xf32> to vector<1x96xf32>
    %638 = arith.truncf %636 : vector<1x32xf32> to vector<1x32xbf16>
    %cst_242 = arith.constant dense<0.000000e+00> : vector<1x96xf32>
    %639 = tpu.matmul %638, %465, %cst_242 {dimension_numbers = #tpu.dot_dimension_numbers<[1], [0], [0], [1], [0, 0, 1, 1], [], []>} : vector<1x32xbf16>, vector<32x96xbf16>, vector<1x96xf32> -> vector<1x96xf32>
    %640 = arith.addf %639, %467 : vector<1x96xf32>
    %641 = vector.extract_strided_slice %637 {offsets = [0, 0], sizes = [1, 64], strides = [1, 1]} : vector<1x96xf32> to vector<1x64xf32>
    %642 = vector.extract_strided_slice %640 {offsets = [0, 0], sizes = [1, 64], strides = [1, 1]} : vector<1x96xf32> to vector<1x64xf32>
    %643 = arith.addf %641, %642 : vector<1x64xf32>
    %644 = arith.negf %643 : vector<1x64xf32>
    %645 = math.exp %644 : vector<1x64xf32>
    %cst_243 = arith.constant 1.000000e+00 : f32
    %646 = vector.broadcast %cst_243 : f32 to vector<1x64xf32>
    %647 = arith.addf %646, %645 : vector<1x64xf32>
    %648 = arith.divf %646, %647 : vector<1x64xf32>
    %649 = vector.extract_strided_slice %648 {offsets = [0, 0], sizes = [1, 32], strides = [1, 1]} : vector<1x64xf32> to vector<1x32xf32>
    %650 = vector.extract_strided_slice %648 {offsets = [0, 32], sizes = [1, 32], strides = [1, 1]} : vector<1x64xf32> to vector<1x32xf32>
    %651 = vector.extract_strided_slice %637 {offsets = [0, 64], sizes = [1, 32], strides = [1, 1]} : vector<1x96xf32> to vector<1x32xf32>
    %652 = vector.extract_strided_slice %640 {offsets = [0, 64], sizes = [1, 32], strides = [1, 1]} : vector<1x96xf32> to vector<1x32xf32>
    %653 = arith.mulf %649, %652 : vector<1x32xf32>
    %654 = arith.addf %651, %653 : vector<1x32xf32>
    %655 = math.tanh %654 : vector<1x32xf32>
    %cst_244 = arith.constant 1.000000e+00 : f32
    %656 = vector.broadcast %cst_244 : f32 to vector<1x32xf32>
    %657 = arith.subf %656, %650 : vector<1x32xf32>
    %658 = arith.mulf %657, %655 : vector<1x32xf32>
    %659 = arith.mulf %650, %636 : vector<1x32xf32>
    %660 = arith.addf %658, %659 : vector<1x32xf32>
    %661 = tpu.concatenate %492, %516, %540, %564, %588, %612, %636, %660 in 0 : vector<1x32xf32>, vector<1x32xf32>, vector<1x32xf32>, vector<1x32xf32>, vector<1x32xf32>, vector<1x32xf32>, vector<1x32xf32>, vector<1x32xf32> -> vector<8x32xf32>
    %c1_245 = arith.constant 1 : index
    %c0_246 = arith.constant 0 : index
    %c0_247 = arith.constant 0 : index
    %662 = vector.load %arg43[%c1_245, %c0_246, %c0_247] : memref<2x32x96xbf16, #tpu.memory_space<vmem>>, vector<1x32x96xbf16>
    %663 = vector.shape_cast %662 : vector<1x32x96xbf16> to vector<32x96xbf16>
    %664 = arith.truncf %661 : vector<8x32xf32> to vector<8x32xbf16>
    %cst_248 = arith.constant dense<0.000000e+00> : vector<8x96xf32>
    %665 = tpu.matmul %664, %663, %cst_248 {dimension_numbers = #tpu.dot_dimension_numbers<[1], [0], [0], [1], [0, 0, 1, 1], [], []>} : vector<8x32xbf16>, vector<32x96xbf16>, vector<8x96xf32> -> vector<8x96xf32>
    %c1_249 = arith.constant 1 : index
    %c0_250 = arith.constant 0 : index
    %c0_251 = arith.constant 0 : index
    %666 = vector.load %arg45[%c1_249, %c0_250, %c0_251] : memref<2x1x96xf32, #tpu.memory_space<vmem>>, vector<1x1x96xf32>
    %667 = vector.shape_cast %666 : vector<1x1x96xf32> to vector<1x96xf32>
    %668 = vector.broadcast %667 : vector<1x96xf32> to vector<8x96xf32>
    %669 = arith.addf %665, %668 : vector<8x96xf32>
    %c1_252 = arith.constant 1 : index
    %c0_253 = arith.constant 0 : index
    %c0_254 = arith.constant 0 : index
    %670 = vector.load %arg44[%c1_252, %c0_253, %c0_254] : memref<2x32x96xbf16, #tpu.memory_space<vmem>>, vector<1x32x96xbf16>
    %671 = vector.shape_cast %670 : vector<1x32x96xbf16> to vector<32x96xbf16>
    %c1_255 = arith.constant 1 : index
    %c0_256 = arith.constant 0 : index
    %c0_257 = arith.constant 0 : index
    %672 = vector.load %arg46[%c1_255, %c0_256, %c0_257] : memref<2x1x96xf32, #tpu.memory_space<vmem>>, vector<1x1x96xf32>
    %673 = vector.shape_cast %672 : vector<1x1x96xf32> to vector<1x96xf32>
    %cst_258 = arith.constant 0.000000e+00 : f32
    %674 = vector.broadcast %cst_258 : f32 to vector<1x32xf32>
    %675 = vector.extract_strided_slice %669 {offsets = [0, 0], sizes = [1, 96], strides = [1, 1]} : vector<8x96xf32> to vector<1x96xf32>
    %676 = arith.truncf %674 : vector<1x32xf32> to vector<1x32xbf16>
    %cst_259 = arith.constant dense<0.000000e+00> : vector<1x96xf32>
    %677 = tpu.matmul %676, %671, %cst_259 {dimension_numbers = #tpu.dot_dimension_numbers<[1], [0], [0], [1], [0, 0, 1, 1], [], []>} : vector<1x32xbf16>, vector<32x96xbf16>, vector<1x96xf32> -> vector<1x96xf32>
    %678 = arith.addf %677, %673 : vector<1x96xf32>
    %679 = vector.extract_strided_slice %675 {offsets = [0, 0], sizes = [1, 64], strides = [1, 1]} : vector<1x96xf32> to vector<1x64xf32>
    %680 = vector.extract_strided_slice %678 {offsets = [0, 0], sizes = [1, 64], strides = [1, 1]} : vector<1x96xf32> to vector<1x64xf32>
    %681 = arith.addf %679, %680 : vector<1x64xf32>
    %682 = arith.negf %681 : vector<1x64xf32>
    %683 = math.exp %682 : vector<1x64xf32>
    %cst_260 = arith.constant 1.000000e+00 : f32
    %684 = vector.broadcast %cst_260 : f32 to vector<1x64xf32>
    %685 = arith.addf %684, %683 : vector<1x64xf32>
    %686 = arith.divf %684, %685 : vector<1x64xf32>
    %687 = vector.extract_strided_slice %686 {offsets = [0, 0], sizes = [1, 32], strides = [1, 1]} : vector<1x64xf32> to vector<1x32xf32>
    %688 = vector.extract_strided_slice %686 {offsets = [0, 32], sizes = [1, 32], strides = [1, 1]} : vector<1x64xf32> to vector<1x32xf32>
    %689 = vector.extract_strided_slice %675 {offsets = [0, 64], sizes = [1, 32], strides = [1, 1]} : vector<1x96xf32> to vector<1x32xf32>
    %690 = vector.extract_strided_slice %678 {offsets = [0, 64], sizes = [1, 32], strides = [1, 1]} : vector<1x96xf32> to vector<1x32xf32>
    %691 = arith.mulf %687, %690 : vector<1x32xf32>
    %692 = arith.addf %689, %691 : vector<1x32xf32>
    %693 = math.tanh %692 : vector<1x32xf32>
    %cst_261 = arith.constant 1.000000e+00 : f32
    %694 = vector.broadcast %cst_261 : f32 to vector<1x32xf32>
    %695 = arith.subf %694, %688 : vector<1x32xf32>
    %696 = arith.mulf %695, %693 : vector<1x32xf32>
    %697 = arith.mulf %688, %674 : vector<1x32xf32>
    %698 = arith.addf %696, %697 : vector<1x32xf32>
    %699 = vector.extract_strided_slice %669 {offsets = [1, 0], sizes = [1, 96], strides = [1, 1]} : vector<8x96xf32> to vector<1x96xf32>
    %700 = arith.truncf %698 : vector<1x32xf32> to vector<1x32xbf16>
    %cst_262 = arith.constant dense<0.000000e+00> : vector<1x96xf32>
    %701 = tpu.matmul %700, %671, %cst_262 {dimension_numbers = #tpu.dot_dimension_numbers<[1], [0], [0], [1], [0, 0, 1, 1], [], []>} : vector<1x32xbf16>, vector<32x96xbf16>, vector<1x96xf32> -> vector<1x96xf32>
    %702 = arith.addf %701, %673 : vector<1x96xf32>
    %703 = vector.extract_strided_slice %699 {offsets = [0, 0], sizes = [1, 64], strides = [1, 1]} : vector<1x96xf32> to vector<1x64xf32>
    %704 = vector.extract_strided_slice %702 {offsets = [0, 0], sizes = [1, 64], strides = [1, 1]} : vector<1x96xf32> to vector<1x64xf32>
    %705 = arith.addf %703, %704 : vector<1x64xf32>
    %706 = arith.negf %705 : vector<1x64xf32>
    %707 = math.exp %706 : vector<1x64xf32>
    %cst_263 = arith.constant 1.000000e+00 : f32
    %708 = vector.broadcast %cst_263 : f32 to vector<1x64xf32>
    %709 = arith.addf %708, %707 : vector<1x64xf32>
    %710 = arith.divf %708, %709 : vector<1x64xf32>
    %711 = vector.extract_strided_slice %710 {offsets = [0, 0], sizes = [1, 32], strides = [1, 1]} : vector<1x64xf32> to vector<1x32xf32>
    %712 = vector.extract_strided_slice %710 {offsets = [0, 32], sizes = [1, 32], strides = [1, 1]} : vector<1x64xf32> to vector<1x32xf32>
    %713 = vector.extract_strided_slice %699 {offsets = [0, 64], sizes = [1, 32], strides = [1, 1]} : vector<1x96xf32> to vector<1x32xf32>
    %714 = vector.extract_strided_slice %702 {offsets = [0, 64], sizes = [1, 32], strides = [1, 1]} : vector<1x96xf32> to vector<1x32xf32>
    %715 = arith.mulf %711, %714 : vector<1x32xf32>
    %716 = arith.addf %713, %715 : vector<1x32xf32>
    %717 = math.tanh %716 : vector<1x32xf32>
    %cst_264 = arith.constant 1.000000e+00 : f32
    %718 = vector.broadcast %cst_264 : f32 to vector<1x32xf32>
    %719 = arith.subf %718, %712 : vector<1x32xf32>
    %720 = arith.mulf %719, %717 : vector<1x32xf32>
    %721 = arith.mulf %712, %698 : vector<1x32xf32>
    %722 = arith.addf %720, %721 : vector<1x32xf32>
    %723 = vector.extract_strided_slice %669 {offsets = [2, 0], sizes = [1, 96], strides = [1, 1]} : vector<8x96xf32> to vector<1x96xf32>
    %724 = arith.truncf %722 : vector<1x32xf32> to vector<1x32xbf16>
    %cst_265 = arith.constant dense<0.000000e+00> : vector<1x96xf32>
    %725 = tpu.matmul %724, %671, %cst_265 {dimension_numbers = #tpu.dot_dimension_numbers<[1], [0], [0], [1], [0, 0, 1, 1], [], []>} : vector<1x32xbf16>, vector<32x96xbf16>, vector<1x96xf32> -> vector<1x96xf32>
    %726 = arith.addf %725, %673 : vector<1x96xf32>
    %727 = vector.extract_strided_slice %723 {offsets = [0, 0], sizes = [1, 64], strides = [1, 1]} : vector<1x96xf32> to vector<1x64xf32>
    %728 = vector.extract_strided_slice %726 {offsets = [0, 0], sizes = [1, 64], strides = [1, 1]} : vector<1x96xf32> to vector<1x64xf32>
    %729 = arith.addf %727, %728 : vector<1x64xf32>
    %730 = arith.negf %729 : vector<1x64xf32>
    %731 = math.exp %730 : vector<1x64xf32>
    %cst_266 = arith.constant 1.000000e+00 : f32
    %732 = vector.broadcast %cst_266 : f32 to vector<1x64xf32>
    %733 = arith.addf %732, %731 : vector<1x64xf32>
    %734 = arith.divf %732, %733 : vector<1x64xf32>
    %735 = vector.extract_strided_slice %734 {offsets = [0, 0], sizes = [1, 32], strides = [1, 1]} : vector<1x64xf32> to vector<1x32xf32>
    %736 = vector.extract_strided_slice %734 {offsets = [0, 32], sizes = [1, 32], strides = [1, 1]} : vector<1x64xf32> to vector<1x32xf32>
    %737 = vector.extract_strided_slice %723 {offsets = [0, 64], sizes = [1, 32], strides = [1, 1]} : vector<1x96xf32> to vector<1x32xf32>
    %738 = vector.extract_strided_slice %726 {offsets = [0, 64], sizes = [1, 32], strides = [1, 1]} : vector<1x96xf32> to vector<1x32xf32>
    %739 = arith.mulf %735, %738 : vector<1x32xf32>
    %740 = arith.addf %737, %739 : vector<1x32xf32>
    %741 = math.tanh %740 : vector<1x32xf32>
    %cst_267 = arith.constant 1.000000e+00 : f32
    %742 = vector.broadcast %cst_267 : f32 to vector<1x32xf32>
    %743 = arith.subf %742, %736 : vector<1x32xf32>
    %744 = arith.mulf %743, %741 : vector<1x32xf32>
    %745 = arith.mulf %736, %722 : vector<1x32xf32>
    %746 = arith.addf %744, %745 : vector<1x32xf32>
    %747 = vector.extract_strided_slice %669 {offsets = [3, 0], sizes = [1, 96], strides = [1, 1]} : vector<8x96xf32> to vector<1x96xf32>
    %748 = arith.truncf %746 : vector<1x32xf32> to vector<1x32xbf16>
    %cst_268 = arith.constant dense<0.000000e+00> : vector<1x96xf32>
    %749 = tpu.matmul %748, %671, %cst_268 {dimension_numbers = #tpu.dot_dimension_numbers<[1], [0], [0], [1], [0, 0, 1, 1], [], []>} : vector<1x32xbf16>, vector<32x96xbf16>, vector<1x96xf32> -> vector<1x96xf32>
    %750 = arith.addf %749, %673 : vector<1x96xf32>
    %751 = vector.extract_strided_slice %747 {offsets = [0, 0], sizes = [1, 64], strides = [1, 1]} : vector<1x96xf32> to vector<1x64xf32>
    %752 = vector.extract_strided_slice %750 {offsets = [0, 0], sizes = [1, 64], strides = [1, 1]} : vector<1x96xf32> to vector<1x64xf32>
    %753 = arith.addf %751, %752 : vector<1x64xf32>
    %754 = arith.negf %753 : vector<1x64xf32>
    %755 = math.exp %754 : vector<1x64xf32>
    %cst_269 = arith.constant 1.000000e+00 : f32
    %756 = vector.broadcast %cst_269 : f32 to vector<1x64xf32>
    %757 = arith.addf %756, %755 : vector<1x64xf32>
    %758 = arith.divf %756, %757 : vector<1x64xf32>
    %759 = vector.extract_strided_slice %758 {offsets = [0, 0], sizes = [1, 32], strides = [1, 1]} : vector<1x64xf32> to vector<1x32xf32>
    %760 = vector.extract_strided_slice %758 {offsets = [0, 32], sizes = [1, 32], strides = [1, 1]} : vector<1x64xf32> to vector<1x32xf32>
    %761 = vector.extract_strided_slice %747 {offsets = [0, 64], sizes = [1, 32], strides = [1, 1]} : vector<1x96xf32> to vector<1x32xf32>
    %762 = vector.extract_strided_slice %750 {offsets = [0, 64], sizes = [1, 32], strides = [1, 1]} : vector<1x96xf32> to vector<1x32xf32>
    %763 = arith.mulf %759, %762 : vector<1x32xf32>
    %764 = arith.addf %761, %763 : vector<1x32xf32>
    %765 = math.tanh %764 : vector<1x32xf32>
    %cst_270 = arith.constant 1.000000e+00 : f32
    %766 = vector.broadcast %cst_270 : f32 to vector<1x32xf32>
    %767 = arith.subf %766, %760 : vector<1x32xf32>
    %768 = arith.mulf %767, %765 : vector<1x32xf32>
    %769 = arith.mulf %760, %746 : vector<1x32xf32>
    %770 = arith.addf %768, %769 : vector<1x32xf32>
    %771 = vector.extract_strided_slice %669 {offsets = [4, 0], sizes = [1, 96], strides = [1, 1]} : vector<8x96xf32> to vector<1x96xf32>
    %772 = arith.truncf %770 : vector<1x32xf32> to vector<1x32xbf16>
    %cst_271 = arith.constant dense<0.000000e+00> : vector<1x96xf32>
    %773 = tpu.matmul %772, %671, %cst_271 {dimension_numbers = #tpu.dot_dimension_numbers<[1], [0], [0], [1], [0, 0, 1, 1], [], []>} : vector<1x32xbf16>, vector<32x96xbf16>, vector<1x96xf32> -> vector<1x96xf32>
    %774 = arith.addf %773, %673 : vector<1x96xf32>
    %775 = vector.extract_strided_slice %771 {offsets = [0, 0], sizes = [1, 64], strides = [1, 1]} : vector<1x96xf32> to vector<1x64xf32>
    %776 = vector.extract_strided_slice %774 {offsets = [0, 0], sizes = [1, 64], strides = [1, 1]} : vector<1x96xf32> to vector<1x64xf32>
    %777 = arith.addf %775, %776 : vector<1x64xf32>
    %778 = arith.negf %777 : vector<1x64xf32>
    %779 = math.exp %778 : vector<1x64xf32>
    %cst_272 = arith.constant 1.000000e+00 : f32
    %780 = vector.broadcast %cst_272 : f32 to vector<1x64xf32>
    %781 = arith.addf %780, %779 : vector<1x64xf32>
    %782 = arith.divf %780, %781 : vector<1x64xf32>
    %783 = vector.extract_strided_slice %782 {offsets = [0, 0], sizes = [1, 32], strides = [1, 1]} : vector<1x64xf32> to vector<1x32xf32>
    %784 = vector.extract_strided_slice %782 {offsets = [0, 32], sizes = [1, 32], strides = [1, 1]} : vector<1x64xf32> to vector<1x32xf32>
    %785 = vector.extract_strided_slice %771 {offsets = [0, 64], sizes = [1, 32], strides = [1, 1]} : vector<1x96xf32> to vector<1x32xf32>
    %786 = vector.extract_strided_slice %774 {offsets = [0, 64], sizes = [1, 32], strides = [1, 1]} : vector<1x96xf32> to vector<1x32xf32>
    %787 = arith.mulf %783, %786 : vector<1x32xf32>
    %788 = arith.addf %785, %787 : vector<1x32xf32>
    %789 = math.tanh %788 : vector<1x32xf32>
    %cst_273 = arith.constant 1.000000e+00 : f32
    %790 = vector.broadcast %cst_273 : f32 to vector<1x32xf32>
    %791 = arith.subf %790, %784 : vector<1x32xf32>
    %792 = arith.mulf %791, %789 : vector<1x32xf32>
    %793 = arith.mulf %784, %770 : vector<1x32xf32>
    %794 = arith.addf %792, %793 : vector<1x32xf32>
    %795 = vector.extract_strided_slice %669 {offsets = [5, 0], sizes = [1, 96], strides = [1, 1]} : vector<8x96xf32> to vector<1x96xf32>
    %796 = arith.truncf %794 : vector<1x32xf32> to vector<1x32xbf16>
    %cst_274 = arith.constant dense<0.000000e+00> : vector<1x96xf32>
    %797 = tpu.matmul %796, %671, %cst_274 {dimension_numbers = #tpu.dot_dimension_numbers<[1], [0], [0], [1], [0, 0, 1, 1], [], []>} : vector<1x32xbf16>, vector<32x96xbf16>, vector<1x96xf32> -> vector<1x96xf32>
    %798 = arith.addf %797, %673 : vector<1x96xf32>
    %799 = vector.extract_strided_slice %795 {offsets = [0, 0], sizes = [1, 64], strides = [1, 1]} : vector<1x96xf32> to vector<1x64xf32>
    %800 = vector.extract_strided_slice %798 {offsets = [0, 0], sizes = [1, 64], strides = [1, 1]} : vector<1x96xf32> to vector<1x64xf32>
    %801 = arith.addf %799, %800 : vector<1x64xf32>
    %802 = arith.negf %801 : vector<1x64xf32>
    %803 = math.exp %802 : vector<1x64xf32>
    %cst_275 = arith.constant 1.000000e+00 : f32
    %804 = vector.broadcast %cst_275 : f32 to vector<1x64xf32>
    %805 = arith.addf %804, %803 : vector<1x64xf32>
    %806 = arith.divf %804, %805 : vector<1x64xf32>
    %807 = vector.extract_strided_slice %806 {offsets = [0, 0], sizes = [1, 32], strides = [1, 1]} : vector<1x64xf32> to vector<1x32xf32>
    %808 = vector.extract_strided_slice %806 {offsets = [0, 32], sizes = [1, 32], strides = [1, 1]} : vector<1x64xf32> to vector<1x32xf32>
    %809 = vector.extract_strided_slice %795 {offsets = [0, 64], sizes = [1, 32], strides = [1, 1]} : vector<1x96xf32> to vector<1x32xf32>
    %810 = vector.extract_strided_slice %798 {offsets = [0, 64], sizes = [1, 32], strides = [1, 1]} : vector<1x96xf32> to vector<1x32xf32>
    %811 = arith.mulf %807, %810 : vector<1x32xf32>
    %812 = arith.addf %809, %811 : vector<1x32xf32>
    %813 = math.tanh %812 : vector<1x32xf32>
    %cst_276 = arith.constant 1.000000e+00 : f32
    %814 = vector.broadcast %cst_276 : f32 to vector<1x32xf32>
    %815 = arith.subf %814, %808 : vector<1x32xf32>
    %816 = arith.mulf %815, %813 : vector<1x32xf32>
    %817 = arith.mulf %808, %794 : vector<1x32xf32>
    %818 = arith.addf %816, %817 : vector<1x32xf32>
    %819 = vector.extract_strided_slice %669 {offsets = [6, 0], sizes = [1, 96], strides = [1, 1]} : vector<8x96xf32> to vector<1x96xf32>
    %820 = arith.truncf %818 : vector<1x32xf32> to vector<1x32xbf16>
    %cst_277 = arith.constant dense<0.000000e+00> : vector<1x96xf32>
    %821 = tpu.matmul %820, %671, %cst_277 {dimension_numbers = #tpu.dot_dimension_numbers<[1], [0], [0], [1], [0, 0, 1, 1], [], []>} : vector<1x32xbf16>, vector<32x96xbf16>, vector<1x96xf32> -> vector<1x96xf32>
    %822 = arith.addf %821, %673 : vector<1x96xf32>
    %823 = vector.extract_strided_slice %819 {offsets = [0, 0], sizes = [1, 64], strides = [1, 1]} : vector<1x96xf32> to vector<1x64xf32>
    %824 = vector.extract_strided_slice %822 {offsets = [0, 0], sizes = [1, 64], strides = [1, 1]} : vector<1x96xf32> to vector<1x64xf32>
    %825 = arith.addf %823, %824 : vector<1x64xf32>
    %826 = arith.negf %825 : vector<1x64xf32>
    %827 = math.exp %826 : vector<1x64xf32>
    %cst_278 = arith.constant 1.000000e+00 : f32
    %828 = vector.broadcast %cst_278 : f32 to vector<1x64xf32>
    %829 = arith.addf %828, %827 : vector<1x64xf32>
    %830 = arith.divf %828, %829 : vector<1x64xf32>
    %831 = vector.extract_strided_slice %830 {offsets = [0, 0], sizes = [1, 32], strides = [1, 1]} : vector<1x64xf32> to vector<1x32xf32>
    %832 = vector.extract_strided_slice %830 {offsets = [0, 32], sizes = [1, 32], strides = [1, 1]} : vector<1x64xf32> to vector<1x32xf32>
    %833 = vector.extract_strided_slice %819 {offsets = [0, 64], sizes = [1, 32], strides = [1, 1]} : vector<1x96xf32> to vector<1x32xf32>
    %834 = vector.extract_strided_slice %822 {offsets = [0, 64], sizes = [1, 32], strides = [1, 1]} : vector<1x96xf32> to vector<1x32xf32>
    %835 = arith.mulf %831, %834 : vector<1x32xf32>
    %836 = arith.addf %833, %835 : vector<1x32xf32>
    %837 = math.tanh %836 : vector<1x32xf32>
    %cst_279 = arith.constant 1.000000e+00 : f32
    %838 = vector.broadcast %cst_279 : f32 to vector<1x32xf32>
    %839 = arith.subf %838, %832 : vector<1x32xf32>
    %840 = arith.mulf %839, %837 : vector<1x32xf32>
    %841 = arith.mulf %832, %818 : vector<1x32xf32>
    %842 = arith.addf %840, %841 : vector<1x32xf32>
    %843 = vector.extract_strided_slice %669 {offsets = [7, 0], sizes = [1, 96], strides = [1, 1]} : vector<8x96xf32> to vector<1x96xf32>
    %844 = arith.truncf %842 : vector<1x32xf32> to vector<1x32xbf16>
    %cst_280 = arith.constant dense<0.000000e+00> : vector<1x96xf32>
    %845 = tpu.matmul %844, %671, %cst_280 {dimension_numbers = #tpu.dot_dimension_numbers<[1], [0], [0], [1], [0, 0, 1, 1], [], []>} : vector<1x32xbf16>, vector<32x96xbf16>, vector<1x96xf32> -> vector<1x96xf32>
    %846 = arith.addf %845, %673 : vector<1x96xf32>
    %847 = vector.extract_strided_slice %843 {offsets = [0, 0], sizes = [1, 64], strides = [1, 1]} : vector<1x96xf32> to vector<1x64xf32>
    %848 = vector.extract_strided_slice %846 {offsets = [0, 0], sizes = [1, 64], strides = [1, 1]} : vector<1x96xf32> to vector<1x64xf32>
    %849 = arith.addf %847, %848 : vector<1x64xf32>
    %850 = arith.negf %849 : vector<1x64xf32>
    %851 = math.exp %850 : vector<1x64xf32>
    %cst_281 = arith.constant 1.000000e+00 : f32
    %852 = vector.broadcast %cst_281 : f32 to vector<1x64xf32>
    %853 = arith.addf %852, %851 : vector<1x64xf32>
    %854 = arith.divf %852, %853 : vector<1x64xf32>
    %855 = vector.extract_strided_slice %854 {offsets = [0, 0], sizes = [1, 32], strides = [1, 1]} : vector<1x64xf32> to vector<1x32xf32>
    %856 = vector.extract_strided_slice %854 {offsets = [0, 32], sizes = [1, 32], strides = [1, 1]} : vector<1x64xf32> to vector<1x32xf32>
    %857 = vector.extract_strided_slice %843 {offsets = [0, 64], sizes = [1, 32], strides = [1, 1]} : vector<1x96xf32> to vector<1x32xf32>
    %858 = vector.extract_strided_slice %846 {offsets = [0, 64], sizes = [1, 32], strides = [1, 1]} : vector<1x96xf32> to vector<1x32xf32>
    %859 = arith.mulf %855, %858 : vector<1x32xf32>
    %860 = arith.addf %857, %859 : vector<1x32xf32>
    %861 = math.tanh %860 : vector<1x32xf32>
    %cst_282 = arith.constant 1.000000e+00 : f32
    %862 = vector.broadcast %cst_282 : f32 to vector<1x32xf32>
    %863 = arith.subf %862, %856 : vector<1x32xf32>
    %864 = arith.mulf %863, %861 : vector<1x32xf32>
    %865 = arith.mulf %856, %842 : vector<1x32xf32>
    %866 = arith.addf %864, %865 : vector<1x32xf32>
    %c0_283 = arith.constant 0 : index
    %c0_284 = arith.constant 0 : index
    %867 = vector.load %arg47[%c0_283, %c0_284] : memref<32x5xbf16, #tpu.memory_space<vmem>>, vector<32x5xbf16>
    %868 = arith.truncf %866 : vector<1x32xf32> to vector<1x32xbf16>
    %cst_285 = arith.constant dense<0.000000e+00> : vector<1x5xf32>
    %869 = tpu.matmul %868, %867, %cst_285 {dimension_numbers = #tpu.dot_dimension_numbers<[1], [0], [0], [1], [0, 0, 1, 1], [], []>} : vector<1x32xbf16>, vector<32x5xbf16>, vector<1x5xf32> -> vector<1x5xf32>
    %c0_286 = arith.constant 0 : index
    %c0_287 = arith.constant 0 : index
    %870 = vector.load %arg48[%c0_286, %c0_287] : memref<1x5xf32, #tpu.memory_space<vmem>>, vector<1x5xf32>
    %871 = arith.addf %869, %870 : vector<1x5xf32>
    %c0_288 = arith.constant 0 : index
    %c0_289 = arith.constant 0 : index
    %c0_290 = arith.constant 0 : index
    %872 = vector.load %arg49[%c0_288, %c0_289, %c0_290] : memref<1x1x5xf32, #tpu.memory_space<vmem>>, vector<1x1x5xf32>
    %873 = vector.shape_cast %872 : vector<1x1x5xf32> to vector<1x5xf32>
    %874 = vector.shape_cast %871 : vector<1x5xf32> to vector<1x1x5xf32>
    tpu.vector_store %arg49[%c0_288, %c0_289, %c0_290], %874 {strides = array<i32>} : memref<1x1x5xf32, #tpu.memory_space<vmem>>, vector<1x1x5xf32>,
    return
  }
  func.func @transform_0(%arg0: i32) -> (i32, i32, i32) {
    %c0_i32 = arith.constant 0 : i32
    %c0_i32_0 = arith.constant 0 : i32
    %c0_i32_1 = arith.constant 0 : i32
    return %arg0, %c0_i32, %c0_i32_0 : i32, i32, i32
  }
  func.func @transform_1(%arg0: i32) -> (i32, i32, i32) {
    %c0_i32 = arith.constant 0 : i32
    %c0_i32_0 = arith.constant 0 : i32
    %c0_i32_1 = arith.constant 0 : i32
    return %arg0, %c0_i32, %c0_i32_0 : i32, i32, i32
  }
  func.func @transform_2(%arg0: i32) -> (i32, i32, i32) {
    %c0_i32 = arith.constant 0 : i32
    %c0_i32_0 = arith.constant 0 : i32
    %c0_i32_1 = arith.constant 0 : i32
    return %arg0, %c0_i32, %c0_i32_0 : i32, i32, i32
  }
  func.func @transform_3(%arg0: i32) -> (i32, i32) {
    %c0_i32 = arith.constant 0 : i32
    %c0_i32_0 = arith.constant 0 : i32
    %c0_i32_1 = arith.constant 0 : i32
    return %c0_i32, %c0_i32_0 : i32, i32
  }
  func.func @transform_4(%arg0: i32) -> (i32, i32) {
    %c0_i32 = arith.constant 0 : i32
    %c0_i32_0 = arith.constant 0 : i32
    %c0_i32_1 = arith.constant 0 : i32
    return %c0_i32, %c0_i32_0 : i32, i32
  }
  func.func @transform_5(%arg0: i32) -> (i32, i32) {
    %c0_i32 = arith.constant 0 : i32
    %c0_i32_0 = arith.constant 0 : i32
    %c0_i32_1 = arith.constant 0 : i32
    return %c0_i32, %c0_i32_0 : i32, i32
  }
  func.func @transform_6(%arg0: i32) -> (i32, i32) {
    %c0_i32 = arith.constant 0 : i32
    %c0_i32_0 = arith.constant 0 : i32
    %c0_i32_1 = arith.constant 0 : i32
    return %c0_i32, %c0_i32_0 : i32, i32
  }
  func.func @transform_7(%arg0: i32) -> (i32, i32) {
    %c0_i32 = arith.constant 0 : i32
    %c0_i32_0 = arith.constant 0 : i32
    %c0_i32_1 = arith.constant 0 : i32
    return %c0_i32, %c0_i32_0 : i32, i32
  }
  func.func @transform_8(%arg0: i32) -> (i32, i32) {
    %c0_i32 = arith.constant 0 : i32
    %c0_i32_0 = arith.constant 0 : i32
    %c0_i32_1 = arith.constant 0 : i32
    return %c0_i32, %c0_i32_0 : i32, i32
  }
  func.func @transform_9(%arg0: i32) -> (i32, i32) {
    %c0_i32 = arith.constant 0 : i32
    %c0_i32_0 = arith.constant 0 : i32
    %c0_i32_1 = arith.constant 0 : i32
    return %c0_i32, %c0_i32_0 : i32, i32
  }
  func.func @transform_10(%arg0: i32) -> (i32, i32) {
    %c0_i32 = arith.constant 0 : i32
    %c0_i32_0 = arith.constant 0 : i32
    %c0_i32_1 = arith.constant 0 : i32
    return %c0_i32, %c0_i32_0 : i32, i32
  }
  func.func @transform_11(%arg0: i32) -> (i32, i32) {
    %c0_i32 = arith.constant 0 : i32
    %c0_i32_0 = arith.constant 0 : i32
    %c0_i32_1 = arith.constant 0 : i32
    return %c0_i32, %c0_i32_0 : i32, i32
  }
  func.func @transform_12(%arg0: i32) -> (i32, i32) {
    %c0_i32 = arith.constant 0 : i32
    %c0_i32_0 = arith.constant 0 : i32
    %c0_i32_1 = arith.constant 0 : i32
    return %c0_i32, %c0_i32_0 : i32, i32
  }
  func.func @transform_13(%arg0: i32) -> (i32, i32) {
    %c0_i32 = arith.constant 0 : i32
    %c0_i32_0 = arith.constant 0 : i32
    %c0_i32_1 = arith.constant 0 : i32
    return %c0_i32, %c0_i32_0 : i32, i32
  }
  func.func @transform_14(%arg0: i32) -> (i32, i32) {
    %c0_i32 = arith.constant 0 : i32
    %c0_i32_0 = arith.constant 0 : i32
    %c0_i32_1 = arith.constant 0 : i32
    return %c0_i32, %c0_i32_0 : i32, i32
  }
  func.func @transform_15(%arg0: i32) -> (i32, i32, i32) {
    %c0_i32 = arith.constant 0 : i32
    %c0_i32_0 = arith.constant 0 : i32
    %c0_i32_1 = arith.constant 0 : i32
    %c0_i32_2 = arith.constant 0 : i32
    return %c0_i32, %c0_i32_0, %c0_i32_1 : i32, i32, i32
  }
  func.func @transform_16(%arg0: i32) -> (i32, i32) {
    %c0_i32 = arith.constant 0 : i32
    %c0_i32_0 = arith.constant 0 : i32
    %c0_i32_1 = arith.constant 0 : i32
    return %c0_i32, %c0_i32_0 : i32, i32
  }
  func.func @transform_17(%arg0: i32) -> (i32, i32) {
    %c0_i32 = arith.constant 0 : i32
    %c0_i32_0 = arith.constant 0 : i32
    %c0_i32_1 = arith.constant 0 : i32
    return %c0_i32, %c0_i32_0 : i32, i32
  }
  func.func @transform_18(%arg0: i32) -> (i32, i32) {
    %c0_i32 = arith.constant 0 : i32
    %c0_i32_0 = arith.constant 0 : i32
    %c0_i32_1 = arith.constant 0 : i32
    return %c0_i32, %c0_i32_0 : i32, i32
  }
  func.func @transform_19(%arg0: i32) -> (i32, i32) {
    %c0_i32 = arith.constant 0 : i32
    %c0_i32_0 = arith.constant 0 : i32
    %c0_i32_1 = arith.constant 0 : i32
    return %c0_i32, %c0_i32_0 : i32, i32
  }
  func.func @transform_20(%arg0: i32) -> (i32, i32) {
    %c0_i32 = arith.constant 0 : i32
    %c0_i32_0 = arith.constant 0 : i32
    %c0_i32_1 = arith.constant 0 : i32
    return %c0_i32, %c0_i32_0 : i32, i32
  }
  func.func @transform_21(%arg0: i32) -> (i32, i32) {
    %c0_i32 = arith.constant 0 : i32
    %c0_i32_0 = arith.constant 0 : i32
    %c0_i32_1 = arith.constant 0 : i32
    return %c0_i32, %c0_i32_0 : i32, i32
  }
  func.func @transform_22(%arg0: i32) -> (i32, i32) {
    %c0_i32 = arith.constant 0 : i32
    %c0_i32_0 = arith.constant 0 : i32
    %c0_i32_1 = arith.constant 0 : i32
    return %c0_i32, %c0_i32_0 : i32, i32
  }
  func.func @transform_23(%arg0: i32) -> (i32, i32) {
    %c0_i32 = arith.constant 0 : i32
    %c0_i32_0 = arith.constant 0 : i32
    %c0_i32_1 = arith.constant 0 : i32
    return %c0_i32, %c0_i32_0 : i32, i32
  }
  func.func @transform_24(%arg0: i32) -> (i32, i32) {
    %c0_i32 = arith.constant 0 : i32
    %c0_i32_0 = arith.constant 0 : i32
    %c0_i32_1 = arith.constant 0 : i32
    return %c0_i32, %c0_i32_0 : i32, i32
  }
  func.func @transform_25(%arg0: i32) -> (i32, i32) {
    %c0_i32 = arith.constant 0 : i32
    %c0_i32_0 = arith.constant 0 : i32
    %c0_i32_1 = arith.constant 0 : i32
    return %c0_i32, %c0_i32_0 : i32, i32
  }
  func.func @transform_26(%arg0: i32) -> (i32, i32) {
    %c0_i32 = arith.constant 0 : i32
    %c0_i32_0 = arith.constant 0 : i32
    %c0_i32_1 = arith.constant 0 : i32
    return %c0_i32, %c0_i32_0 : i32, i32
  }
  func.func @transform_27(%arg0: i32) -> (i32, i32) {
    %c0_i32 = arith.constant 0 : i32
    %c0_i32_0 = arith.constant 0 : i32
    %c0_i32_1 = arith.constant 0 : i32
    return %c0_i32, %c0_i32_0 : i32, i32
  }
  func.func @transform_28(%arg0: i32) -> (i32, i32) {
    %c0_i32 = arith.constant 0 : i32
    %c0_i32_0 = arith.constant 0 : i32
    %c0_i32_1 = arith.constant 0 : i32
    return %c0_i32, %c0_i32_0 : i32, i32
  }
  func.func @transform_29(%arg0: i32) -> (i32, i32, i32) {
    %c0_i32 = arith.constant 0 : i32
    %c0_i32_0 = arith.constant 0 : i32
    %c0_i32_1 = arith.constant 0 : i32
    %c0_i32_2 = arith.constant 0 : i32
    return %c0_i32, %c0_i32_0, %c0_i32_1 : i32, i32, i32
  }
  func.func @transform_30(%arg0: i32) -> (i32, i32) {
    %c0_i32 = arith.constant 0 : i32
    %c0_i32_0 = arith.constant 0 : i32
    %c0_i32_1 = arith.constant 0 : i32
    return %c0_i32, %c0_i32_0 : i32, i32
  }
  func.func @transform_31(%arg0: i32) -> (i32, i32, i32) {
    %c0_i32 = arith.constant 0 : i32
    %c0_i32_0 = arith.constant 0 : i32
    %c0_i32_1 = arith.constant 0 : i32
    %c0_i32_2 = arith.constant 0 : i32
    return %c0_i32, %c0_i32_0, %c0_i32_1 : i32, i32, i32
  }
  func.func @transform_32(%arg0: i32) -> (i32, i32) {
    %c0_i32 = arith.constant 0 : i32
    %c0_i32_0 = arith.constant 0 : i32
    %c0_i32_1 = arith.constant 0 : i32
    return %c0_i32, %c0_i32_0 : i32, i32
  }
  func.func @transform_33(%arg0: i32) -> (i32, i32, i32) {
    %c0_i32 = arith.constant 0 : i32
    %c0_i32_0 = arith.constant 0 : i32
    %c0_i32_1 = arith.constant 0 : i32
    %c0_i32_2 = arith.constant 0 : i32
    return %c0_i32, %c0_i32_0, %c0_i32_1 : i32, i32, i32
  }
  func.func @transform_34(%arg0: i32) -> (i32, i32) {
    %c0_i32 = arith.constant 0 : i32
    %c0_i32_0 = arith.constant 0 : i32
    %c0_i32_1 = arith.constant 0 : i32
    return %c0_i32, %c0_i32_0 : i32, i32
  }
  func.func @transform_35(%arg0: i32) -> (i32, i32) {
    %c0_i32 = arith.constant 0 : i32
    %c0_i32_0 = arith.constant 0 : i32
    %c0_i32_1 = arith.constant 0 : i32
    return %c0_i32, %c0_i32_0 : i32, i32
  }
  func.func @transform_36(%arg0: i32) -> (i32, i32) {
    %c0_i32 = arith.constant 0 : i32
    %c0_i32_0 = arith.constant 0 : i32
    %c0_i32_1 = arith.constant 0 : i32
    return %c0_i32, %c0_i32_0 : i32, i32
  }
  func.func @transform_37(%arg0: i32) -> (i32, i32) {
    %c0_i32 = arith.constant 0 : i32
    %c0_i32_0 = arith.constant 0 : i32
    %c0_i32_1 = arith.constant 0 : i32
    return %c0_i32, %c0_i32_0 : i32, i32
  }
  func.func @transform_38(%arg0: i32) -> (i32, i32) {
    %c0_i32 = arith.constant 0 : i32
    %c0_i32_0 = arith.constant 0 : i32
    %c0_i32_1 = arith.constant 0 : i32
    return %c0_i32, %c0_i32_0 : i32, i32
  }
  func.func @transform_39(%arg0: i32) -> (i32, i32) {
    %c0_i32 = arith.constant 0 : i32
    %c0_i32_0 = arith.constant 0 : i32
    %c0_i32_1 = arith.constant 0 : i32
    return %c0_i32, %c0_i32_0 : i32, i32
  }
  func.func @transform_40(%arg0: i32) -> (i32, i32) {
    %c0_i32 = arith.constant 0 : i32
    %c0_i32_0 = arith.constant 0 : i32
    %c0_i32_1 = arith.constant 0 : i32
    return %c0_i32, %c0_i32_0 : i32, i32
  }
  func.func @transform_41(%arg0: i32) -> (i32, i32) {
    %c0_i32 = arith.constant 0 : i32
    %c0_i32_0 = arith.constant 0 : i32
    %c0_i32_1 = arith.constant 0 : i32
    return %c0_i32, %c0_i32_0 : i32, i32
  }
  func.func @transform_42(%arg0: i32) -> (i32, i32, i32) {
    %c0_i32 = arith.constant 0 : i32
    %c0_i32_0 = arith.constant 0 : i32
    %c0_i32_1 = arith.constant 0 : i32
    %c0_i32_2 = arith.constant 0 : i32
    return %c0_i32, %c0_i32_0, %c0_i32_1 : i32, i32, i32
  }
  func.func @transform_43(%arg0: i32) -> (i32, i32, i32) {
    %c0_i32 = arith.constant 0 : i32
    %c0_i32_0 = arith.constant 0 : i32
    %c0_i32_1 = arith.constant 0 : i32
    %c0_i32_2 = arith.constant 0 : i32
    return %c0_i32, %c0_i32_0, %c0_i32_1 : i32, i32, i32
  }
  func.func @transform_44(%arg0: i32) -> (i32, i32, i32) {
    %c0_i32 = arith.constant 0 : i32
    %c0_i32_0 = arith.constant 0 : i32
    %c0_i32_1 = arith.constant 0 : i32
    %c0_i32_2 = arith.constant 0 : i32
    return %c0_i32, %c0_i32_0, %c0_i32_1 : i32, i32, i32
  }
  func.func @transform_45(%arg0: i32) -> (i32, i32, i32) {
    %c0_i32 = arith.constant 0 : i32
    %c0_i32_0 = arith.constant 0 : i32
    %c0_i32_1 = arith.constant 0 : i32
    %c0_i32_2 = arith.constant 0 : i32
    return %c0_i32, %c0_i32_0, %c0_i32_1 : i32, i32, i32
  }
  func.func @transform_46(%arg0: i32) -> (i32, i32) {
    %c0_i32 = arith.constant 0 : i32
    %c0_i32_0 = arith.constant 0 : i32
    %c0_i32_1 = arith.constant 0 : i32
    return %c0_i32, %c0_i32_0 : i32, i32
  }
  func.func @transform_47(%arg0: i32) -> (i32, i32) {
    %c0_i32 = arith.constant 0 : i32
    %c0_i32_0 = arith.constant 0 : i32
    %c0_i32_1 = arith.constant 0 : i32
    return %c0_i32, %c0_i32_0 : i32, i32
  }
  func.func @transform_48(%arg0: i32) -> (i32, i32, i32) {
    %c0_i32 = arith.constant 0 : i32
    %c0_i32_0 = arith.constant 0 : i32
    %c0_i32_1 = arith.constant 0 : i32
    return %arg0, %c0_i32, %c0_i32_0 : i32, i32, i32
  }
}

</mosaic_0001>

<bundles_post_ra>
// kernel: forward.1
= control target key start
LH: loop header
LB: loop body
LE: loop exit
PB: predicated region body
PF: predicated region fallthrough
CT: control target
= control target key end

     0   :  { %s11323_s6 = smov 1   ;;  %s11324_s10 = smov 2   ;;  %s13185_s0 = inlined_call_operand.smem [shape: u32[49], index: -1, kind: input, shape index: {}] }
   0x1   :  { %s11396_s5 = sld [smem:[%s13185_s0]]   ;;  %s11325_s14 = smov 3  }
   0x2   :  { %s11401_s9 = sld [smem:[%s13185_s0 + %s11323_s6]]   ;;  %s11326_s18 = smov 4  }
   0x3   :  { %s11406_s13 = sld [smem:[%s13185_s0 + %s11324_s10]]   ;;  %s11327_s22 = smov 5  }
   0x4   :  { %s11411_s17 = sld [smem:[%s13185_s0 + %s11325_s14]]   ;;  %s11328_s26 = smov 6  }
   0x5   :  { %s11416_s21 = sld [smem:[%s13185_s0 + %s11326_s18]]   ;;  %s11329_s30 = smov 7  }
   0x6   :  { %s11421_s25 = sld [smem:[%s13185_s0 + %s11327_s22]]   ;;  %s11330_s4 = smov 8  }
   0x7   :  { %13218 = sst [smem:[#allocation5_spill]] %s11396_s5  ;;  %s11331_s10 = smov 9  }
   0x8   :  { %13219 = sst [smem:[#allocation6_spill]] %s11401_s9  ;;  %s11332_s15 = smov 10  }
   0x9   :  { %13220 = sst [smem:[#allocation7_spill]] %s11406_s13  ;;  %s11333_s20 = smov 11  }
   0xa   :  { %s11426_s29 = sld [smem:[%s13185_s0 + %s11328_s26]]   ;;  %s11334_s26 = smov 12  }
   0xb   :  { %s11431_s3 = sld [smem:[%s13185_s0 + %s11329_s30]]   ;;  %s11335_s1 = smov 13  }
   0xc   :  { %13221 = sst [smem:[#allocation8_spill]] %s11421_s25  ;;  %s11336_s7 = smov 14  }
   0xd   :  { %s11436_s8 = sld [smem:[%s13185_s0 + %s11330_s4]]   ;;  %s11338_s22 = smov 16  }
   0xe   :  { %s11441_s14 = sld [smem:[%s13185_s0 + %s11331_s10]]   ;;  %s11339_s28 = smov 17  }
   0xf   :  { %s11446_s19 = sld [smem:[%s13185_s0 + %s11332_s15]]   ;;  %s11337_s15 = smov 15  }
  0x10   :  { %s11451_s24 = sld [smem:[%s13185_s0 + %s11333_s20]]  }
  0x11   :  { %13222 = sst [smem:[#allocation9_spill]] %s11431_s3 }
  0x12   :  { %s11456_s30 = sld [smem:[%s13185_s0 + %s11334_s26]]  }
  0x13   :  { %13223 = sst [smem:[#allocation10_spill]] %s11436_s8 }
  0x14   :  { %s11461_s6 = sld [smem:[%s13185_s0 + %s11335_s1]]  }
  0x15   :  { %s11466_s12 = sld [smem:[%s13185_s0 + %s11336_s7]]   ;;  %s11340_s7 = smov 18  }
  0x16   :  { %s11471_s20 = sld [smem:[%s13185_s0 + %s11337_s15]]   ;;  %s11341_s15 = smov 19  }
  0x17   :  { %s11476_s27 = sld [smem:[%s13185_s0 + %s11338_s22]]   ;;  %s11342_s22 = smov 20  }
  0x18   :  { %s11481_s4 = sld [smem:[%s13185_s0 + %s11339_s28]]   ;;  %s11343_s28 = smov 21  }
  0x19   :  { %s11486_s9 = sld [smem:[%s13185_s0 + %s11340_s7]]   ;;  %s11344_s7 = smov 22  }
  0x1a   :  { %13224 = sst [smem:[#allocation11_spill]] %s11461_s6 }
  0x1b   :  { %13225 = sst [smem:[#allocation12_spill]] %s11466_s12 }
  0x1c   :  { %s11491_s25 = sld [smem:[%s13185_s0 + %s11341_s15]]   ;;  %s11345_s15 = smov 23  }
  0x1d   :  { %13226 = sst [smem:[#allocation13_spill]] %s11476_s27 }
  0x1e   :  { %13227 = sst [smem:[#allocation14_spill]] %s11481_s4 }
  0x1f   :  { %13228 = sst [smem:[#allocation15_spill]] %s11486_s9 }
  0x20   :  { %s11496_s27 = sld [smem:[%s13185_s0 + %s11342_s22]]   ;;  %s11346_s22 = smov 24  }
  0x21   :  { %s11501_s4 = sld [smem:[%s13185_s0 + %s11343_s28]]   ;;  %s11347_s28 = smov 25  }
  0x22   :  { %13229 = sst [smem:[#allocation16_spill]] %s11491_s25 }
  0x23   :  { %s11506_s9 = sld [smem:[%s13185_s0 + %s11344_s7]]   ;;  %s11348_s7 = smov 26  }
  0x24   :  { %s11511_s25 = sld [smem:[%s13185_s0 + %s11345_s15]]   ;;  %s11349_s15 = smov 27  }
  0x26   :  { %13230 = sst [smem:[#allocation17_spill]] %s11496_s27 }
  0x27   :  { %13231 = sst [smem:[#allocation18_spill]] %s11501_s4 }
  0x28   :  { %s11516_s27 = sld [smem:[%s13185_s0 + %s11346_s22]]   ;;  %s11350_s22 = smov 28  }
  0x29   :  { %13232 = sst [smem:[#allocation19_spill]] %s11506_s9 }
  0x2a   :  { %13233 = sst [smem:[#allocation20_spill]] %s11511_s25 }
  0x2b   :  { %s11521_s4 = sld [smem:[%s13185_s0 + %s11347_s28]]   ;;  %s11351_s28 = smov 29  }
  0x2c   :  { %s11526_s9 = sld [smem:[%s13185_s0 + %s11348_s7]]   ;;  %s11352_s7 = smov 30  }
  0x2d   :  { %s11531_s25 = sld [smem:[%s13185_s0 + %s11349_s15]]   ;;  %s11353_s15 = smov 31  }
  0x2e   :  { %13234 = sst [smem:[#allocation21_spill]] %s11516_s27 }
  0x2f   :  { %s11536_s27 = sld [smem:[%s13185_s0 + %s11350_s22]]   ;;  %s11354_s22 = smov 32  }
  0x30   :  { %s11541_s13 = sld [smem:[%s13185_s0 + %s11351_s28]]   ;;  %s11355_s28 = smov 33  }
  0x31   :  { %13235 = sst [smem:[#allocation22_spill]] %s11521_s4 }
  0x32   :  { %13236 = sst [smem:[#allocation23_spill]] %s11526_s9 }
  0x33   :  { %13237 = sst [smem:[#allocation24_spill]] %s11531_s25 }
  0x34   :  { %s11546_s9 = sld [smem:[%s13185_s0 + %s11352_s7]]   ;;  %s11356_s7 = smov 34  }
  0x35   :  { %13238 = sst [smem:[#allocation25_spill]] %s11536_s27 }
  0x36   :  { %13239 = sst [smem:[#allocation26_spill]] %s11541_s13 }
  0x37   :  { %s11551_s25 = sld [smem:[%s13185_s0 + %s11353_s15]]   ;;  %s11357_s15 = smov 35  }
  0x38   :  { %s11556_s27 = sld [smem:[%s13185_s0 + %s11354_s22]]   ;;  %s11358_s22 = smov 36  }
  0x39   :  { %s11561_s13 = sld [smem:[%s13185_s0 + %s11355_s28]]   ;;  %s11359_s28 = smov 37  }
  0x3a   :  { %13240 = sst [smem:[#allocation27_spill]] %s11546_s9 }
  0x3b   :  { %s11566_s9 = sld [smem:[%s13185_s0 + %s11356_s7]]   ;;  %s11360_s7 = smov 38  }
  0x3d   :  { %13241 = sst [smem:[#allocation28_spill]] %s11551_s25 }
  0x3e   :  { %13242 = sst [smem:[#allocation29_spill]] %s11556_s27 }
  0x3f   :  { %13243 = sst [smem:[#allocation30_spill]] %s11561_s13 }
  0x40   :  { %s11571_s25 = sld [smem:[%s13185_s0 + %s11357_s15]]   ;;  %s11361_s15 = smov 39  }
  0x41   :  { %13244 = sst [smem:[#allocation31_spill]] %s11566_s9 }
  0x42   :  { %s11576_s27 = sld [smem:[%s13185_s0 + %s11358_s22]]   ;;  %s11362_s22 = smov 40  }
  0x43   :  { %s11581_s13 = sld [smem:[%s13185_s0 + %s11359_s28]]   ;;  %s11363_s28 = smov 41  }
  0x44   :  { %s11586_s9 = sld [smem:[%s13185_s0 + %s11360_s7]]   ;;  %s11364_s7 = smov 42  }
  0x46   :  { %13245 = sst [smem:[#allocation32_spill]] %s11571_s25 }
  0x47   :  { %s11591_s25 = sld [smem:[%s13185_s0 + %s11361_s15]]   ;;  %s11365_s15 = smov 43  }
  0x48   :  { %13246 = sst [smem:[#allocation33_spill]] %s11576_s27 }
  0x49   :  { %13247 = sst [smem:[#allocation34_spill]] %s11581_s13 }
  0x4a   :  { %13248 = sst [smem:[#allocation35_spill]] %s11586_s9 }
  0x4b   :  { %s11596_s27 = sld [smem:[%s13185_s0 + %s11362_s22]]   ;;  %s11366_s22 = smov 44  }
  0x4c   :  { %s11601_s13 = sld [smem:[%s13185_s0 + %s11363_s28]]   ;;  %s11367_s28 = smov 45  }
  0x4d   :  { %13249 = sst [smem:[#allocation36_spill]] %s11591_s25 }
  0x4e   :  { %s11606_s9 = sld [smem:[%s13185_s0 + %s11364_s7]]   ;;  %s11368_s7 = smov 46  }
  0x4f   :  { %s11611_s25 = sld [smem:[%s13185_s0 + %s11365_s15]]   ;;  %s11369_s15 = smov 47  }
  0x51   :  { %13250 = sst [smem:[#allocation37_spill]] %s11596_s27 }
  0x52   :  { %13251 = sst [smem:[#allocation38_spill]] %s11601_s13 }
  0x53   :  { %s11616_s27 = sld [smem:[%s13185_s0 + %s11366_s22]]   ;;  %s11370_s22 = smov 48  }
  0x54   :  { %13252 = sst [smem:[#allocation39_spill]] %s11606_s9 }
  0x55   :  { %13253 = sst [smem:[#allocation40_spill]] %s11611_s25 }
  0x56   :  { %s11621_s13 = sld [smem:[%s13185_s0 + %s11367_s28]]  }
  0x57   :  { %s11626_s9 = sld [smem:[%s13185_s0 + %s11368_s7]]  }
  0x58   :  { %s11631_s25 = sld [smem:[%s13185_s0 + %s11369_s15]]  }
  0x59   :  { %13254 = sst [smem:[#allocation41_spill]] %s11616_s27 }
  0x5a   :  { %s11636_s27 = sld [smem:[%s13185_s0 + %s11370_s22]]  }
  0x5d   :  { %13255 = sst [smem:[#allocation42_spill]] %s11626_s9 }
  0x5e   :  { %102 = vsyncpa [#allocation3], 0 }
  0x5f   :  { %104 = vsyncpa [#allocation3 + $0x1], 0  ;;  %s11638_s28 = smov 0   ;;  %s11640_s1 = smov 0  }
  0x60   :  { %s11642_s2 = smov 0   ;;  %s11644_s7 = smov 0  }
  0x61 LB: > { %s13256_s9 = sld [smem:[#allocation42_spill]]  ;;  %s13257_s6 = sld [smem:[#allocation11_spill]]  ;;  %s11313_s1 = sphi %s11640_s1, %s13301_s1   ;;  %s11309_s28 = sphi %s11638_s28, %s13300_s28   ;;  %s11321_s7 = sphi %s11644_s7, %s13303_s7   ;;  %s11317_s2 = sphi %s11642_s2, %s13302_s2  }
  0x62   : > { %s11659_s0 = sadd.s32 4294967295, %s11321_s7   ;;  %s9490_s10 = sadd.s32 4294967294, %s11321_s7  }
  0x63   : > { %s11663_s11 = sadd.s32 1, %s11321_s7   ;;  %s1140_s15 = sadd.s32 1, %s11317_s2 }
  0x64   : > { %s1137_s16 = ssub.s32 %s11321_s7, %s11663_s11  ;;  %p1150_p0 = scmp.ne.s32.totalorder %s11317_s2, %s11313_s1 }
  0x65   : > { %p1138_p1 = scmp.eq.s32.totalorder %s1137_s16, 0  ;;  %p1151_p2 = scmp.eq.s32.totalorder %s11659_s0, 1 }
  0x66   : > { %p1156_p3 = scmp.ne.s32.totalorder %s11313_s1, %s11309_s28  ;;  %p1157_p4 = scmp.eq.s32.totalorder %s9490_s10, 1 }
  0x67   : > { %s11674_s18 = scalar_select %p1138_p1, %s11317_s2, %s1140_s15  }
  0x68   : > { %p11676_p5 = por %p1151_p2, %p1150_p0  ;;  %p11680_p6 = por %p1157_p4, %p1156_p3 }
  0x69   : > { %p9493_p7 = scmp.ge.s32.totalorder %s11321_s7, 1  ;;  %p1332_p8 = scmp.lt.s32.totalorder %s11321_s7, 3 }
  0x6b   : > { %p1333_p9 = pnand %p9493_p7, %p1332_p8 }
  0x6c   : > { %s13260_s8 = sld [smem:[#allocation10_spill]] (!%p1333_p9)  ;;  %s13261_s5 = sld [smem:[#allocation5_spill]] (!%p1333_p9)  ;;  %v1474_v0 = vld [vmem:[%s11426_s29] sm:$0x3] (!%p1333_p9)  ;;  %vm1484_vm0 = vcmask (!%p1333_p9), 1040384   ;;  %vm1485_vm1 = vcmask (!%p1333_p9), 1041408  }
  0x6d   : > { %1336 = sbr.rel (%p1333_p9) target bundleno = 18075 (0x469b), region = 212  ;;  %p1453_p10 = scmp.lt.s32.totalorder (!%p1333_p9), %s11659_s0, 1  ;;  %v11371_v1 = vmov (!%p1333_p9), 65535   ;;  %vm1477_vm2 = vcmask (!%p1333_p9), 23552   ;;  %v11373_v12 = vmov (!%p1333_p9), 0.0   ;;  %vm11374_vm3 = vmmov (!%p1333_p9), 0  }
  0x6e   : > { %v1486_v2 = vsel (!%p1333_p9), %vm1484_vm0, 4294967295, %v11371_v1  ;;  %s11372_s10 = smov (!%p1333_p9), 32   ;;  %s13262_s3 = sld [smem:[#allocation9_spill]] (!%p1333_p9)  ;;  %10055 = vmatprep.subr.bf16.mxu1 (!%p1333_p9), %v11373_v12  ;;  %10057 = vmatprep.mubr.msk.bf16.mxu1 (!%p1333_p9), %vm11374_vm3, %v11373_v12  ;;  %v1540_v19 = vld [vmem:[%s11411_s17] sm:$0xf] (!%p1333_p9)  ;;  %vm1543_vm4 = vcmask (!%p1333_p9), 31744  }
  0x6f   : > { %v1487_v4 = vsel (!%p1333_p9), %vm1485_vm1, %v1486_v2, 0  ;;  %v11717_v26 = vpack.c.bf16 (!%p1333_p9), %v1540_v19, %v1540_v19  ;;  %v10962_v33 = vld [vmem:[%s11441_s14] sm:$0xff] (!%p1333_p9)   ;;  %v10963_v34 = vld [vmem:[%s11441_s14 + $0x8] sm:$0xff] (!%p1333_p9)   ;;  %p1467_p11 = scmp.eq.s32.totalorder (!%p1333_p9), %s11659_s0, 0  ;;  %vm1593_vm5 = vcmask (!%p1333_p9), 1043456   ;;  %vm1703_vm6 = vcmask (!%p1333_p9), 261120  }
  0x70   : > { %v1489_v5 = vand.u32 (!%p1333_p9), %v1487_v4, %v1474_v0  ;;  %v1610_v35 = vld [vmem:[%s11416_s21] sm:$0xf] (!%p1333_p9)  ;;  %v10965_v53 = vld [vmem:[%s11451_s24 + $0x8] sm:$0xff] (!%p1333_p9)   ;;  %s13264_s12 = sld [smem:[#allocation12_spill]] (!%p1333_p9)  ;;  %vm6930_vm7 = vcmask (!%p1333_p9), 257024   ;;  %vm2073_vm8 = vcmask (!%p1333_p9), 64512  }
  0x71   : > { %v11725_v38 = vpack.c.bf16 (!%p1333_p9), %v1610_v35, %v1610_v35  ;;  %v10964_v52 = vld [vmem:[%s11451_s24] sm:$0xff] (!%p1333_p9)   ;;  %vm7152_vm9 = vcmask (!%p1333_p9), 1041409   ;;  %vm7154_vm10 = vcmask (!%p1333_p9), 1042434   ;;  %vm7156_vm11 = vcmask (!%p1333_p9), 1043459   ;;  %s13265_s4 = sld [smem:[#allocation22_spill]] (!%p1333_p9) }
  0x72   : > { %v9503_v3 = vld [vmem:[%s13260_s8] ss:$0 sm:$0xff] (!%p1333_p9)  ;;  %10049 = vmatprep.subr.bf16.mxu0 (!%p1333_p9), %v1489_v5  ;;  %vm7158_vm12 = vcmask (!%p1333_p9), 1044484   ;;  %vm7160_vm13 = vcmask (!%p1333_p9), 1045509   ;;  %vm7162_vm14 = vcmask (!%p1333_p9), 1046534   ;;  %vm7164_vm15 = vcmask (!%p1333_p9), 1047559  }
  0x73   : > { %1674 = vrot.lane.b32.xlu1 (!%p1333_p9), %v9503_v3, %s11372_s10  ;;  %10050 = vmatpush3.bf16.msra.mxu0 (!%p1333_p9), %v1489_v5  ;;  %s13278_s8 = sld [smem:[#allocation17_spill]] (!%p1333_p9) }
  0x74   : > { %s11692_s26 = scalar_select %p1453_p10, %s11659_s0, 1  ;;  %10061 = vmatprep.subr.bf16.mxu0 %v11373_v12  ;;  %v9501_v14 = vld [vmem:[%s13262_s3] ss:$0 sm:$0xff] }
  0x75   : > { %s11378_s3 = smov 120  }
  0x76   : > { %s9760_s15 = sshll.u32 %s11692_s26, 5 }
  0x77   : > { %s1457_s16 = scalar_lea.vmem %s13261_s5, %s9760_s15  ;;  %s13199_s15 = smov 96  }
  0x78   : > { %v1470_v6 = vld [vmem:[%s1457_s16] sm:$0xff]  ;;  %v1471_v7 = vld [vmem:[%s1457_s16 + $0x8] sm:$0xff]  ;;  %v1472_v9 = vld [vmem:[%s1457_s16 + $0x10] sm:$0xff] }
  0x79   : > { %v1475_v8 = vpack.c.bf16 %v1471_v7, %v1470_v6  ;;  %v1473_v10 = vld [vmem:[%s1457_s16 + $0x18] sm:$0xff]  ;;  %s1468_s16 = scalar_select %p1467_p11, 1, 0 }
  0x7a   : > { %v1476_v11 = vpack.c.bf16 %v1473_v10, %v1472_v9  ;;  %v10966_v9 = vld [vmem:[%s13257_s6] sm:$0xff]  }
  0x7b   : > { %10051 = vmatprep.mubr.msk.bf16.mxu0 %vm1477_vm2, %v1475_v8 }
  0x7c   : > { %10052 = vmatmul.mubr.msk.bf16.vlgmr.msra.gmra.mrb[0].mxu0 %vm1477_vm2, %v1476_v11  ;;  %v10967_v11 = vld [vmem:[%s13257_s6 + $0x8] sm:$0xff]   ;;  %vm2471_vm2 = vcmask 27648  }
  0x7d   : > { %10063 = vmatprep.mubr.msk.bf16.mxu0 %vm11374_vm3, %v11373_v12 }
  0xe5   : > { %v11703_v13 = vpop.permute.xlu1 %1674 }
 0x14f   : > { %v10053_v15 = vpop.f32.mrb[0].mxu0 }
 0x150   : > { %v1604_v16 = vadd.f32 %v10053_v15, %v9501_v14  ;;  %v1679_v17 = vadd.f32 %v10053_v15, %v11703_v13  ;;  %v11707_v18 = vpop.f32.mrb[1].mxu0 }
 0x151   : > { %v10054_v20 = vpop.f32.mrb[2].mxu0  ;;  %v1542_v21 = vpack.c.bf16 %v11707_v18, %v11707_v18 }
 0x152   : > { %v1605_v22 = vadd.f32 %v10054_v20, %v9501_v14  ;;  %v1680_v23 = vadd.f32 %v10054_v20, %v11703_v13  ;;  %v11713_v24 = vpop.f32.mrb[3].mxu0  ;;  %v1608_v27 = vmax.f32 %v1604_v16, 0.0  ;;  %v1683_v28 = vmax.f32 %v1679_v17, 0.0  ;;  %v9509_v17 = vld [vmem:[%s11446_s19] ss:$0 sm:$0xff] }
 0x153   : > { %1613 = vrot.lane.b32.xlu0 %v1542_v21, %s13199_s15  ;;  %v1548_v25 = vsel %vm1485_vm1, %v1542_v21, 0  ;;  %s1469_s15 = scvt.s32.f32 %s1468_s16  ;;  %v1603_v46 = vadd.f32 %v9501_v14, %v11713_v24  ;;  %v1678_v3 = vadd.f32 %v11703_v13, %v11713_v24  ;;  %s11377_s16 = smov 88  }
 0x154   : > { %v1609_v29 = vmax.f32 %v1605_v22, 0.0  ;;  %v1684_v30 = vmax.f32 %v1680_v23, 0.0  ;;  %10056 = vmatpush3.bf16.msra.mxu1 %v1548_v25 }
 0x155   : > { %10067 = vmatprep.subr.bf16.mxu1 %v10962_v33  ;;  %v11733_v39 = vstv %s1469_s15  ;;  %v1607_v49 = vmax.f32 %v1603_v46, 0.0  ;;  %s13263_s15 = smov 96   ;;  %v1682_v6 = vmax.f32 %v1678_v3, 0.0 }
 0x156   : > { %v1690_v31 = vpack.c.bf16 %v1609_v29, %v1608_v27  ;;  %v1826_v32 = vpack.c.bf16 %v1684_v30, %v1683_v28 }
 0x157   : > { %10058 = vmatmul.mubr.msk.bf16.vlgmr.msra.gmra.mrb[0].mxu1 %vm1543_vm4, %v11717_v26 }
 0x158   : > { %10068 = vmatpush3.bf16.msra.mxu1 %v10962_v33 }
 0x159   : > { %10069 = vmatprep.subr.bf16.mxu1 %v10963_v34 }
 0x15c   : > { %10070 = vmatpush3.bf16.msra.mxu1 %v10963_v34 }
 0x15d   : > { %10081 = vmatprep.subr.bf16.mxu1 %v10964_v52 }
 0x1c5   : > { %v1614_v36 = vpop.permute.xlu0 %1613 }
 0x1c6   : > { %v1619_v37 = vsel %vm1485_vm1, %v1614_v36, 0 }
 0x1c7   : > { %10062 = vmatpush3.bf16.msra.mxu0 %v1619_v37 }
 0x1c8   : > { %10075 = vmatprep.subr.bf16.mxu0 %v11373_v12 }
 0x1ca   : > { %10064 = vmatmul.mubr.msk.bf16.vlgmr.msra.gmra.mrb[4].mxu0 %vm1543_vm4, %v11725_v38 }
 0x1cb   : > { %10077 = vmatprep.mubr.msk.bf16.mxu0 %vm11374_vm3, %v11373_v12 }
 0x22a   : > { %v1584_v40 = vpop.f32.mrb[0].mxu1 }
 0x22b   : > { %v1591_v41 = vmul.f32 %v11733_v39, %v1584_v40  ;;  %v10059_v42 = vpop.f32.mrb[1].mxu1  ;;  %v9516_v40 = vld [vmem:[%s13264_s12] ss:$0 sm:$0xff] }
 0x22c   : > { %v1587_v43 = vpop.f32.mrb[2].mxu1 }
 0x22d   : > { %v1592_v44 = vadd.f32 %v1591_v41, %v11707_v18  ;;  %v10060_v45 = vpop.f32.mrb[3].mxu1 }
 0x22f   : > { %v1594_v47 = vsel %vm1593_vm5, %v1592_v44, %v11707_v18 }
 0x230   : > { %v1602_v48 = vadd.f32 %v9501_v14, %v1594_v47 }
 0x232   : > { %v1606_v50 = vmax.f32 %v1602_v48, 0.0 }
 0x234   : > { %v1689_v51 = vpack.c.bf16 %v1607_v49, %v1606_v50 }
 0x236   : > { %10071 = vmatprep.mubr.msk.bf16.mxu1 %vm1703_vm6, %v1689_v51 }
 0x237   : > { %10072 = vmatmul.mubr.msk.bf16.vlgmr.msra.gmra.mrb[4].mxu1 %vm1703_vm6, %v1690_v31 }
 0x238   : > { %10082 = vmatpush3.bf16.msra.mxu1 %v10964_v52 }
 0x239   : > { %10083 = vmatprep.subr.bf16.mxu1 %v10965_v53 }
 0x23c   : > { %10084 = vmatpush3.bf16.msra.mxu1 %v10965_v53 }
 0x23d   : > { %10095 = vmatprep.subr.bf16.mxu1 %v10966_v9 }
 0x29d   : > { %v1655_v54 = vpop.f32.mrb[4].mxu0 }
 0x29e   : > { %v1661_v55 = vmul.f32 %v1655_v54, %v11733_v39  ;;  %v10065_v56 = vpop.f32.mrb[5].mxu0 }
 0x29f   : > { %v1658_v57 = vpop.f32.mrb[6].mxu0 }
 0x2a0   : > { %1663 = vrot.lane.b32.xlu0 %v1661_v55, %s11372_s10  ;;  %v10066_v58 = vpop.f32.mrb[7].mxu0  ;;  %s13201_s10 = smov 64  }
 0x2a4   : > { %1831 = vrot.lane.b32.xlu0 %v1826_v32, %s13263_s15 }
 0x30a   : > { %v10073_v59 = vpop.f32.mrb[4].mxu1 }
 0x30b   : > { %v1744_v60 = vpop.f32.mrb[5].mxu1  ;;  %v11771_v23 = vadd.f32 %v10073_v59, %v9509_v17 }
 0x30c   : > { %v1759_v61 = vpack.c.bf16 %v1744_v60, %v1744_v60  ;;  %v10074_v62 = vpop.f32.mrb[6].mxu1 }
 0x30d   : > { %v1747_v63 = vpop.f32.mrb[7].mxu1  ;;  %v11767_v19 = vadd.f32 %v10074_v62, %v9509_v17  ;;  %v1819_v29 = vmax.f32 %v11771_v23, 0.0 }
 0x30e   : > { %v1761_v0 = vsel %vm1485_vm1, %v1759_v61, 0  ;;  %v11769_v22 = vadd.f32 %v9509_v17, %v1747_v63 }
 0x30f   : > { %10076 = vmatpush3.bf16.msra.mxu0 %v1761_v0 }
 0x310   : > { %10089 = vmatprep.subr.bf16.mxu0 %v11373_v12  ;;  %v1818_v27 = vmax.f32 %v11769_v22, 0.0 }
 0x312   : > { %v1664_v1 = vpop.permute.xlu0 %1663  ;;  %10078 = vmatmul.mubr.msk.bf16.vlgmr.msra.gmra.mrb[8].mxu0 %vm1543_vm4, %v11717_v26  ;;  %v1820_v26 = vmax.f32 %v11767_v19, 0.0 }
 0x313   : > { %v1666_v2 = vadd.f32 %v1664_v1, %v11707_v18  ;;  %10091 = vmatprep.mubr.msk.bf16.mxu0 %vm11374_vm3, %v11373_v12 }
 0x314   : > { %v1967_v31 = vpack.c.bf16 %v1820_v26, %v1819_v29 }
 0x315   : > { %v1667_v4 = vsel %vm1593_vm5, %v1666_v2, %v11707_v18 }
 0x316   : > { %v1677_v5 = vadd.f32 %v11703_v13, %v1667_v4  ;;  %v1832_v14 = vpop.permute.xlu0 %1831 }
 0x318   : > { %v1681_v7 = vmax.f32 %v1677_v5, 0.0 }
 0x31a   : > { %v1825_v8 = vpack.c.bf16 %v1682_v6, %v1681_v7 }
 0x31c   : > { %1829 = vrot.lane.b32.xlu1 %v1825_v8, %s13263_s15 }
 0x38e   : > { %v1830_v10 = vpop.permute.xlu1 %1829 }
 0x38f   : > { %10085 = vmatprep.mubr.msk.bf16.mxu1 %vm1703_vm6, %v1830_v10 }
 0x390   : > { %10086 = vmatmul.mubr.msk.bf16.vlgmr.msra.gmra.mrb[8].mxu1 %vm1703_vm6, %v1832_v14 }
 0x391   : > { %10096 = vmatpush3.bf16.msra.mxu1 %v10966_v9 }
 0x392   : > { %10097 = vmatprep.subr.bf16.mxu1 %v10967_v11 }
 0x395   : > { %10098 = vmatpush3.bf16.msra.mxu1 %v10967_v11 }
 0x396   : > { %10109 = vmatprep.subr.bf16.mxu1 %v11373_v12 }
 0x3e5   : > { %v1797_v13 = vpop.f32.mrb[8].mxu0 }
 0x3e6   : > { %v1803_v15 = vmul.f32 %v1797_v13, %v11733_v39  ;;  %v10079_v16 = vpop.f32.mrb[9].mxu0 }
 0x3e7   : > { %v1800_v18 = vpop.f32.mrb[10].mxu0 }
 0x3e8   : > { %v1804_v20 = vadd.f32 %v1803_v15, %v1744_v60  ;;  %v10080_v21 = vpop.f32.mrb[11].mxu0 }
 0x3ea   : > { %v1805_v24 = vsel %vm1593_vm5, %v1804_v20, %v1744_v60  ;;  %v9515_v60 = vld [vmem:[%s11456_s30] ss:$0 sm:$0xff] }
 0x3eb   : > { %v11774_v25 = vadd.f32 %v9509_v17, %v1805_v24 }
 0x3ed   : > { %v1817_v28 = vmax.f32 %v11774_v25, 0.0 }
 0x3ef   : > { %v1966_v30 = vpack.c.bf16 %v1818_v27, %v1817_v28 }
 0x3f1   : > { %10099 = vmatprep.mubr.msk.bf16.mxu1 %vm1703_vm6, %v1966_v30 }
 0x3f2   : > { %10100 = vmatmul.mubr.msk.bf16.vlgmr.msra.gmra.mrb[12].mxu1 %vm1703_vm6, %v1967_v31 }
 0x3f3   : > { %10111 = vmatprep.mubr.msk.bf16.mxu1 %vm11374_vm3, %v11373_v12 }
 0x463   : > { %v10087_v32 = vpop.f32.mrb[8].mxu1 }
 0x464   : > { %v11792_v33 = vpop.f32.mrb[9].mxu1  ;;  %v1956_v62 = vadd.f32 %v10087_v32, %v9515_v60 }
 0x465   : > { %v1900_v34 = vpack.c.bf16 %v11792_v33, %v11792_v33  ;;  %v10088_v35 = vpop.f32.mrb[10].mxu1 }
 0x466   : > { %v1888_v36 = vpop.f32.mrb[11].mxu1  ;;  %v1957_v63 = vadd.f32 %v10088_v35, %v9515_v60  ;;  %v1960_v1 = vmax.f32 %v1956_v62, 0.0 }
 0x467   : > { %v1902_v37 = vsel %vm1485_vm1, %v1900_v34, 0  ;;  %v1955_v61 = vadd.f32 %v9515_v60, %v1888_v36 }
 0x468   : > { %10090 = vmatpush3.bf16.msra.mxu0 %v1902_v37  ;;  %v1961_v2 = vmax.f32 %v1957_v63, 0.0  ;;  %v6924_v4 = vcombine.high %v1960_v1, %v1960_v1  ;;  %v6959_v8 = vsel %vm6930_vm7, %v1960_v1, 0.0 }
 0x469   : > { %10103 = vmatprep.subr.bf16.mxu0 %v11373_v12  ;;  %v1959_v0 = vmax.f32 %v1955_v61, 0.0  ;;  %v6960_v15 = vrot.slane %v6959_v8, 4 }
 0x46a   : > { %v6925_v6 = vcombine.high %v1961_v2, %v1961_v2  ;;  %v6966_v9 = vsel %vm6930_vm7, %v6924_v4, 0.0  ;;  %v6973_v10 = vsel %vm6930_vm7, %v1961_v2, 0.0 }
 0x46b   : > { %10092 = vmatmul.mubr.msk.bf16.vlgmr.msra.gmra.mrb[12].mxu0 %vm1543_vm4, %v11725_v38  ;;  %v6923_v3 = vcombine.high %v1959_v0, %v1959_v0  ;;  %v6945_v5 = vsel %vm6930_vm7, %v1959_v0, 0.0  ;;  %v6967_v20 = vrot.slane %v6966_v9, 4  ;;  %v6974_v21 = vrot.slane %v6973_v10, 4 }
 0x46c   : > { %10105 = vmatprep.mubr.msk.bf16.mxu0 %vm11374_vm3, %v11373_v12  ;;  %v6946_v11 = vrot.slane %v6945_v5, 4  ;;  %v6980_v16 = vsel %vm6930_vm7, %v6925_v6, 0.0 }
 0x46d   : > { %v6952_v7 = vsel %vm6930_vm7, %v6923_v3, 0.0  ;;  %v6981_v36 = vrot.slane %v6980_v16, 4 }
 0x46e   : > { %v6953_v14 = vrot.slane %v6952_v7, 4  ;;  %v6947_v32 = vadd.f32 %v6946_v11, %v6945_v5 }
 0x470   : > { %v6954_v37 = vadd.f32 %v6953_v14, %v6952_v7 }
 0x4c5   : > { %v10101_v41 = vpop.f32.mrb[12].mxu1 }
 0x4c6   : > { %v2027_v42 = vpop.f32.mrb[13].mxu1  ;;  %v2036_v49 = vadd.f32 %v10101_v41, %v9516_v40 }
 0x4c7   : > { %v2028_v43 = vadd.f32 %v9516_v40, %v2027_v42  ;;  %v10102_v44 = vpop.f32.mrb[14].mxu1  ;;  %v6961_v42 = vadd.f32 %v6960_v15, %v6959_v8 }
 0x4c8   : > { %v2030_v45 = vpop.f32.mrb[15].mxu1  ;;  %v2048_v52 = vcombine.high %v2036_v49, %v2036_v49  ;;  %v2039_v53 = vadd.f32 %v10102_v44, %v9516_v40  ;;  %v11817_v55 = vpack.c.bf16 %v2036_v49, %v2036_v49  ;;  %v6975_v44 = vadd.f32 %v6974_v21, %v6973_v10 }
 0x4c9   : > { %v2046_v46 = vcombine.high %v2028_v43, %v2028_v43  ;;  %v11803_v47 = vpack.c.bf16 %v2028_v43, %v2028_v43  ;;  %v2031_v48 = vadd.f32 %v9516_v40, %v2030_v45  ;;  %v6968_v43 = vadd.f32 %v6967_v20, %v6966_v9 }
 0x4ca   : > { %v11821_v56 = vpack.c.bf16 %v2048_v52, %v2048_v52  ;;  %v2049_v57 = vcombine.high %v2039_v53, %v2039_v53  ;;  %v11825_v58 = vpack.c.bf16 %v2039_v53, %v2039_v53  ;;  %v6955_v52 = vrot.slane %v6954_v37, 2 }
 0x4cb   : > { %v11805_v50 = vpack.c.bf16 %v2046_v46, %v2046_v46  ;;  %v2047_v51 = vcombine.high %v2031_v48, %v2031_v48  ;;  %2071 = vrot.lane.b32.xlu1 %v11803_v47, %s13263_s15  ;;  %v11809_v38 = vpack.c.bf16 %v2031_v48, %v2031_v48  ;;  %v6948_v48 = vrot.slane %v6947_v32, 2 }
 0x4cc   : > { %v11829_v59 = vpack.c.bf16 %v2049_v57, %v2049_v57  ;;  %v6962_v57 = vrot.slane %v6961_v42, 2  ;;  %v6969_v63 = vrot.slane %v6968_v43, 2  ;;  %v6976_v0 = vrot.slane %v6975_v44, 2 }
 0x4cd   : > { %2121 = vrot.lane.b32.xlu0 %v11805_v50, %s13263_s15  ;;  %v11813_v54 = vpack.c.bf16 %v2047_v51, %v2047_v51  ;;  %v6982_v51 = vadd.f32 %v6981_v36, %v6980_v16  ;;  %v6956_v4 = vadd.f32 %v6955_v52, %v6954_v37 }
 0x4ce   : > { %v6963_v6 = vadd.f32 %v6962_v57, %v6961_v42  ;;  %v6970_v8 = vadd.f32 %v6969_v63, %v6968_v43  ;;  %v6977_v14 = vadd.f32 %v6976_v0, %v6975_v44 }
 0x4cf   : > { %2170 = vrot.lane.b32.xlu1 %v11809_v38, %s13263_s15  ;;  %v6983_v3 = vrot.slane %v6982_v51, 2  ;;  %v6957_v16 = vrot.slane %v6956_v4, 1 }
 0x4d0   : > { %v6964_v21 = vrot.slane %v6963_v6, 1 }
 0x4d1   : > { %2219 = vrot.lane.b32.xlu0 %v11813_v54, %s13263_s15  ;;  %v6984_v15 = vadd.f32 %v6983_v3, %v6982_v51 }
 0x4d2   : > { %v6965_v43 = vadd.f32 %v6964_v21, %v6963_v6 }
 0x4d3   : > { %2268 = vrot.lane.b32.xlu1 %v11817_v55, %s13263_s15  ;;  %v6985_v37 = vrot.slane %v6984_v15, 1 }
 0x4d4   : > { %v6991_v63 = vmul.f32 0.25, %v6965_v43 }
 0x4d5   : > { %2317 = vrot.lane.b32.xlu0 %v11821_v56, %s13263_s15  ;;  %v6986_v52 = vadd.f32 %v6985_v37, %v6984_v15 }
 0x4d7   : > { %2366 = vrot.lane.b32.xlu1 %v11825_v58, %s13263_s15 }
 0x4d9   : > { %2415 = vrot.lane.b32.xlu0 %v11829_v59, %s13263_s15 }
 0x4db   : > { %2616 = vrot.lane.b32.xlu1 %v11805_v50, %s13201_s10 }
 0x4dd   : > { %2568 = vrot.lane.b32.xlu0 %v11803_v47, %s13201_s10 }
 0x53d   : > { %v2072_v13 = vpop.permute.xlu1 %2071 }
 0x53e   : > { %v2078_v17 = vsel %vm2073_vm8, %v2072_v13, 0  ;;  %v1938_v18 = vpop.f32.mrb[12].mxu0 }
 0x53f   : > { %v1944_v24 = vmul.f32 %v1938_v18, %v11733_v39  ;;  %10104 = vmatpush3.bf16.xpose.msra.mxu0 %v2078_v17  ;;  %v2122_v30 = vpop.permute.xlu0 %2121  ;;  %v10093_v31 = vpop.f32.mrb[13].mxu0 }
 0x540   : > { %v2127_v34 = vsel %vm2073_vm8, %v2122_v30, 0  ;;  %10115 = vmatprep.subr.bf16.mxu0 %v11373_v12  ;;  %v1941_v35 = vpop.f32.mrb[14].mxu0  ;;  %v6971_v30 = vrot.slane %v6970_v8, 1 }
 0x541   : > { %v1945_v40 = vadd.f32 %v1944_v24, %v11792_v33  ;;  %10110 = vmatpush3.bf16.xpose.msra.mxu1 %v2127_v34  ;;  %v10094_v41 = vpop.f32.mrb[15].mxu0  ;;  %v2171_v46 = vpop.permute.xlu1 %2170  ;;  %v6978_v34 = vrot.slane %v6977_v14, 1 }
 0x542   : > { %10121 = vmatprep.subr.bf16.mxu1 %v11373_v12  ;;  %v2176_v62 = vsel %vm2073_vm8, %v2171_v46, 0  ;;  %v6972_v44 = vadd.f32 %v6971_v30, %v6970_v8  ;;  %v7132_v8 = vpack.c.bf16 %v6991_v63, %v6991_v63 }
 0x543   : > { %v1946_v45 = vsel %vm1593_vm5, %v1945_v40, %v11792_v33  ;;  %v2220_v53 = vpop.permute.xlu0 %2219  ;;  %v6949_v33 = vadd.f32 %v6948_v48, %v6947_v32  ;;  %v6958_v40 = vadd.f32 %v6957_v16, %v6956_v4 }
 0x544   : > { %v1954_v49 = vadd.f32 %v9515_v60, %v1946_v45  ;;  %v2225_v2 = vsel %vm2073_vm8, %v2220_v53, 0  ;;  %v7148_v21 = vunpack.c.l.b16 %v7132_v8 }
 0x545   : > { %v2269_v11 = vpop.permute.xlu1 %2268  ;;  %v6950_v13 = vrot.slane %v6949_v33, 1  ;;  %v6990_v53 = vmul.f32 0.25, %v6958_v40 }
 0x546   : > { %v1958_v61 = vmax.f32 %v1954_v49, 0.0  ;;  %10106 = vmatmul.mubr.msk.bf16.vlgmr.msra.gmra.mrb[16].mxu0 %vm2073_vm8, %v11803_v47  ;;  %v2274_v24 = vsel %vm2073_vm8, %v2269_v11, 0  ;;  %v6979_v49 = vadd.f32 %v6978_v34, %v6977_v14 }
 0x547   : > { %10116 = vmatpush3.bf16.xpose.msra.mxu0 %v2176_v62  ;;  %10117 = vmatprep.mubr.msk.bf16.mxu0 %vm11374_vm3, %v11373_v12  ;;  %v2318_v20 = vpop.permute.xlu0 %2317  ;;  %v6951_v35 = vadd.f32 %v6950_v13, %v6949_v33  ;;  %v6992_v33 = vmul.f32 0.25, %v6972_v44  ;;  %v7131_v6 = vpack.c.bf16 %v6990_v53, %v6990_v53 }
 0x548   : > { %v6922_v1 = vcombine.high %v1958_v61, %v1958_v61  ;;  %v6931_v60 = vsel %vm6930_vm7, %v1958_v61, 0.0  ;;  %10112 = vmatmul.mubr.msk.bf16.vlgmr.msra.gmra.mrb[16].mxu1 %vm2073_vm8, %v11805_v50  ;;  %10127 = vmatprep.subr.bf16.mxu0 %v11373_v12  ;;  %v2323_v36 = vsel %vm2073_vm8, %v2318_v20, 0 }
 0x549   : > { %v6932_v5 = vrot.slane %v6931_v60, 4  ;;  %10122 = vmatpush3.bf16.xpose.msra.mxu1 %v2225_v2  ;;  %10123 = vmatprep.mubr.msk.bf16.mxu1 %vm11374_vm3, %v11373_v12  ;;  %v2367_v48 = vpop.permute.xlu1 %2366  ;;  %v6989_v51 = vmul.f32 0.25, %v6951_v35  ;;  %v6993_v2 = vmul.f32 0.25, %v6979_v49 }
 0x54a   : > { %v6938_v7 = vsel %vm6930_vm7, %v6922_v1, 0.0  ;;  %10133 = vmatprep.subr.bf16.mxu1 %v11373_v12  ;;  %v2372_v0 = vsel %vm2073_vm8, %v2367_v48, 0  ;;  %vm6313_vm7 = vcmask 1042432  }
 0x54b   : > { %v6933_v9 = vadd.f32 %v6932_v5, %v6931_v60  ;;  %v6939_v10 = vrot.slane %v6938_v7, 4  ;;  %v2416_v62 = vpop.permute.xlu0 %2415  ;;  %v7130_v3 = vpack.c.bf16 %v6989_v51, %v6989_v51  ;;  %v6994_v5 = vmul.f32 0.25, %v6986_v52 }
 0x54c   : > { %v2421_v4 = vsel %vm2073_vm8, %v2416_v62, 0  ;;  %v7134_v13 = vpack.c.bf16 %v6993_v2, %v6993_v2 }
 0x54d   : > { %v6934_v17 = vrot.slane %v6933_v9, 2  ;;  %v6940_v18 = vadd.f32 %v6939_v10, %v6938_v7  ;;  %v7146_v15 = vunpack.c.l.b16 %v7130_v3  ;;  %v7135_v16 = vpack.c.bf16 %v6994_v5, %v6994_v5  ;;  %v2617_v20 = vpop.permute.xlu1 %2616 }
 0x54e   : > { %10118 = vmatmul.mubr.msk.bf16.vlgmr.msra.gmra.mrb[20].mxu0 %vm2073_vm8, %v11809_v38  ;;  %v7150_v34 = vunpack.c.l.b16 %v7134_v13  ;;  %v2622_v35 = vsel %vm1485_vm1, %v2617_v20, 0 }
 0x54f   : > { %v6935_v31 = vadd.f32 %v6934_v17, %v6933_v9  ;;  %v6941_v32 = vrot.slane %v6940_v18, 2  ;;  %10128 = vmatpush3.bf16.xpose.msra.mxu0 %v2274_v24  ;;  %10129 = vmatprep.mubr.msk.bf16.mxu0 %vm11374_vm3, %v11373_v12  ;;  %v7133_v9 = vpack.c.bf16 %v6992_v33, %v6992_v33  ;;  %v2569_v14 = vpop.permute.xlu0 %2568  ;;  %v7147_v17 = vunpack.c.l.b16 %v7131_v6 }
 0x550   : > { %10124 = vmatmul.mubr.msk.bf16.vlgmr.msra.gmra.mrb[20].mxu1 %vm2073_vm8, %v11813_v54  ;;  %10139 = vmatprep.subr.bf16.mxu0 %v11373_v12  ;;  %v2574_v24 = vsel %vm1485_vm1, %v2569_v14, 0  ;;  %v7151_v37 = vunpack.c.l.b16 %v7135_v16 }
 0x551   : > { %v6936_v41 = vrot.slane %v6935_v31, 1  ;;  %v6942_v42 = vadd.f32 %v6941_v32, %v6940_v18  ;;  %10134 = vmatpush3.bf16.xpose.msra.mxu1 %v2323_v36  ;;  %10135 = vmatprep.mubr.msk.bf16.mxu1 %vm11374_vm3, %v11373_v12 }
 0x552   : > { %10145 = vmatprep.subr.bf16.mxu1 %v11373_v12 }
 0x553   : > { %v6937_v45 = vadd.f32 %v6936_v41, %v6935_v31  ;;  %v6943_v46 = vrot.slane %v6942_v42, 1  ;;  %v7149_v31 = vunpack.c.l.b16 %v7133_v9 }
 0x555   : > { %v6944_v57 = vadd.f32 %v6943_v46, %v6942_v42  ;;  %v6987_v61 = vmul.f32 0.25, %v6937_v45 }
 0x556   : > { %10130 = vmatmul.mubr.msk.bf16.vlgmr.msra.gmra.mrb[24].mxu0 %vm2073_vm8, %v11817_v55 }
 0x557   : > { %v6988_v1 = vmul.f32 0.25, %v6944_v57  ;;  %v7128_v60 = vpack.c.bf16 %v6987_v61, %v6987_v61  ;;  %10140 = vmatpush3.bf16.xpose.msra.mxu0 %v2372_v0  ;;  %10141 = vmatprep.mubr.msk.bf16.mxu0 %vm11374_vm3, %v11373_v12 }
 0x558   : > { %10136 = vmatmul.mubr.msk.bf16.vlgmr.msra.gmra.mrb[24].mxu1 %vm2073_vm8, %v11821_v56  ;;  %10151 = vmatprep.subr.bf16.mxu0 %v11373_v12 }
 0x559   : > { %v7129_v7 = vpack.c.bf16 %v6988_v1, %v6988_v1  ;;  %10146 = vmatpush3.bf16.xpose.msra.mxu1 %v2421_v4  ;;  %10147 = vmatprep.mubr.msk.bf16.mxu1 %vm11374_vm3, %v11373_v12  ;;  %v7144_v10 = vunpack.c.l.b16 %v7128_v60 }
 0x55a   : > { %10157 = vmatprep.subr.bf16.mxu1 %v11373_v12 }
 0x55b   : > { %v7145_v11 = vunpack.c.l.b16 %v7129_v7 }
 0x55d   : > { %v7153_v18 = vsel %vm7152_vm9, %v7145_v11, %v7144_v10 }
 0x55e   : > { %10142 = vmatmul.mubr.msk.bf16.vlgmr.msra.gmra.mrb[28].mxu0 %vm2073_vm8, %v11825_v58  ;;  %v7155_v30 = vsel %vm7154_vm10, %v7146_v15, %v7153_v18 }
 0x55f   : > { %10152 = vmatpush3.bf16.msra.mxu0 %v2574_v24  ;;  %10153 = vmatprep.mubr.msk.bf16.mxu0 %vm11374_vm3, %v11373_v12  ;;  %v7157_v32 = vsel %vm7156_vm11, %v7147_v17, %v7155_v30 }
 0x560   : > { %10148 = vmatmul.mubr.msk.bf16.vlgmr.msra.gmra.mrb[28].mxu1 %vm2073_vm8, %v11829_v59  ;;  %10163 = vmatprep.subr.bf16.mxu0 %v11373_v12  ;;  %v7159_v36 = vsel %vm7158_vm12, %v7148_v21, %v7157_v32 }
 0x561   : > { %10158 = vmatpush3.bf16.msra.mxu1 %v2622_v35  ;;  %10159 = vmatprep.mubr.msk.bf16.mxu1 %vm11374_vm3, %v11373_v12  ;;  %v7161_v40 = vsel %vm7160_vm13, %v7149_v31, %v7159_v36 }
 0x562   : > { %10169 = vmatprep.subr.bf16.mxu1 %v11373_v12  ;;  %v7163_v41 = vsel %vm7162_vm14, %v7150_v34, %v7161_v40 }
 0x563   : > { %v11911_v42 = vsel %vm7164_vm15, %v7151_v37, %v7163_v41 }
 0x619   : > { %v2114_v43 = vpop.f32.mrb[16].mxu0 }
 0x61a   : > { %v2463_v44 = vmul.f32 0.35355338, %v2114_v43  ;;  %v10107_v45 = vpop.f32.mrb[17].mxu0 }
 0x61b   : > { %v2117_v46 = vpop.f32.mrb[18].mxu0  ;;  %v2163_v48 = vpop.f32.mrb[16].mxu1 }
 0x61c   : > { %v2464_v49 = vmul.f32 0.35355338, %v2163_v48  ;;  %v10108_v51 = vpop.f32.mrb[19].mxu0  ;;  %v10113_v52 = vpop.f32.mrb[17].mxu1  ;;  %v2472_v53 = vsel %vm2471_vm2, %v2463_v44, -inf }
 0x61d   : > { %2473 = vmax.xlane.f32.xlu1 %v2472_v53  ;;  %v2166_v57 = vpop.f32.mrb[18].mxu1 }
 0x61e   : > { %v10114_v61 = vpop.f32.mrb[19].mxu1  ;;  %v2475_v62 = vsel %vm2471_vm2, %v2464_v49, -inf }
 0x61f   : > { %2476 = vmax.xlane.f32.xlu0 %v2475_v62 }
 0x621   : > { %v2212_v63 = vpop.f32.mrb[20].mxu0 }
 0x622   : > { %v2465_v0 = vmul.f32 0.35355338, %v2212_v63  ;;  %v10119_v33 = vpop.f32.mrb[21].mxu0 }
 0x623   : > { %v2215_v1 = vpop.f32.mrb[22].mxu0  ;;  %v2261_v60 = vpop.f32.mrb[20].mxu1 }
 0x624   : > { %v11915_v2 = vmul.f32 0.35355338, %v2261_v60  ;;  %v10120_v3 = vpop.f32.mrb[23].mxu0  ;;  %v10125_v4 = vpop.f32.mrb[21].mxu1  ;;  %v2478_v5 = vsel %vm2471_vm2, %v2465_v0, -inf }
 0x625   : > { %2479 = vmax.xlane.f32.xlu0 %v2478_v5  ;;  %v2264_v6 = vpop.f32.mrb[22].mxu1 }
 0x626   : > { %v10126_v7 = vpop.f32.mrb[23].mxu1  ;;  %v2481_v8 = vsel %vm2471_vm2, %v11915_v2, -inf }
 0x627   : > { %2482 = vmax.xlane.f32.xlu1 %v2481_v8 }
 0x629   : > { %v2310_v9 = vpop.f32.mrb[24].mxu0 }
 0x62a   : > { %v11920_v10 = vmul.f32 0.35355338, %v2310_v9  ;;  %v10131_v11 = vpop.f32.mrb[25].mxu0 }
 0x62b   : > { %v2313_v14 = vpop.f32.mrb[26].mxu0  ;;  %v2359_v13 = vpop.f32.mrb[24].mxu1 }
 0x62c   : > { %v2468_v15 = vmul.f32 0.35355338, %v2359_v13  ;;  %v10132_v16 = vpop.f32.mrb[27].mxu0  ;;  %v10137_v17 = vpop.f32.mrb[25].mxu1  ;;  %v2484_v18 = vsel %vm2471_vm2, %v11920_v10, -inf }
 0x62d   : > { %2485 = vmax.xlane.f32.xlu0 %v2484_v18  ;;  %v2362_v20 = vpop.f32.mrb[26].mxu1 }
 0x62e   : > { %v10138_v21 = vpop.f32.mrb[27].mxu1  ;;  %v2487_v24 = vsel %vm2471_vm2, %v2468_v15, -inf }
 0x62f   : > { %2488 = vmax.xlane.f32.xlu1 %v2487_v24 }
 0x631   : > { %v2408_v30 = vpop.f32.mrb[28].mxu0 }
 0x632   : > { %v2469_v31 = vmul.f32 0.35355338, %v2408_v30  ;;  %v10143_v32 = vpop.f32.mrb[29].mxu0 }
 0x633   : > { %v2411_v34 = vpop.f32.mrb[30].mxu0  ;;  %v2457_v35 = vpop.f32.mrb[28].mxu1 }
 0x634   : > { %v2470_v36 = vmul.f32 0.35355338, %v2457_v35  ;;  %v10144_v37 = vpop.f32.mrb[31].mxu0  ;;  %v10149_v40 = vpop.f32.mrb[29].mxu1  ;;  %v2490_v41 = vsel %vm2471_vm2, %v2469_v31, -inf }
 0x635   : > { %2491 = vmax.xlane.f32.xlu0 %v2490_v41  ;;  %v2460_v43 = vpop.f32.mrb[30].mxu1 }
 0x636   : > { %v10150_v45 = vpop.f32.mrb[31].mxu1  ;;  %v2493_v46 = vsel %vm2471_vm2, %v2470_v36, -inf }
 0x637   : > { %2494 = vmax.xlane.f32.xlu1 %v2493_v46 }
 0x648   : > { %2664 = vrot.lane.b32.xlu1 %v11809_v38, %s13201_s10 }
 0x64b   : > { %2712 = vrot.lane.b32.xlu0 %v11813_v54, %s13201_s10 }
 0x6aa   : > { %v2474_v48 = vpop.xlane.xlu1 %2473 }
 0x6ab   : > { %v2496_v51 = vsub.f32 %v2463_v44, %v2474_v48 }
 0x6ac   : > { %v2477_v52 = vpop.xlane.xlu0 %2476 }
 0x6ad   : > { %v2504_v53 = vmul.f32 1.442695, %v2496_v51  ;;  %v2497_v57 = vsub.f32 %v2464_v49, %v2477_v52 }
 0x6af   : > { %11017 = vpow2.f32 %v2504_v53  ;;  %v2506_v61 = vmul.f32 1.442695, %v2497_v57 }
 0x6b1   : > { %11019 = vpow2.f32 %v2506_v61 }
 0x6b2   : > { %v2480_v62 = vpop.xlane.xlu0 %2479 }
 0x6b3   : > { %v2498_v63 = vsub.f32 %v2465_v0, %v2480_v62 }
 0x6b4   : > { %v2483_v0 = vpop.xlane.xlu1 %2482 }
 0x6b5   : > { %v2508_v33 = vmul.f32 1.442695, %v2498_v63  ;;  %v2499_v5 = vsub.f32 %v11915_v2, %v2483_v0 }
 0x6b7   : > { %11021 = vpow2.f32 %v2508_v33  ;;  %v2510_v8 = vmul.f32 1.442695, %v2499_v5 }
 0x6b9   : > { %v11931_v1 = vpop.eup %11017  ;;  %11023 = vpow2.f32 %v2510_v8 }
 0x6ba   : > { %v2520_v60 = vsel %vm2471_vm2, %v11931_v1, 0.0  ;;  %v2486_v7 = vpop.xlane.xlu0 %2485 }
 0x6bb   : > { %v11935_v3 = vpop.eup %11019  ;;  %2521 = vadd.xlane.f32.xlu0 %v2520_v60  ;;  %v2500_v14 = vsub.f32 %v11920_v10, %v2486_v7 }
 0x6bc   : > { %v2523_v44 = vsel %vm2471_vm2, %v11935_v3, 0.0  ;;  %v2489_v6 = vpop.xlane.xlu1 %2488 }
 0x6bd   : > { %2524 = vadd.xlane.f32.xlu1 %v2523_v44  ;;  %v2501_v9 = vsub.f32 %v2468_v15, %v2489_v6  ;;  %v2512_v18 = vmul.f32 1.442695, %v2500_v14 }
 0x6bf   : > { %v2514_v16 = vmul.f32 1.442695, %v2501_v9 }
 0x6c1   : > { %v11939_v49 = vpop.eup %11021  ;;  %11025 = vpow2.f32 %v2514_v16 }
 0x6c2   : > { %v2526_v4 = vsel %vm2471_vm2, %v11939_v49, 0.0  ;;  %v2492_v13 = vpop.xlane.xlu0 %2491  ;;  %11027 = vpow2.f32 %v2512_v18 }
 0x6c3   : > { %2527 = vadd.xlane.f32.xlu0 %v2526_v4  ;;  %v2502_v20 = vsub.f32 %v2469_v31, %v2492_v13  ;;  %v11949_v30 = vpop.eup %11023 }
 0x6c4   : > { %v2495_v11 = vpop.xlane.xlu1 %2494  ;;  %v2529_v2 = vsel %vm2471_vm2, %v11949_v30, 0.0 }
 0x6c5   : > { %v2503_v17 = vsub.f32 %v2470_v36, %v2495_v11  ;;  %v2516_v24 = vmul.f32 1.442695, %v2502_v20 }
 0x6c6   : > { %v2713_v40 = vpop.permute.xlu0 %2712 }
 0x6c7   : > { %v2518_v21 = vmul.f32 1.442695, %v2503_v17  ;;  %v2718_v63 = vsel %vm1485_vm1, %v2713_v40, 0 }
 0x6c8   : > { %v2665_v41 = vpop.permute.xlu1 %2664 }
 0x6c9   : > { %11029 = vpow2.f32 %v2518_v21  ;;  %v2670_v61 = vsel %vm1485_vm1, %v2665_v41, 0 }
 0x6ca   : > { %11031 = vpow2.f32 %v2516_v24 }
 0x6cb   : > { %v11953_v15 = vpop.eup %11025 }
 0x6cc   : > { %v11955_v10 = vpop.eup %11027  ;;  %v2535_v32 = vsel %vm2471_vm2, %v11953_v15, 0.0 }
 0x6cd   : > { %v2532_v34 = vsel %vm2471_vm2, %v11955_v10, 0.0 }
 0x6ce   : > { %2760 = vrot.lane.b32.xlu1 %v11817_v55, %s13201_s10 }
 0x6d3   : > { %v11959_v31 = vpop.eup %11029 }
 0x6d4   : > { %v11963_v35 = vpop.eup %11031  ;;  %v2541_v36 = vsel %vm2471_vm2, %v11959_v31, 0.0 }
 0x6d5   : > { %v2538_v37 = vsel %vm2471_vm2, %v11963_v35, 0.0 }
 0x6d9   : > { %2808 = vrot.lane.b32.xlu0 %v11821_v56, %s13201_s10 }
 0x6f2   : > { %2530 = vadd.xlane.f32.xlu1 %v2529_v2 }
 0x6f6   : > { %2536 = vadd.xlane.f32.xlu1 %v2535_v32 }
 0x6f8   : > { %2533 = vadd.xlane.f32.xlu0 %v2532_v34 }
 0x6fa   : > { %2542 = vadd.xlane.f32.xlu1 %v2541_v36 }
 0x6fc   : > { %2539 = vadd.xlane.f32.xlu0 %v2538_v37 }
 0x70b   : > { %2856 = vrot.lane.b32.xlu1 %v11825_v58, %s13201_s10 }
 0x70f   : > { %3035 = vrot.lane.b32.xlu1 %v11803_v47, %s11377_s16 }
 0x712   : > { %2904 = vrot.lane.b32.xlu0 %v11829_v59, %s13201_s10  ;;  %s11381_s10 = smov 80  }
 0x713   : > { %3033 = vrot.lane.b32.xlu1 %v11803_v47, %s11378_s3 }
 0x716   : > { %3085 = vrot.lane.b32.xlu0 %v11805_v50, %s11377_s16 }
 0x717   : > { %3135 = vrot.lane.b32.xlu1 %v11809_v38, %s11377_s16 }
 0x71a   : > { %3083 = vrot.lane.b32.xlu0 %v11805_v50, %s11378_s3 }
 0x71b   : > { %3133 = vrot.lane.b32.xlu1 %v11809_v38, %s11378_s3 }
 0x71e   : > { %3185 = vrot.lane.b32.xlu0 %v11813_v54, %s11377_s16 }
 0x71f   : > { %3235 = vrot.lane.b32.xlu1 %v11817_v55, %s11377_s16 }
 0x722   : > { %3183 = vrot.lane.b32.xlu0 %v11813_v54, %s11378_s3 }
 0x723   : > { %3233 = vrot.lane.b32.xlu1 %v11817_v55, %s11378_s3 }
 0x726   : > { %3285 = vrot.lane.b32.xlu0 %v11821_v56, %s11377_s16 }
 0x727   : > { %3335 = vrot.lane.b32.xlu1 %v11825_v58, %s11377_s16 }
 0x72a   : > { %3283 = vrot.lane.b32.xlu0 %v11821_v56, %s11378_s3 }
 0x72b   : > { %3333 = vrot.lane.b32.xlu1 %v11825_v58, %s11378_s3 }
 0x72e   : > { %3385 = vrot.lane.b32.xlu0 %v11829_v59, %s11377_s16  ;;  %s11380_s16 = smov 112  }
 0x732   : > { %3383 = vrot.lane.b32.xlu0 %v11829_v59, %s11378_s3  ;;  %s11379_s3 = smov 56  }
 0x748   : > { %v2522_v43 = vpop.xlane.xlu0 %2521 }
 0x749   : > { %11033 = vrcp.f32 %v2522_v43 }
 0x74a   : > { %v2525_v45 = vpop.xlane.xlu1 %2524 }
 0x74b   : > { %11035 = vrcp.f32 %v2525_v45 }
 0x74e   : > { %v2761_v60 = vpop.permute.xlu1 %2760 }
 0x74f   : > { %v2766_v44 = vsel %vm1485_vm1, %v2761_v60, 0 }
 0x750   : > { %v2528_v46 = vpop.xlane.xlu0 %2527 }
 0x751   : > { %11037 = vrcp.f32 %v2528_v46 }
 0x753   : > { %v11034_v48 = vpop.eup %11033 }
 0x754   : > { %v2552_v51 = vmul.f32 %v11034_v48, %v11931_v1  ;;  %v2809_v0 = vpop.permute.xlu0 %2808 }
 0x755   : > { %v11036_v52 = vpop.eup %11035  ;;  %v2814_v16 = vsel %vm1485_vm1, %v2809_v0, 0 }
 0x756   : > { %v2560_v53 = vpack.c.bf16 %v2552_v51, %v2552_v51  ;;  %v2553_v57 = vmul.f32 %v11036_v52, %v11935_v3 }
 0x758   : > { %10154 = vmatmul.mubr.msk.bf16.vlgmr.msra.gmra.mrb[32].mxu0 %vm1543_vm4, %v2560_v53  ;;  %v2561_v62 = vpack.c.bf16 %v2553_v57, %v2553_v57 }
 0x759   : > { %10164 = vmatpush3.bf16.msra.mxu0 %v2670_v61  ;;  %10165 = vmatprep.mubr.msk.bf16.mxu0 %vm11374_vm3, %v11373_v12 }
 0x75a   : > { %10160 = vmatmul.mubr.msk.bf16.vlgmr.msra.gmra.mrb[32].mxu1 %vm1543_vm4, %v2561_v62  ;;  %10175 = vmatprep.subr.bf16.mxu0 %v11373_v12  ;;  %v2952_v62 = vld [vmem:[%s11471_s20] sm:$0xf] }
 0x75b   : > { %v11038_v33 = vpop.eup %11037  ;;  %10170 = vmatpush3.bf16.msra.mxu1 %v2718_v63  ;;  %10171 = vmatprep.mubr.msk.bf16.mxu1 %vm11374_vm3, %v11373_v12  ;;  %v2978_v63 = vsel %vm1593_vm5, %v2952_v62, 0 }
 0x75c   : > { %v2554_v1 = vmul.f32 %v11038_v33, %v11939_v49  ;;  %10181 = vmatprep.subr.bf16.mxu1 %v11373_v12 }
 0x75e   : > { %v2562_v3 = vpack.c.bf16 %v2554_v1, %v2554_v1 }
 0x760   : > { %10166 = vmatmul.mubr.msk.bf16.vlgmr.msra.gmra.mrb[36].mxu0 %vm1543_vm4, %v2562_v3 }
 0x761   : > { %10176 = vmatpush3.bf16.msra.mxu0 %v2766_v44  ;;  %10177 = vmatprep.mubr.msk.bf16.mxu0 %vm11374_vm3, %v11373_v12 }
 0x762   : > { %10187 = vmatprep.subr.bf16.mxu0 %v11373_v12 }
 0x77f   : > { %v2531_v4 = vpop.xlane.xlu1 %2530 }
 0x780   : > { %11039 = vrcp.f32 %v2531_v4 }
 0x783   : > { %v2537_v5 = vpop.xlane.xlu1 %2536 }
 0x784   : > { %11041 = vrcp.f32 %v2537_v5 }
 0x785   : > { %v2534_v49 = vpop.xlane.xlu0 %2533 }
 0x786   : > { %11043 = vrcp.f32 %v2534_v49 }
 0x787   : > { %v2543_v6 = vpop.xlane.xlu1 %2542 }
 0x789   : > { %v2540_v7 = vpop.xlane.xlu0 %2539 }
 0x78a   : > { %v11040_v8 = vpop.eup %11039  ;;  %11045 = vrcp.f32 %v2540_v7 }
 0x78b   : > { %v2857_v9 = vpop.permute.xlu1 %2856  ;;  %v2555_v11 = vmul.f32 %v11040_v8, %v11949_v30  ;;  %11047 = vrcp.f32 %v2543_v6 }
 0x78c   : > { %v2862_v32 = vsel %vm1485_vm1, %v2857_v9, 0 }
 0x78d   : > { %v2563_v14 = vpack.c.bf16 %v2555_v11, %v2555_v11  ;;  %v2905_v2 = vpop.permute.xlu0 %2904 }
 0x78e   : > { %v11042_v13 = vpop.eup %11041  ;;  %v2910_v37 = vsel %vm1485_vm1, %v2905_v2, 0 }
 0x78f   : > { %10172 = vmatmul.mubr.msk.bf16.vlgmr.msra.gmra.mrb[36].mxu1 %vm1543_vm4, %v2563_v14  ;;  %v3036_v18 = vpop.permute.xlu1 %3035  ;;  %v2557_v21 = vmul.f32 %v11042_v13, %v11953_v15 }
 0x790   : > { %v11044_v17 = vpop.eup %11043  ;;  %10182 = vmatpush3.bf16.msra.mxu1 %v2814_v16  ;;  %10183 = vmatprep.mubr.msk.bf16.mxu1 %vm11374_vm3, %v11373_v12  ;;  %v3041_v46 = vsel %vm2073_vm8, %v3036_v18, 0 }
 0x791   : > { %v2556_v20 = vmul.f32 %v11044_v17, %v11955_v10  ;;  %10193 = vmatprep.subr.bf16.mxu1 %v11373_v12  ;;  %v2565_v34 = vpack.c.bf16 %v2557_v21, %v2557_v21 }
 0x793   : > { %v2564_v24 = vpack.c.bf16 %v2556_v20, %v2556_v20  ;;  %v3034_v10 = vpop.permute.xlu1 %3033  ;;  %v3086_v20 = vpop.permute.xlu0 %3085 }
 0x794   : > { %v11046_v30 = vpop.eup %11045 }
 0x795   : > { %10178 = vmatmul.mubr.msk.bf16.vlgmr.msra.gmra.mrb[40].mxu0 %vm1543_vm4, %v2564_v24  ;;  %v11048_v36 = vpop.eup %11047  ;;  %v2558_v15 = vmul.f32 %v11046_v30, %v11963_v35 }
 0x796   : > { %10188 = vmatpush3.bf16.msra.mxu0 %v2862_v32  ;;  %10189 = vmatprep.mubr.msk.bf16.mxu0 %vm11374_vm3, %v11373_v12  ;;  %v2559_v40 = vmul.f32 %v11048_v36, %v11959_v31 }
 0x797   : > { %10184 = vmatmul.mubr.msk.bf16.vlgmr.msra.gmra.mrb[40].mxu1 %vm1543_vm4, %v2565_v34  ;;  %v2566_v41 = vpack.c.bf16 %v2558_v15, %v2558_v15  ;;  %v3136_v43 = vpop.permute.xlu1 %3135  ;;  %10855 = vmatprep.subr.msk.bf16.mxu0 %vm1593_vm5, %v2952_v62  ;;  %v3084_v15 = vpop.permute.xlu0 %3083 }
 0x798   : > { %10194 = vmatpush3.bf16.msra.mxu1 %v2910_v37  ;;  %10195 = vmatprep.mubr.msk.bf16.mxu1 %vm11374_vm3, %v11373_v12  ;;  %v2567_v45 = vpack.c.bf16 %v2559_v40, %v2559_v40  ;;  %v3141_v31 = vsel %vm2073_vm8, %v3136_v43, 0 }
 0x799   : > { %10205 = vmatprep.subr.bf16.mxu1 %v11373_v12 }
 0x79b   : > { %v3134_v35 = vpop.permute.xlu1 %3133 }
 0x79d   : > { %10190 = vmatmul.mubr.msk.bf16.vlgmr.msra.gmra.mrb[44].mxu0 %vm1543_vm4, %v2566_v41 }
 0x79e   : > { %10200 = vmatpush3.bf16.msra.mxu0 %v2978_v63 }
 0x79f   : > { %10196 = vmatmul.mubr.msk.bf16.vlgmr.msra.gmra.mrb[44].mxu1 %vm1543_vm4, %v2567_v45  ;;  %v3236_v48 = vpop.permute.xlu1 %3235  ;;  %10211 = vmatprep.subr.bf16.mxu0 %v11373_v12 }
 0x7a0   : > { %10207 = vmatprep.mubr.msk.bf16.mxu1 %vm11374_vm3, %v11373_v12  ;;  %v3241_v52 = vsel %vm2073_vm8, %v3236_v48, 0  ;;  %v3186_v48 = vpop.permute.xlu0 %3185 }
 0x7a1   : > { %10206 = vmatpush3.bf16.xpose.msra.mxu1 %v3041_v46 }
 0x7a2   : > { %10217 = vmatprep.subr.bf16.mxu1 %v11373_v12 }
 0x7a3   : > { %v3234_v51 = vpop.permute.xlu1 %3233 }
 0x7a7   : > { %v3336_v53 = vpop.permute.xlu1 %3335 }
 0x7a8   : > { %10208 = vmatmul.mubr.msk.bf16.vlgmr.msra.gmra.mrb[48].mxu1 %vm2073_vm8, %v3034_v10  ;;  %v3341_v57 = vsel %vm2073_vm8, %v3336_v53, 0 }
 0x7a9   : > { %10218 = vmatpush3.bf16.xpose.msra.mxu1 %v3141_v31  ;;  %10219 = vmatprep.mubr.msk.bf16.mxu1 %vm11374_vm3, %v11373_v12 }
 0x7aa   : > { %10229 = vmatprep.subr.bf16.mxu1 %v11373_v12 }
 0x7ab   : > { %v3334_v61 = vpop.permute.xlu1 %3333 }
 0x7b0   : > { %10220 = vmatmul.mubr.msk.bf16.vlgmr.msra.gmra.mrb[52].mxu1 %vm2073_vm8, %v3134_v35 }
 0x7b1   : > { %10230 = vmatpush3.bf16.xpose.msra.mxu1 %v3241_v52  ;;  %10231 = vmatprep.mubr.msk.bf16.mxu1 %vm11374_vm3, %v11373_v12 }
 0x7b2   : > { %10241 = vmatprep.subr.bf16.mxu1 %v11373_v12 }
 0x7b8   : > { %10232 = vmatmul.mubr.msk.bf16.vlgmr.msra.gmra.mrb[56].mxu1 %vm2073_vm8, %v3234_v51 }
 0x7b9   : > { %10242 = vmatpush3.bf16.xpose.msra.mxu1 %v3341_v57  ;;  %10243 = vmatprep.mubr.msk.bf16.mxu1 %vm11374_vm3, %v11373_v12  ;;  %v3091_v57 = vsel %vm2073_vm8, %v3086_v20, 0 }
 0x7ba   : > { %10253 = vmatprep.subr.bf16.mxu1 %v11373_v12 }
 0x7c0   : > { %10244 = vmatmul.mubr.msk.bf16.vlgmr.msra.gmra.mrb[60].mxu1 %vm2073_vm8, %v3334_v61  ;;  %v3184_v61 = vpop.permute.xlu0 %3183 }
 0x7c1   : > { %10255 = vmatprep.mubr.msk.bf16.mxu1 %vm11374_vm3, %v11373_v12 }
 0x82b   : > { %v2610_v33 = vpop.f32.mrb[32].mxu0 }
 0x82c   : > { %v10155_v1 = vpop.f32.mrb[33].mxu0 }
 0x82d   : > { %v2613_v60 = vpop.f32.mrb[34].mxu0  ;;  %v2658_v3 = vpop.f32.mrb[32].mxu1 }
 0x82e   : > { %v2961_v44 = vcombine.low %v2610_v33, %v2658_v3  ;;  %v10156_v4 = vpop.f32.mrb[35].mxu0  ;;  %v10161_v0 = vpop.f32.mrb[33].mxu1 }
 0x82f   : > { %v2661_v5 = vpop.f32.mrb[34].mxu1  ;;  %v3286_v4 = vpop.permute.xlu0 %3285 }
 0x830   : > { %v10162_v49 = vpop.f32.mrb[35].mxu1 }
 0x833   : > { %v2706_v6 = vpop.f32.mrb[36].mxu0 }
 0x834   : > { %v10167_v7 = vpop.f32.mrb[37].mxu0 }
 0x835   : > { %v2709_v8 = vpop.f32.mrb[38].mxu0 }
 0x836   : > { %v10168_v9 = vpop.f32.mrb[39].mxu0  ;;  %v3291_v8 = vsel %vm2073_vm8, %v3286_v4, 0 }
 0x862   : > { %v2754_v11 = vpop.f32.mrb[36].mxu1 }
 0x863   : > { %v2962_v14 = vcombine.low %v2706_v6, %v2754_v11  ;;  %v10173_v13 = vpop.f32.mrb[37].mxu1  ;;  %v3284_v6 = vpop.permute.xlu0 %3283 }
 0x864   : > { %v2757_v16 = vpop.f32.mrb[38].mxu1 }
 0x865   : > { %v2969_v17 = vpack.c.bf16 %v2962_v14, %v2961_v44  ;;  %v10174_v18 = vpop.f32.mrb[39].mxu1  ;;  %v3191_v44 = vsel %vm2073_vm8, %v3186_v48, 0 }
 0x867   : > { %10201 = vmatprep.mubr.msk.bf16.mxu0 %vm2073_vm8, %v2969_v17  ;;  %v3386_v11 = vpop.permute.xlu0 %3385 }
 0x868   : > { %v2802_v21 = vpop.f32.mrb[40].mxu0  ;;  %v3391_v17 = vsel %vm2073_vm8, %v3386_v11, 0 }
 0x869   : > { %v10179_v24 = vpop.f32.mrb[41].mxu0 }
 0x86a   : > { %v2805_v30 = vpop.f32.mrb[42].mxu0  ;;  %v2850_v2 = vpop.f32.mrb[40].mxu1 }
 0x86b   : > { %v2963_v32 = vcombine.low %v2802_v21, %v2850_v2  ;;  %v10180_v34 = vpop.f32.mrb[43].mxu0  ;;  %v10185_v36 = vpop.f32.mrb[41].mxu1 }
 0x86c   : > { %v2853_v37 = vpop.f32.mrb[42].mxu1  ;;  %v3384_v24 = vpop.permute.xlu0 %3383 }
 0x86d   : > { %v10186_v10 = vpop.f32.mrb[43].mxu1 }
 0x870   : > { %v2898_v40 = vpop.f32.mrb[44].mxu0 }
 0x871   : > { %v10191_v41 = vpop.f32.mrb[45].mxu0 }
 0x872   : > { %v2901_v43 = vpop.f32.mrb[46].mxu0  ;;  %v2946_v45 = vpop.f32.mrb[44].mxu1 }
 0x873   : > { %v2964_v46 = vcombine.low %v2898_v40, %v2946_v45  ;;  %v10192_v35 = vpop.f32.mrb[47].mxu0  ;;  %v10197_v31 = vpop.f32.mrb[45].mxu1 }
 0x874   : > { %v2949_v51 = vpop.f32.mrb[46].mxu1 }
 0x875   : > { %v2970_v52 = vpack.c.bf16 %v2964_v46, %v2963_v32  ;;  %v10198_v53 = vpop.f32.mrb[47].mxu1 }
 0x877   : > { %10202 = vmatmul.mubr.msk.bf16.vlgmr.msra.gmra.mrb[48].mxu0 %vm2073_vm8, %v2970_v52 }
 0x878   : > { %10212 = vmatpush3.bf16.xpose.msra.mxu0 %v3091_v57  ;;  %10213 = vmatprep.mubr.msk.bf16.mxu0 %vm11374_vm3, %v11373_v12 }
 0x879   : > { %10223 = vmatprep.subr.bf16.mxu0 %v11373_v12 }
 0x87b   : > { %v3077_v62 = vpop.f32.mrb[48].mxu1 }
 0x87c   : > { %v3433_v63 = vmul.f32 0.35355338, %v3077_v62  ;;  %v10209_v33 = vpop.f32.mrb[49].mxu1 }
 0x87d   : > { %v3080_v1 = vpop.f32.mrb[50].mxu1 }
 0x87e   : > { %v10210_v60 = vpop.f32.mrb[51].mxu1  ;;  %v3441_v3 = vsel %vm2471_vm2, %v3433_v63, -inf }
 0x87f   : > { %3442 = vmax.xlane.f32.xlu1 %v3441_v3  ;;  %10214 = vmatmul.mubr.msk.bf16.vlgmr.msra.gmra.mrb[52].mxu0 %vm2073_vm8, %v3084_v15 }
 0x880   : > { %10224 = vmatpush3.bf16.xpose.msra.mxu0 %v3191_v44  ;;  %10225 = vmatprep.mubr.msk.bf16.mxu0 %vm11374_vm3, %v11373_v12 }
 0x881   : > { %10235 = vmatprep.subr.bf16.mxu0 %v11373_v12 }
 0x883   : > { %v3177_v0 = vpop.f32.mrb[52].mxu1 }
 0x884   : > { %v10221_v5 = vpop.f32.mrb[53].mxu1  ;;  %v3435_v43 = vmul.f32 0.35355338, %v3177_v0 }
 0x885   : > { %v3180_v49 = vpop.f32.mrb[54].mxu1 }
 0x886   : > { %v10222_v7 = vpop.f32.mrb[55].mxu1  ;;  %v3447_v31 = vsel %vm2471_vm2, %v3435_v43, -inf }
 0x887   : > { %10226 = vmatmul.mubr.msk.bf16.vlgmr.msra.gmra.mrb[56].mxu0 %vm2073_vm8, %v3184_v61 }
 0x888   : > { %10236 = vmatpush3.bf16.xpose.msra.mxu0 %v3291_v8  ;;  %10237 = vmatprep.mubr.msk.bf16.mxu0 %vm11374_vm3, %v11373_v12 }
 0x889   : > { %10247 = vmatprep.subr.bf16.mxu0 %v11373_v12 }
 0x88b   : > { %v3277_v9 = vpop.f32.mrb[56].mxu1 }
 0x88c   : > { %v10233_v14 = vpop.f32.mrb[57].mxu1  ;;  %v3437_v35 = vmul.f32 0.35355338, %v3277_v9 }
 0x88d   : > { %v3280_v13 = vpop.f32.mrb[58].mxu1 }
 0x88e   : > { %v10234_v16 = vpop.f32.mrb[59].mxu1  ;;  %v3453_v62 = vsel %vm2471_vm2, %v3437_v35, -inf }
 0x88f   : > { %10238 = vmatmul.mubr.msk.bf16.vlgmr.msra.gmra.mrb[60].mxu0 %vm2073_vm8, %v3284_v6 }
 0x890   : > { %3585 = vrot.lane.b32.xlu1 %v11805_v50, %s11379_s3  ;;  %10248 = vmatpush3.bf16.xpose.msra.mxu0 %v3391_v17 }
 0x891   : > { %10249 = vmatprep.mubr.msk.bf16.mxu0 %vm11374_vm3, %v11373_v12  ;;  %10259 = vmatprep.subr.bf16.mxu0 %v11373_v12 }
 0x893   : > { %v3377_v18 = vpop.f32.mrb[60].mxu1 }
 0x894   : > { %v10245_v20 = vpop.f32.mrb[61].mxu1  ;;  %v3439_v57 = vmul.f32 0.35355338, %v3377_v18 }
 0x895   : > { %v3380_v21 = vpop.f32.mrb[62].mxu1 }
 0x896   : > { %v10246_v30 = vpop.f32.mrb[63].mxu1  ;;  %v3459_v33 = vsel %vm2471_vm2, %v3439_v57, -inf }
 0x897   : > { %10250 = vmatmul.mubr.msk.bf16.vlgmr.msra.gmra.mrb[64].mxu0 %vm2073_vm8, %v3384_v24 }
 0x898   : > { %10261 = vmatprep.mubr.msk.bf16.mxu0 %vm11374_vm3, %v11373_v12 }
 0x90c   : > { %v3443_v2 = vpop.xlane.xlu1 %3442 }
 0x90d   : > { %v3465_v36 = vsub.f32 %v3433_v63, %v3443_v2 }
 0x90f   : > { %v3473_v40 = vmul.f32 1.442695, %v3465_v36 }
 0x910   : > { %v3586_v32 = vpop.permute.xlu1 %3585 }
 0x911   : > { %v3591_v34 = vsel %vm1485_vm1, %v3586_v32, 0  ;;  %11049 = vpow2.f32 %v3473_v40 }
 0x912   : > { %10260 = vmatpush3.bf16.msra.mxu0 %v3591_v34 }
 0x913   : > { %10271 = vmatprep.subr.bf16.mxu0 %v11373_v12 }
 0x91b   : > { %v12088_v1 = vpop.eup %11049 }
 0x91c   : > { %v3489_v5 = vsel %vm2471_vm2, %v12088_v1, 0.0 }
 0x952   : > { %v3127_v37 = vpop.f32.mrb[52].mxu0 }
 0x953   : > { %v3434_v10 = vmul.f32 0.35355338, %v3127_v37  ;;  %v10215_v15 = vpop.f32.mrb[53].mxu0 }
 0x954   : > { %v3130_v41 = vpop.f32.mrb[54].mxu0 }
 0x955   : > { %v10216_v45 = vpop.f32.mrb[55].mxu0  ;;  %v3444_v46 = vsel %vm2471_vm2, %v3434_v10, -inf }
 0x956   : > { %3445 = vmax.xlane.f32.xlu0 %v3444_v46 }
 0x95a   : > { %3448 = vmax.xlane.f32.xlu0 %v3447_v31  ;;  %v3227_v48 = vpop.f32.mrb[56].mxu0 }
 0x95b   : > { %v3436_v51 = vmul.f32 0.35355338, %v3227_v48  ;;  %v10227_v52 = vpop.f32.mrb[57].mxu0 }
 0x95c   : > { %v3230_v53 = vpop.f32.mrb[58].mxu0 }
 0x95d   : > { %v10228_v61 = vpop.f32.mrb[59].mxu0  ;;  %v3450_v63 = vsel %vm2471_vm2, %v3436_v51, -inf }
 0x95e   : > { %3454 = vmax.xlane.f32.xlu0 %v3453_v62  ;;  %3451 = vmax.xlane.f32.xlu1 %v3450_v63 }
 0x962   : > { %3460 = vmax.xlane.f32.xlu0 %v3459_v33  ;;  %v3327_v60 = vpop.f32.mrb[60].mxu0 }
 0x963   : > { %v3438_v3 = vmul.f32 0.35355338, %v3327_v60  ;;  %v10239_v44 = vpop.f32.mrb[61].mxu0 }
 0x964   : > { %v3330_v4 = vpop.f32.mrb[62].mxu0 }
 0x965   : > { %v10240_v0 = vpop.f32.mrb[63].mxu0  ;;  %v3456_v49 = vsel %vm2471_vm2, %v3438_v3, -inf }
 0x966   : > { %3490 = vadd.xlane.f32.xlu0 %v3489_v5  ;;  %3457 = vmax.xlane.f32.xlu1 %v3456_v49 }
 0x96a   : > { %v3427_v6 = vpop.f32.mrb[64].mxu0 }
 0x96b   : > { %v3440_v7 = vmul.f32 0.35355338, %v3427_v6  ;;  %v10251_v8 = vpop.f32.mrb[65].mxu0 }
 0x96c   : > { %v3430_v9 = vpop.f32.mrb[66].mxu0 }
 0x96d   : > { %v10252_v11 = vpop.f32.mrb[67].mxu0  ;;  %v3462_v14 = vsel %vm2471_vm2, %v3440_v7, -inf }
 0x96e   : > { %3463 = vmax.xlane.f32.xlu1 %v3462_v14 }
 0x97f   : > { %3633 = vrot.lane.b32.xlu1 %v11809_v38, %s11379_s3 }
 0x9e3   : > { %v3446_v13 = vpop.xlane.xlu0 %3445 }
 0x9e4   : > { %v3466_v16 = vsub.f32 %v3434_v10, %v3446_v13 }
 0x9e6   : > { %v3475_v17 = vmul.f32 1.442695, %v3466_v16 }
 0x9e7   : > { %v3449_v18 = vpop.xlane.xlu0 %3448 }
 0x9e8   : > { %11051 = vpow2.f32 %v3475_v17  ;;  %v3467_v20 = vsub.f32 %v3435_v43, %v3449_v18 }
 0x9ea   : > { %v3477_v21 = vmul.f32 1.442695, %v3467_v20 }
 0x9eb   : > { %v3455_v24 = vpop.xlane.xlu0 %3454 }
 0x9ec   : > { %11053 = vpow2.f32 %v3477_v21  ;;  %v3469_v30 = vsub.f32 %v3437_v35, %v3455_v24  ;;  %v3452_v35 = vpop.xlane.xlu1 %3451 }
 0x9ed   : > { %v3468_v31 = vsub.f32 %v3436_v51, %v3452_v35 }
 0x9ee   : > { %v3481_v2 = vmul.f32 1.442695, %v3469_v30 }
 0x9ef   : > { %v3461_v32 = vpop.xlane.xlu0 %3460  ;;  %v3479_v52 = vmul.f32 1.442695, %v3468_v31 }
 0x9f0   : > { %v3471_v34 = vsub.f32 %v3439_v57, %v3461_v32  ;;  %11055 = vpow2.f32 %v3481_v2 }
 0x9f2   : > { %v12096_v36 = vpop.eup %11051  ;;  %v3485_v37 = vmul.f32 1.442695, %v3471_v34 }
 0x9f3   : > { %v3492_v15 = vsel %vm2471_vm2, %v12096_v36, 0.0  ;;  %v3458_v48 = vpop.xlane.xlu1 %3457  ;;  %v3491_v5 = vpop.xlane.xlu0 %3490 }
 0x9f4   : > { %11057 = vpow2.f32 %v3485_v37  ;;  %3493 = vadd.xlane.f32.xlu1 %v3492_v15  ;;  %v3470_v53 = vsub.f32 %v3438_v3, %v3458_v48 }
 0x9f5   : > { %11059 = vpow2.f32 %v3479_v52 }
 0x9f6   : > { %v12100_v10 = vpop.eup %11053  ;;  %v3483_v61 = vmul.f32 1.442695, %v3470_v53 }
 0x9f7   : > { %v3495_v40 = vsel %vm2471_vm2, %v12100_v10, 0.0 }
 0x9f8   : > { %3496 = vadd.xlane.f32.xlu0 %v3495_v40  ;;  %11061 = vpow2.f32 %v3483_v61 }
 0x9fa   : > { %v12104_v41 = vpop.eup %11055 }
 0x9fb   : > { %v3501_v43 = vsel %vm2471_vm2, %v12104_v41, 0.0  ;;  %v3464_v57 = vpop.xlane.xlu1 %3463 }
 0x9fc   : > { %3502 = vadd.xlane.f32.xlu0 %v3501_v43  ;;  %v3472_v62 = vsub.f32 %v3440_v7, %v3464_v57 }
 0x9fe   : > { %v12108_v45 = vpop.eup %11057  ;;  %v3487_v63 = vmul.f32 1.442695, %v3472_v62 }
 0x9ff   : > { %v3507_v46 = vsel %vm2471_vm2, %v12108_v45, 0.0  ;;  %v12122_v51 = vpop.eup %11059  ;;  %v3634_v0 = vpop.permute.xlu1 %3633 }
 0xa00   : > { %3508 = vadd.xlane.f32.xlu0 %v3507_v46  ;;  %11063 = vpow2.f32 %v3487_v63  ;;  %v3498_v33 = vsel %vm2471_vm2, %v12122_v51, 0.0  ;;  %v3639_v30 = vsel %vm1485_vm1, %v3634_v0, 0 }
 0xa02   : > { %v12127_v60 = vpop.eup %11061 }
 0xa03   : > { %v3504_v3 = vsel %vm2471_vm2, %v12127_v60, 0.0 }
 0xa05   : > { %3729 = vrot.lane.b32.xlu1 %v11817_v55, %s11379_s3 }
 0xa0a   : > { %v12132_v44 = vpop.eup %11063 }
 0xa0b   : > { %v3510_v4 = vsel %vm2471_vm2, %v12132_v44, 0.0 }
 0xa16   : > { %3537 = vrot.lane.b32.xlu0 %v11803_v47, %s11379_s3 }
 0xa1a   : > { %3681 = vrot.lane.b32.xlu0 %v11813_v54, %s11379_s3 }
 0xa1e   : > { %3777 = vrot.lane.b32.xlu0 %v11821_v56, %s11379_s3 }
 0xa22   : > { %3873 = vrot.lane.b32.xlu0 %v11829_v59, %s11379_s3 }
 0xa26   : > { %4003 = vrot.lane.b32.xlu0 %v11803_v47, %s11380_s16 }
 0xa29   : > { %3499 = vadd.xlane.f32.xlu1 %v3498_v33 }
 0xa2a   : > { %4053 = vrot.lane.b32.xlu0 %v11805_v50, %s11380_s16 }
 0xa2d   : > { %3505 = vadd.xlane.f32.xlu1 %v3504_v3 }
 0xa2e   : > { %4155 = vrot.lane.b32.xlu0 %v11813_v54, %s11381_s10 }
 0xa31   : > { %3511 = vadd.xlane.f32.xlu1 %v3510_v4 }
 0xa32   : > { %4153 = vrot.lane.b32.xlu0 %v11813_v54, %s11380_s16 }
 0xa36   : > { %4255 = vrot.lane.b32.xlu0 %v11821_v56, %s11381_s10 }
 0xa3a   : > { %4253 = vrot.lane.b32.xlu0 %v11821_v56, %s11380_s16 }
 0xa3e   : > { %4355 = vrot.lane.b32.xlu0 %v11829_v59, %s11381_s10 }
 0xa42   : > { %3825 = vrot.lane.b32.xlu1 %v11825_v58, %s11379_s3  ;;  %4353 = vrot.lane.b32.xlu0 %v11829_v59, %s11380_s16  ;;  %s11383_s3 = smov 72  }
 0xa46   : > { %4005 = vrot.lane.b32.xlu1 %v11803_v47, %s11381_s10 }
 0xa4a   : > { %4055 = vrot.lane.b32.xlu1 %v11805_v50, %s11381_s10 }
 0xa4e   : > { %4105 = vrot.lane.b32.xlu1 %v11809_v38, %s11381_s10 }
 0xa52   : > { %4103 = vrot.lane.b32.xlu1 %v11809_v38, %s11380_s16 }
 0xa56   : > { %4205 = vrot.lane.b32.xlu1 %v11817_v55, %s11381_s10 }
 0xa5a   : > { %4203 = vrot.lane.b32.xlu1 %v11817_v55, %s11380_s16 }
 0xa5e   : > { %4305 = vrot.lane.b32.xlu1 %v11825_v58, %s11381_s10  ;;  %s11382_s10 = smov 48  }
 0xa62   : > { %4303 = vrot.lane.b32.xlu1 %v11825_v58, %s11380_s16  ;;  %s11384_s16 = smov 104  }
 0xa81   : > { %v3494_v49 = vpop.xlane.xlu1 %3493 }
 0xa82   : > { %11065 = vrcp.f32 %v3494_v49 }
 0xa83   : > { %11067 = vrcp.f32 %v3491_v5 }
 0xa85   : > { %v3497_v6 = vpop.xlane.xlu0 %3496  ;;  %v3730_v32 = vpop.permute.xlu1 %3729 }
 0xa86   : > { %11069 = vrcp.f32 %v3497_v6  ;;  %v3735_v37 = vsel %vm1485_vm1, %v3730_v32, 0 }
 0xa89   : > { %v3503_v7 = vpop.xlane.xlu0 %3502 }
 0xa8a   : > { %11071 = vrcp.f32 %v3503_v7 }
 0xa8c   : > { %v11066_v8 = vpop.eup %11065 }
 0xa8d   : > { %v3522_v9 = vmul.f32 %v11066_v8, %v12096_v36  ;;  %v11068_v11 = vpop.eup %11067  ;;  %v3509_v14 = vpop.xlane.xlu0 %3508 }
 0xa8e   : > { %v3521_v16 = vmul.f32 %v11068_v11, %v12088_v1  ;;  %11073 = vrcp.f32 %v3509_v14 }
 0xa8f   : > { %v3530_v13 = vpack.c.bf16 %v3522_v9, %v3522_v9 }
 0xa90   : > { %v3529_v20 = vpack.c.bf16 %v3521_v16, %v3521_v16  ;;  %v11070_v21 = vpop.eup %11069 }
 0xa91   : > { %10262 = vmatmul.mubr.msk.bf16.vlgmr.msra.gmra.mrb[68].mxu0 %vm1543_vm4, %v3530_v13  ;;  %v3538_v17 = vpop.permute.xlu0 %3537  ;;  %v3523_v1 = vmul.f32 %v11070_v21, %v12100_v10 }
 0xa92   : > { %10273 = vmatprep.mubr.msk.bf16.mxu0 %vm11374_vm3, %v11373_v12  ;;  %v3543_v18 = vsel %vm1485_vm1, %v3538_v17, 0 }
 0xa93   : > { %10254 = vmatpush3.bf16.msra.mxu1 %v3543_v18  ;;  %v3531_v34 = vpack.c.bf16 %v3523_v1, %v3523_v1 }
 0xa94   : > { %10265 = vmatprep.subr.bf16.mxu1 %v11373_v12  ;;  %v11072_v36 = vpop.eup %11071 }
 0xa95   : > { %v3682_v24 = vpop.permute.xlu0 %3681  ;;  %v3525_v15 = vmul.f32 %v11072_v36, %v12104_v41 }
 0xa96   : > { %v3687_v2 = vsel %vm1485_vm1, %v3682_v24, 0  ;;  %10256 = vmatmul.mubr.msk.bf16.vlgmr.msra.gmra.mrb[64].mxu1 %vm1543_vm4, %v3529_v20 }
 0xa97   : > { %10266 = vmatpush3.bf16.msra.mxu1 %v3639_v30  ;;  %10272 = vmatpush3.bf16.msra.mxu0 %v3687_v2  ;;  %v3533_v40 = vpack.c.bf16 %v3525_v15, %v3525_v15  ;;  %v9556_v30 = vld [vmem:[%s11471_s20 + $0x4] sm:$0xf] }
 0xa98   : > { %10267 = vmatprep.mubr.msk.bf16.mxu1 %vm11374_vm3, %v11373_v12  ;;  %10277 = vmatprep.subr.bf16.mxu1 %v11373_v12  ;;  %v11074_v35 = vpop.eup %11073  ;;  %v3948_v2 = vsel %vm1593_vm5, %v9556_v30, 0 }
 0xa99   : > { %10283 = vmatprep.subr.bf16.mxu0 %v11373_v12  ;;  %v3778_v43 = vpop.permute.xlu0 %3777  ;;  %v3527_v41 = vmul.f32 %v11074_v35, %v12108_v45 }
 0xa9a   : > { %v3783_v4 = vsel %vm1485_vm1, %v3778_v43, 0 }
 0xa9b   : > { %v3535_v3 = vpack.c.bf16 %v3527_v41, %v3527_v41 }
 0xa9d   : > { %v3874_v48 = vpop.permute.xlu0 %3873 }
 0xa9e   : > { %10268 = vmatmul.mubr.msk.bf16.vlgmr.msra.gmra.mrb[68].mxu1 %vm1543_vm4, %v3531_v34  ;;  %v3879_v7 = vsel %vm1485_vm1, %v3874_v48, 0 }
 0xa9f   : > { %10278 = vmatpush3.bf16.msra.mxu1 %v3735_v37  ;;  %10279 = vmatprep.mubr.msk.bf16.mxu1 %vm11374_vm3, %v11373_v12 }
 0xaa0   : > { %10289 = vmatprep.subr.bf16.mxu1 %v11373_v12 }
 0xaa1   : > { %v4004_v33 = vpop.permute.xlu0 %4003 }
 0xaa5   : > { %v4054_v0 = vpop.permute.xlu0 %4053 }
 0xaa6   : > { %10280 = vmatmul.mubr.msk.bf16.vlgmr.msra.gmra.mrb[72].mxu1 %vm1543_vm4, %v3533_v40 }
 0xaa7   : > { %10291 = vmatprep.mubr.msk.bf16.mxu1 %vm11374_vm3, %v11373_v12 }
 0xaa9   : > { %v4156_v8 = vpop.permute.xlu0 %4155 }
 0xaaa   : > { %v4161_v16 = vsel %vm2073_vm8, %v4156_v8, 0 }
 0xaad   : > { %v4154_v13 = vpop.permute.xlu0 %4153 }
 0xab6   : > { %v3500_v10 = vpop.xlane.xlu1 %3499 }
 0xab7   : > { %11075 = vrcp.f32 %v3500_v10 }
 0xaba   : > { %v3506_v46 = vpop.xlane.xlu1 %3505 }
 0xabb   : > { %11077 = vrcp.f32 %v3506_v46 }
 0xabe   : > { %v3512_v31 = vpop.xlane.xlu1 %3511 }
 0xabf   : > { %11079 = vrcp.f32 %v3512_v31 }
 0xac1   : > { %v11076_v52 = vpop.eup %11075 }
 0xac2   : > { %v3826_v53 = vpop.permute.xlu1 %3825  ;;  %v3524_v57 = vmul.f32 %v11076_v52, %v12122_v51 }
 0xac3   : > { %v3831_v61 = vsel %vm1485_vm1, %v3826_v53, 0 }
 0xac4   : > { %10290 = vmatpush3.bf16.msra.mxu1 %v3831_v61  ;;  %v3532_v62 = vpack.c.bf16 %v3524_v57, %v3524_v57 }
 0xac5   : > { %v11078_v63 = vpop.eup %11077  ;;  %10307 = vmatprep.subr.bf16.mxu1 %v11373_v12 }
 0xac6   : > { %10274 = vmatmul.mubr.msk.bf16.vlgmr.msra.gmra.mrb[72].mxu0 %vm1543_vm4, %v3532_v62  ;;  %v3526_v45 = vmul.f32 %v11078_v63, %v12127_v60  ;;  %v4006_v51 = vpop.permute.xlu1 %4005 }
 0xac7   : > { %10284 = vmatpush3.bf16.msra.mxu0 %v3783_v4  ;;  %10292 = vmatmul.mubr.msk.bf16.vlgmr.msra.gmra.mrb[76].mxu1 %vm1543_vm4, %v3535_v3  ;;  %v4011_v5 = vsel %vm2073_vm8, %v4006_v51, 0 }
 0xac8   : > { %10285 = vmatprep.mubr.msk.bf16.mxu0 %vm11374_vm3, %v11373_v12  ;;  %10295 = vmatprep.subr.bf16.mxu0 %v11373_v12  ;;  %v3534_v49 = vpack.c.bf16 %v3526_v45, %v3526_v45 }
 0xac9   : > { %10309 = vmatprep.mubr.msk.bf16.mxu1 %vm11374_vm3, %v11373_v12  ;;  %v11080_v6 = vpop.eup %11079 }
 0xaca   : > { %v3528_v60 = vmul.f32 %v11080_v6, %v12132_v44  ;;  %v4056_v9 = vpop.permute.xlu1 %4055  ;;  %v4256_v44 = vpop.permute.xlu0 %4255 }
 0xacb   : > { %v4061_v11 = vsel %vm2073_vm8, %v4056_v9, 0  ;;  %v4261_v18 = vsel %vm2073_vm8, %v4256_v44, 0 }
 0xacc   : > { %v3536_v14 = vpack.c.bf16 %v3528_v60, %v3528_v60 }
 0xacd   : > { %10308 = vmatpush3.bf16.xpose.msra.mxu1 %v4011_v5 }
 0xace   : > { %10286 = vmatmul.mubr.msk.bf16.vlgmr.msra.gmra.mrb[76].mxu0 %vm1543_vm4, %v3534_v49  ;;  %10313 = vmatprep.subr.bf16.mxu1 %v11373_v12  ;;  %v4254_v17 = vpop.permute.xlu0 %4253  ;;  %v4106_v6 = vpop.permute.xlu1 %4105 }
 0xacf   : > { %10296 = vmatpush3.bf16.msra.mxu0 %v3879_v7  ;;  %10297 = vmatprep.mubr.msk.bf16.mxu0 %vm11374_vm3, %v11373_v12 }
 0xad0   : > { %10856 = vmatprep.subr.msk.bf16.mxu0 %vm1593_vm5, %v9556_v30 }
 0xad2   : > { %v4356_v20 = vpop.permute.xlu0 %4355 }
 0xad3   : > { %v4361_v21 = vsel %vm2073_vm8, %v4356_v20, 0 }
 0xad4   : > { %10310 = vmatmul.mubr.msk.bf16.vlgmr.msra.gmra.mrb[80].mxu1 %vm2073_vm8, %v4004_v33 }
 0xad5   : > { %10314 = vmatpush3.bf16.xpose.msra.mxu1 %v4061_v11  ;;  %10315 = vmatprep.mubr.msk.bf16.mxu1 %vm11374_vm3, %v11373_v12 }
 0xad6   : > { %10298 = vmatmul.mubr.msk.bf16.vlgmr.msra.gmra.mrb[80].mxu0 %vm1543_vm4, %v3536_v14  ;;  %10325 = vmatprep.subr.bf16.mxu1 %v11373_v12  ;;  %v4354_v24 = vpop.permute.xlu0 %4353  ;;  %v4104_v14 = vpop.permute.xlu1 %4103 }
 0xad7   : > { %10302 = vmatpush3.bf16.msra.mxu0 %v3948_v2 }
 0xad8   : > { %10319 = vmatprep.subr.bf16.mxu0 %v11373_v12 }
 0xadc   : > { %10316 = vmatmul.mubr.msk.bf16.vlgmr.msra.gmra.mrb[84].mxu1 %vm2073_vm8, %v4054_v0 }
 0xadd   : > { %10326 = vmatpush3.bf16.xpose.msra.mxu1 %v4161_v16  ;;  %10327 = vmatprep.mubr.msk.bf16.mxu1 %vm11374_vm3, %v11373_v12 }
 0xade   : > { %10337 = vmatprep.subr.bf16.mxu1 %v11373_v12 }
 0xae4   : > { %10328 = vmatmul.mubr.msk.bf16.vlgmr.msra.gmra.mrb[88].mxu1 %vm2073_vm8, %v4154_v13 }
 0xae5   : > { %10338 = vmatpush3.bf16.xpose.msra.mxu1 %v4261_v18  ;;  %10339 = vmatprep.mubr.msk.bf16.mxu1 %vm11374_vm3, %v11373_v12 }
 0xae6   : > { %10349 = vmatprep.subr.bf16.mxu1 %v11373_v12 }
 0xaec   : > { %10340 = vmatmul.mubr.msk.bf16.vlgmr.msra.gmra.mrb[92].mxu1 %vm2073_vm8, %v4254_v17 }
 0xaed   : > { %10350 = vmatpush3.bf16.xpose.msra.mxu1 %v4361_v21  ;;  %10351 = vmatprep.mubr.msk.bf16.mxu1 %vm11374_vm3, %v11373_v12 }
 0xaee   : > { %10361 = vmatprep.subr.bf16.mxu1 %v11373_v12 }
 0xaf4   : > { %10352 = vmatmul.mubr.msk.bf16.vlgmr.msra.gmra.mrb[96].mxu1 %vm2073_vm8, %v4354_v24 }
 0xaf5   : > { %10363 = vmatprep.mubr.msk.bf16.mxu1 %vm11374_vm3, %v11373_v12 }
 0xb64   : > { %v3627_v1 = vpop.f32.mrb[68].mxu0 }
 0xb65   : > { %v10263_v32 = vpop.f32.mrb[69].mxu0 }
 0xb66   : > { %v3630_v34 = vpop.f32.mrb[70].mxu0  ;;  %v4111_v32 = vsel %vm2073_vm8, %v4106_v6, 0 }
 0xb67   : > { %v10264_v36 = vpop.f32.mrb[71].mxu0  ;;  %v4206_v34 = vpop.permute.xlu1 %4205 }
 0xb69   : > { %v3579_v37 = vpop.f32.mrb[64].mxu1 }
 0xb6a   : > { %v3931_v15 = vcombine.low %v3579_v37, %v3627_v1  ;;  %v10257_v40 = vpop.f32.mrb[65].mxu1 }
 0xb6b   : > { %v3582_v10 = vpop.f32.mrb[66].mxu1 }
 0xb6c   : > { %v10258_v43 = vpop.f32.mrb[67].mxu1 }
 0xb71   : > { %v3675_v46 = vpop.f32.mrb[68].mxu1 }
 0xb72   : > { %v10269_v35 = vpop.f32.mrb[69].mxu1 }
 0xb73   : > { %v3678_v31 = vpop.f32.mrb[70].mxu1  ;;  %v4211_v35 = vsel %vm2073_vm8, %v4206_v34, 0 }
 0xb74   : > { %v10270_v48 = vpop.f32.mrb[71].mxu1 }
 0xb79   : > { %v3771_v52 = vpop.f32.mrb[72].mxu1 }
 0xb7a   : > { %v10281_v41 = vpop.f32.mrb[73].mxu1 }
 0xb7b   : > { %v3774_v53 = vpop.f32.mrb[74].mxu1 }
 0xb7c   : > { %v10282_v57 = vpop.f32.mrb[75].mxu1 }
 0xb99   : > { %v3723_v61 = vpop.f32.mrb[72].mxu0 }
 0xb9a   : > { %v3932_v62 = vcombine.low %v3675_v46, %v3723_v61  ;;  %v10275_v63 = vpop.f32.mrb[73].mxu0  ;;  %v3867_v33 = vpop.f32.mrb[76].mxu1 }
 0xb9b   : > { %v3726_v3 = vpop.f32.mrb[74].mxu0  ;;  %v10293_v4 = vpop.f32.mrb[77].mxu1 }
 0xb9c   : > { %v3939_v45 = vpack.c.bf16 %v3932_v62, %v3931_v15  ;;  %v10276_v51 = vpop.f32.mrb[75].mxu0  ;;  %v3870_v0 = vpop.f32.mrb[78].mxu1 }
 0xb9d   : > { %v10294_v5 = vpop.f32.mrb[79].mxu1  ;;  %v4204_v46 = vpop.permute.xlu1 %4203 }
 0xb9e   : > { %10303 = vmatprep.mubr.msk.bf16.mxu0 %vm2073_vm8, %v3939_v45 }
 0xba1   : > { %v3819_v49 = vpop.f32.mrb[76].mxu0  ;;  %v4306_v61 = vpop.permute.xlu1 %4305 }
 0xba2   : > { %v3933_v7 = vcombine.low %v3771_v52, %v3819_v49  ;;  %v10287_v60 = vpop.f32.mrb[77].mxu0  ;;  %v4311_v62 = vsel %vm2073_vm8, %v4306_v61, 0 }
 0xba3   : > { %v3822_v8 = vpop.f32.mrb[78].mxu0 }
 0xba4   : > { %v10288_v9 = vpop.f32.mrb[79].mxu0 }
 0xba5   : > { %v4304_v0 = vpop.permute.xlu1 %4303 }
 0xba7   : > { %v4047_v11 = vpop.f32.mrb[80].mxu1 }
 0xba8   : > { %v12225_v13 = vmul.f32 0.35355338, %v4047_v11  ;;  %v10311_v16 = vpop.f32.mrb[81].mxu1 }
 0xba9   : > { %v3915_v44 = vpop.f32.mrb[80].mxu0  ;;  %v4050_v17 = vpop.f32.mrb[82].mxu1 }
 0xbaa   : > { %v3934_v18 = vcombine.low %v3867_v33, %v3915_v44  ;;  %v10299_v20 = vpop.f32.mrb[81].mxu0  ;;  %v10312_v21 = vpop.f32.mrb[83].mxu1  ;;  %v4411_v24 = vsel %vm2471_vm2, %v12225_v13, -inf }
 0xbab   : > { %v3918_v30 = vpop.f32.mrb[82].mxu0  ;;  %4412 = vmax.xlane.f32.xlu1 %v4411_v24 }
 0xbac   : > { %v3940_v2 = vpack.c.bf16 %v3934_v18, %v3933_v7  ;;  %v10300_v1 = vpop.f32.mrb[83].mxu0 }
 0xbae   : > { %10304 = vmatmul.mubr.msk.bf16.vlgmr.msra.gmra.mrb[48].mxu0 %vm2073_vm8, %v3940_v2 }
 0xbaf   : > { %10320 = vmatpush3.bf16.xpose.msra.mxu0 %v4111_v32  ;;  %v4097_v36 = vpop.f32.mrb[84].mxu1  ;;  %10321 = vmatprep.mubr.msk.bf16.mxu0 %vm11374_vm3, %v11373_v12 }
 0xbb0   : > { %v4404_v37 = vmul.f32 0.35355338, %v4097_v36  ;;  %v10317_v15 = vpop.f32.mrb[85].mxu1  ;;  %10331 = vmatprep.subr.bf16.mxu0 %v11373_v12 }
 0xbb1   : > { %v4100_v40 = vpop.f32.mrb[86].mxu1 }
 0xbb2   : > { %v10318_v10 = vpop.f32.mrb[87].mxu1  ;;  %v4414_v43 = vsel %vm2471_vm2, %v4404_v37, -inf }
 0xbb3   : > { %4415 = vmax.xlane.f32.xlu0 %v4414_v43 }
 0xbb6   : > { %10322 = vmatmul.mubr.msk.bf16.vlgmr.msra.gmra.mrb[84].mxu0 %vm2073_vm8, %v4104_v14 }
 0xbb7   : > { %10332 = vmatpush3.bf16.xpose.msra.mxu0 %v4211_v35  ;;  %v4197_v31 = vpop.f32.mrb[88].mxu1  ;;  %10333 = vmatprep.mubr.msk.bf16.mxu0 %vm11374_vm3, %v11373_v12 }
 0xbb8   : > { %v4406_v48 = vmul.f32 0.35355338, %v4197_v31  ;;  %v10329_v52 = vpop.f32.mrb[89].mxu1  ;;  %10343 = vmatprep.subr.bf16.mxu0 %v11373_v12 }
 0xbb9   : > { %v4200_v41 = vpop.f32.mrb[90].mxu1 }
 0xbba   : > { %v10330_v53 = vpop.f32.mrb[91].mxu1  ;;  %v4420_v57 = vsel %vm2471_vm2, %v4406_v48, -inf }
 0xbbb   : > { %4421 = vmax.xlane.f32.xlu1 %v4420_v57 }
 0xbbe   : > { %10334 = vmatmul.mubr.msk.bf16.vlgmr.msra.gmra.mrb[88].mxu0 %vm2073_vm8, %v4204_v46 }
 0xbbf   : > { %10344 = vmatpush3.bf16.xpose.msra.mxu0 %v4311_v62  ;;  %v4297_v63 = vpop.f32.mrb[92].mxu1  ;;  %10345 = vmatprep.mubr.msk.bf16.mxu0 %vm11374_vm3, %v11373_v12 }
 0xbc0   : > { %v4408_v33 = vmul.f32 0.35355338, %v4297_v63  ;;  %v10341_v3 = vpop.f32.mrb[93].mxu1  ;;  %10355 = vmatprep.subr.bf16.mxu0 %v11373_v12 }
 0xbc1   : > { %v4300_v4 = vpop.f32.mrb[94].mxu1 }
 0xbc2   : > { %v10342_v45 = vpop.f32.mrb[95].mxu1  ;;  %v4426_v51 = vsel %vm2471_vm2, %v4408_v33, -inf }
 0xbc3   : > { %4427 = vmax.xlane.f32.xlu1 %v4426_v51 }
 0xbc6   : > { %10346 = vmatmul.mubr.msk.bf16.vlgmr.msra.gmra.mrb[92].mxu0 %vm2073_vm8, %v4304_v0 }
 0xbc7   : > { %v4397_v5 = vpop.f32.mrb[96].mxu1  ;;  %10357 = vmatprep.mubr.msk.bf16.mxu0 %vm11374_vm3, %v11373_v12 }
 0xbc8   : > { %v4410_v49 = vmul.f32 0.35355338, %v4397_v5  ;;  %v10353_v6 = vpop.f32.mrb[97].mxu1 }
 0xbc9   : > { %4507 = vrot.lane.b32.xlu0 %v11803_v47, %s11382_s10  ;;  %v4400_v7 = vpop.f32.mrb[98].mxu1 }
 0xbca   : > { %v10354_v60 = vpop.f32.mrb[99].mxu1  ;;  %v4432_v8 = vsel %vm2471_vm2, %v4410_v49, -inf }
 0xbcb   : > { %4433 = vmax.xlane.f32.xlu1 %v4432_v8 }
 0xbdc   : > { %4555 = vrot.lane.b32.xlu1 %v11805_v50, %s11382_s10 }
 0xbe0   : > { %4603 = vrot.lane.b32.xlu1 %v11809_v38, %s11382_s10 }
 0xc38   : > { %v4413_v9 = vpop.xlane.xlu1 %4412 }
 0xc39   : > { %v4435_v11 = vsub.f32 %v12225_v13, %v4413_v9 }
 0xc3b   : > { %v4443_v14 = vmul.f32 1.442695, %v4435_v11 }
 0xc3d   : > { %11081 = vpow2.f32 %v4443_v14 }
 0xc40   : > { %v4416_v16 = vpop.xlane.xlu0 %4415 }
 0xc41   : > { %v4436_v44 = vsub.f32 %v4404_v37, %v4416_v16 }
 0xc43   : > { %v4445_v17 = vmul.f32 1.442695, %v4436_v44 }
 0xc44   : > { %v4508_v18 = vpop.permute.xlu0 %4507 }
 0xc45   : > { %11083 = vpow2.f32 %v4445_v17  ;;  %v4513_v20 = vsel %vm1485_vm1, %v4508_v18, 0 }
 0xc46   : > { %10356 = vmatpush3.bf16.msra.mxu0 %v4513_v20 }
 0xc47   : > { %v12259_v21 = vpop.eup %11081  ;;  %10367 = vmatprep.subr.bf16.mxu0 %v11373_v12 }
 0xc48   : > { %v4422_v24 = vpop.xlane.xlu1 %4421  ;;  %v4459_v30 = vsel %vm2471_vm2, %v12259_v21, 0.0 }
 0xc49   : > { %v4438_v2 = vsub.f32 %v4406_v48, %v4422_v24  ;;  %4460 = vadd.xlane.f32.xlu0 %v4459_v30 }
 0xc4b   : > { %v4449_v13 = vmul.f32 1.442695, %v4438_v2 }
 0xc4d   : > { %11085 = vpow2.f32 %v4449_v13 }
 0xc4f   : > { %v12264_v1 = vpop.eup %11083 }
 0xc50   : > { %v4428_v32 = vpop.xlane.xlu1 %4427  ;;  %v4462_v34 = vsel %vm2471_vm2, %v12264_v1, 0.0 }
 0xc51   : > { %v4440_v36 = vsub.f32 %v4408_v33, %v4428_v32  ;;  %4463 = vadd.xlane.f32.xlu1 %v4462_v34 }
 0xc53   : > { %v4453_v37 = vmul.f32 1.442695, %v4440_v36 }
 0xc55   : > { %11087 = vpow2.f32 %v4453_v37 }
 0xc57   : > { %v12268_v15 = vpop.eup %11085 }
 0xc58   : > { %v4434_v40 = vpop.xlane.xlu1 %4433  ;;  %v4468_v10 = vsel %vm2471_vm2, %v12268_v15, 0.0 }
 0xc59   : > { %v4442_v43 = vsub.f32 %v4410_v49, %v4434_v40  ;;  %4469 = vadd.xlane.f32.xlu1 %v4468_v10 }
 0xc5b   : > { %v4457_v46 = vmul.f32 1.442695, %v4442_v43 }
 0xc5c   : > { %v4556_v35 = vpop.permute.xlu1 %4555 }
 0xc5d   : > { %11089 = vpow2.f32 %v4457_v46  ;;  %v4561_v31 = vsel %vm1485_vm1, %v4556_v35, 0 }
 0xc5e   : > { %10362 = vmatpush3.bf16.msra.mxu1 %v4561_v31 }
 0xc5f   : > { %v12273_v48 = vpop.eup %11087  ;;  %10373 = vmatprep.subr.bf16.mxu1 %v11373_v12 }
 0xc60   : > { %v4474_v52 = vsel %vm2471_vm2, %v12273_v48, 0.0  ;;  %v4604_v16 = vpop.permute.xlu1 %4603 }
 0xc61   : > { %4475 = vadd.xlane.f32.xlu1 %v4474_v52  ;;  %v4609_v24 = vsel %vm1485_vm1, %v4604_v16, 0 }
 0xc67   : > { %v12278_v41 = vpop.eup %11089 }
 0xc68   : > { %v4480_v53 = vsel %vm2471_vm2, %v12278_v41, 0.0 }
 0xc69   : > { %4481 = vadd.xlane.f32.xlu1 %v4480_v53 }
 0xc7a   : > { %4699 = vrot.lane.b32.xlu1 %v11817_v55, %s11382_s10 }
 0xc7e   : > { %4795 = vrot.lane.b32.xlu1 %v11825_v58, %s11382_s10 }
 0xc82   : > { %4975 = vrot.lane.b32.xlu1 %v11803_v47, %s11383_s3 }
 0xc86   : > { %4973 = vrot.lane.b32.xlu1 %v11803_v47, %s11384_s16 }
 0xc89   : > { %v4147_v57 = vpop.f32.mrb[84].mxu0 }
 0xc8a   : > { %v4405_v61 = vmul.f32 0.35355338, %v4147_v57  ;;  %v10323_v62 = vpop.f32.mrb[85].mxu0  ;;  %5075 = vrot.lane.b32.xlu1 %v11809_v38, %s11383_s3 }
 0xc8b   : > { %v4150_v63 = vpop.f32.mrb[86].mxu0 }
 0xc8c   : > { %v10324_v33 = vpop.f32.mrb[87].mxu0  ;;  %v4417_v3 = vsel %vm2471_vm2, %v4405_v61, -inf }
 0xc8d   : > { %4418 = vmax.xlane.f32.xlu0 %v4417_v3 }
 0xc8e   : > { %5073 = vrot.lane.b32.xlu1 %v11809_v38, %s11384_s16 }
 0xc91   : > { %v4247_v4 = vpop.f32.mrb[88].mxu0 }
 0xc92   : > { %v4407_v45 = vmul.f32 0.35355338, %v4247_v4  ;;  %v10335_v51 = vpop.f32.mrb[89].mxu0  ;;  %5175 = vrot.lane.b32.xlu1 %v11817_v55, %s11383_s3 }
 0xc93   : > { %v4250_v0 = vpop.f32.mrb[90].mxu0 }
 0xc94   : > { %v10336_v5 = vpop.f32.mrb[91].mxu0  ;;  %v4423_v49 = vsel %vm2471_vm2, %v4407_v45, -inf }
 0xc95   : > { %4424 = vmax.xlane.f32.xlu0 %v4423_v49 }
 0xc96   : > { %5173 = vrot.lane.b32.xlu1 %v11817_v55, %s11384_s16 }
 0xc99   : > { %v4347_v6 = vpop.f32.mrb[92].mxu0 }
 0xc9a   : > { %v4409_v7 = vmul.f32 0.35355338, %v4347_v6  ;;  %v10347_v60 = vpop.f32.mrb[93].mxu0  ;;  %5275 = vrot.lane.b32.xlu1 %v11825_v58, %s11383_s3 }
 0xc9b   : > { %v4350_v8 = vpop.f32.mrb[94].mxu0 }
 0xc9c   : > { %v10348_v9 = vpop.f32.mrb[95].mxu0  ;;  %v4429_v11 = vsel %vm2471_vm2, %v4409_v7, -inf }
 0xc9d   : > { %4430 = vmax.xlane.f32.xlu0 %v4429_v11 }
 0xc9e   : > { %5273 = vrot.lane.b32.xlu1 %v11825_v58, %s11384_s16 }
 0xcb3   : > { %4651 = vrot.lane.b32.xlu0 %v11813_v54, %s11382_s10 }
 0xcd6   : > { %v4461_v14 = vpop.xlane.xlu0 %4460 }
 0xcd7   : > { %11091 = vrcp.f32 %v4461_v14 }
 0xcde   : > { %v4464_v44 = vpop.xlane.xlu1 %4463 }
 0xcdf   : > { %11093 = vrcp.f32 %v4464_v44 }
 0xce1   : > { %v11092_v17 = vpop.eup %11091 }
 0xce2   : > { %v4491_v18 = vmul.f32 %v11092_v17, %v12259_v21 }
 0xce4   : > { %v4499_v20 = vpack.c.bf16 %v4491_v18, %v4491_v18 }
 0xce6   : > { %10358 = vmatmul.mubr.msk.bf16.vlgmr.msra.gmra.mrb[96].mxu0 %vm1543_vm4, %v4499_v20  ;;  %v4470_v34 = vpop.xlane.xlu1 %4469 }
 0xce7   : > { %10368 = vmatpush3.bf16.msra.mxu0 %v4609_v24  ;;  %10369 = vmatprep.mubr.msk.bf16.mxu0 %vm11374_vm3, %v11373_v12 }
 0xce8   : > { %10379 = vmatprep.subr.bf16.mxu0 %v11373_v12 }
 0xce9   : > { %v11094_v30 = vpop.eup %11093 }
 0xcea   : > { %v4492_v2 = vmul.f32 %v11094_v30, %v12264_v1 }
 0xcec   : > { %v4500_v13 = vpack.c.bf16 %v4492_v2, %v4492_v2 }
 0xcee   : > { %10364 = vmatmul.mubr.msk.bf16.vlgmr.msra.gmra.mrb[100].mxu1 %vm1543_vm4, %v4500_v13  ;;  %v4476_v4 = vpop.xlane.xlu1 %4475 }
 0xcef   : > { %10375 = vmatprep.mubr.msk.bf16.mxu1 %vm11374_vm3, %v11373_v12 }
 0xcf6   : > { %v4482_v9 = vpop.xlane.xlu1 %4481 }
 0xcfa   : > { %v4700_v24 = vpop.permute.xlu1 %4699 }
 0xcfb   : > { %v4705_v2 = vsel %vm1485_vm1, %v4700_v24, 0 }
 0xcfe   : > { %v4796_v13 = vpop.permute.xlu1 %4795 }
 0xd1a   : > { %v4419_v21 = vpop.xlane.xlu0 %4418 }
 0xd1b   : > { %v4437_v32 = vsub.f32 %v4405_v61, %v4419_v21 }
 0xd1d   : > { %v4447_v36 = vmul.f32 1.442695, %v4437_v32  ;;  %v4976_v32 = vpop.permute.xlu1 %4975 }
 0xd1f   : > { %11095 = vpow2.f32 %v4447_v36 }
 0xd20   : > { %11097 = vrcp.f32 %v4470_v34 }
 0xd22   : > { %v4425_v37 = vpop.xlane.xlu0 %4424 }
 0xd23   : > { %v4439_v53 = vsub.f32 %v4407_v45, %v4425_v37 }
 0xd25   : > { %v4451_v57 = vmul.f32 1.442695, %v4439_v53 }
 0xd27   : > { %11099 = vpow2.f32 %v4451_v57  ;;  %v4981_v57 = vsel %vm2073_vm8, %v4976_v32, 0 }
 0xd29   : > { %v11096_v40 = vpop.eup %11095 }
 0xd2a   : > { %v11098_v10 = vpop.eup %11097  ;;  %v4431_v43 = vpop.xlane.xlu0 %4430  ;;  %v4465_v46 = vsel %vm2471_vm2, %v11096_v40, 0.0 }
 0xd2b   : > { %4466 = vadd.xlane.f32.xlu0 %v4465_v46  ;;  %v4494_v1 = vmul.f32 %v11098_v10, %v12268_v15  ;;  %v4441_v61 = vsub.f32 %v4409_v7, %v4431_v43  ;;  %v4974_v10 = vpop.permute.xlu1 %4973 }
 0xd2d   : > { %v4502_v52 = vpack.c.bf16 %v4494_v1, %v4494_v1  ;;  %v4455_v15 = vmul.f32 1.442695, %v4441_v61 }
 0xd2e   : > { %v4652_v35 = vpop.permute.xlu0 %4651 }
 0xd2f   : > { %v4657_v31 = vsel %vm1485_vm1, %v4652_v35, 0  ;;  %11101 = vpow2.f32 %v4455_v15  ;;  %v5076_v53 = vpop.permute.xlu1 %5075 }
 0xd30   : > { %10374 = vmatpush3.bf16.msra.mxu1 %v4657_v31  ;;  %11103 = vrcp.f32 %v4476_v4 }
 0xd31   : > { %10385 = vmatprep.subr.bf16.mxu1 %v11373_v12  ;;  %v12326_v62 = vpop.eup %11099 }
 0xd32   : > { %v4471_v63 = vsel %vm2471_vm2, %v12326_v62, 0.0 }
 0xd33   : > { %10376 = vmatmul.mubr.msk.bf16.vlgmr.msra.gmra.mrb[104].mxu1 %vm1543_vm4, %v4502_v52  ;;  %v5074_v15 = vpop.permute.xlu1 %5073 }
 0xd34   : > { %10387 = vmatprep.mubr.msk.bf16.mxu1 %vm11374_vm3, %v11373_v12 }
 0xd39   : > { %v12330_v33 = vpop.eup %11101 }
 0xd3a   : > { %v4477_v3 = vsel %vm2471_vm2, %v12330_v33, 0.0  ;;  %v11104_v45 = vpop.eup %11103 }
 0xd3b   : > { %v4496_v6 = vmul.f32 %v11104_v45, %v12273_v48  ;;  %v5176_v45 = vpop.permute.xlu1 %5175 }
 0xd3d   : > { %v4504_v11 = vpack.c.bf16 %v4496_v6, %v4496_v6 }
 0xd41   : > { %4747 = vrot.lane.b32.xlu0 %v11821_v56, %s11382_s10 }
 0xd60   : > { %4472 = vadd.xlane.f32.xlu0 %v4471_v63 }
 0xd64   : > { %4478 = vadd.xlane.f32.xlu0 %v4477_v3  ;;  %v5081_v3 = vsel %vm2073_vm8, %v5076_v53, 0 }
 0xd7a   : > { %4843 = vrot.lane.b32.xlu0 %v11829_v59, %s11382_s10  ;;  %s11385_s10 = smov 40  }
 0xd7e   : > { %5025 = vrot.lane.b32.xlu0 %v11805_v50, %s11383_s3 }
 0xd82   : > { %5023 = vrot.lane.b32.xlu0 %v11805_v50, %s11384_s16 }
 0xd86   : > { %5125 = vrot.lane.b32.xlu0 %v11813_v54, %s11383_s3 }
 0xd8a   : > { %5123 = vrot.lane.b32.xlu0 %v11813_v54, %s11384_s16 }
 0xd8e   : > { %5225 = vrot.lane.b32.xlu0 %v11821_v56, %s11383_s3 }
 0xd92   : > { %5223 = vrot.lane.b32.xlu0 %v11821_v56, %s11384_s16 }
 0xd96   : > { %5325 = vrot.lane.b32.xlu0 %v11829_v59, %s11383_s3  ;;  %s13266_s3 = sld [smem:[#allocation7_spill]] }
 0xd9a   : > { %5323 = vrot.lane.b32.xlu0 %v11829_v59, %s11384_s16  ;;  %s13203_s16 = sshll.u32 %s11692_s26, 3 }
 0xd9c   : > { %s1465_s5 = scalar_lea.vmem %s13266_s3, %s13203_s16  ;;  %s13268_s3 = sld [smem:[#allocation8_spill]] }
 0xd9d   : > { %s13272_s16 = sld [smem:[#allocation14_spill]] }
 0xdb8   : > { %v4467_v51 = vpop.xlane.xlu0 %4466 }
 0xdb9   : > { %11105 = vrcp.f32 %v4467_v51  ;;  %v12352_v0 = vpop.f32.mrb[96].mxu0 }
 0xdba   : > { %v10359_v5 = vpop.f32.mrb[97].mxu0  ;;  %11107 = vrcp.f32 %v4482_v9 }
 0xdbb   : > { %v4552_v49 = vpop.f32.mrb[98].mxu0  ;;  %v5174_v5 = vpop.permute.xlu1 %5173 }
 0xdbc   : > { %v10360_v7 = vpop.f32.mrb[99].mxu0  ;;  %v4748_v60 = vpop.permute.xlu0 %4747  ;;  %v5181_v49 = vsel %vm2073_vm8, %v5176_v45, 0 }
 0xdbd   : > { %v4753_v8 = vsel %vm1485_vm1, %v4748_v60, 0 }
 0xdbe   : > { %10386 = vmatpush3.bf16.msra.mxu1 %v4753_v8  ;;  %v9575_v8 = vld [vmem:[%s11471_s20 + $0x8] sm:$0xf] }
 0xdbf   : > { %10397 = vmatprep.subr.bf16.mxu1 %v11373_v12  ;;  %v5276_v6 = vpop.permute.xlu1 %5275  ;;  %v4918_v9 = vsel %vm1593_vm5, %v9575_v8, 0 }
 0xdc0   : > { %v5281_v7 = vsel %vm2073_vm8, %v5276_v6, 0 }
 0xdc1   : > { %v12357_v14 = vpop.f32.mrb[100].mxu1  ;;  %10388 = vmatmul.mubr.msk.bf16.vlgmr.msra.gmra.mrb[108].mxu1 %vm1543_vm4, %v4504_v11 }
 0xdc2   : > { %v4901_v16 = vcombine.low %v12352_v0, %v12357_v14  ;;  %v10365_v44 = vpop.f32.mrb[101].mxu1  ;;  %10399 = vmatprep.mubr.msk.bf16.mxu1 %vm11374_vm3, %v11373_v12 }
 0xdc3   : > { %v11106_v48 = vpop.eup %11105  ;;  %v4600_v17 = vpop.f32.mrb[102].mxu1 }
 0xdc4   : > { %v10366_v18 = vpop.f32.mrb[103].mxu1  ;;  %v4493_v20 = vmul.f32 %v11106_v48, %v11096_v40  ;;  %v11108_v34 = vpop.eup %11107 }
 0xdc5   : > { %v4498_v37 = vmul.f32 %v11108_v34, %v12278_v41  ;;  %v4801_v41 = vsel %vm1485_vm1, %v4796_v13, 0  ;;  %v5274_v60 = vpop.permute.xlu1 %5273 }
 0xdc6   : > { %v4501_v30 = vpack.c.bf16 %v4493_v20, %v4493_v20 }
 0xdc7   : > { %v4506_v1 = vpack.c.bf16 %v4498_v37, %v4498_v37 }
 0xdc8   : > { %10370 = vmatmul.mubr.msk.bf16.vlgmr.msra.gmra.mrb[100].mxu0 %vm1543_vm4, %v4501_v30 }
 0xdc9   : > { %10380 = vmatpush3.bf16.msra.mxu0 %v4705_v2  ;;  %10381 = vmatprep.mubr.msk.bf16.mxu0 %vm11374_vm3, %v11373_v12 }
 0xdca   : > { %10391 = vmatprep.subr.bf16.mxu0 %v11373_v12 }
 0xded   : > { %v4473_v21 = vpop.xlane.xlu0 %4472 }
 0xdee   : > { %11109 = vrcp.f32 %v4473_v21 }
 0xdf1   : > { %v4479_v36 = vpop.xlane.xlu0 %4478 }
 0xdf2   : > { %11111 = vrcp.f32 %v4479_v36 }
 0xdf5   : > { %v4844_v40 = vpop.permute.xlu0 %4843 }
 0xdf6   : > { %v4849_v43 = vsel %vm1485_vm1, %v4844_v40, 0 }
 0xdf7   : > { %10398 = vmatpush3.bf16.msra.mxu1 %v4849_v43 }
 0xdf8   : > { %v11110_v46 = vpop.eup %11109  ;;  %10409 = vmatprep.subr.bf16.mxu1 %v11373_v12 }
 0xdf9   : > { %v4495_v35 = vmul.f32 %v11110_v46, %v12326_v62  ;;  %v5026_v21 = vpop.permute.xlu0 %5025 }
 0xdfa   : > { %10400 = vmatmul.mubr.msk.bf16.vlgmr.msra.gmra.mrb[112].mxu1 %vm1543_vm4, %v4506_v1 }
 0xdfb   : > { %v4503_v31 = vpack.c.bf16 %v4495_v35, %v4495_v35  ;;  %10411 = vmatprep.mubr.msk.bf16.mxu1 %vm11374_vm3, %v11373_v12 }
 0xdfc   : > { %v11112_v52 = vpop.eup %11111 }
 0xdfd   : > { %10382 = vmatmul.mubr.msk.bf16.vlgmr.msra.gmra.mrb[104].mxu0 %vm1543_vm4, %v4503_v31  ;;  %v4497_v61 = vmul.f32 %v11112_v52, %v12330_v33  ;;  %v5024_v1 = vpop.permute.xlu0 %5023 }
 0xdfe   : > { %10392 = vmatpush3.bf16.msra.mxu0 %v4801_v41  ;;  %10393 = vmatprep.mubr.msk.bf16.mxu0 %vm11374_vm3, %v11373_v12 }
 0xdff   : > { %v4505_v62 = vpack.c.bf16 %v4497_v61, %v4497_v61  ;;  %10857 = vmatprep.subr.msk.bf16.mxu0 %vm1593_vm5, %v9575_v8 }
 0xe00   : > { %10410 = vmatpush3.bf16.xpose.msra.mxu1 %v4981_v57 }
 0xe01   : > { %10421 = vmatprep.subr.bf16.mxu1 %v11373_v12  ;;  %v5126_v52 = vpop.permute.xlu0 %5125 }
 0xe05   : > { %10394 = vmatmul.mubr.msk.bf16.vlgmr.msra.gmra.mrb[108].mxu0 %vm1543_vm4, %v4505_v62  ;;  %v5124_v45 = vpop.permute.xlu0 %5123 }
 0xe06   : > { %v4693_v63 = vpop.f32.mrb[104].mxu1  ;;  %10404 = vmatpush3.bf16.msra.mxu0 %v4918_v9 }
 0xe07   : > { %v10377_v4 = vpop.f32.mrb[105].mxu1  ;;  %10412 = vmatmul.mubr.msk.bf16.vlgmr.msra.gmra.mrb[116].mxu1 %vm2073_vm8, %v4974_v10  ;;  %10415 = vmatprep.subr.bf16.mxu0 %v11373_v12 }
 0xe08   : > { %v4696_v51 = vpop.f32.mrb[106].mxu1  ;;  %10422 = vmatpush3.bf16.xpose.msra.mxu1 %v5081_v3  ;;  %10423 = vmatprep.mubr.msk.bf16.mxu1 %vm11374_vm3, %v11373_v12 }
 0xe09   : > { %v10378_v33 = vpop.f32.mrb[107].mxu1  ;;  %10433 = vmatprep.subr.bf16.mxu1 %v11373_v12 }
 0xe0f   : > { %10424 = vmatmul.mubr.msk.bf16.vlgmr.msra.gmra.mrb[120].mxu1 %vm2073_vm8, %v5074_v15 }
 0xe10   : > { %10434 = vmatpush3.bf16.xpose.msra.mxu1 %v5181_v49  ;;  %10435 = vmatprep.mubr.msk.bf16.mxu1 %vm11374_vm3, %v11373_v12  ;;  %v5131_v49 = vsel %vm2073_vm8, %v5126_v52, 0 }
 0xe11   : > { %10445 = vmatprep.subr.bf16.mxu1 %v11373_v12 }
 0xe17   : > { %10436 = vmatmul.mubr.msk.bf16.vlgmr.msra.gmra.mrb[124].mxu1 %vm2073_vm8, %v5174_v5 }
 0xe18   : > { %10446 = vmatpush3.bf16.xpose.msra.mxu1 %v5281_v7  ;;  %10447 = vmatprep.mubr.msk.bf16.mxu1 %vm11374_vm3, %v11373_v12  ;;  %v5226_v7 = vpop.permute.xlu0 %5225 }
 0xe19   : > { %10457 = vmatprep.subr.bf16.mxu1 %v11373_v12 }
 0xe1c   : > { %v5224_v9 = vpop.permute.xlu0 %5223 }
 0xe1f   : > { %10448 = vmatmul.mubr.msk.bf16.vlgmr.msra.gmra.mrb[128].mxu1 %vm2073_vm8, %v5274_v60 }
 0xe20   : > { %10459 = vmatprep.mubr.msk.bf16.mxu1 %vm11374_vm3, %v11373_v12 }
 0xe94   : > { %v4789_v11 = vpop.f32.mrb[108].mxu1 }
 0xe95   : > { %v10389_v44 = vpop.f32.mrb[109].mxu1 }
 0xe96   : > { %v4792_v48 = vpop.f32.mrb[110].mxu1  ;;  %v5231_v44 = vsel %vm2073_vm8, %v5226_v7, 0 }
 0xe97   : > { %v10390_v17 = vpop.f32.mrb[111].mxu1 }
 0xe98   : > { %v5326_v17 = vpop.permute.xlu0 %5325 }
 0xe9b   : > { %v4645_v18 = vpop.f32.mrb[100].mxu0 }
 0xe9c   : > { %v4902_v20 = vcombine.low %v4645_v18, %v4693_v63  ;;  %v10371_v24 = vpop.f32.mrb[101].mxu0  ;;  %v5031_v63 = vsel %vm2073_vm8, %v5026_v21, 0 }
 0xe9d   : > { %v4648_v30 = vpop.f32.mrb[102].mxu0 }
 0xe9e   : > { %v4909_v2 = vpack.c.bf16 %v4902_v20, %v4901_v16  ;;  %v10372_v13 = vpop.f32.mrb[103].mxu0  ;;  %v5331_v30 = vsel %vm2073_vm8, %v5326_v17, 0 }
 0xe9f   : > { %v5324_v13 = vpop.permute.xlu0 %5323 }
 0xea0   : > { %10405 = vmatprep.mubr.msk.bf16.mxu0 %vm2073_vm8, %v4909_v2 }
 0xecd   : > { %v4885_v32 = vpop.f32.mrb[112].mxu1 }
 0xece   : > { %v10401_v34 = vpop.f32.mrb[113].mxu1 }
 0xecf   : > { %v4888_v36 = vpop.f32.mrb[114].mxu1 }
 0xed0   : > { %v4741_v37 = vpop.f32.mrb[104].mxu0  ;;  %v10402_v40 = vpop.f32.mrb[115].mxu1 }
 0xed1   : > { %v4903_v10 = vcombine.low %v4741_v37, %v4789_v11  ;;  %v10383_v43 = vpop.f32.mrb[105].mxu0 }
 0xed2   : > { %v4744_v46 = vpop.f32.mrb[106].mxu0 }
 0xed3   : > { %v10384_v35 = vpop.f32.mrb[107].mxu0 }
 0xed8   : > { %v4837_v31 = vpop.f32.mrb[108].mxu0 }
 0xed9   : > { %v4904_v53 = vcombine.low %v4837_v31, %v4885_v32  ;;  %v10395_v41 = vpop.f32.mrb[109].mxu0 }
 0xeda   : > { %v4840_v0 = vpop.f32.mrb[110].mxu0  ;;  %v5017_v14 = vpop.f32.mrb[116].mxu1 }
 0xedb   : > { %v4910_v16 = vpack.c.bf16 %v4904_v53, %v4903_v10  ;;  %v5373_v57 = vmul.f32 0.35355338, %v5017_v14  ;;  %v10396_v61 = vpop.f32.mrb[111].mxu0  ;;  %v10413_v15 = vpop.f32.mrb[117].mxu1 }
 0xedc   : > { %v5020_v62 = vpop.f32.mrb[118].mxu1 }
 0xedd   : > { %10406 = vmatmul.mubr.msk.bf16.vlgmr.msra.gmra.mrb[48].mxu0 %vm2073_vm8, %v4910_v16  ;;  %v10414_v3 = vpop.f32.mrb[119].mxu1  ;;  %v5381_v4 = vsel %vm2471_vm2, %v5373_v57, -inf }
 0xede   : > { %10416 = vmatpush3.bf16.xpose.msra.mxu0 %v5031_v63  ;;  %5382 = vmax.xlane.f32.xlu1 %v5381_v4 }
 0xedf   : > { %10417 = vmatprep.mubr.msk.bf16.mxu0 %vm11374_vm3, %v11373_v12  ;;  %10427 = vmatprep.subr.bf16.mxu0 %v11373_v12 }
 0xee2   : > { %v5117_v51 = vpop.f32.mrb[120].mxu1 }
 0xee3   : > { %v10425_v33 = vpop.f32.mrb[121].mxu1  ;;  %v5375_v46 = vmul.f32 0.35355338, %v5117_v51 }
 0xee4   : > { %v5120_v5 = vpop.f32.mrb[122].mxu1 }
 0xee5   : > { %10418 = vmatmul.mubr.msk.bf16.vlgmr.msra.gmra.mrb[112].mxu0 %vm2073_vm8, %v5024_v1  ;;  %v10426_v6 = vpop.f32.mrb[123].mxu1  ;;  %v5387_v52 = vsel %vm2471_vm2, %v5375_v46, -inf }
 0xee6   : > { %10428 = vmatpush3.bf16.xpose.msra.mxu0 %v5131_v49  ;;  %10429 = vmatprep.mubr.msk.bf16.mxu0 %vm11374_vm3, %v11373_v12 }
 0xee7   : > { %10439 = vmatprep.subr.bf16.mxu0 %v11373_v12 }
 0xeea   : > { %v5217_v60 = vpop.f32.mrb[124].mxu1 }
 0xeeb   : > { %v10437_v8 = vpop.f32.mrb[125].mxu1  ;;  %v5377_v31 = vmul.f32 0.35355338, %v5217_v60 }
 0xeec   : > { %v5220_v11 = vpop.f32.mrb[126].mxu1 }
 0xeed   : > { %10430 = vmatmul.mubr.msk.bf16.vlgmr.msra.gmra.mrb[116].mxu0 %vm2073_vm8, %v5124_v45  ;;  %v10438_v48 = vpop.f32.mrb[127].mxu1  ;;  %v5393_v61 = vsel %vm2471_vm2, %v5377_v31, -inf }
 0xeee   : > { %10440 = vmatpush3.bf16.xpose.msra.mxu0 %v5231_v44  ;;  %10441 = vmatprep.mubr.msk.bf16.mxu0 %vm11374_vm3, %v11373_v12 }
 0xeef   : > { %5525 = vrot.lane.b32.xlu1 %v11805_v50, %s11385_s10  ;;  %10451 = vmatprep.subr.bf16.mxu0 %v11373_v12 }
 0xef2   : > { %v5317_v18 = vpop.f32.mrb[128].mxu1 }
 0xef3   : > { %v10449_v20 = vpop.f32.mrb[129].mxu1  ;;  %v5379_v16 = vmul.f32 0.35355338, %v5317_v18 }
 0xef4   : > { %v5320_v24 = vpop.f32.mrb[130].mxu1 }
 0xef5   : > { %10442 = vmatmul.mubr.msk.bf16.vlgmr.msra.gmra.mrb[120].mxu0 %vm2073_vm8, %v5224_v9  ;;  %v10450_v2 = vpop.f32.mrb[131].mxu1  ;;  %v5399_v62 = vsel %vm2471_vm2, %v5379_v16, -inf }
 0xef6   : > { %10452 = vmatpush3.bf16.xpose.msra.mxu0 %v5331_v30  ;;  %10453 = vmatprep.mubr.msk.bf16.mxu0 %vm11374_vm3, %v11373_v12 }
 0xef7   : > { %10463 = vmatprep.subr.bf16.mxu0 %v11373_v12 }
 0xefd   : > { %10454 = vmatmul.mubr.msk.bf16.vlgmr.msra.gmra.mrb[124].mxu0 %vm2073_vm8, %v5324_v13 }
 0xefe   : > { %10465 = vmatprep.mubr.msk.bf16.mxu0 %vm11374_vm3, %v11373_v12 }
 0xf6b   : > { %v5383_v50 = vpop.xlane.xlu1 %5382 }
 0xf6c   : > { %v5405_v34 = vsub.f32 %v5373_v57, %v5383_v50 }
 0xf6e   : > { %v5413_v10 = vmul.f32 1.442695, %v5405_v34 }
 0xf6f   : > { %v5526_v21 = vpop.permute.xlu1 %5525 }
 0xf70   : > { %v5531_v32 = vsel %vm1485_vm1, %v5526_v21, 0  ;;  %11113 = vpow2.f32 %v5413_v10 }
 0xf71   : > { %10464 = vmatpush3.bf16.msra.mxu0 %v5531_v32 }
 0xf72   : > { %10475 = vmatprep.subr.bf16.mxu0 %v11373_v12 }
 0xf7a   : > { %v12443_v63 = vpop.eup %11113 }
 0xf7b   : > { %v5429_v5 = vsel %vm2471_vm2, %v12443_v63, 0.0 }
 0xfb8   : > { %v5067_v36 = vpop.f32.mrb[112].mxu0 }
 0xfb9   : > { %v5374_v37 = vmul.f32 0.35355338, %v5067_v36  ;;  %v10419_v40 = vpop.f32.mrb[113].mxu0 }
 0xfba   : > { %v5070_v43 = vpop.f32.mrb[114].mxu0 }
 0xfbb   : > { %v10420_v1 = vpop.f32.mrb[115].mxu0  ;;  %v5384_v35 = vsel %vm2471_vm2, %v5374_v37, -inf }
 0xfbc   : > { %5385 = vmax.xlane.f32.xlu0 %v5384_v35 }
 0xfc0   : > { %5388 = vmax.xlane.f32.xlu0 %v5387_v52  ;;  %v5167_v53 = vpop.f32.mrb[116].mxu0 }
 0xfc1   : > { %v5376_v41 = vmul.f32 0.35355338, %v5167_v53  ;;  %v10431_v0 = vpop.f32.mrb[117].mxu0 }
 0xfc2   : > { %v5170_v14 = vpop.f32.mrb[118].mxu0 }
 0xfc3   : > { %v10432_v57 = vpop.f32.mrb[119].mxu0  ;;  %v5390_v15 = vsel %vm2471_vm2, %v5376_v41, -inf }
 0xfc4   : > { %5394 = vmax.xlane.f32.xlu0 %v5393_v61  ;;  %5391 = vmax.xlane.f32.xlu1 %v5390_v15 }
 0xfc8   : > { %5400 = vmax.xlane.f32.xlu0 %v5399_v62  ;;  %v5267_v3 = vpop.f32.mrb[120].mxu0 }
 0xfc9   : > { %v5378_v4 = vmul.f32 0.35355338, %v5267_v3  ;;  %v10443_v45 = vpop.f32.mrb[121].mxu0 }
 0xfca   : > { %v5270_v51 = vpop.f32.mrb[122].mxu0 }
 0xfcb   : > { %v10444_v33 = vpop.f32.mrb[123].mxu0  ;;  %v5396_v49 = vsel %vm2471_vm2, %v5378_v4, -inf }
 0xfcc   : > { %5430 = vadd.xlane.f32.xlu0 %v5429_v5  ;;  %5397 = vmax.xlane.f32.xlu1 %v5396_v49 }
 0xfd0   : > { %v5367_v6 = vpop.f32.mrb[124].mxu0 }
 0xfd1   : > { %v5380_v7 = vmul.f32 0.35355338, %v5367_v6  ;;  %v10455_v60 = vpop.f32.mrb[125].mxu0 }
 0xfd2   : > { %v5370_v8 = vpop.f32.mrb[126].mxu0 }
 0xfd3   : > { %v10456_v9 = vpop.f32.mrb[127].mxu0  ;;  %v5402_v11 = vsel %vm2471_vm2, %v5380_v7, -inf }
 0xfd4   : > { %5403 = vmax.xlane.f32.xlu1 %v5402_v11 }
 0xfe5   : > { %5573 = vrot.lane.b32.xlu1 %v11809_v38, %s11385_s10 }
0x1049   : > { %v5386_v44 = vpop.xlane.xlu0 %5385 }
0x104a   : > { %v5406_v48 = vsub.f32 %v5374_v37, %v5386_v44 }
0x104c   : > { %v5415_v17 = vmul.f32 1.442695, %v5406_v48 }
0x104d   : > { %v5389_v18 = vpop.xlane.xlu0 %5388 }
0x104e   : > { %11115 = vpow2.f32 %v5415_v17  ;;  %v5407_v20 = vsub.f32 %v5375_v46, %v5389_v18 }
0x1050   : > { %v5417_v24 = vmul.f32 1.442695, %v5407_v20 }
0x1051   : > { %v5395_v30 = vpop.xlane.xlu0 %5394  ;;  %v5392_v1 = vpop.xlane.xlu1 %5391 }
0x1052   : > { %11117 = vpow2.f32 %v5417_v24  ;;  %v5409_v2 = vsub.f32 %v5377_v31, %v5395_v30  ;;  %v5408_v35 = vsub.f32 %v5376_v41, %v5392_v1 }
0x1054   : > { %v5421_v13 = vmul.f32 1.442695, %v5409_v2  ;;  %v5419_v52 = vmul.f32 1.442695, %v5408_v35 }
0x1055   : > { %v5401_v50 = vpop.xlane.xlu0 %5400 }
0x1056   : > { %v5411_v21 = vsub.f32 %v5379_v16, %v5401_v50  ;;  %11119 = vpow2.f32 %v5421_v13 }
0x1058   : > { %v11116_v32 = vpop.eup %11115  ;;  %v5425_v34 = vmul.f32 1.442695, %v5411_v21 }
0x1059   : > { %v5432_v36 = vsel %vm2471_vm2, %v11116_v32, 0.0  ;;  %v5398_v31 = vpop.xlane.xlu1 %5397  ;;  %v5431_v15 = vpop.xlane.xlu0 %5430 }
0x105a   : > { %11121 = vpow2.f32 %v5425_v34  ;;  %5433 = vadd.xlane.f32.xlu1 %v5432_v36  ;;  %v5410_v53 = vsub.f32 %v5378_v4, %v5398_v31 }
0x105b   : > { %11123 = vpow2.f32 %v5419_v52 }
0x105c   : > { %v12452_v38 = vpop.eup %11117  ;;  %v5423_v14 = vmul.f32 1.442695, %v5410_v53 }
0x105d   : > { %v5435_v37 = vsel %vm2471_vm2, %v12452_v38, 0.0 }
0x105e   : > { %5436 = vadd.xlane.f32.xlu0 %v5435_v37  ;;  %11125 = vpow2.f32 %v5423_v14 }
0x1060   : > { %v12456_v40 = vpop.eup %11119 }
0x1061   : > { %v5441_v10 = vsel %vm2471_vm2, %v12456_v40, 0.0  ;;  %v5404_v0 = vpop.xlane.xlu1 %5403 }
0x1062   : > { %5442 = vadd.xlane.f32.xlu0 %v5441_v10  ;;  %v5412_v16 = vsub.f32 %v5380_v7, %v5404_v0 }
0x1064   : > { %v12460_v43 = vpop.eup %11121  ;;  %v5427_v57 = vmul.f32 1.442695, %v5412_v16 }
0x1065   : > { %v5447_v46 = vsel %vm2471_vm2, %v12460_v43, 0.0 }
0x1066   : > { %5448 = vadd.xlane.f32.xlu0 %v5447_v46  ;;  %11127 = vpow2.f32 %v5427_v57  ;;  %v9594_v57 = vld [vmem:[%s11471_s20 + $0xc] sm:$0xf] }
0x106b   : > { %5669 = vrot.lane.b32.xlu1 %v11817_v55, %s11385_s10  ;;  %v12474_v55 = vpop.eup %11123 }
0x106c   : > { %v12478_v41 = vpop.eup %11125 }
0x1070   : > { %v12482_v61 = vpop.eup %11127 }
0x107c   : > { %5477 = vrot.lane.b32.xlu0 %v11803_v47, %s11385_s10  ;;  %v5438_v47 = vsel %vm2471_vm2, %v12474_v55, 0.0 }
0x1080   : > { %5621 = vrot.lane.b32.xlu0 %v11813_v54, %s11385_s10  ;;  %v5444_v54 = vsel %vm2471_vm2, %v12478_v41, 0.0 }
0x1084   : > { %5717 = vrot.lane.b32.xlu0 %v11821_v56, %s11385_s10  ;;  %v5450_v56 = vsel %vm2471_vm2, %v12482_v61, 0.0  ;;  %vm6309_vm2 = vcmask 48128  }
0x1088   : > { %5813 = vrot.lane.b32.xlu0 %v11829_v59, %s11385_s10  ;;  %v5574_v59 = vpop.permute.xlu1 %5573 }
0x1089   : > { %v5579_v11 = vsel %vm1485_vm1, %v5574_v59, 0 }
0x108f   : > { %5439 = vadd.xlane.f32.xlu1 %v5438_v47 }
0x1093   : > { %5445 = vadd.xlane.f32.xlu1 %v5444_v54 }
0x1097   : > { %5451 = vadd.xlane.f32.xlu1 %v5450_v56 }
0x10a8   : > { %5765 = vrot.lane.b32.xlu1 %v11825_v58, %s11385_s10  ;;  %s13267_s10 = sld [smem:[#allocation13_spill]] }
0x10e7   : > { %v5434_v62 = vpop.xlane.xlu1 %5433 }
0x10e8   : > { %11129 = vrcp.f32 %v5434_v62 }
0x10e9   : > { %11131 = vrcp.f32 %v5431_v15 }
0x10eb   : > { %v5437_v3 = vpop.xlane.xlu0 %5436  ;;  %v5670_v48 = vpop.permute.xlu1 %5669 }
0x10ec   : > { %11133 = vrcp.f32 %v5437_v3  ;;  %v5675_v20 = vsel %vm1485_vm1, %v5670_v48, 0 }
0x10ef   : > { %v5443_v4 = vpop.xlane.xlu0 %5442 }
0x10f0   : > { %11135 = vrcp.f32 %v5443_v4 }
0x10f2   : > { %v11130_v45 = vpop.eup %11129 }
0x10f3   : > { %v5462_v51 = vmul.f32 %v11130_v45, %v11116_v32  ;;  %v11132_v33 = vpop.eup %11131  ;;  %v5449_v5 = vpop.xlane.xlu0 %5448 }
0x10f4   : > { %v5461_v6 = vmul.f32 %v11132_v33, %v12443_v63  ;;  %11137 = vrcp.f32 %v5449_v5 }
0x10f5   : > { %v5470_v49 = vpack.c.bf16 %v5462_v51, %v5462_v51 }
0x10f6   : > { %v5469_v60 = vpack.c.bf16 %v5461_v6, %v5461_v6  ;;  %v11134_v8 = vpop.eup %11133 }
0x10f7   : > { %10466 = vmatmul.mubr.msk.bf16.vlgmr.msra.gmra.mrb[128].mxu0 %vm1543_vm4, %v5470_v49  ;;  %v5478_v7 = vpop.permute.xlu0 %5477  ;;  %v5463_v63 = vmul.f32 %v11134_v8, %v12452_v38 }
0x10f8   : > { %10477 = vmatprep.mubr.msk.bf16.mxu0 %vm11374_vm3, %v11373_v12  ;;  %v5483_v58 = vsel %vm1485_vm1, %v5478_v7, 0 }
0x10f9   : > { %10458 = vmatpush3.bf16.msra.mxu1 %v5483_v58  ;;  %v5471_v17 = vpack.c.bf16 %v5463_v63, %v5463_v63 }
0x10fa   : > { %10469 = vmatprep.subr.bf16.mxu1 %v11373_v12  ;;  %v11136_v18 = vpop.eup %11135 }
0x10fb   : > { %v5622_v9 = vpop.permute.xlu0 %5621  ;;  %v5465_v24 = vmul.f32 %v11136_v18, %v12456_v40 }
0x10fc   : > { %v5627_v44 = vsel %vm1485_vm1, %v5622_v9, 0  ;;  %10460 = vmatmul.mubr.msk.bf16.vlgmr.msra.gmra.mrb[132].mxu1 %vm1543_vm4, %v5469_v60 }
0x10fd   : > { %10470 = vmatpush3.bf16.msra.mxu1 %v5579_v11  ;;  %10476 = vmatpush3.bf16.msra.mxu0 %v5627_v44  ;;  %v5473_v30 = vpack.c.bf16 %v5465_v24, %v5465_v24 }
0x10fe   : > { %10471 = vmatprep.mubr.msk.bf16.mxu1 %vm11374_vm3, %v11373_v12  ;;  %10481 = vmatprep.subr.bf16.mxu1 %v11373_v12  ;;  %v11138_v50 = vpop.eup %11137 }
0x10ff   : > { %10487 = vmatprep.subr.bf16.mxu0 %v11373_v12  ;;  %v5467_v34 = vmul.f32 %v11138_v50, %v12460_v43  ;;  %v5718_v37 = vpop.permute.xlu0 %5717 }
0x1100   : > { %v5723_v35 = vsel %vm1485_vm1, %v5718_v37, 0 }
0x1101   : > { %v5475_v1 = vpack.c.bf16 %v5467_v34, %v5467_v34 }
0x1103   : > { %v5814_v31 = vpop.permute.xlu0 %5813 }
0x1104   : > { %10472 = vmatmul.mubr.msk.bf16.vlgmr.msra.gmra.mrb[136].mxu1 %vm1543_vm4, %v5471_v17  ;;  %v5819_v0 = vsel %vm1485_vm1, %v5814_v31, 0 }
0x1105   : > { %10482 = vmatpush3.bf16.msra.mxu1 %v5675_v20  ;;  %10483 = vmatprep.mubr.msk.bf16.mxu1 %vm11374_vm3, %v11373_v12 }
0x1106   : > { %10493 = vmatprep.subr.bf16.mxu1 %v11373_v12 }
0x110c   : > { %10484 = vmatmul.mubr.msk.bf16.vlgmr.msra.gmra.mrb[140].mxu1 %vm1543_vm4, %v5473_v30 }
0x110d   : > { %10495 = vmatprep.mubr.msk.bf16.mxu1 %vm11374_vm3, %v11373_v12 }
0x111c   : > { %v5440_v2 = vpop.xlane.xlu1 %5439 }
0x111d   : > { %11139 = vrcp.f32 %v5440_v2 }
0x1120   : > { %v5446_v13 = vpop.xlane.xlu1 %5445 }
0x1121   : > { %11141 = vrcp.f32 %v5446_v13 }
0x1124   : > { %v5452_v21 = vpop.xlane.xlu1 %5451 }
0x1125   : > { %11143 = vrcp.f32 %v5452_v21  ;;  %v6307_v21 = vld [vmem:[%s13265_s4] sm:$0x7]  ;;  %s13274_s4 = sld [smem:[#allocation18_spill]] }
0x1127   : > { %v11140_v32 = vpop.eup %11139 }
0x1128   : > { %v5464_v36 = vmul.f32 %v11140_v32, %v12474_v55  ;;  %v5766_v38 = vpop.permute.xlu1 %5765  ;;  %v5888_v55 = vsel %vm1593_vm5, %v9594_v57, 0 }
0x1129   : > { %v5771_v40 = vsel %vm1485_vm1, %v5766_v38, 0 }
0x112a   : > { %10494 = vmatpush3.bf16.msra.mxu1 %v5771_v40  ;;  %v5472_v10 = vpack.c.bf16 %v5464_v36, %v5464_v36  ;;  %v6315_v40 = vsel %vm6313_vm7, %v6307_v21, 0 }
0x112b   : > { %v11142_v46 = vpop.eup %11141 }
0x112c   : > { %10478 = vmatmul.mubr.msk.bf16.vlgmr.msra.gmra.mrb[132].mxu0 %vm1543_vm4, %v5472_v10  ;;  %v5466_v43 = vmul.f32 %v11142_v46, %v12478_v41  ;;  %v6306_v10 = vld [vmem:[%s1465_s5] sm:$0xff]  ;;  %s13269_s5 = sld [smem:[#allocation24_spill]] }
0x112d   : > { %10488 = vmatpush3.bf16.msra.mxu0 %v5723_v35  ;;  %10496 = vmatmul.mubr.msk.bf16.vlgmr.msra.gmra.mrb[144].mxu1 %vm1543_vm4, %v5475_v1  ;;  %v6308_v46 = vpack.c.bf16 %v6306_v10, %v6306_v10  ;;  %v9521_v1 = vld [vmem:[%s13267_s10] ss:$0 sm:$0xff]  ;;  %s13270_s10 = sld [smem:[#allocation16_spill]] }
0x112e   : > { %10489 = vmatprep.mubr.msk.bf16.mxu0 %vm11374_vm3, %v11373_v12  ;;  %10499 = vmatprep.subr.bf16.mxu0 %v11373_v12  ;;  %v5474_v52 = vpack.c.bf16 %v5466_v43, %v5466_v43 }
0x112f   : > { %v11144_v53 = vpop.eup %11143 }
0x1130   : > { %v5468_v14 = vmul.f32 %v11144_v53, %v12482_v61 }
0x1132   : > { %v5476_v16 = vpack.c.bf16 %v5468_v14, %v5468_v14 }
0x1134   : > { %10490 = vmatmul.mubr.msk.bf16.vlgmr.msra.gmra.mrb[136].mxu0 %vm1543_vm4, %v5474_v52 }
0x1135   : > { %10500 = vmatpush3.bf16.msra.mxu0 %v5819_v0  ;;  %10501 = vmatprep.mubr.msk.bf16.mxu0 %vm11374_vm3, %v11373_v12 }
0x1136   : > { %10858 = vmatprep.subr.msk.bf16.mxu0 %vm1593_vm5, %v9594_v57 }
0x113c   : > { %10502 = vmatmul.mubr.msk.bf16.vlgmr.msra.gmra.mrb[140].mxu0 %vm1543_vm4, %v5476_v16 }
0x113d   : > { %10506 = vmatpush3.bf16.msra.mxu0 %v5888_v55 }
0x113e   : > { %10539 = vmatprep.subr.bf16.mxu0 %v11373_v12 }
0x11ca   : > { %v5567_v47 = vpop.f32.mrb[128].mxu0 }
0x11cb   : > { %v10467_v41 = vpop.f32.mrb[129].mxu0 }
0x11cc   : > { %v5570_v54 = vpop.f32.mrb[130].mxu0 }
0x11cd   : > { %v10468_v56 = vpop.f32.mrb[131].mxu0 }
0x11cf   : > { %v5519_v59 = vpop.f32.mrb[132].mxu1 }
0x11d0   : > { %v5871_v15 = vcombine.low %v5519_v59, %v5567_v47  ;;  %v10461_v62 = vpop.f32.mrb[133].mxu1 }
0x11d1   : > { %v5522_v3 = vpop.f32.mrb[134].mxu1 }
0x11d2   : > { %v10462_v61 = vpop.f32.mrb[135].mxu1  ;;  %v10969_v3 = vld [vmem:[%s13269_s5 + $0x8] sm:$0xff]  }
0x11d7   : > { %v5615_v4 = vpop.f32.mrb[136].mxu1 }
0x11d8   : > { %v10473_v45 = vpop.f32.mrb[137].mxu1 }
0x11d9   : > { %v5618_v51 = vpop.f32.mrb[138].mxu1 }
0x11da   : > { %v10474_v33 = vpop.f32.mrb[139].mxu1 }
0x11df   : > { %v5711_v5 = vpop.f32.mrb[140].mxu1 }
0x11e0   : > { %v10485_v49 = vpop.f32.mrb[141].mxu1 }
0x11e1   : > { %v5714_v6 = vpop.f32.mrb[142].mxu1 }
0x11e2   : > { %v10486_v7 = vpop.f32.mrb[143].mxu1 }
0x11ff   : > { %v5663_v58 = vpop.f32.mrb[132].mxu0 }
0x1200   : > { %v5872_v60 = vcombine.low %v5615_v4, %v5663_v58  ;;  %v10479_v8 = vpop.f32.mrb[133].mxu0  ;;  %v5807_v9 = vpop.f32.mrb[144].mxu1 }
0x1201   : > { %v5666_v11 = vpop.f32.mrb[134].mxu0  ;;  %v10497_v44 = vpop.f32.mrb[145].mxu1 }
0x1202   : > { %v5879_v63 = vpack.c.bf16 %v5872_v60, %v5871_v15  ;;  %v10480_v48 = vpop.f32.mrb[135].mxu0  ;;  %v5810_v17 = vpop.f32.mrb[146].mxu1  ;;  %v6357_v15 = vld [vmem:[%s13268_s3] sm:$0xf]  ;;  %s13271_s3 = sld [smem:[#allocation23_spill]] }
0x1203   : > { %v10498_v18 = vpop.f32.mrb[147].mxu1 }
0x1204   : > { %10507 = vmatprep.mubr.msk.bf16.mxu0 %vm2073_vm8, %v5879_v63 }
0x1207   : > { %v5759_v20 = vpop.f32.mrb[136].mxu0 }
0x1208   : > { %v5873_v24 = vcombine.low %v5711_v5, %v5759_v20  ;;  %v10491_v30 = vpop.f32.mrb[137].mxu0 }
0x1209   : > { %v5762_v2 = vpop.f32.mrb[138].mxu0  ;;  %v10971_v30 = vld [vmem:[%s13270_s10 + $0x8] sm:$0xff]  }
0x120a   : > { %v10492_v13 = vpop.f32.mrb[139].mxu0 }
0x120f   : > { %v5855_v50 = vpop.f32.mrb[140].mxu0 }
0x1210   : > { %v5874_v32 = vcombine.low %v5807_v9, %v5855_v50  ;;  %v10503_v34 = vpop.f32.mrb[141].mxu0 }
0x1211   : > { %v5858_v36 = vpop.f32.mrb[142].mxu0  ;;  %v9617_v34 = vld [vmem:[%s13271_s3] ss:$0 sm:$0xff]  ;;  %s13273_s3 = sld [smem:[#allocation15_spill]] }
0x1212   : > { %v5880_v38 = vpack.c.bf16 %v5874_v32, %v5873_v24  ;;  %v10504_v37 = vpop.f32.mrb[143].mxu0  ;;  %v10970_v24 = vld [vmem:[%s13270_s10] sm:$0xff]  }
0x1213   : > { %10511 = vmatprep.subr.bf16.mxu1 %v10970_v24 }
0x1214   : > { %10508 = vmatmul.mubr.msk.bf16.vlgmr.msra.gmra.mrb[48].mxu0 %vm2073_vm8, %v5880_v38  ;;  %10512 = vmatpush3.bf16.msra.mxu1 %v10970_v24  ;;  %vm6559_vm8 = vcmask 1045504  }
0x1215   : > { %10540 = vmatpush3.bf16.msra.mxu0 %v6315_v40  ;;  %10541 = vmatprep.mubr.msk.bf16.mxu0 %vm11374_vm3, %v11373_v12 }
0x1216   : > { %10545 = vmatprep.subr.bf16.mxu0 %v11373_v12  ;;  %10513 = vmatprep.subr.bf16.mxu1 %v10971_v30 }
0x1218   : > { %10514 = vmatpush3.bf16.msra.mxu1 %v10971_v30 }
0x121c   : > { %10542 = vmatmul.mubr.msk.bf16.vlgmr.msra.gmra.mrb[144].mxu0 %vm6309_vm2, %v6308_v46  ;;  %vm6555_vm2 = vcmask 97280  }
0x121d   : > { %10547 = vmatprep.mubr.msk.bf16.mxu0 %vm11374_vm3, %v11373_v12 }
0x12e7   : > { %v10509_v35 = vpop.f32.mrb[48].mxu0 }
0x12e8   : > { %v5924_v43 = vpop.f32.mrb[49].mxu0  ;;  %v10827_v14 = vadd.f32 %v10509_v35, %v9521_v1 }
0x12e9   : > { %v10828_v31 = vadd.f32 %v9521_v1, %v5924_v43  ;;  %v10510_v52 = vpop.f32.mrb[50].mxu0 }
0x12ea   : > { %v10829_v53 = vadd.f32 %v10510_v52, %v9521_v1  ;;  %v5927_v0 = vpop.f32.mrb[51].mxu0  ;;  %v5945_v54 = vadd.f32 %v10827_v14, %v1819_v29  ;;  %v10968_v29 = vld [vmem:[%s13269_s5] sm:$0xff]   ;;  %s13277_s5 = sshll.u32 %s11692_s26, 3  ;;  %s13281_s26 = sld [smem:[#allocation27_spill]] }
0x12eb   : > { %v5943_v16 = vadd.f32 %v10828_v31, %v1817_v28  ;;  %v10830_v57 = vadd.f32 %v9521_v1, %v5927_v0 }
0x12ec   : > { %v5946_v55 = vadd.f32 %v10829_v53, %v1820_v26  ;;  %v5955_v23 = vsel %vm1703_vm6, %v5945_v54, 0.0 }
0x12ed   : > { %v5944_v47 = vadd.f32 %v10830_v57, %v1818_v27  ;;  %v5949_v41 = vsel %vm1703_vm6, %v5943_v16, 0.0  ;;  %v12558_v27 = vpack.c.bf16 %v6357_v15, %v6357_v15 }
0x12ee   : > { %5950 = vadd.xlane.f32.xlu1 %v5949_v41  ;;  %v5958_v19 = vsel %vm1703_vm6, %v5946_v55, 0.0  ;;  %v9597_v41 = vld [vmem:[%s13272_s16] ss:$0 sm:$0xff]  ;;  %s13275_s16 = sld [smem:[#allocation6_spill]] }
0x12ef   : > { %v6351_v56 = vpop.f32.mrb[144].mxu0  ;;  %v5952_v59 = vsel %vm1703_vm6, %v5944_v47, 0.0 }
0x12f0   : > { %v6359_v25 = vpack.c.bf16 %v6351_v56, %v6351_v56  ;;  %5953 = vadd.xlane.f32.xlu0 %v5952_v59  ;;  %v10543_v28 = vpop.f32.mrb[145].mxu0 }
0x12f1   : > { %v6354_v26 = vpop.f32.mrb[146].mxu0 }
0x12f2   : > { %5959 = vadd.xlane.f32.xlu1 %v5958_v19  ;;  %v6364_v22 = vsel %vm1485_vm1, %v6359_v25, 0  ;;  %v10544_v62 = vpop.f32.mrb[147].mxu0  ;;  %v9598_v25 = vld [vmem:[%s13273_s3] ss:$0 sm:$0xff]  ;;  %s13276_s3 = sld [smem:[#allocation26_spill]] }
0x12f3   : > { %10546 = vmatpush3.bf16.msra.mxu0 %v6364_v22 }
0x12f4   : > { %5956 = vadd.xlane.f32.xlu0 %v5955_v23  ;;  %10551 = vmatprep.subr.bf16.mxu0 %v11373_v12  ;;  %s1461_s6 = scalar_lea.vmem %s13275_s16, %s13277_s5  ;;  %s13282_s5 = sld [smem:[#allocation25_spill]] }
0x12f5   : > { %s13283_s16 = sld [smem:[#allocation31_spill]] }
0x12f6   : > { %10548 = vmatmul.mubr.msk.bf16.vlgmr.msra.gmra.mrb[148].mxu0 %vm1543_vm4, %v12558_v27 }
0x12f7   : > { %10555 = vmatprep.mubr.msk.bf16.mxu0 %vm11374_vm3, %v11373_v12  ;;  %10552 = vmatpush3.bf16.msra.mxu0 %v10968_v29 }
0x12f8   : > { %10553 = vmatprep.subr.bf16.mxu0 %v11373_v12 }
0x12fb   : > { %10554 = vmatpush3.bf16.msra.mxu0 %v10969_v3 }
0x12fc   : > { %10559 = vmatprep.subr.bf16.mxu0 %v11373_v12 }
0x137b   : > { %v5951_v61 = vpop.xlane.xlu1 %5950 }
0x137c   : > { %v5962_v4 = vmul.f32 0.03125, %v5951_v61 }
0x137d   : > { %v5954_v45 = vpop.xlane.xlu0 %5953 }
0x137e   : > { %v5966_v51 = vsub.f32 %v5943_v16, %v5962_v4  ;;  %v5963_v33 = vmul.f32 0.03125, %v5954_v45 }
0x137f   : > { %v5960_v5 = vpop.xlane.xlu1 %5959 }
0x1380   : > { %v5967_v49 = vsub.f32 %v5944_v47, %v5963_v33  ;;  %v5965_v6 = vmul.f32 0.03125, %v5960_v5  ;;  %v5970_v7 = vmul.f32 %v5966_v51, %v5966_v51  ;;  %v10972_v5 = vld [vmem:[%s13274_s4] sm:$0xff]  }
0x1381   : > { %v5957_v58 = vpop.xlane.xlu0 %5956  ;;  %10519 = vmatprep.subr.bf16.mxu1 %v10972_v5 }
0x1382   : > { %v5969_v60 = vsub.f32 %v5946_v55, %v5965_v6  ;;  %v5964_v8 = vmul.f32 0.03125, %v5957_v58  ;;  %v5974_v9 = vsel %vm1703_vm6, %v5970_v7, 0.0  ;;  %v5971_v11 = vmul.f32 %v5967_v49, %v5967_v49  ;;  %v10974_v6 = vld [vmem:[%s13274_s4 + $0x10] sm:$0xff]   ;;  %v10975_v7 = vld [vmem:[%s13274_s4 + $0x18] sm:$0xff]   ;;  %v10976_v58 = vld [vmem:[%s13274_s4 + $0x20] sm:$0xff]  }
0x1383   : > { %5975 = vadd.xlane.f32.xlu0 %v5974_v9  ;;  %v10979_v9 = vld [vmem:[%s13274_s4 + $0x38] sm:$0xff]  }
0x1384   : > { %v5968_v44 = vsub.f32 %v5945_v54, %v5964_v8  ;;  %v5977_v63 = vsel %vm1703_vm6, %v5971_v11, 0.0  ;;  %v5973_v48 = vmul.f32 %v5969_v60, %v5969_v60  ;;  %v10978_v8 = vld [vmem:[%s13274_s4 + $0x30] sm:$0xff]  }
0x1385   : > { %5978 = vadd.xlane.f32.xlu1 %v5977_v63 }
0x1386   : > { %v5972_v17 = vmul.f32 %v5968_v44, %v5968_v44  ;;  %v5983_v18 = vsel %vm1703_vm6, %v5973_v48, 0.0  ;;  %v10981_v48 = vld [vmem:[%s13276_s3] sm:$0x3f]  }
0x1388   : > { %v5980_v20 = vsel %vm1703_vm6, %v5972_v17, 0.0 }
0x1389   : > { %5984 = vadd.xlane.f32.xlu1 %v5983_v18  ;;  %5981 = vadd.xlane.f32.xlu0 %v5980_v20  ;;  %v6534_v18 = vld [vmem:[%s1461_s6] sm:$0xff]  ;;  %s13280_s6 = sld [smem:[#allocation19_spill]] }
0x138a   : > { %v6536_v30 = vrot.slane %v6534_v18, 7 }
0x13c9   : > { %v6400_v2 = vpop.f32.mrb[148].mxu0 }
0x13ca   : > { %v6406_v13 = vmul.f32 %v6400_v2, %v11733_v39  ;;  %v10549_v50 = vpop.f32.mrb[149].mxu0  ;;  %v6612_v2 = vsel %vm6559_vm8, %v10981_v48, 0 }
0x13cb   : > { %v6403_v21 = vpop.f32.mrb[150].mxu0 }
0x13cc   : > { %v6407_v32 = vadd.f32 %v6406_v13, %v6351_v56  ;;  %v10550_v36 = vpop.f32.mrb[151].mxu0  ;;  %v6538_v13 = vsel %vm1484_vm0, 0.0, %v6536_v30  ;;  %v9599_v21 = vld [vmem:[%s13278_s8] ss:$0 sm:$0xff]  ;;  %s13279_s8 = sld [smem:[#allocation28_spill]] }
0x13cd   : > { %v6545_v50 = vpack.c.bf16 %v6538_v13, %v6538_v13 }
0x13ce   : > { %v6408_v38 = vsel %vm1593_vm5, %v6407_v32, %v6351_v56 }
0x13cf   : > { %v6416_v37 = vadd.f32 %v9617_v34, %v6408_v38 }
0x13d1   : > { %v6417_v40 = vmax.f32 %v6416_v37, 0.0 }
0x13d3   : > { %v6422_v10 = vpack.c.bf16 %v6417_v40, %v6417_v40 }
0x13d5   : > { %10556 = vmatmul.mubr.msk.bf16.vlgmr.msra.gmra.mrb[152].mxu0 %vm1703_vm6, %v6422_v10 }
0x13d6   : > { %10561 = vmatprep.mubr.msk.bf16.mxu0 %vm11374_vm3, %v11373_v12 }
0x1410   : > { %v5976_v46 = vpop.xlane.xlu0 %5975 }
0x1411   : > { %v5986_v1 = vmul.f32 0.03125, %v5976_v46 }
0x1412   : > { %v5979_v35 = vpop.xlane.xlu1 %5978 }
0x1413   : > { %v5990_v43 = vadd.f32 1e-05, %v5986_v1  ;;  %v5987_v31 = vmul.f32 0.03125, %v5979_v35  ;;  %v10980_v35 = vld [vmem:[%s13276_s3 + $0x8] sm:$0x3f]  }
0x1415   : > { %11145 = vrsqrt.f32 %v5990_v43  ;;  %v5991_v52 = vadd.f32 1e-05, %v5987_v31 }
0x1416   : > { %v5985_v53 = vpop.xlane.xlu1 %5984  ;;  %v5982_v0 = vpop.xlane.xlu0 %5981 }
0x1417   : > { %11147 = vrsqrt.f32 %v5991_v52  ;;  %v5989_v14 = vmul.f32 0.03125, %v5985_v53  ;;  %v5988_v16 = vmul.f32 0.03125, %v5982_v0  ;;  %v6561_v0 = vsel %vm6559_vm8, %v10980_v35, 0 }
0x1419   : > { %v5993_v57 = vadd.f32 1e-05, %v5989_v14  ;;  %v5992_v55 = vadd.f32 1e-05, %v5988_v16  ;;  %v10982_v14 = vld [vmem:[%s13276_s3 + $0x10] sm:$0x3f]   ;;  %v6549_v16 = vpack.c.bf16 %v6534_v18, %v6534_v18 }
0x141a   : > { %s13287_s3 = sld [smem:[#allocation29_spill]] }
0x141b   : > { %11149 = vrsqrt.f32 %v5993_v57  ;;  %v6539_v57 = vrot.slane %v6534_v18, 1 }
0x141c   : > { %11151 = vrsqrt.f32 %v5992_v55  ;;  %v6667_v55 = vsel %vm6559_vm8, %v10982_v14, 0 }
0x141f   : > { %v11146_v47 = vpop.eup %11145 }
0x1420   : > { %v5998_v54 = vmul.f32 %v11146_v47, %v5966_v51 }
0x1421   : > { %v11148_v56 = vpop.eup %11147 }
0x1422   : > { %v5999_v59 = vmul.f32 %v11148_v56, %v5967_v49  ;;  %v6008_v15 = vmul.f32 %v9597_v41, %v5998_v54  ;;  %v10973_v49 = vld [vmem:[%s13274_s4 + $0x8] sm:$0xff]   ;;  %v10983_v54 = vld [vmem:[%s13279_s8 + $0x10] sm:$0xff]   ;;  %v10984_v56 = vld [vmem:[%s13279_s8] sm:$0xff]  }
0x1424   : > { %v6009_v28 = vmul.f32 %v9597_v41, %v5999_v59  ;;  %v12584_v62 = vadd.f32 %v9598_v25, %v6008_v15  ;;  %v10985_v59 = vld [vmem:[%s13279_s8 + $0x18] sm:$0xff]   ;;  %v10986_v15 = vld [vmem:[%s13279_s8 + $0x8] sm:$0xff]  }
0x1425   : > { %v11150_v19 = vpop.eup %11149 }
0x1426   : > { %v11152_v26 = vpop.eup %11151  ;;  %v6001_v22 = vmul.f32 %v11150_v19, %v5969_v60  ;;  %v12586_v23 = vadd.f32 %v9598_v25, %v6009_v28  ;;  %v10977_v60 = vld [vmem:[%s13274_s4 + $0x28] sm:$0xff]   ;;  %s13289_s4 = sld [smem:[#allocation21_spill]] }
0x1427   : > { %v6000_v29 = vmul.f32 %v11152_v26, %v5968_v44 }
0x1428   : > { %v6011_v3 = vmul.f32 %v9597_v41, %v6001_v22  ;;  %v6026_v61 = vpack.c.bf16 %v12586_v23, %v12584_v62 }
0x1429   : > { %v6010_v4 = vmul.f32 %v9597_v41, %v6000_v29 }
0x142a   : > { %10515 = vmatprep.mubr.msk.bf16.mxu1 %vm1703_vm6, %v6026_v61  ;;  %v12591_v45 = vadd.f32 %v9598_v25, %v6011_v3 }
0x142b   : > { %v12593_v51 = vadd.f32 %v9598_v25, %v6010_v4 }
0x142d   : > { %v6027_v33 = vpack.c.bf16 %v12591_v45, %v12593_v51 }
0x142f   : > { %10516 = vmatmul.mubr.msk.bf16.vlgmr.msra.gmra.mrb[148].mxu1 %vm1703_vm6, %v6027_v33 }
0x1430   : > { %10520 = vmatpush3.bf16.msra.mxu1 %v10972_v5 }
0x1431   : > { %10521 = vmatprep.subr.bf16.mxu1 %v10973_v49 }
0x1434   : > { %10522 = vmatpush3.bf16.msra.mxu1 %v10973_v49  ;;  %v9604_v49 = vld [vmem:[%s13280_s6] ss:$0 sm:$0xff]  ;;  %s13284_s6 = sld [smem:[#allocation33_spill]] }
0x1435   : > { %10523 = vmatprep.subr.bf16.mxu1 %v10974_v6 }
0x1438   : > { %10524 = vmatpush3.bf16.msra.mxu1 %v10974_v6 }
0x1439   : > { %10525 = vmatprep.subr.bf16.mxu1 %v10975_v7 }
0x143c   : > { %10526 = vmatpush3.bf16.msra.mxu1 %v10975_v7 }
0x143d   : > { %10527 = vmatprep.subr.bf16.mxu1 %v10976_v58 }
0x1440   : > { %10528 = vmatpush3.bf16.msra.mxu1 %v10976_v58 }
0x1441   : > { %10529 = vmatprep.subr.bf16.mxu1 %v10977_v60 }
0x1444   : > { %10530 = vmatpush3.bf16.msra.mxu1 %v10977_v60 }
0x1445   : > { %10531 = vmatprep.subr.bf16.mxu1 %v10978_v8 }
0x1448   : > { %10532 = vmatpush3.bf16.msra.mxu1 %v10978_v8 }
0x1449   : > { %10533 = vmatprep.subr.bf16.mxu1 %v10979_v9 }
0x144c   : > { %10534 = vmatpush3.bf16.msra.mxu1 %v10979_v9 }
0x144d   : > { %10565 = vmatprep.subr.bf16.mxu1 %v11373_v12 }
0x14a8   : > { %v12610_v11 = vpop.f32.mrb[152].mxu0 }
0x14a9   : > { %v6478_v44 = vpack.c.bf16 %v12610_v11, %v12610_v11  ;;  %v10557_v63 = vpop.f32.mrb[153].mxu0 }
0x14aa   : > { %v6475_v17 = vpop.f32.mrb[154].mxu0 }
0x14ab   : > { %v10558_v20 = vpop.f32.mrb[155].mxu0  ;;  %v6480_v24 = vsel %vm1485_vm1, %v6478_v44, 0 }
0x14ac   : > { %10560 = vmatpush3.bf16.msra.mxu0 %v6480_v24 }
0x14ad   : > { %10571 = vmatprep.subr.bf16.mxu0 %v11373_v12 }
0x14af   : > { %10562 = vmatmul.mubr.msk.bf16.vlgmr.msra.gmra.mrb[156].mxu0 %vm1543_vm4, %v12558_v27  ;;  %vm13208_vm4 = vcmask 1046528  }
0x14b0   : > { %10572 = vmatpush3.bf16.msra.mxu0 %v6612_v2  ;;  %10573 = vmatprep.mubr.msk.bf16.mxu0 %vm11374_vm3, %v11373_v12  ;;  %v6542_v47 = vsel %vm13208_vm4, %v6539_v57, 0.0 }
0x14b1   : > { %10583 = vmatprep.subr.bf16.mxu0 %v11373_v12  ;;  %v6657_v41 = vpack.c.bf16 %v6542_v47, %v6542_v47 }
0x14b7   : > { %10574 = vmatmul.mubr.msk.bf16.vlgmr.msra.gmra.mrb[160].mxu0 %vm6555_vm2, %v6545_v50  ;;  %v9633_v50 = vld [vmem:[%s13281_s26] ss:$0 sm:$0xff]  ;;  %s13285_s26 = sld [smem:[#allocation32_spill]] }
0x14b8   : > { %10587 = vmatprep.mubr.msk.bf16.mxu0 %vm11374_vm3, %v11373_v12  ;;  %10584 = vmatpush3.bf16.msra.mxu0 %v10983_v54  ;;  %v7166_v54 = vpack.c.b16 %v11911_v42, %v11911_v42 }
0x14b9   : > { %10585 = vmatprep.subr.bf16.mxu0 %v11373_v12 }
0x14bc   : > { %10586 = vmatpush3.bf16.msra.mxu0 %v10985_v59 }
0x14bd   : > { %10599 = vmatprep.subr.bf16.mxu0 %v11373_v12  ;;  %v10994_v59 = vld [vmem:[%s13285_s26 + $0x8] sm:$0xff]  }
0x1502   : > { %v10517_v32 = vpop.f32.mrb[148].mxu1 }
0x1503   : > { %v6096_v34 = vadd.f32 %v10517_v32, %v9599_v21  ;;  %v6087_v27 = vpop.f32.mrb[149].mxu1 }
0x1504   : > { %v6088_v36 = vadd.f32 %v9599_v21, %v6087_v27  ;;  %v10518_v38 = vpop.f32.mrb[150].mxu1 }
0x1505   : > { %v6099_v37 = vadd.f32 %v10518_v38, %v9599_v21  ;;  %v6090_v40 = vpop.f32.mrb[151].mxu1  ;;  %v6104_v46 = vmax.f32 %v6096_v34, 0.0 }
0x1506   : > { %v6091_v10 = vadd.f32 %v9599_v21, %v6090_v40  ;;  %v6102_v43 = vmax.f32 %v6088_v36, 0.0  ;;  %v9622_v40 = vld [vmem:[%s13282_s5] ss:$0 sm:$0xff]  ;;  %s13286_s5 = sld [smem:[#allocation30_spill]] }
0x1507   : > { %v6105_v1 = vmax.f32 %v6099_v37, 0.0  ;;  %v10987_v37 = vld [vmem:[%s13279_s8 + $0x20] sm:$0xff]  }
0x1508   : > { %v6103_v31 = vmax.f32 %v6091_v10, 0.0 }
0x1509   : > { %v6123_v52 = vpack.c.bf16 %v6105_v1, %v6104_v46 }
0x150a   : > { %v6122_v53 = vpack.c.bf16 %v6103_v31, %v6102_v43  ;;  %v10988_v43 = vld [vmem:[%s13283_s16] sm:$0xff]  }
0x150c   : > { %10535 = vmatprep.mubr.bf16.mxu1 %v6122_v53 }
0x150d   : > { %10536 = vmatmul.mubr.bf16.vlgmr.msra.gmra.mrb[152].mxu1 %v6123_v52 }
0x150e   : > { %10566 = vmatpush3.bf16.msra.mxu1 %v6561_v0  ;;  %10567 = vmatprep.mubr.msk.bf16.mxu1 %vm11374_vm3, %v11373_v12  ;;  %v10989_v0 = vld [vmem:[%s13279_s8 + $0x28] sm:$0xff]   ;;  %s13295_s8 = sld [smem:[#allocation40_spill]] }
0x150f   : > { %10577 = vmatprep.subr.bf16.mxu1 %v11373_v12 }
0x1515   : > { %10568 = vmatmul.mubr.msk.bf16.vlgmr.msra.gmra.mrb[156].mxu1 %vm6555_vm2, %v6549_v16  ;;  %v10990_v16 = vld [vmem:[%s13283_s16 + $0x8] sm:$0xff]  }
0x1516   : > { %10578 = vmatpush3.bf16.msra.mxu1 %v6667_v55  ;;  %10579 = vmatprep.mubr.msk.bf16.mxu1 %vm11374_vm3, %v11373_v12  ;;  %v10991_v55 = vld [vmem:[%s13284_s6] sm:$0xff]  }
0x1517   : > { %10591 = vmatprep.subr.bf16.mxu1 %v11373_v12 }
0x151d   : > { %10580 = vmatmul.mubr.msk.bf16.vlgmr.msra.gmra.mrb[160].mxu1 %vm6555_vm2, %v6657_v41  ;;  %v10992_v41 = vld [vmem:[%s13284_s6 + $0x8] sm:$0xff]   ;;  %s13294_s6 = sld [smem:[#allocation39_spill]] }
0x151e   : > { %10595 = vmatprep.mubr.msk.bf16.mxu1 %vm11374_vm3, %v11373_v12  ;;  %10592 = vmatpush3.bf16.msra.mxu1 %v10984_v56  ;;  %v10993_v56 = vld [vmem:[%s13285_s26] sm:$0xff]  }
0x151f   : > { %10593 = vmatprep.subr.bf16.mxu1 %v11373_v12 }
0x1522   : > { %10594 = vmatpush3.bf16.msra.mxu1 %v10986_v15 }
0x1523   : > { %10607 = vmatprep.subr.bf16.mxu1 %v11373_v12 }
0x1582   : > { %v6516_v25 = vpop.f32.mrb[156].mxu0 }
0x1583   : > { %v6522_v28 = vmul.f32 %v6516_v25, %v11733_v39  ;;  %v10563_v19 = vpop.f32.mrb[157].mxu0 }
0x1584   : > { %v6519_v26 = vpop.f32.mrb[158].mxu0 }
0x1585   : > { %v6523_v22 = vadd.f32 %v6522_v28, %v12610_v11  ;;  %v10564_v29 = vpop.f32.mrb[159].mxu0 }
0x1587   : > { %v6524_v3 = vsel %vm1593_vm5, %v6523_v22, %v12610_v11 }
0x1588   : > { %v6532_v31 = vadd.f32 %v9622_v40, %v6524_v3 }
0x158a   : > { %v6648_v61 = vpop.f32.mrb[160].mxu0  ;;  %v6533_v57 = vmax.f32 %v6532_v31, 0.0 }
0x158b   : > { %v10575_v4 = vpop.f32.mrb[161].mxu0 }
0x158c   : > { %v6651_v33 = vpop.f32.mrb[162].mxu0  ;;  %v7000_v47 = vpack.c.bf16 %v6533_v57, %v6533_v57 }
0x158d   : > { %v10576_v5 = vpop.f32.mrb[163].mxu0 }
0x15e0   : > { %v10537_v6 = vpop.f32.mrb[152].mxu1 }
0x15e1   : > { %v6213_v7 = vpop.f32.mrb[153].mxu1  ;;  %v6222_v58 = vadd.f32 %v10537_v6, %v9604_v49 }
0x15e2   : > { %v6214_v60 = vadd.f32 %v9604_v49, %v6213_v7  ;;  %v10538_v8 = vpop.f32.mrb[154].mxu1 }
0x15e3   : > { %v6216_v9 = vpop.f32.mrb[155].mxu1  ;;  %v6225_v44 = vadd.f32 %v10538_v8, %v9604_v49  ;;  %v12660_v48 = vadd.f32 %v6222_v58, %v12593_v51 }
0x15e4   : > { %v12657_v39 = vadd.f32 %v6214_v60, %v12584_v62  ;;  %v6217_v63 = vadd.f32 %v9604_v49, %v6216_v9 }
0x15e5   : > { %v12668_v18 = vadd.f32 %v6225_v44, %v12591_v45 }
0x15e6   : > { %v12663_v11 = vadd.f32 %v6217_v63, %v12586_v23  ;;  %v6234_v17 = vsel %vm1703_vm6, %v12657_v39, 0.0  ;;  %v6240_v23 = vsel %vm1703_vm6, %v12660_v48, 0.0 }
0x15e7   : > { %6235 = vadd.xlane.f32.xlu0 %v6234_v17  ;;  %v6243_v13 = vsel %vm1703_vm6, %v12668_v18, 0.0 }
0x15e8   : > { %v6237_v62 = vsel %vm1703_vm6, %v12663_v11, 0.0  ;;  %v6597_v20 = vpop.f32.mrb[156].mxu1 }
0x15e9   : > { %6238 = vadd.xlane.f32.xlu1 %v6237_v62  ;;  %v10569_v24 = vpop.f32.mrb[157].mxu1  ;;  %v6649_v51 = vadd.f32 %v6648_v61, %v6597_v20 }
0x15ea   : > { %v6600_v30 = vpop.f32.mrb[158].mxu1 }
0x15eb   : > { %6241 = vadd.xlane.f32.xlu0 %v6240_v23  ;;  %v10570_v2 = vpop.f32.mrb[159].mxu1  ;;  %v9651_v23 = vld [vmem:[%s13287_s3] ss:$0 sm:$0xff]  ;;  %s13288_s3 = sld [smem:[#allocation20_spill]] }
0x15ed   : > { %6244 = vadd.xlane.f32.xlu1 %v6243_v13 }
0x15f0   : > { %v6703_v45 = vpop.f32.mrb[160].mxu1 }
0x15f1   : > { %v6709_v21 = vadd.f32 %v6703_v45, %v6649_v51  ;;  %v10581_v32 = vpop.f32.mrb[161].mxu1 }
0x15f2   : > { %v6706_v34 = vpop.f32.mrb[162].mxu1 }
0x15f3   : > { %v6717_v27 = vadd.f32 %v9633_v50, %v6709_v21  ;;  %v10582_v36 = vpop.f32.mrb[163].mxu1 }
0x15f5   : > { %v6718_v38 = vmax.f32 %v6717_v27, 0.0 }
0x15f7   : > { %v6720_v10 = vrot.slane %v6718_v38, 7  ;;  %v6723_v46 = vrot.slane %v6718_v38, 1  ;;  %v6736_v1 = vpack.c.bf16 %v6718_v38, %v6718_v38 }
0x15f9   : > { %v6722_v35 = vsel %vm1484_vm0, 0.0, %v6720_v10  ;;  %10588 = vmatmul.mubr.msk.bf16.vlgmr.msra.gmra.mrb[164].mxu0 %vm1703_vm6, %v6736_v1  ;;  %v6725_v52 = vsel %vm13208_vm4, %v6723_v46, 0.0  ;;  %v12745_v10 = vld [vmem:[%s13286_s5] sm:$0xff]  }
0x15fa   : > { %v6730_v53 = vpack.c.bf16 %v6722_v35, %v6722_v35  ;;  %10600 = vmatpush3.bf16.msra.mxu0 %v10987_v37  ;;  %10603 = vmatprep.mubr.msk.bf16.mxu0 %vm11374_vm3, %v11373_v12  ;;  %v6852_v14 = vpack.c.bf16 %v6725_v52, %v6725_v52  ;;  %v10996_v37 = vld [vmem:[%s13286_s5 + $0x18] sm:$0xff]  }
0x15fb   : > { %10601 = vmatprep.subr.bf16.mxu0 %v11373_v12 }
0x15fc   : > { %10596 = vmatmul.mubr.msk.bf16.vlgmr.msra.gmra.mrb[164].mxu1 %vm1703_vm6, %v6730_v53 }
0x15fd   : > { %10608 = vmatpush3.bf16.msra.mxu1 %v10988_v43  ;;  %10611 = vmatprep.mubr.msk.bf16.mxu1 %vm11374_vm3, %v11373_v12 }
0x15fe   : > { %10602 = vmatpush3.bf16.msra.mxu0 %v10989_v0  ;;  %10609 = vmatprep.subr.bf16.mxu1 %v11373_v12 }
0x15ff   : > { %10615 = vmatprep.subr.bf16.mxu0 %v11373_v12 }
0x1601   : > { %10604 = vmatmul.mubr.msk.bf16.vlgmr.msra.gmra.mrb[168].mxu0 %vm1703_vm6, %v6852_v14  ;;  %10610 = vmatpush3.bf16.msra.mxu1 %v10990_v16 }
0x1602   : > { %10623 = vmatprep.subr.bf16.mxu1 %v11373_v12  ;;  %10619 = vmatprep.mubr.msk.bf16.mxu0 %vm11374_vm3, %v11373_v12 }
0x1603   : > { %10616 = vmatpush3.bf16.msra.mxu0 %v10993_v56  ;;  %v7235_v56 = vlaneseq }
0x1604   : > { %10612 = vmatmul.mubr.msk.bf16.vlgmr.msra.gmra.mrb[168].mxu1 %vm1703_vm6, %v7000_v47  ;;  %10617 = vmatprep.subr.bf16.mxu0 %v11373_v12 }
0x1605   : > { %10624 = vmatpush3.bf16.msra.mxu1 %v10991_v55  ;;  %10627 = vmatprep.mubr.msk.bf16.mxu1 %vm11374_vm3, %v11373_v12 }
0x1606   : > { %10625 = vmatprep.subr.bf16.mxu1 %v11373_v12 }
0x1607   : > { %10618 = vmatpush3.bf16.msra.mxu0 %v10994_v59  ;;  %v12748_v59 = vshrl.u32 %v7235_v56, 7 }
0x1609   : > { %10626 = vmatpush3.bf16.msra.mxu1 %v10992_v41  ;;  %vm7270_vm2 = vcmp.eq.s32.totalorder %v12748_v59, 1  ;;  %vm7237_vm4 = vcmp.eq.s32.totalorder %v12748_v59, 0 }
0x160a   : > { %10663 = vmatprep.subr.bf16.mxu1 %v11373_v12 }
0x160c   : > { %10628 = vmatmul.mubr.msk.bf16.vlgmr.msra.gmra.mrb[172].mxu1 %vm1703_vm6, %v7166_v54 }
0x160d   : > { %10671 = vmatprep.mubr.msk.bf16.mxu1 %vm11374_vm3, %v11373_v12 }
0x1674   : > { %v6236_v15 = vpop.xlane.xlu0 %6235 }
0x1675   : > { %v6246_v25 = vmul.f32 0.03125, %v6236_v15 }
0x1676   : > { %v6239_v28 = vpop.xlane.xlu1 %6238 }
0x1677   : > { %v12713_v19 = vsub.f32 %v12657_v39, %v6246_v25  ;;  %v6247_v42 = vmul.f32 0.03125, %v6239_v28  ;;  %v10995_v39 = vld [vmem:[%s13286_s5 + $0x10] sm:$0xff]   ;;  %v9613_v25 = vld [vmem:[%s13288_s3] ss:$0 sm:$0xff]  ;;  %s13291_s3 = sld [smem:[#allocation37_spill]] }
0x1678   : > { %v6242_v26 = vpop.xlane.xlu0 %6241  ;;  %10631 = vmatprep.subr.bf16.mxu0 %v10995_v39 }
0x1679   : > { %v12716_v22 = vsub.f32 %v12663_v11, %v6247_v42  ;;  %v6248_v29 = vmul.f32 0.03125, %v6242_v26  ;;  %v6254_v3 = vmul.f32 %v12713_v19, %v12713_v19  ;;  %v9614_v26 = vld [vmem:[%s13289_s4] ss:$0 sm:$0xff]  ;;  %s13290_s4 = sld [smem:[#allocation34_spill]] }
0x167a   : > { %v6245_v61 = vpop.xlane.xlu1 %6244 }
0x167b   : > { %v12721_v4 = vsub.f32 %v12660_v48, %v6248_v29  ;;  %v6249_v33 = vmul.f32 0.03125, %v6245_v61  ;;  %v6258_v5 = vsel %vm1703_vm6, %v6254_v3, 0.0  ;;  %v6255_v49 = vmul.f32 %v12716_v22, %v12716_v22 }
0x167c   : > { %6259 = vadd.xlane.f32.xlu0 %v6258_v5 }
0x167d   : > { %v12727_v6 = vsub.f32 %v12668_v18, %v6249_v33  ;;  %v6261_v7 = vsel %vm1703_vm6, %v6255_v49, 0.0  ;;  %v6256_v58 = vmul.f32 %v12721_v4, %v12721_v4 }
0x167e   : > { %6262 = vadd.xlane.f32.xlu1 %v6261_v7 }
0x167f   : > { %v6264_v60 = vsel %vm1703_vm6, %v6256_v58, 0.0  ;;  %v6257_v8 = vmul.f32 %v12727_v6, %v12727_v6  ;;  %v9663_v58 = vsel %vm7270_vm2, 1.0, %v11373_v12  ;;  %vm7543_vm2 = vcmp.eq.s32.totalorder %v12748_v59, 3 }
0x1680   : > { %6265 = vadd.xlane.f32.xlu0 %v6264_v60 }
0x1681   : > { %v6267_v9 = vsel %vm1703_vm6, %v6257_v8, 0.0 }
0x1682   : > { %6268 = vadd.xlane.f32.xlu1 %v6267_v9 }
0x16cc   : > { %v6786_v44 = vpop.f32.mrb[164].mxu0 }
0x16cd   : > { %v10589_v63 = vpop.f32.mrb[165].mxu0 }
0x16ce   : > { %v6789_v48 = vpop.f32.mrb[166].mxu0 }
0x16cf   : > { %v6841_v11 = vpop.f32.mrb[164].mxu1  ;;  %v10590_v17 = vpop.f32.mrb[167].mxu0  ;;  %v9662_v48 = vsel %vm7237_vm4, 1.0, %v11373_v12  ;;  %vm7438_vm4 = vcmp.eq.s32.totalorder %v12748_v59, 2 }
0x16d0   : > { %v6842_v18 = vadd.f32 %v6841_v11, %v6786_v44  ;;  %v10597_v62 = vpop.f32.mrb[165].mxu1 }
0x16d1   : > { %v6844_v20 = vpop.f32.mrb[166].mxu1 }
0x16d2   : > { %v10598_v24 = vpop.f32.mrb[167].mxu1 }
0x16d4   : > { %v6902_v51 = vpop.f32.mrb[168].mxu0 }
0x16d5   : > { %v6908_v30 = vadd.f32 %v6902_v51, %v6842_v18  ;;  %v10605_v2 = vpop.f32.mrb[169].mxu0 }
0x16d6   : > { %v6905_v13 = vpop.f32.mrb[170].mxu0 }
0x16d7   : > { %v6916_v45 = vadd.f32 %v9651_v23, %v6908_v30  ;;  %v12738_v50 = vpop.f32.mrb[168].mxu1  ;;  %v10606_v21 = vpop.f32.mrb[171].mxu0 }
0x16d8   : > { %v10613_v32 = vpop.f32.mrb[169].mxu1 }
0x16d9   : > { %v6917_v34 = vmax.f32 %v6916_v45, 0.0  ;;  %v7053_v27 = vpop.f32.mrb[170].mxu1 }
0x16da   : > { %v10614_v36 = vpop.f32.mrb[171].mxu1 }
0x16db   : > { %v7067_v38 = vpack.c.bf16 %v6917_v34, %v6917_v34 }
0x16dd   : > { %10620 = vmatmul.mubr.msk.bf16.vlgmr.msra.gmra.mrb[172].mxu0 %vm1703_vm6, %v7067_v38 }
0x16de   : > { %10632 = vmatpush3.bf16.msra.mxu0 %v10995_v39 }
0x16df   : > { %v12742_v40 = vpop.f32.mrb[172].mxu1  ;;  %10633 = vmatprep.subr.bf16.mxu0 %v10996_v37 }
0x16e0   : > { %v10629_v46 = vpop.f32.mrb[173].mxu1 }
0x16e1   : > { %v7219_v1 = vpop.f32.mrb[174].mxu1 }
0x16e2   : > { %v10630_v35 = vpop.f32.mrb[175].mxu1  ;;  %10634 = vmatpush3.bf16.msra.mxu0 %v10996_v37  ;;  %v10998_v1 = vld [vmem:[%s13286_s5 + $0x8] sm:$0xff]  }
0x16e3   : > { %10639 = vmatprep.subr.bf16.mxu0 %v12745_v10 }
0x1709   : > { %v6260_v43 = vpop.xlane.xlu0 %6259 }
0x170a   : > { %v6270_v31 = vmul.f32 0.03125, %v6260_v43 }
0x170b   : > { %v6263_v52 = vpop.xlane.xlu1 %6262 }
0x170c   : > { %v6274_v53 = vadd.f32 1e-05, %v6270_v31  ;;  %v6271_v0 = vmul.f32 0.03125, %v6263_v52  ;;  %v9676_v31 = vsel %vm7438_vm4, 1.0, %v11373_v12  ;;  %v10999_v52 = vld [vmem:[%s13286_s5 + $0x20] sm:$0xff]   ;;  %vm7660_vm4 = vcmask 519168  }
0x170d   : > { %v6266_v14 = vpop.xlane.xlu0 %6265 }
0x170e   : > { %11153 = vrsqrt.f32 %v6274_v53  ;;  %v6275_v16 = vadd.f32 1e-05, %v6271_v0  ;;  %v6272_v57 = vmul.f32 0.03125, %v6266_v14 }
0x170f   : > { %v6269_v55 = vpop.xlane.xlu1 %6268 }
0x1710   : > { %11155 = vrsqrt.f32 %v6275_v16  ;;  %v6276_v47 = vadd.f32 1e-05, %v6272_v57  ;;  %v6273_v41 = vmul.f32 0.03125, %v6269_v55 }
0x1712   : > { %11157 = vrsqrt.f32 %v6276_v47  ;;  %v6277_v54 = vadd.f32 1e-05, %v6273_v41 }
0x1714   : > { %11159 = vrsqrt.f32 %v6277_v54 }
0x1718   : > { %v11154_v15 = vpop.eup %11153 }
0x1719   : > { %v6282_v28 = vmul.f32 %v11154_v15, %v12713_v19 }
0x171a   : > { %v11156_v42 = vpop.eup %11155 }
0x171b   : > { %v6292_v29 = vmul.f32 %v9613_v25, %v6282_v28  ;;  %v6283_v3 = vmul.f32 %v11156_v42, %v12716_v22 }
0x171c   : > { %v11158_v61 = vpop.eup %11157 }
0x171d   : > { %v12755_v33 = vadd.f32 %v9614_v26, %v6292_v29  ;;  %v6293_v5 = vmul.f32 %v9613_v25, %v6283_v3  ;;  %v6284_v49 = vmul.f32 %v11158_v61, %v12721_v4  ;;  %v11001_v29 = vld [vmem:[%s13286_s5 + $0x30] sm:$0xff]  }
0x171e   : > { %v11160_v7 = vpop.eup %11159 }
0x171f   : > { %v12760_v60 = vadd.f32 %v9614_v26, %v6293_v5  ;;  %v6294_v19 = vmul.f32 %v9613_v25, %v6284_v49  ;;  %v6285_v8 = vmul.f32 %v11160_v7, %v12727_v6  ;;  %v12765_v22 = vcombine.high %v12755_v33, %v12755_v33 }
0x1720   : > { %v7273_v63 = vmul.f32 %v9663_v58, %v12755_v33  ;;  %v7240_v34 = vmul.f32 %v9662_v48, %v12755_v33  ;;  %v7441_v47 = vmul.f32 %v9676_v31, %v12755_v33 }
0x1721   : > { %v12767_v9 = vadd.f32 %v9614_v26, %v6294_v19  ;;  %v6295_v39 = vmul.f32 %v9613_v25, %v6285_v8  ;;  %v7228_v4 = vcombine.high %v12760_v60, %v12760_v60  ;;  %v7274_v44 = vmul.f32 %v9663_v58, %v12765_v22  ;;  %v11000_v25 = vld [vmem:[%s13286_s5 + $0x28] sm:$0xff]  }
0x1722   : > { %v7275_v6 = vmul.f32 %v9663_v58, %v12760_v60  ;;  %v7241_v30 = vmul.f32 %v9662_v48, %v12765_v22  ;;  %v7242_v2 = vmul.f32 %v9662_v48, %v12760_v60  ;;  %v7442_v16 = vmul.f32 %v9676_v31, %v12765_v22 }
0x1723   : > { %v12774_v11 = vadd.f32 %v9614_v26, %v6295_v39  ;;  %v7276_v17 = vmul.f32 %v9663_v58, %v7228_v4  ;;  %v12779_v18 = vcombine.high %v12767_v9, %v12767_v9  ;;  %v7243_v62 = vmul.f32 %v9662_v48, %v7228_v4 }
0x1724   : > { %v7294_v20 = vcombine.low %v7273_v63, %v7274_v44  ;;  %v7277_v45 = vmul.f32 %v9663_v58, %v12767_v9  ;;  %v7260_v37 = vcombine.low %v7240_v34, %v7241_v30  ;;  %v7444_v53 = vmul.f32 %v9676_v31, %v7228_v4 }
0x1725   : > { %v7295_v24 = vcombine.low %v7275_v6, %v7276_v17  ;;  %v12783_v51 = vcombine.high %v12774_v11, %v12774_v11  ;;  %v7278_v23 = vmul.f32 %v9663_v58, %v12779_v18  ;;  %v7279_v21 = vmul.f32 %v9663_v58, %v12774_v11 }
0x1726   : > { %v7261_v27 = vcombine.low %v7242_v2, %v7243_v62  ;;  %v7245_v0 = vmul.f32 %v9662_v48, %v12779_v18  ;;  %v7246_v14 = vmul.f32 %v9662_v48, %v12774_v11  ;;  %v7443_v57 = vmul.f32 %v9676_v31, %v12760_v60 }
0x1727   : > { %v7302_v13 = vpack.c.bf16 %v7295_v24, %v7294_v20  ;;  %v7280_v32 = vmul.f32 %v9663_v58, %v12783_v51  ;;  %v7296_v36 = vcombine.low %v7277_v45, %v7278_v23  ;;  %v7247_v43 = vmul.f32 %v9662_v48, %v12783_v51  ;;  %v9655_v24 = vld [vmem:[%s13290_s4] ss:$0 sm:$0xff]  ;;  %s13292_s4 = sld [smem:[#allocation35_spill]] }
0x1728   : > { %v7268_v35 = vpack.c.bf16 %v7261_v27, %v7260_v37  ;;  %v7244_v55 = vmul.f32 %v9662_v48, %v12767_v9  ;;  %v7463_v41 = vcombine.low %v7443_v57, %v7444_v53  ;;  %v7462_v56 = vcombine.low %v7441_v47, %v7442_v16 }
0x1729   : > { %10635 = vmatprep.mubr.msk.bf16.mxu0 %vm1703_vm6, %v7302_v13  ;;  %v7297_v38 = vcombine.low %v7279_v21, %v7280_v32  ;;  %v7448_v42 = vmul.f32 %v9676_v31, %v12783_v51  ;;  %v9685_v26 = vsel %vm7543_vm2, 1.0, %v11373_v12  ;;  %v7446_v61 = vmul.f32 %v9676_v31, %v12779_v18 }
0x172a   : > { %v7262_v54 = vcombine.low %v7244_v55, %v7245_v0  ;;  %v7470_v28 = vpack.c.bf16 %v7463_v41, %v7462_v56  ;;  %v7549_v3 = vmul.f32 %v9685_v26, %v7228_v4  ;;  %v7447_v5 = vmul.f32 %v9676_v31, %v12774_v11  ;;  %v11002_v4 = vld [vmem:[%s13286_s5 + $0x38] sm:$0xff]   ;;  %s13293_s5 = sld [smem:[#allocation36_spill]] }
0x172b   : > { %v7303_v46 = vpack.c.bf16 %v7297_v38, %v7296_v36  ;;  %v7547_v59 = vmul.f32 %v9685_v26, %v12765_v22  ;;  %v7548_v49 = vmul.f32 %v9685_v26, %v12760_v60  ;;  %v7445_v7 = vmul.f32 %v9676_v31, %v12767_v9 }
0x172c   : > { %v7465_v58 = vcombine.low %v7447_v5, %v7448_v42  ;;  %v7546_v19 = vmul.f32 %v9685_v26, %v12755_v33  ;;  %v7553_v60 = vmul.f32 %v9685_v26, %v12783_v51  ;;  %v7551_v22 = vmul.f32 %v9685_v26, %v12779_v18 }
0x172d   : > { %10636 = vmatmul.mubr.msk.bf16.vlgmr.msra.gmra.mrb[176].mxu0 %vm1703_vm6, %v7303_v46  ;;  %v7568_v8 = vcombine.low %v7548_v49, %v7549_v3  ;;  %v7464_v39 = vcombine.low %v7445_v7, %v7446_v61  ;;  %v7552_v6 = vmul.f32 %v9685_v26, %v12774_v11  ;;  %v7550_v33 = vmul.f32 %v9685_v26, %v12767_v9 }
0x172e   : > { %10643 = vmatprep.mubr.msk.bf16.mxu0 %vm1703_vm6, %v7268_v35  ;;  %10640 = vmatpush3.bf16.msra.mxu0 %v12745_v10  ;;  %v7263_v10 = vcombine.low %v7246_v14, %v7247_v43  ;;  %v7567_v44 = vcombine.low %v7546_v19, %v7547_v59  ;;  %v7062_v51 = vadd.f32 %v9655_v24, %v12738_v50 }
0x172f   : > { %10641 = vmatprep.subr.bf16.mxu0 %v10998_v1  ;;  %v7471_v63 = vpack.c.bf16 %v7465_v58, %v7464_v39  ;;  %v7570_v17 = vcombine.low %v7552_v6, %v7553_v60  ;;  %v7569_v62 = vcombine.low %v7550_v33, %v7551_v22 }
0x1730   : > { %v7269_v15 = vpack.c.bf16 %v7263_v10, %v7262_v54  ;;  %v7575_v48 = vpack.c.bf16 %v7568_v8, %v7567_v44 }
0x1731   : > { %v7576_v20 = vpack.c.bf16 %v7570_v17, %v7569_v62 }
0x1732   : > { %10642 = vmatpush3.bf16.msra.mxu0 %v10998_v1 }
0x1733   : > { %10647 = vmatprep.subr.bf16.mxu0 %v10999_v52 }
0x1739   : > { %10644 = vmatmul.mubr.msk.bf16.vlgmr.msra.gmra.mrb[176].mxu0 %vm1703_vm6, %v7269_v15 }
0x173a   : > { %10651 = vmatprep.mubr.msk.bf16.mxu0 %vm1703_vm6, %v7470_v28  ;;  %10648 = vmatpush3.bf16.msra.mxu0 %v10999_v52 }
0x173b   : > { %10649 = vmatprep.subr.bf16.mxu0 %v11000_v25 }
0x173e   : > { %10650 = vmatpush3.bf16.msra.mxu0 %v11000_v25 }
0x173f   : > { %10655 = vmatprep.subr.bf16.mxu0 %v11001_v29 }
0x1745   : > { %10652 = vmatmul.mubr.msk.bf16.vlgmr.msra.gmra.mrb[176].mxu0 %vm1703_vm6, %v7471_v63 }
0x1746   : > { %10659 = vmatprep.mubr.msk.bf16.mxu0 %vm1703_vm6, %v7575_v48  ;;  %10656 = vmatpush3.bf16.msra.mxu0 %v11001_v29 }
0x1747   : > { %10657 = vmatprep.subr.bf16.mxu0 %v11002_v4 }
0x174a   : > { %10658 = vmatpush3.bf16.msra.mxu0 %v11002_v4 }
0x174b   : > { %10691 = vmatprep.subr.bf16.mxu0 %v11373_v12 }
0x1751   : > { %10660 = vmatmul.mubr.msk.bf16.vlgmr.msra.gmra.mrb[176].mxu0 %vm1703_vm6, %v7576_v20 }
0x1752   : > { %10695 = vmatprep.mubr.msk.bf16.mxu0 %vm11374_vm3, %v11373_v12 }
0x17b0   : > { %v7117_v23 = vpop.f32.mrb[172].mxu0 }
0x17b1   : > { %v7123_v18 = vadd.f32 %v7117_v23, %v7062_v51  ;;  %v10621_v30 = vpop.f32.mrb[173].mxu0 }
0x17b2   : > { %v7120_v11 = vpop.f32.mrb[174].mxu0 }
0x17b3   : > { %v12834_v2 = vadd.f32 %v12742_v40, %v7123_v18  ;;  %v10622_v9 = vpop.f32.mrb[175].mxu0 }
0x1824   : > { %v10661_v13 = vpop.f32.mrb[176].mxu0 }
0x1825   : > { %v7654_v45 = vcombine.high %v10661_v13, %v10661_v13  ;;  %v7689_v21 = vsel %vm7660_vm4, %v10661_v13, 0.0  ;;  %v7629_v32 = vpop.f32.mrb[177].mxu0 }
0x1826   : > { %v7690_v34 = vrot.slane %v7689_v21, 4  ;;  %v7652_v27 = vcombine.high %v7629_v32, %v7629_v32  ;;  %v7661_v36 = vsel %vm7660_vm4, %v7629_v32, 0.0  ;;  %v10662_v38 = vpop.f32.mrb[178].mxu0 }
0x1827   : > { %v7696_v50 = vsel %vm7660_vm4, %v7654_v45, 0.0  ;;  %v7662_v37 = vrot.slane %v7661_v36, 4  ;;  %v7655_v46 = vcombine.high %v10662_v38, %v10662_v38  ;;  %v7703_v1 = vsel %vm7660_vm4, %v10662_v38, 0.0  ;;  %v7632_v40 = vpop.f32.mrb[179].mxu0 }
0x1828   : > { %v7691_v35 = vadd.f32 %v7690_v34, %v7689_v21  ;;  %v7697_v43 = vrot.slane %v7696_v50, 4  ;;  %v7668_v31 = vsel %vm7660_vm4, %v7652_v27, 0.0  ;;  %v7704_v52 = vrot.slane %v7703_v1, 4 }
0x1829   : > { %v7663_v53 = vadd.f32 %v7662_v37, %v7661_v36  ;;  %v7669_v0 = vrot.slane %v7668_v31, 4  ;;  %v7710_v14 = vsel %vm7660_vm4, %v7655_v46, 0.0  ;;  %v7653_v16 = vcombine.high %v7632_v40, %v7632_v40 }
0x182a   : > { %v7698_v57 = vadd.f32 %v7697_v43, %v7696_v50  ;;  %v7705_v55 = vadd.f32 %v7704_v52, %v7703_v1  ;;  %v7711_v10 = vrot.slane %v7710_v14, 4  ;;  %v7675_v54 = vsel %vm7660_vm4, %v7632_v40, 0.0  ;;  %v11003_v52 = vld [vmem:[%s13291_s3] sm:$0xff]  }
0x182b   : > { %v7664_v47 = vrot.slane %v7663_v53, 2  ;;  %v7670_v41 = vadd.f32 %v7669_v0, %v7668_v31  ;;  %v7682_v56 = vsel %vm7660_vm4, %v7653_v16, 0.0  ;;  %v7692_v15 = vrot.slane %v7691_v35, 2  ;;  %10664 = vmatpush3.bf16.msra.mxu1 %v11003_v52  ;;  %v11006_v0 = vld [vmem:[%s13291_s3 + $0x18] sm:$0xff]  }
0x182c   : > { %v7712_v25 = vadd.f32 %v7711_v10, %v7710_v14  ;;  %v7676_v26 = vrot.slane %v7675_v54, 4  ;;  %v7683_v29 = vrot.slane %v7682_v56, 4  ;;  %v7699_v3 = vrot.slane %v7698_v57, 2  ;;  %10665 = vmatprep.subr.bf16.mxu1 %v11373_v12  ;;  %v9694_v10 = vld [vmem:[%s13292_s4] ss:$0 sm:$0xff]  ;;  %s1451_s4 = sand.u32 1, %s11313_s1  }
0x182d   : > { %v7665_v28 = vadd.f32 %v7664_v47, %v7663_v53  ;;  %v7671_v42 = vrot.slane %v7670_v41, 2  ;;  %v7706_v5 = vrot.slane %v7705_v55, 2  ;;  %v7693_v19 = vadd.f32 %v7692_v15, %v7691_v35  ;;  %v11004_v53 = vld [vmem:[%s13291_s3 + $0x8] sm:$0xff]  }
0x182e   : > { %v7677_v59 = vadd.f32 %v7676_v26, %v7675_v54  ;;  %v7684_v49 = vadd.f32 %v7683_v29, %v7682_v56  ;;  %v7713_v58 = vrot.slane %v7712_v25, 2  ;;  %v7700_v63 = vadd.f32 %v7699_v3, %v7698_v57  ;;  %v12871_v26 = vld [vmem:[%s13295_s8] sm:$0xff]   ;;  %v12877_v29 = vld [vmem:[%s13295_s8 + $0x8] sm:$0xff]  }
0x182f   : > { %v7672_v61 = vadd.f32 %v7671_v42, %v7670_v41  ;;  %v7666_v7 = vrot.slane %v7665_v28, 1  ;;  %v7707_v48 = vadd.f32 %v7706_v5, %v7705_v55  ;;  %v7694_v17 = vrot.slane %v7693_v19, 1  ;;  %10666 = vmatpush3.bf16.msra.mxu1 %v11004_v53  ;;  %v9695_v41 = vld [vmem:[%s13293_s5] ss:$0 sm:$0xff]  ;;  %v11008_v42 = vld [vmem:[%s13294_s6 + $0x8] sm:$0xff]   ;;  %10692 = vmatpush3.bf16.msra.mxu0 %v12871_v26  ;;  %s13297_s5 = sld [smem:[#allocation41_spill]] }
0x1830   : > { %v7678_v39 = vrot.slane %v7677_v59, 2  ;;  %v7685_v44 = vrot.slane %v7684_v49, 2  ;;  %v7714_v33 = vadd.f32 %v7713_v58, %v7712_v25  ;;  %v7701_v24 = vrot.slane %v7700_v63, 1  ;;  %10667 = vmatprep.subr.bf16.mxu1 %v11373_v12  ;;  %v11007_v25 = vld [vmem:[%s13294_s6] sm:$0xff]   ;;  %10693 = vmatprep.subr.bf16.mxu0 %v11373_v12 }
0x1831   : > { %v7673_v8 = vrot.slane %v7672_v61, 1  ;;  %v7667_v6 = vadd.f32 %v7666_v7, %v7665_v28  ;;  %v7708_v23 = vrot.slane %v7707_v48, 1  ;;  %v7695_v9 = vadd.f32 %v7694_v17, %v7693_v19 }
0x1832   : > { %v7679_v60 = vadd.f32 %v7678_v39, %v7677_v59  ;;  %v7686_v22 = vadd.f32 %v7685_v44, %v7684_v49  ;;  %v7715_v11 = vrot.slane %v7714_v33, 1  ;;  %v7702_v45 = vadd.f32 %v7701_v24, %v7700_v63 }
0x1833   : > { %v7674_v4 = vadd.f32 %v7673_v8, %v7672_v61  ;;  %v7709_v32 = vadd.f32 %v7708_v23, %v7707_v48  ;;  %10694 = vmatpush3.bf16.msra.mxu0 %v12877_v29  ;;  %v11386_v19 = vmov 0  }
0x1834   : > { %v7680_v62 = vrot.slane %v7679_v60, 1  ;;  %v7687_v20 = vrot.slane %v7686_v22, 1  ;;  %v7716_v27 = vadd.f32 %v7715_v11, %v7714_v33  ;;  %10707 = vmatprep.subr.bf16.mxu0 %v11373_v12 }
0x1835   : > { %v7725_v51 = vsel %vm7152_vm9, %v7674_v4, %v7667_v6  ;;  %vm7736_vm9 = vcmask 523264   ;;  %v12897_v4 = vld [vmem:[%s11621_s13] sm:$0x1] }
0x1836   : > { %v7681_v18 = vadd.f32 %v7680_v62, %v7679_v60  ;;  %v7688_v30 = vadd.f32 %v7687_v20, %v7686_v22  ;;  %v9702_v17 = vld [vmem:[%s13297_s5] ss:$0 sm:$0xff] }
0x1838   : > { %v7726_v13 = vsel %vm7154_vm10, %v7681_v18, %v7725_v51 }
0x1839   : > { %v7727_v21 = vsel %vm7156_vm11, %v7688_v30, %v7726_v13 }
0x183a   : > { %v7728_v34 = vsel %vm7158_vm12, %v7695_v9, %v7727_v21 }
0x183b   : > { %v7729_v36 = vsel %vm7160_vm13, %v7702_v45, %v7728_v34 }
0x183c   : > { %v7730_v38 = vsel %vm7162_vm14, %v7709_v32, %v7729_v36 }
0x183d   : > { %v7731_v50 = vsel %vm7164_vm15, %v7716_v27, %v7730_v38 }
0x183e   : > { %v7733_v37 = vadd.f32 %v7731_v50, %v12834_v2  ;;  %v11005_v2 = vld [vmem:[%s13291_s3 + $0x10] sm:$0xff]   ;;  %s13296_s3 = sld [smem:[#allocation38_spill]] }
0x183f   : > { %10668 = vmatpush3.bf16.msra.mxu1 %v11005_v2 }
0x1840   : > { %v7737_v46 = vsel %vm7736_vm9, %v7733_v37, 0.0  ;;  %10669 = vmatprep.subr.bf16.mxu1 %v11373_v12 }
0x1841   : > { %7738 = vadd.xlane.f32.xlu0 %v7737_v46 }
0x1843   : > { %10670 = vmatpush3.bf16.msra.mxu1 %v11006_v0 }
0x1844   : > { %10675 = vmatprep.subr.bf16.mxu1 %v11373_v12  ;;  %v9696_v3 = vld [vmem:[%s13296_s3] ss:$0 sm:$0xff]  ;;  %s13298_s3 = smov 64  }
0x18ce   : > { %v7739_v1 = vpop.xlane.xlu0 %7738 }
0x18cf   : > { %v7741_v40 = vmul.f32 0.015625, %v7739_v1 }
0x18d1   : > { %v7742_v35 = vsub.f32 %v7733_v37, %v7741_v40 }
0x18d3   : > { %v7743_v43 = vmul.f32 %v7742_v35, %v7742_v35 }
0x18d5   : > { %v7744_v31 = vsel %vm7736_vm9, %v7743_v43, 0.0 }
0x18d6   : > { %7745 = vadd.xlane.f32.xlu1 %v7744_v31 }
0x1963   : > { %v7746_v14 = vpop.xlane.xlu1 %7745 }
0x1964   : > { %v7747_v16 = vmul.f32 0.015625, %v7746_v14 }
0x1966   : > { %v7748_v57 = vadd.f32 1e-05, %v7747_v16 }
0x1968   : > { %11161 = vrsqrt.f32 %v7748_v57 }
0x1972   : > { %v11162_v55 = vpop.eup %11161 }
0x1973   : > { %v7750_v47 = vmul.f32 %v11162_v55, %v7742_v35 }
0x1975   : > { %v7757_v54 = vmul.f32 %v9694_v10, %v7750_v47 }
0x1977   : > { %v7764_v56 = vadd.f32 %v9695_v41, %v7757_v54 }
0x1979   : > { %v7765_v15 = vmax.f32 %v7764_v56, 0.0 }
0x197b   : > { %v7774_v28 = vpack.c.bf16 %v7765_v15, %v7765_v15 }
0x197d   : > { %10672 = vmatmul.mubr.msk.bf16.vlgmr.msra.gmra.mrb[176].mxu1 %vm7736_vm9, %v7774_v28 }
0x197e   : > { %10676 = vmatpush3.bf16.msra.mxu1 %v11007_v25  ;;  %10679 = vmatprep.mubr.msk.bf16.mxu1 %vm11374_vm3, %v11373_v12 }
0x197f   : > { %10677 = vmatprep.subr.bf16.mxu1 %v11373_v12 }
0x1982   : > { %10678 = vmatpush3.bf16.msra.mxu1 %v11008_v42 }
0x1983   : > { %10683 = vmatprep.subr.bf16.mxu1 %v11373_v12 }
0x1a50   : > { %v7843_v61 = vpop.f32.mrb[176].mxu1 }
0x1a51   : > { %v7844_v5 = vadd.f32 %v9696_v3, %v7843_v61  ;;  %v10673_v59 = vpop.f32.mrb[177].mxu1 }
0x1a52   : > { %v7846_v49 = vpop.f32.mrb[178].mxu1 }
0x1a53   : > { %v7853_v7 = vpack.c.bf16 %v7844_v5, %v7844_v5  ;;  %v10674_v58 = vpop.f32.mrb[179].mxu1 }
0x1a55   : > { %10680 = vmatmul.mubr.msk.bf16.vlgmr.msra.gmra.mrb[180].mxu1 %vm1703_vm6, %v7853_v7 }
0x1a56   : > { %10684 = vmatpush3.bf16.msra.mxu1 %v12871_v26  ;;  %10687 = vmatprep.mubr.msk.bf16.mxu1 %vm11374_vm3, %v11373_v12 }
0x1a57   : > { %10685 = vmatprep.subr.bf16.mxu1 %v11373_v12 }
0x1a5a   : > { %10686 = vmatpush3.bf16.msra.mxu1 %v12877_v29 }
0x1a5b   : > { %10699 = vmatprep.subr.bf16.mxu1 %v11373_v12 }
0x1a5d   : > { %10688 = vmatmul.mubr.bf16.vlgmr.msra.gmra.mrb[184].mxu1 %v11386_v19 }
0x1a5e   : > { %10700 = vmatpush3.bf16.msra.mxu1 %v12871_v26  ;;  %10703 = vmatprep.mubr.msk.bf16.mxu1 %vm11374_vm3, %v11373_v12 }
0x1a5f   : > { %10701 = vmatprep.subr.bf16.mxu1 %v11373_v12 }
0x1a62   : > { %10702 = vmatpush3.bf16.msra.mxu1 %v12877_v29 }
0x1a63   : > { %10715 = vmatprep.subr.bf16.mxu1 %v11373_v12 }
0x1b28   : > { %v7910_v8 = vpop.f32.mrb[180].mxu1 }
0x1b29   : > { %v10681_v39 = vpop.f32.mrb[181].mxu1  ;;  %v12902_v62 = vadd.f32 %v9702_v17, %v7910_v8 }
0x1b2a   : > { %v7913_v44 = vpop.f32.mrb[182].mxu1 }
0x1b2b   : > { %v10682_v63 = vpop.f32.mrb[183].mxu1 }
0x1b30   : > { %v7970_v48 = vpop.f32.mrb[184].mxu1 }
0x1b31   : > { %v7971_v60 = vadd.f32 %v7970_v48, %v12897_v4  ;;  %v10689_v22 = vpop.f32.mrb[185].mxu1 }
0x1b32   : > { %v7973_v6 = vpop.f32.mrb[186].mxu1 }
0x1b33   : > { %7984 = vrot.lane.b32.xlu0 %v7971_v60, %s13298_s3  ;;  %v10690_v33 = vpop.f32.mrb[187].mxu1  ;;  %v7976_v20 = vadd.f32 %v7971_v60, %v12902_v62 }
0x1b35   : > { %v9708_v24 = vmul.f32 -1.442695, %v7976_v20 }
0x1b37   : > { %11163 = vpow2.f32 %v9708_v24 }
0x1b41   : > { %v11164_v51 = vpop.eup %11163 }
0x1b42   : > { %v7980_v23 = vadd.f32 1.0, %v11164_v51 }
0x1b44   : > { %11165 = vrcp.f32 %v7980_v23 }
0x1b4e   : > { %v11166_v18 = vpop.eup %11165 }
0x1b4f   : > { %v7994_v21 = vsub.f32 1.0, %v11166_v18  ;;  %v8000_v34 = vmul.f32 0.0, %v11166_v18 }
0x1ba5   : > { %v7985_v30 = vpop.permute.xlu0 %7984 }
0x1ba6   : > { %v7987_v11 = vmul.f32 %v11166_v18, %v7985_v30 }
0x1ba8   : > { %7989 = vrot.lane.b32.xlu1 %v7987_v11, %s13298_s3 }
0x1c1a   : > { %v7990_v9 = vpop.permute.xlu1 %7989 }
0x1c1b   : > { %v7992_v13 = vadd.f32 %v7990_v9, %v12902_v62 }
0x1c1d   : > { %11167 = vtanh.f32 %v7992_v13 }
0x1c27   : > { %v11168_v45 = vpop.eup %11167 }
0x1c28   : > { %7996 = vrot.lane.b32.xlu1 %v11168_v45, %s13263_s15 }
0x1c9a   : > { %v7997_v32 = vpop.permute.xlu1 %7996 }
0x1c9b   : > { %v7999_v27 = vmul.f32 %v7997_v32, %v7994_v21 }
0x1c9d   : > { %v12908_v36 = vadd.f32 %v8000_v34, %v7999_v27 }
0x1c9f   : > { %v8002_v38 = vpack.c.bf16 %v12908_v36, %v12908_v36  ;;  %v8076_v41 = vrot.slane %v12908_v36, 7 }
0x1ca1   : > { %8004 = vrot.lane.b32.xlu0 %v8002_v38, %s13263_s15 }
0x1d13   : > { %v8005_v50 = vpop.permute.xlu0 %8004 }
0x1d14   : > { %10696 = vmatmul.mubr.msk.bf16.vlgmr.msra.gmra.mrb[180].mxu0 %vm1703_vm6, %v8005_v50 }
0x1d15   : > { %10708 = vmatpush3.bf16.msra.mxu0 %v12871_v26  ;;  %10711 = vmatprep.mubr.msk.bf16.mxu0 %vm11374_vm3, %v11373_v12 }
0x1d16   : > { %10709 = vmatprep.subr.bf16.mxu0 %v11373_v12 }
0x1d19   : > { %10710 = vmatpush3.bf16.msra.mxu0 %v12877_v29 }
0x1d1a   : > { %10723 = vmatprep.subr.bf16.mxu0 %v11373_v12 }
0x1de7   : > { %v8043_v37 = vpop.f32.mrb[180].mxu0 }
0x1de8   : > { %v8044_v46 = vadd.f32 %v8043_v37, %v12897_v4  ;;  %v10697_v1 = vpop.f32.mrb[181].mxu0 }
0x1de9   : > { %v8046_v40 = vpop.f32.mrb[182].mxu0 }
0x1dea   : > { %v8050_v35 = vrot.slane %v8044_v46, 7  ;;  %v10698_v43 = vpop.f32.mrb[183].mxu0 }
0x1dec   : > { %8059 = vrot.lane.b32.xlu1 %v8050_v35, %s13298_s3  ;;  %v8052_v31 = vadd.f32 %v8050_v35, %v12902_v62 }
0x1dee   : > { %v9710_v52 = vmul.f32 -1.442695, %v8052_v31 }
0x1df0   : > { %11169 = vpow2.f32 %v9710_v52 }
0x1dfa   : > { %v11170_v53 = vpop.eup %11169 }
0x1dfb   : > { %v8056_v2 = vadd.f32 1.0, %v11170_v53 }
0x1dfd   : > { %11171 = vrcp.f32 %v8056_v2 }
0x1e07   : > { %v11172_v0 = vpop.eup %11171 }
0x1e08   : > { %v8069_v47 = vsub.f32 1.0, %v11172_v0  ;;  %v8078_v56 = vmul.f32 %v11172_v0, %v8076_v41 }
0x1e5e   : > { %v8060_v14 = vpop.permute.xlu1 %8059 }
0x1e5f   : > { %v8062_v16 = vmul.f32 %v11172_v0, %v8060_v14 }
0x1e61   : > { %8064 = vrot.lane.b32.xlu0 %v8062_v16, %s13298_s3 }
0x1ed3   : > { %v8065_v57 = vpop.permute.xlu0 %8064 }
0x1ed4   : > { %v8067_v55 = vadd.f32 %v8065_v57, %v12902_v62 }
0x1ed6   : > { %11173 = vtanh.f32 %v8067_v55 }
0x1ee0   : > { %v11174_v10 = vpop.eup %11173 }
0x1ee1   : > { %8071 = vrot.lane.b32.xlu1 %v11174_v10, %s13263_s15 }
0x1f53   : > { %v8072_v54 = vpop.permute.xlu1 %8071 }
0x1f54   : > { %v8074_v15 = vmul.f32 %v8072_v54, %v8069_v47 }
0x1f56   : > { %v8079_v25 = vadd.f32 %v8078_v56, %v8074_v15 }
0x1f58   : > { %v8080_v28 = vpack.c.bf16 %v8079_v25, %v8079_v25  ;;  %v8156_v24 = vrot.slane %v8079_v25, 7  ;;  %v8559_v11 = vsel %vm1484_vm0, %v12908_v36, %v8079_v25  ;;  %vm8563_vm0 = vcmask 1044480  }
0x1f5a   : > { %v8082_v42 = vshrl.u32 %v8080_v28, 16 }
0x1f5c   : > { %8084 = vrot.lane.b32.xlu0 %v8082_v42, %s13263_s15 }
0x1fce   : > { %v8085_v3 = vpop.permute.xlu0 %8084 }
0x1fcf   : > { %10704 = vmatmul.mubr.msk.bf16.vlgmr.msra.gmra.mrb[188].mxu1 %vm1703_vm6, %v8085_v3 }
0x1fd0   : > { %10716 = vmatpush3.bf16.msra.mxu1 %v12871_v26  ;;  %10719 = vmatprep.mubr.msk.bf16.mxu1 %vm11374_vm3, %v11373_v12 }
0x1fd1   : > { %10717 = vmatprep.subr.bf16.mxu1 %v11373_v12 }
0x1fd4   : > { %10718 = vmatpush3.bf16.msra.mxu1 %v12877_v29 }
0x1fd5   : > { %10731 = vmatprep.subr.bf16.mxu1 %v11373_v12 }
0x20a2   : > { %v8123_v61 = vpop.f32.mrb[188].mxu1 }
0x20a3   : > { %v8124_v5 = vadd.f32 %v8123_v61, %v12897_v4  ;;  %v10705_v59 = vpop.f32.mrb[189].mxu1 }
0x20a4   : > { %v8126_v49 = vpop.f32.mrb[190].mxu1 }
0x20a5   : > { %v8130_v7 = vrot.slane %v8124_v5, 6  ;;  %v10706_v58 = vpop.f32.mrb[191].mxu1 }
0x20a7   : > { %8139 = vrot.lane.b32.xlu1 %v8130_v7, %s13298_s3  ;;  %v8132_v8 = vadd.f32 %v8130_v7, %v12902_v62 }
0x20a9   : > { %v9712_v39 = vmul.f32 -1.442695, %v8132_v8 }
0x20ab   : > { %11175 = vpow2.f32 %v9712_v39 }
0x20b5   : > { %v11176_v44 = vpop.eup %11175 }
0x20b6   : > { %v8136_v63 = vadd.f32 1.0, %v11176_v44 }
0x20b8   : > { %11177 = vrcp.f32 %v8136_v63 }
0x20c2   : > { %v11178_v48 = vpop.eup %11177 }
0x20c3   : > { %v8149_v20 = vsub.f32 1.0, %v11178_v48  ;;  %v8158_v23 = vmul.f32 %v11178_v48, %v8156_v24 }
0x2119   : > { %v8140_v60 = vpop.permute.xlu1 %8139 }
0x211a   : > { %v8142_v22 = vmul.f32 %v11178_v48, %v8140_v60 }
0x211c   : > { %8144 = vrot.lane.b32.xlu0 %v8142_v22, %s13298_s3 }
0x218e   : > { %v8145_v6 = vpop.permute.xlu0 %8144 }
0x218f   : > { %v8147_v33 = vadd.f32 %v8145_v6, %v12902_v62 }
0x2191   : > { %11179 = vtanh.f32 %v8147_v33 }
0x219b   : > { %v11180_v17 = vpop.eup %11179 }
0x219c   : > { %8151 = vrot.lane.b32.xlu1 %v11180_v17, %s13263_s15 }
0x220e   : > { %v8152_v51 = vpop.permute.xlu1 %8151 }
0x220f   : > { %v8154_v18 = vmul.f32 %v8152_v51, %v8149_v20 }
0x2211   : > { %v8159_v30 = vadd.f32 %v8158_v23, %v8154_v18 }
0x2213   : > { %v8160_v9 = vpack.c.bf16 %v8159_v30, %v8159_v30  ;;  %v8560_v13 = vsel %vm1485_vm1, %v8559_v11, %v8159_v30  ;;  %v8235_v14 = vrot.slane %v8159_v30, 7  ;;  %vm13299_vm1 = vcmask 1046528  }
0x2215   : > { %v8162_v45 = vrot.slane %v8160_v9, 1 }
0x2217   : > { %8163 = vrot.lane.b32.xlu0 %v8162_v45, %s13263_s15 }
0x2289   : > { %v8164_v21 = vpop.permute.xlu0 %8163 }
0x228a   : > { %10712 = vmatmul.mubr.msk.bf16.vlgmr.msra.gmra.mrb[184].mxu0 %vm1703_vm6, %v8164_v21 }
0x228b   : > { %10724 = vmatpush3.bf16.msra.mxu0 %v12871_v26  ;;  %10727 = vmatprep.mubr.msk.bf16.mxu0 %vm11374_vm3, %v11373_v12 }
0x228c   : > { %10725 = vmatprep.subr.bf16.mxu0 %v11373_v12 }
0x228f   : > { %10726 = vmatpush3.bf16.msra.mxu0 %v12877_v29 }
0x2290   : > { %10739 = vmatprep.subr.bf16.mxu0 %v11373_v12 }
0x235d   : > { %v8202_v32 = vpop.f32.mrb[184].mxu0 }
0x235e   : > { %v8203_v34 = vadd.f32 %v8202_v32, %v12897_v4  ;;  %v10713_v27 = vpop.f32.mrb[185].mxu0 }
0x235f   : > { %v8205_v36 = vpop.f32.mrb[186].mxu0 }
0x2360   : > { %v8209_v38 = vrot.slane %v8203_v34, 5  ;;  %v10714_v50 = vpop.f32.mrb[187].mxu0 }
0x2362   : > { %8218 = vrot.lane.b32.xlu1 %v8209_v38, %s13298_s3  ;;  %v8211_v37 = vadd.f32 %v8209_v38, %v12902_v62 }
0x2364   : > { %v9714_v46 = vmul.f32 -1.442695, %v8211_v37 }
0x2366   : > { %11181 = vpow2.f32 %v9714_v46 }
0x2370   : > { %v11182_v1 = vpop.eup %11181 }
0x2371   : > { %v8215_v40 = vadd.f32 1.0, %v11182_v1 }
0x2373   : > { %11183 = vrcp.f32 %v8215_v40 }
0x237d   : > { %v11184_v35 = vpop.eup %11183 }
0x237e   : > { %v8228_v0 = vsub.f32 1.0, %v11184_v35  ;;  %v8237_v57 = vmul.f32 %v11184_v35, %v8235_v14 }
0x23d4   : > { %v8219_v43 = vpop.permute.xlu1 %8218 }
0x23d5   : > { %v8221_v31 = vmul.f32 %v11184_v35, %v8219_v43 }
0x23d7   : > { %8223 = vrot.lane.b32.xlu0 %v8221_v31, %s13298_s3 }
0x2449   : > { %v8224_v52 = vpop.permute.xlu0 %8223 }
0x244a   : > { %v8226_v53 = vadd.f32 %v8224_v52, %v12902_v62 }
0x244c   : > { %11185 = vtanh.f32 %v8226_v53 }
0x2456   : > { %v11186_v2 = vpop.eup %11185 }
0x2457   : > { %8230 = vrot.lane.b32.xlu1 %v11186_v2, %s13263_s15 }
0x24c9   : > { %v8231_v16 = vpop.permute.xlu1 %8230 }
0x24ca   : > { %v8233_v55 = vmul.f32 %v8231_v16, %v8228_v0 }
0x24cc   : > { %v8238_v10 = vadd.f32 %v8237_v57, %v8233_v55 }
0x24ce   : > { %v8239_v47 = vpack.c.bf16 %v8238_v10, %v8238_v10  ;;  %v8561_v41 = vsel %vm6313_vm7, %v8560_v13, %v8238_v10  ;;  %v8316_v6 = vrot.slane %v8238_v10, 7 }
0x24d0   : > { %v8241_v54 = vshrl.u32 %v8239_v47, 16 }
0x24d2   : > { %v8243_v56 = vrot.slane %v8241_v54, 1 }
0x24d4   : > { %8244 = vrot.lane.b32.xlu0 %v8243_v56, %s13263_s15 }
0x2546   : > { %v8245_v15 = vpop.permute.xlu0 %8244 }
0x2547   : > { %10720 = vmatmul.mubr.msk.bf16.vlgmr.msra.gmra.mrb[192].mxu1 %vm1703_vm6, %v8245_v15 }
0x2548   : > { %10732 = vmatpush3.bf16.msra.mxu1 %v12871_v26  ;;  %10735 = vmatprep.mubr.msk.bf16.mxu1 %vm11374_vm3, %v11373_v12 }
0x2549   : > { %10733 = vmatprep.subr.bf16.mxu1 %v11373_v12 }
0x254c   : > { %10734 = vmatpush3.bf16.msra.mxu1 %v12877_v29 }
0x254d   : > { %10747 = vmatprep.subr.bf16.mxu1 %v11373_v12 }
0x261a   : > { %v8283_v25 = vpop.f32.mrb[192].mxu1 }
0x261b   : > { %v8284_v28 = vadd.f32 %v8283_v25, %v12897_v4  ;;  %v10721_v42 = vpop.f32.mrb[193].mxu1 }
0x261c   : > { %v8286_v3 = vpop.f32.mrb[194].mxu1 }
0x261d   : > { %v8290_v61 = vrot.slane %v8284_v28, 4  ;;  %v10722_v5 = vpop.f32.mrb[195].mxu1 }
0x261f   : > { %8299 = vrot.lane.b32.xlu1 %v8290_v61, %s13298_s3  ;;  %v8292_v59 = vadd.f32 %v8290_v61, %v12902_v62 }
0x2621   : > { %v9716_v49 = vmul.f32 -1.442695, %v8292_v59 }
0x2623   : > { %11187 = vpow2.f32 %v9716_v49 }
0x262d   : > { %v11188_v7 = vpop.eup %11187 }
0x262e   : > { %v8296_v58 = vadd.f32 1.0, %v11188_v7 }
0x2630   : > { %11189 = vrcp.f32 %v8296_v58 }
0x263a   : > { %v11190_v8 = vpop.eup %11189 }
0x263b   : > { %v8309_v22 = vsub.f32 1.0, %v11190_v8  ;;  %v8318_v17 = vmul.f32 %v11190_v8, %v8316_v6 }
0x2691   : > { %v8300_v39 = vpop.permute.xlu1 %8299 }
0x2692   : > { %v8302_v44 = vmul.f32 %v11190_v8, %v8300_v39 }
0x2694   : > { %8304 = vrot.lane.b32.xlu0 %v8302_v44, %s13298_s3 }
0x2706   : > { %v8305_v63 = vpop.permute.xlu0 %8304 }
0x2707   : > { %v8307_v48 = vadd.f32 %v8305_v63, %v12902_v62 }
0x2709   : > { %11191 = vtanh.f32 %v8307_v48 }
0x2713   : > { %v11192_v60 = vpop.eup %11191 }
0x2714   : > { %8311 = vrot.lane.b32.xlu1 %v11192_v60, %s13263_s15 }
0x2786   : > { %v8312_v33 = vpop.permute.xlu1 %8311 }
0x2787   : > { %v8314_v20 = vmul.f32 %v8312_v33, %v8309_v22 }
0x2789   : > { %v8319_v24 = vadd.f32 %v8318_v17, %v8314_v20 }
0x278b   : > { %v8320_v51 = vpack.c.bf16 %v8319_v24, %v8319_v24  ;;  %v8562_v23 = vsel %vm1593_vm5, %v8561_v41, %v8319_v24  ;;  %v8395_v35 = vrot.slane %v8319_v24, 7 }
0x278d   : > { %v8322_v18 = vrot.slane %v8320_v51, 2 }
0x278f   : > { %8323 = vrot.lane.b32.xlu0 %v8322_v18, %s13263_s15 }
0x2801   : > { %v8324_v30 = vpop.permute.xlu0 %8323 }
0x2802   : > { %10728 = vmatmul.mubr.msk.bf16.vlgmr.msra.gmra.mrb[188].mxu0 %vm1703_vm6, %v8324_v30 }
0x2803   : > { %10740 = vmatpush3.bf16.msra.mxu0 %v12871_v26  ;;  %10743 = vmatprep.mubr.msk.bf16.mxu0 %vm11374_vm3, %v11373_v12 }
0x2804   : > { %10741 = vmatprep.subr.bf16.mxu0 %v11373_v12 }
0x2807   : > { %10742 = vmatpush3.bf16.msra.mxu0 %v12877_v29 }
0x2808   : > { %10755 = vmatprep.subr.bf16.mxu0 %v11373_v12 }
0x28d5   : > { %v8362_v11 = vpop.f32.mrb[188].mxu0 }
0x28d6   : > { %v8363_v9 = vadd.f32 %v8362_v11, %v12897_v4  ;;  %v10729_v13 = vpop.f32.mrb[189].mxu0 }
0x28d7   : > { %v8365_v45 = vpop.f32.mrb[190].mxu0 }
0x28d8   : > { %v8369_v21 = vrot.slane %v8363_v9, 3  ;;  %v10730_v32 = vpop.f32.mrb[191].mxu0 }
0x28da   : > { %8378 = vrot.lane.b32.xlu1 %v8369_v21, %s13298_s3  ;;  %v8371_v26 = vadd.f32 %v8369_v21, %v12902_v62 }
0x28dc   : > { %v9718_v34 = vmul.f32 -1.442695, %v8371_v26 }
0x28de   : > { %11193 = vpow2.f32 %v9718_v34  ;;  %v13009_v34 = vld [vmem:[%s13295_s8 + $0x10] sm:$0xff]  }
0x28e8   : > { %v11194_v27 = vpop.eup %11193 }
0x28e9   : > { %v8375_v36 = vadd.f32 1.0, %v11194_v27  ;;  %v11013_v27 = vld [vmem:[%s13294_s6 + $0x10] sm:$0xff]  }
0x28eb   : > { %11195 = vrcp.f32 %v8375_v36  ;;  %v13014_v36 = vld [vmem:[%s13295_s8 + $0x18] sm:$0xff]  }
0x28f5   : > { %v11196_v38 = vpop.eup %11195 }
0x28f6   : > { %v8388_v40 = vsub.f32 1.0, %v11196_v38  ;;  %v8397_v31 = vmul.f32 %v11196_v38, %v8395_v35 }
0x294c   : > { %v8379_v29 = vpop.permute.xlu1 %8378 }
0x294d   : > { %v8381_v50 = vmul.f32 %v11196_v38, %v8379_v29  ;;  %v11014_v38 = vld [vmem:[%s13294_s6 + $0x18] sm:$0xff]  }
0x294f   : > { %8383 = vrot.lane.b32.xlu0 %v8381_v50, %s13298_s3 }
0x29c1   : > { %v8384_v37 = vpop.permute.xlu0 %8383 }
0x29c2   : > { %v8386_v46 = vadd.f32 %v8384_v37, %v12902_v62 }
0x29c4   : > { %11197 = vtanh.f32 %v8386_v46 }
0x29ce   : > { %v11198_v1 = vpop.eup %11197 }
0x29cf   : > { %8390 = vrot.lane.b32.xlu1 %v11198_v1, %s13263_s15 }
0x2a41   : > { %v8391_v43 = vpop.permute.xlu1 %8390 }
0x2a42   : > { %v8393_v52 = vmul.f32 %v8391_v43, %v8388_v40  ;;  %v13033_v43 = vld [vmem:[%s11621_s13 + $0x1] sm:$0x1] }
0x2a44   : > { %v8398_v53 = vadd.f32 %v8397_v31, %v8393_v52 }
0x2a46   : > { %v8399_v2 = vpack.c.bf16 %v8398_v53, %v8398_v53  ;;  %v8564_v0 = vsel %vm8563_vm0, %v8562_v23, %v8398_v53  ;;  %v8476_v8 = vrot.slane %v8398_v53, 7 }
0x2a48   : > { %v8401_v14 = vshrl.u32 %v8399_v2, 16 }
0x2a4a   : > { %v8403_v16 = vrot.slane %v8401_v14, 2 }
0x2a4c   : > { %8404 = vrot.lane.b32.xlu0 %v8403_v16, %s13263_s15  ;;  %v9728_v16 = vld [vmem:[%s13297_s5 + $0x1] ss:$0 sm:$0xff]  ;;  %s1452_s5 = scalar_lea.vmem [#allocation2], %s1451_s4 }
0x2a4d   : > { %s9363_s6 = sshll.u32 %s1452_s5, 4  ;;  %s13149_s6 = int_to_ptr.vmem [resolvable:$true] %s9363_s6 }
0x2abe   : > { %v8405_v57 = vpop.permute.xlu0 %8404 }
0x2abf   : > { %10736 = vmatmul.mubr.msk.bf16.vlgmr.msra.gmra.mrb[196].mxu1 %vm1703_vm6, %v8405_v57 }
0x2ac0   : > { %10751 = vmatprep.mubr.msk.bf16.mxu1 %vm11374_vm3, %v11373_v12  ;;  %10748 = vmatpush3.bf16.msra.mxu1 %v11013_v27 }
0x2ac1   : > { %10749 = vmatprep.subr.bf16.mxu1 %v11373_v12 }
0x2ac4   : > { %10750 = vmatpush3.bf16.msra.mxu1 %v11014_v38 }
0x2ac5   : > { %10763 = vmatprep.subr.bf16.mxu1 %v11373_v12 }
0x2b92   : > { %v8443_v55 = vpop.f32.mrb[196].mxu1 }
0x2b93   : > { %v8444_v10 = vadd.f32 %v8443_v55, %v12897_v4  ;;  %v10737_v47 = vpop.f32.mrb[197].mxu1 }
0x2b94   : > { %v8446_v41 = vpop.f32.mrb[198].mxu1 }
0x2b95   : > { %v8450_v54 = vrot.slane %v8444_v10, 2  ;;  %v10738_v56 = vpop.f32.mrb[199].mxu1 }
0x2b97   : > { %8459 = vrot.lane.b32.xlu1 %v8450_v54, %s13298_s3  ;;  %v8452_v15 = vadd.f32 %v8450_v54, %v12902_v62 }
0x2b99   : > { %v9720_v25 = vmul.f32 -1.442695, %v8452_v15 }
0x2b9b   : > { %11199 = vpow2.f32 %v9720_v25 }
0x2ba5   : > { %v11200_v28 = vpop.eup %11199 }
0x2ba6   : > { %v8456_v42 = vadd.f32 1.0, %v11200_v28 }
0x2ba8   : > { %11201 = vrcp.f32 %v8456_v42 }
0x2bb2   : > { %v11202_v3 = vpop.eup %11201 }
0x2bb3   : > { %v8469_v58 = vsub.f32 1.0, %v11202_v3  ;;  %v8478_v44 = vmul.f32 %v11202_v3, %v8476_v8 }
0x2c09   : > { %v8460_v61 = vpop.permute.xlu1 %8459 }
0x2c0a   : > { %v8462_v5 = vmul.f32 %v11202_v3, %v8460_v61 }
0x2c0c   : > { %8464 = vrot.lane.b32.xlu0 %v8462_v5, %s13298_s3 }
0x2c7e   : > { %v8465_v59 = vpop.permute.xlu0 %8464 }
0x2c7f   : > { %v8467_v49 = vadd.f32 %v8465_v59, %v12902_v62 }
0x2c81   : > { %11203 = vtanh.f32 %v8467_v49 }
0x2c8b   : > { %v11204_v7 = vpop.eup %11203 }
0x2c8c   : > { %8471 = vrot.lane.b32.xlu1 %v11204_v7, %s13263_s15 }
0x2cfe   : > { %v8472_v39 = vpop.permute.xlu1 %8471 }
0x2cff   : > { %v8474_v63 = vmul.f32 %v8472_v39, %v8469_v58 }
0x2d01   : > { %v8479_v48 = vadd.f32 %v8478_v44, %v8474_v63 }
0x2d03   : > { %v8480_v60 = vpack.c.bf16 %v8479_v48, %v8479_v48  ;;  %v8565_v22 = vsel %vm6559_vm8, %v8564_v0, %v8479_v48  ;;  %v8555_v50 = vrot.slane %v8479_v48, 7 }
0x2d05   : > { %v8482_v6 = vrot.slane %v8480_v60, 3 }
0x2d07   : > { %8483 = vrot.lane.b32.xlu0 %v8482_v6, %s13263_s15 }
0x2d79   : > { %v8484_v33 = vpop.permute.xlu0 %8483 }
0x2d7a   : > { %10744 = vmatmul.mubr.msk.bf16.vlgmr.msra.gmra.mrb[192].mxu0 %vm1703_vm6, %v8484_v33 }
0x2d7b   : > { %10759 = vmatprep.mubr.msk.bf16.mxu0 %vm11374_vm3, %v11373_v12  ;;  %10756 = vmatpush3.bf16.msra.mxu0 %v13009_v34 }
0x2d7c   : > { %10757 = vmatprep.subr.bf16.mxu0 %v11373_v12 }
0x2d7f   : > { %10758 = vmatpush3.bf16.msra.mxu0 %v13014_v36 }
0x2d80   : > { %10771 = vmatprep.subr.bf16.mxu0 %v11373_v12 }
0x2d82   : > { %10760 = vmatmul.mubr.bf16.vlgmr.msra.gmra.mrb[196].mxu0 %v11386_v19 }
0x2d83   : > { %10772 = vmatpush3.bf16.msra.mxu0 %v13009_v34  ;;  %10775 = vmatprep.mubr.msk.bf16.mxu0 %vm11374_vm3, %v11373_v12 }
0x2d84   : > { %10773 = vmatprep.subr.bf16.mxu0 %v11373_v12 }
0x2d87   : > { %10774 = vmatpush3.bf16.msra.mxu0 %v13014_v36 }
0x2d88   : > { %10787 = vmatprep.subr.bf16.mxu0 %v11373_v12 }
0x2e4d   : > { %v8522_v17 = vpop.f32.mrb[192].mxu0 }
0x2e4e   : > { %v8523_v20 = vadd.f32 %v8522_v17, %v12897_v4  ;;  %v10745_v24 = vpop.f32.mrb[193].mxu0 }
0x2e4f   : > { %v8525_v51 = vpop.f32.mrb[194].mxu0 }
0x2e50   : > { %v8529_v23 = vrot.slane %v8523_v20, 1  ;;  %v10746_v18 = vpop.f32.mrb[195].mxu0 }
0x2e52   : > { %8538 = vrot.lane.b32.xlu1 %v8529_v23, %s13298_s3  ;;  %v8531_v30 = vadd.f32 %v8529_v23, %v12902_v62 }
0x2e54   : > { %v9722_v11 = vmul.f32 -1.442695, %v8531_v30 }
0x2e55   : > { %v8692_v31 = vpop.f32.mrb[196].mxu0 }
0x2e56   : > { %11205 = vpow2.f32 %v9722_v11  ;;  %v8693_v52 = vadd.f32 %v13033_v43, %v8692_v31  ;;  %v10761_v53 = vpop.f32.mrb[197].mxu0 }
0x2e57   : > { %v8695_v2 = vpop.f32.mrb[198].mxu0 }
0x2e58   : > { %v10762_v0 = vpop.f32.mrb[199].mxu0 }
0x2e60   : > { %v11206_v9 = vpop.eup %11205 }
0x2e61   : > { %v8535_v13 = vadd.f32 1.0, %v11206_v9 }
0x2e63   : > { %11207 = vrcp.f32 %v8535_v13 }
0x2e6d   : > { %v11208_v45 = vpop.eup %11207 }
0x2e6e   : > { %v8557_v46 = vmul.f32 %v11208_v45, %v8555_v50 }
0x2ec4   : > { %v8539_v21 = vpop.permute.xlu1 %8538 }
0x2ec5   : > { %v8541_v4 = vmul.f32 %v11208_v45, %v8539_v21 }
0x2ec7   : > { %8543 = vrot.lane.b32.xlu0 %v8541_v4, %s13298_s3 }
0x2f39   : > { %v8544_v32 = vpop.permute.xlu0 %8543 }
0x2f3a   : > { %v8546_v26 = vadd.f32 %v8544_v32, %v12902_v62  ;;  %v8548_v62 = vsub.f32 1.0, %v11208_v45 }
0x2f3c   : > { %11209 = vtanh.f32 %v8546_v26 }
0x2f46   : > { %v11210_v29 = vpop.eup %11209 }
0x2f47   : > { %8550 = vrot.lane.b32.xlu1 %v11210_v29, %s13263_s15 }
0x2f4b   : > { %8706 = vrot.lane.b32.xlu1 %v8693_v52, %s13298_s3 }
0x2fb9   : > { %v8551_v37 = vpop.permute.xlu1 %8550 }
0x2fba   : > { %v8553_v1 = vmul.f32 %v8551_v37, %v8548_v62 }
0x2fbc   : > { %v8558_v40 = vadd.f32 %v8557_v46, %v8553_v1 }
0x2fbd   : > { %v8707_v28 = vpop.permute.xlu1 %8706 }
0x2fbe   : > { %v8566_v35 = vsel %vm13299_vm1, %v8565_v22, %v8558_v40 }
0x2fbf   : > { %v8572_v19 = vpack.c.bf16 %v8566_v35, %v8566_v35 }
0x2fc1   : > { %8582 = vrot.lane.b32.xlu0 %v8572_v19, %s13263_s15 }
0x3033   : > { %v8583_v14 = vpop.permute.xlu0 %8582 }
0x3034   : > { %10752 = vmatmul.mubr.msk.bf16.vlgmr.msra.gmra.mrb[200].mxu1 %vm1703_vm6, %v8583_v14 }
0x3035   : > { %10764 = vmatpush3.bf16.msra.mxu1 %v13009_v34  ;;  %10767 = vmatprep.mubr.msk.bf16.mxu1 %vm11374_vm3, %v11373_v12 }
0x3036   : > { %10765 = vmatprep.subr.bf16.mxu1 %v11373_v12 }
0x3039   : > { %10766 = vmatpush3.bf16.msra.mxu1 %v13014_v36 }
0x303a   : > { %10779 = vmatprep.subr.bf16.mxu1 %v11373_v12 }
0x3107   : > { %v8633_v57 = vpop.f32.mrb[200].mxu1 }
0x3108   : > { %v13045_v55 = vadd.f32 %v9728_v16, %v8633_v57  ;;  %v10753_v10 = vpop.f32.mrb[201].mxu1 }
0x3109   : > { %v8636_v47 = vpop.f32.mrb[202].mxu1 }
0x310a   : > { %v10754_v41 = vpop.f32.mrb[203].mxu1  ;;  %v8698_v54 = vadd.f32 %v8693_v52, %v13045_v55 }
0x310c   : > { %v9739_v56 = vmul.f32 -1.442695, %v8698_v54 }
0x310e   : > { %11211 = vpow2.f32 %v9739_v56 }
0x3118   : > { %v11212_v15 = vpop.eup %11211 }
0x3119   : > { %v8702_v25 = vadd.f32 1.0, %v11212_v15 }
0x311b   : > { %11213 = vrcp.f32 %v8702_v25 }
0x3125   : > { %v11214_v42 = vpop.eup %11213 }
0x3126   : > { %v8709_v3 = vmul.f32 %v11214_v42, %v8707_v28  ;;  %v8716_v49 = vsub.f32 1.0, %v11214_v42  ;;  %v8722_v58 = vmul.f32 0.0, %v11214_v42 }
0x3128   : > { %8711 = vrot.lane.b32.xlu0 %v8709_v3, %s13298_s3 }
0x319a   : > { %v8712_v61 = vpop.permute.xlu0 %8711 }
0x319b   : > { %v8714_v5 = vadd.f32 %v8712_v61, %v13045_v55 }
0x319d   : > { %11215 = vtanh.f32 %v8714_v5 }
0x31a7   : > { %v11216_v59 = vpop.eup %11215 }
0x31a8   : > { %8718 = vrot.lane.b32.xlu1 %v11216_v59, %s13263_s15 }
0x321a   : > { %v8719_v7 = vpop.permute.xlu1 %8718 }
0x321b   : > { %v8721_v8 = vmul.f32 %v8719_v7, %v8716_v49 }
0x321d   : > { %v8723_v39 = vadd.f32 %v8722_v58, %v8721_v8 }
0x321f   : > { %v8724_v44 = vpack.c.bf16 %v8723_v39, %v8723_v39  ;;  %v8798_v21 = vrot.slane %v8723_v39, 7 }
0x3221   : > { %8726 = vrot.lane.b32.xlu0 %v8724_v44, %s13263_s15 }
0x3293   : > { %v8727_v63 = vpop.permute.xlu0 %8726 }
0x3294   : > { %10768 = vmatmul.mubr.msk.bf16.vlgmr.msra.gmra.mrb[204].mxu1 %vm1703_vm6, %v8727_v63 }
0x3295   : > { %10780 = vmatpush3.bf16.msra.mxu1 %v13009_v34  ;;  %10783 = vmatprep.mubr.msk.bf16.mxu1 %vm11374_vm3, %v11373_v12 }
0x3296   : > { %10781 = vmatprep.subr.bf16.mxu1 %v11373_v12 }
0x3299   : > { %10782 = vmatpush3.bf16.msra.mxu1 %v13014_v36 }
0x329a   : > { %10795 = vmatprep.subr.bf16.mxu1 %v11373_v12 }
0x3367   : > { %v8765_v48 = vpop.f32.mrb[204].mxu1 }
0x3368   : > { %v8766_v60 = vadd.f32 %v13033_v43, %v8765_v48  ;;  %v10769_v22 = vpop.f32.mrb[205].mxu1 }
0x3369   : > { %v8768_v6 = vpop.f32.mrb[206].mxu1 }
0x336a   : > { %v8772_v33 = vrot.slane %v8766_v60, 7  ;;  %v10770_v17 = vpop.f32.mrb[207].mxu1 }
0x336c   : > { %8781 = vrot.lane.b32.xlu1 %v8772_v33, %s13298_s3  ;;  %v8774_v20 = vadd.f32 %v8772_v33, %v13045_v55 }
0x336e   : > { %v9741_v24 = vmul.f32 -1.442695, %v8774_v20 }
0x3370   : > { %11217 = vpow2.f32 %v9741_v24 }
0x337a   : > { %v11218_v51 = vpop.eup %11217 }
0x337b   : > { %v8778_v23 = vadd.f32 1.0, %v11218_v51 }
0x337d   : > { %11219 = vrcp.f32 %v8778_v23 }
0x3387   : > { %v11220_v18 = vpop.eup %11219 }
0x3388   : > { %v8791_v4 = vsub.f32 1.0, %v11220_v18  ;;  %v8800_v26 = vmul.f32 %v11220_v18, %v8798_v21 }
0x33de   : > { %v8782_v30 = vpop.permute.xlu1 %8781 }
0x33df   : > { %v8784_v11 = vmul.f32 %v11220_v18, %v8782_v30 }
0x33e1   : > { %8786 = vrot.lane.b32.xlu0 %v8784_v11, %s13298_s3 }
0x3453   : > { %v8787_v9 = vpop.permute.xlu0 %8786 }
0x3454   : > { %v8789_v13 = vadd.f32 %v8787_v9, %v13045_v55 }
0x3456   : > { %11221 = vtanh.f32 %v8789_v13 }
0x3460   : > { %v11222_v45 = vpop.eup %11221 }
0x3461   : > { %8793 = vrot.lane.b32.xlu1 %v11222_v45, %s13263_s15 }
0x34d3   : > { %v8794_v32 = vpop.permute.xlu1 %8793 }
0x34d4   : > { %v8796_v27 = vmul.f32 %v8794_v32, %v8791_v4 }
0x34d6   : > { %v8801_v38 = vadd.f32 %v8800_v26, %v8796_v27 }
0x34d8   : > { %v8802_v29 = vpack.c.bf16 %v8801_v38, %v8801_v38  ;;  %v8878_v41 = vrot.slane %v8801_v38, 7 }
0x34da   : > { %v8804_v62 = vshrl.u32 %v8802_v29, 16 }
0x34dc   : > { %8806 = vrot.lane.b32.xlu0 %v8804_v62, %s13263_s15 }
0x354e   : > { %v8807_v50 = vpop.permute.xlu0 %8806 }
0x354f   : > { %10776 = vmatmul.mubr.msk.bf16.vlgmr.msra.gmra.mrb[200].mxu0 %vm1703_vm6, %v8807_v50 }
0x3550   : > { %10788 = vmatpush3.bf16.msra.mxu0 %v13009_v34  ;;  %10791 = vmatprep.mubr.msk.bf16.mxu0 %vm11374_vm3, %v11373_v12 }
0x3551   : > { %10789 = vmatprep.subr.bf16.mxu0 %v11373_v12 }
0x3554   : > { %10790 = vmatpush3.bf16.msra.mxu0 %v13014_v36 }
0x3555   : > { %10803 = vmatprep.subr.bf16.mxu0 %v11373_v12 }
0x3622   : > { %v8845_v37 = vpop.f32.mrb[200].mxu0 }
0x3623   : > { %v8846_v46 = vadd.f32 %v13033_v43, %v8845_v37  ;;  %v10777_v1 = vpop.f32.mrb[201].mxu0 }
0x3624   : > { %v8848_v40 = vpop.f32.mrb[202].mxu0 }
0x3625   : > { %v8852_v35 = vrot.slane %v8846_v46, 6  ;;  %v10778_v19 = vpop.f32.mrb[203].mxu0 }
0x3627   : > { %8861 = vrot.lane.b32.xlu1 %v8852_v35, %s13298_s3  ;;  %v8854_v31 = vadd.f32 %v8852_v35, %v13045_v55 }
0x3629   : > { %v9743_v52 = vmul.f32 -1.442695, %v8854_v31 }
0x362b   : > { %11223 = vpow2.f32 %v9743_v52 }
0x3635   : > { %v11224_v53 = vpop.eup %11223 }
0x3636   : > { %v8858_v2 = vadd.f32 1.0, %v11224_v53 }
0x3638   : > { %11225 = vrcp.f32 %v8858_v2 }
0x3642   : > { %v11226_v0 = vpop.eup %11225 }
0x3643   : > { %v8871_v54 = vsub.f32 1.0, %v11226_v0  ;;  %v8880_v15 = vmul.f32 %v11226_v0, %v8878_v41 }
0x3699   : > { %v8862_v14 = vpop.permute.xlu1 %8861 }
0x369a   : > { %v8864_v16 = vmul.f32 %v11226_v0, %v8862_v14 }
0x369c   : > { %8866 = vrot.lane.b32.xlu0 %v8864_v16, %s13298_s3 }
0x370e   : > { %v8867_v57 = vpop.permute.xlu0 %8866 }
0x370f   : > { %v8869_v10 = vadd.f32 %v8867_v57, %v13045_v55 }
0x3711   : > { %11227 = vtanh.f32 %v8869_v10 }
0x371b   : > { %v11228_v47 = vpop.eup %11227 }
0x371c   : > { %8873 = vrot.lane.b32.xlu1 %v11228_v47, %s13263_s15 }
0x378e   : > { %v8874_v56 = vpop.permute.xlu1 %8873 }
0x378f   : > { %v8876_v25 = vmul.f32 %v8874_v56, %v8871_v54 }
0x3791   : > { %v8881_v28 = vadd.f32 %v8880_v15, %v8876_v25 }
0x3793   : > { %v8882_v42 = vpack.c.bf16 %v8881_v28, %v8881_v28  ;;  %v8957_v24 = vrot.slane %v8881_v28, 7 }
0x3795   : > { %v8884_v3 = vrot.slane %v8882_v42, 1 }
0x3797   : > { %8885 = vrot.lane.b32.xlu0 %v8884_v3, %s13263_s15 }
0x3809   : > { %v8886_v61 = vpop.permute.xlu0 %8885 }
0x380a   : > { %10784 = vmatmul.mubr.msk.bf16.vlgmr.msra.gmra.mrb[208].mxu1 %vm1703_vm6, %v8886_v61 }
0x380b   : > { %10796 = vmatpush3.bf16.msra.mxu1 %v13009_v34  ;;  %10799 = vmatprep.mubr.msk.bf16.mxu1 %vm11374_vm3, %v11373_v12 }
0x380c   : > { %10797 = vmatprep.subr.bf16.mxu1 %v11373_v12 }
0x380f   : > { %10798 = vmatpush3.bf16.msra.mxu1 %v13014_v36 }
0x3810   : > { %10811 = vmatprep.subr.bf16.mxu1 %v11373_v12 }
0x38dd   : > { %v8924_v5 = vpop.f32.mrb[208].mxu1 }
0x38de   : > { %v8925_v59 = vadd.f32 %v13033_v43, %v8924_v5  ;;  %v10785_v49 = vpop.f32.mrb[209].mxu1 }
0x38df   : > { %v8927_v7 = vpop.f32.mrb[210].mxu1 }
0x38e0   : > { %v8931_v58 = vrot.slane %v8925_v59, 5  ;;  %v10786_v8 = vpop.f32.mrb[211].mxu1 }
0x38e2   : > { %8940 = vrot.lane.b32.xlu1 %v8931_v58, %s13298_s3  ;;  %v8933_v39 = vadd.f32 %v8931_v58, %v13045_v55 }
0x38e4   : > { %v9745_v44 = vmul.f32 -1.442695, %v8933_v39 }
0x38e6   : > { %11229 = vpow2.f32 %v9745_v44 }
0x38f0   : > { %v11230_v63 = vpop.eup %11229 }
0x38f1   : > { %v8937_v48 = vadd.f32 1.0, %v11230_v63 }
0x38f3   : > { %11231 = vrcp.f32 %v8937_v48 }
0x38fd   : > { %v11232_v60 = vpop.eup %11231 }
0x38fe   : > { %v8950_v51 = vsub.f32 1.0, %v11232_v60  ;;  %v8959_v18 = vmul.f32 %v11232_v60, %v8957_v24 }
0x3954   : > { %v8941_v22 = vpop.permute.xlu1 %8940 }
0x3955   : > { %v8943_v6 = vmul.f32 %v11232_v60, %v8941_v22 }
0x3957   : > { %8945 = vrot.lane.b32.xlu0 %v8943_v6, %s13298_s3 }
0x39c9   : > { %v8946_v33 = vpop.permute.xlu0 %8945 }
0x39ca   : > { %v8948_v17 = vadd.f32 %v8946_v33, %v13045_v55 }
0x39cc   : > { %11233 = vtanh.f32 %v8948_v17 }
0x39d6   : > { %v11234_v20 = vpop.eup %11233 }
0x39d7   : > { %8952 = vrot.lane.b32.xlu1 %v11234_v20, %s13263_s15 }
0x3a49   : > { %v8953_v23 = vpop.permute.xlu1 %8952 }
0x3a4a   : > { %v8955_v30 = vmul.f32 %v8953_v23, %v8950_v51 }
0x3a4c   : > { %v8960_v11 = vadd.f32 %v8959_v18, %v8955_v30 }
0x3a4e   : > { %v8961_v9 = vpack.c.bf16 %v8960_v11, %v8960_v11  ;;  %v9038_v53 = vrot.slane %v8960_v11, 7 }
0x3a50   : > { %v8963_v13 = vshrl.u32 %v8961_v9, 16 }
0x3a52   : > { %v8965_v45 = vrot.slane %v8963_v13, 1 }
0x3a54   : > { %8966 = vrot.lane.b32.xlu0 %v8965_v45, %s13263_s15 }
0x3ac6   : > { %v8967_v21 = vpop.permute.xlu0 %8966 }
0x3ac7   : > { %10792 = vmatmul.mubr.msk.bf16.vlgmr.msra.gmra.mrb[204].mxu0 %vm1703_vm6, %v8967_v21 }
0x3ac8   : > { %10804 = vmatpush3.bf16.msra.mxu0 %v13009_v34  ;;  %10807 = vmatprep.mubr.msk.bf16.mxu0 %vm11374_vm3, %v11373_v12 }
0x3ac9   : > { %10805 = vmatprep.subr.bf16.mxu0 %v11373_v12 }
0x3acc   : > { %10806 = vmatpush3.bf16.msra.mxu0 %v13014_v36 }
0x3acd   : > { %10819 = vmatprep.subr.bf16.mxu0 %v11373_v12 }
0x3b9a   : > { %v9005_v4 = vpop.f32.mrb[204].mxu0 }
0x3b9b   : > { %v9006_v32 = vadd.f32 %v13033_v43, %v9005_v4  ;;  %v10793_v26 = vpop.f32.mrb[205].mxu0 }
0x3b9c   : > { %v9008_v27 = vpop.f32.mrb[206].mxu0 }
0x3b9d   : > { %v9012_v38 = vrot.slane %v9006_v32, 4  ;;  %v10794_v29 = vpop.f32.mrb[207].mxu0 }
0x3b9f   : > { %9021 = vrot.lane.b32.xlu1 %v9012_v38, %s13298_s3  ;;  %v9014_v62 = vadd.f32 %v9012_v38, %v13045_v55 }
0x3ba1   : > { %v9747_v50 = vmul.f32 -1.442695, %v9014_v62 }
0x3ba3   : > { %11235 = vpow2.f32 %v9747_v50 }
0x3bad   : > { %v11236_v37 = vpop.eup %11235 }
0x3bae   : > { %v9018_v46 = vadd.f32 1.0, %v11236_v37 }
0x3bb0   : > { %11237 = vrcp.f32 %v9018_v46 }
0x3bba   : > { %v11238_v1 = vpop.eup %11237 }
0x3bbb   : > { %v9031_v2 = vsub.f32 1.0, %v11238_v1  ;;  %v9040_v14 = vmul.f32 %v11238_v1, %v9038_v53 }
0x3c11   : > { %v9022_v40 = vpop.permute.xlu1 %9021 }
0x3c12   : > { %v9024_v35 = vmul.f32 %v11238_v1, %v9022_v40 }
0x3c14   : > { %9026 = vrot.lane.b32.xlu0 %v9024_v35, %s13298_s3 }
0x3c86   : > { %v9027_v19 = vpop.permute.xlu0 %9026 }
0x3c87   : > { %v9029_v31 = vadd.f32 %v9027_v19, %v13045_v55 }
0x3c89   : > { %11239 = vtanh.f32 %v9029_v31 }
0x3c93   : > { %v11240_v52 = vpop.eup %11239 }
0x3c94   : > { %9033 = vrot.lane.b32.xlu1 %v11240_v52, %s13263_s15 }
0x3d06   : > { %v9034_v0 = vpop.permute.xlu1 %9033 }
0x3d07   : > { %v9036_v16 = vmul.f32 %v9034_v0, %v9031_v2 }
0x3d09   : > { %v9041_v57 = vadd.f32 %v9040_v14, %v9036_v16 }
0x3d0b   : > { %v9042_v10 = vpack.c.bf16 %v9041_v57, %v9041_v57  ;;  %v9117_v39 = vrot.slane %v9041_v57, 7 }
0x3d0d   : > { %v9044_v47 = vrot.slane %v9042_v10, 2 }
0x3d0f   : > { %9045 = vrot.lane.b32.xlu0 %v9044_v47, %s13263_s15 }
0x3d81   : > { %v9046_v41 = vpop.permute.xlu0 %9045 }
0x3d82   : > { %10800 = vmatmul.mubr.msk.bf16.vlgmr.msra.gmra.mrb[212].mxu1 %vm1703_vm6, %v9046_v41 }
0x3d83   : > { %10812 = vmatpush3.bf16.msra.mxu1 %v13009_v34  ;;  %10815 = vmatprep.mubr.msk.bf16.mxu1 %vm11374_vm3, %v11373_v12 }
0x3d84   : > { %10813 = vmatprep.subr.bf16.mxu1 %v11373_v12 }
0x3d87   : > { %10814 = vmatpush3.bf16.msra.mxu1 %v13014_v36 }
0x3e55   : > { %v9084_v54 = vpop.f32.mrb[212].mxu1 }
0x3e56   : > { %v9085_v56 = vadd.f32 %v13033_v43, %v9084_v54  ;;  %v10801_v15 = vpop.f32.mrb[213].mxu1 }
0x3e57   : > { %v9087_v25 = vpop.f32.mrb[214].mxu1 }
0x3e58   : > { %v9091_v28 = vrot.slane %v9085_v56, 3  ;;  %v10802_v42 = vpop.f32.mrb[215].mxu1 }
0x3e5a   : > { %9100 = vrot.lane.b32.xlu1 %v9091_v28, %s13298_s3  ;;  %v9093_v3 = vadd.f32 %v9091_v28, %v13045_v55  ;;  %v11015_v28 = vld [vmem:[%s13256_s9] sm:$0xff]  }
0x3e5c   : > { %v9749_v61 = vmul.f32 -1.442695, %v9093_v3  ;;  %v11016_v3 = vld [vmem:[%s13256_s9 + $0x8] sm:$0xff]   ;;  %s11259_s9 = scalar_lea.vmem %s13149_s6, 16 }
0x3e5d   : > { %p11260_p12 = scmp.ne.s32.totalorder %s13149_s6, %s11259_s9 }
0x3e5e   : > { %11241 = vpow2.f32 %v9749_v61 }
0x3e5f   : > { %p11261_p13 = pnand %p11260_p12, %p11676_p5 }
0x3e61   : > { %p11262_p0 = pneg %p11261_p13 }
0x3e68   : > { %v11242_v34 = vpop.eup %11241 }
0x3e69   : > { %v9097_v5 = vadd.f32 1.0, %v11242_v34 }
0x3e6b   : > { %11243 = vrcp.f32 %v9097_v5 }
0x3e75   : > { %v11244_v59 = vpop.eup %11243 }
0x3e76   : > { %v9110_v44 = vsub.f32 1.0, %v11244_v59  ;;  %v9119_v48 = vmul.f32 %v11244_v59, %v9117_v39  ;;  %v9286_v39 = vld [vmem:[%s11631_s25] sm:$0x1] }
0x3ecc   : > { %v9101_v49 = vpop.permute.xlu1 %9100 }
0x3ecd   : > { %v9103_v7 = vmul.f32 %v11244_v59, %v9101_v49 }
0x3ecf   : > { %9105 = vrot.lane.b32.xlu0 %v9103_v7, %s13298_s3 }
0x3f41   : > { %v9106_v36 = vpop.permute.xlu0 %9105 }
0x3f42   : > { %v9108_v58 = vadd.f32 %v9106_v36, %v13045_v55 }
0x3f44   : > { %11245 = vtanh.f32 %v9108_v58 }
0x3f4e   : > { %v11246_v8 = vpop.eup %11245 }
0x3f4f   : > { %9112 = vrot.lane.b32.xlu1 %v11246_v8, %s13263_s15 }
0x3fc1   : > { %v9113_v63 = vpop.permute.xlu1 %9112 }
0x3fc2   : > { %v9115_v60 = vmul.f32 %v9113_v63, %v9110_v44 }
0x3fc4   : > { %v9120_v22 = vadd.f32 %v9119_v48, %v9115_v60 }
0x3fc6   : > { %v9121_v6 = vpack.c.bf16 %v9120_v22, %v9120_v22  ;;  %v9198_v62 = vrot.slane %v9120_v22, 7 }
0x3fc8   : > { %v9123_v33 = vshrl.u32 %v9121_v6, 16 }
0x3fca   : > { %v9125_v17 = vrot.slane %v9123_v33, 2 }
0x3fcc   : > { %9126 = vrot.lane.b32.xlu0 %v9125_v17, %s13263_s15 }
0x403e   : > { %v9127_v20 = vpop.permute.xlu0 %9126 }
0x403f   : > { %10808 = vmatmul.mubr.msk.bf16.vlgmr.msra.gmra.mrb[208].mxu0 %vm1703_vm6, %v9127_v20 }
0x4040   : > { %10823 = vmatprep.mubr.msk.bf16.mxu0 %vm11374_vm3, %v11373_v12  ;;  %10820 = vmatpush3.bf16.msra.mxu0 %v11015_v28  ;;  %vm9348_vm3 = vcmask 32768  }
0x4041   : > { %10821 = vmatprep.subr.bf16.mxu0 %v11373_v12 }
0x4044   : > { %10822 = vmatpush3.bf16.msra.mxu0 %v11016_v3 }
0x4112   : > { %v9165_v24 = vpop.f32.mrb[208].mxu0 }
0x4113   : > { %v9166_v51 = vadd.f32 %v13033_v43, %v9165_v24  ;;  %v10809_v23 = vpop.f32.mrb[209].mxu0 }
0x4114   : > { %v9168_v18 = vpop.f32.mrb[210].mxu0 }
0x4115   : > { %v9172_v30 = vrot.slane %v9166_v51, 2  ;;  %v10810_v11 = vpop.f32.mrb[211].mxu0 }
0x4117   : > { %9181 = vrot.lane.b32.xlu1 %v9172_v30, %s13298_s3  ;;  %v9174_v9 = vadd.f32 %v9172_v30, %v13045_v55 }
0x4119   : > { %v9751_v13 = vmul.f32 -1.442695, %v9174_v9 }
0x411b   : > { %11247 = vpow2.f32 %v9751_v13 }
0x4125   : > { %v11248_v45 = vpop.eup %11247 }
0x4126   : > { %v9178_v21 = vadd.f32 1.0, %v11248_v45 }
0x4128   : > { %11249 = vrcp.f32 %v9178_v21 }
0x4132   : > { %v11250_v4 = vpop.eup %11249 }
0x4133   : > { %v9191_v50 = vsub.f32 1.0, %v11250_v4  ;;  %v9200_v46 = vmul.f32 %v11250_v4, %v9198_v62 }
0x4189   : > { %v9182_v32 = vpop.permute.xlu1 %9181 }
0x418a   : > { %v9184_v26 = vmul.f32 %v11250_v4, %v9182_v32 }
0x418c   : > { %9186 = vrot.lane.b32.xlu0 %v9184_v26, %s13298_s3 }
0x41fe   : > { %v9187_v27 = vpop.permute.xlu0 %9186 }
0x41ff   : > { %v9189_v38 = vadd.f32 %v9187_v27, %v13045_v55 }
0x4201   : > { %11251 = vtanh.f32 %v9189_v38 }
0x420b   : > { %v11252_v29 = vpop.eup %11251 }
0x420c   : > { %9193 = vrot.lane.b32.xlu1 %v11252_v29, %s13263_s15 }
0x427e   : > { %v9194_v37 = vpop.permute.xlu1 %9193 }
0x427f   : > { %v9196_v1 = vmul.f32 %v9194_v37, %v9191_v50 }
0x4281   : > { %v9201_v40 = vadd.f32 %v9200_v46, %v9196_v1 }
0x4283   : > { %v9202_v35 = vpack.c.bf16 %v9201_v40, %v9201_v40  ;;  %v9277_v61 = vrot.slane %v9201_v40, 7 }
0x4285   : > { %v9204_v19 = vrot.slane %v9202_v35, 3 }
0x4287   : > { %9205 = vrot.lane.b32.xlu0 %v9204_v19, %s13263_s15 }
0x42f9   : > { %v9206_v31 = vpop.permute.xlu0 %9205 }
0x42fa   : > { %10816 = vmatmul.mubr.msk.bf16.vlgmr.msra.gmra.mrb[216].mxu1 %vm1703_vm6, %v9206_v31 }
0x43cd   : > { %v9244_v52 = vpop.f32.mrb[216].mxu1 }
0x43ce   : > { %v9245_v53 = vadd.f32 %v13033_v43, %v9244_v52  ;;  %v10817_v2 = vpop.f32.mrb[217].mxu1 }
0x43cf   : > { %v9247_v0 = vpop.f32.mrb[218].mxu1 }
0x43d0   : > { %v9251_v14 = vrot.slane %v9245_v53, 1  ;;  %v10818_v16 = vpop.f32.mrb[219].mxu1 }
0x43d2   : > { %9260 = vrot.lane.b32.xlu1 %v9251_v14, %s13298_s3  ;;  %v9253_v57 = vadd.f32 %v9251_v14, %v13045_v55 }
0x43d4   : > { %v9753_v10 = vmul.f32 -1.442695, %v9253_v57 }
0x43d6   : > { %11253 = vpow2.f32 %v9753_v10 }
0x43e0   : > { %v11254_v47 = vpop.eup %11253 }
0x43e1   : > { %v9257_v41 = vadd.f32 1.0, %v11254_v47 }
0x43e3   : > { %11255 = vrcp.f32 %v9257_v41 }
0x43ed   : > { %v11256_v54 = vpop.eup %11255 }
0x43ee   : > { %v9270_v34 = vsub.f32 1.0, %v11256_v54  ;;  %v9279_v59 = vmul.f32 %v11256_v54, %v9277_v61 }
0x4444   : > { %v9261_v56 = vpop.permute.xlu1 %9260 }
0x4445   : > { %v9263_v15 = vmul.f32 %v11256_v54, %v9261_v56 }
0x4447   : > { %9265 = vrot.lane.b32.xlu0 %v9263_v15, %s13298_s3  ;;  %s9757_s3 = sshll.u32 %s11659_s0, 4  ;;  %s11387_s0 = smov [#allocation2]  }
0x4448   : > { %s13147_s8 = scalar_lea.hbm %s11636_s27, %s9757_s3  ;;  %s11263_s10 = sshll.u32 %s11387_s0, 4  ;;  %s11264_s10 = int_to_ptr.vmem [resolvable:$false] %s11263_s10 }
0x4449   : > { %s11265_s12 = scalar_lea.vmem %s11264_s10, 32  ;;  %p11266_p1 = scmp.lt.s32.totalorder %s13149_s6, %s11264_s10 }
0x444a   : > { %p11267_p2 = scmp.lt.s32.totalorder %s11265_s12, %s11259_s9 }
0x444c   : > { %p11268_p3 = por %p11267_p2, %p11266_p1 }
0x444e   : > { %p11269_p4 = pnand %p11268_p3, %p11262_p0 }
0x44b9   : > { %v9266_v43 = vpop.permute.xlu0 %9265 }
0x44ba   : > { %v9268_v25 = vadd.f32 %v9266_v43, %v13045_v55 }
0x44bc   : > { %11257 = vtanh.f32 %v9268_v25 }
0x44c6   : > { %v11258_v42 = vpop.eup %11257 }
0x44c7   : > { %9272 = vrot.lane.b32.xlu1 %v11258_v42, %s13263_s15 }
0x4539   : > { %v9273_v5 = vpop.permute.xlu1 %9272 }
0x453a   : > { %v9275_v49 = vmul.f32 %v9273_v5, %v9270_v34 }
0x453c   : > { %v9280_v7 = vadd.f32 %v9279_v59, %v9275_v49 }
0x453e   : > { %v9285_v55 = vpack.c.bf16 %v9280_v7, %v9280_v7 }
0x4540   : > { %v9288_v36 = vshrl.u32 %v9285_v55, 16 }
0x4542   : > { %v9290_v58 = vrot.slane %v9288_v36, 3 }
0x4544   : > { %9291 = vrot.lane.b32.xlu0 %v9290_v58, %s13263_s15  ;;  %s9351_s15 = scalar_lea.sflag [#allocation3], %s1451_s4 }
0x45b6   : > { %v9292_v8 = vpop.permute.xlu0 %9291 }
0x45b7   : > { %10824 = vmatmul.mubr.msk.bf16.vlgmr.msra.gmra.mrb[212].mxu0 %vm1703_vm6, %v9292_v8 }
0x468a   : > { %v9342_v12 = vpop.f32.mrb[212].mxu0 }
0x468b   : > { %v9343_v44 = vadd.f32 %v9342_v12, %v9286_v39  ;;  %v10825_v63 = vpop.f32.mrb[213].mxu0 }
0x468c   : > { %v9345_v48 = vpop.f32.mrb[214].mxu0 }
0x468d   : > { %v10826_v60 = vpop.f32.mrb[215].mxu0  ;;  %9349 = vst.msk [vmem:[%s1452_s5] sm:$0x1] %vm9348_vm3, %v9343_v44 }
0x468e   : > { %11272 = shalt.err (!%p11269_p4)
}
0x468f   : > { %s11273_s5 = scalar_lea.hbm %s13147_s8, 16  ;;  %s11277_s4 = scalar_lea.hbm %s11636_s27, 32 }
0x4690   : > { %p11274_p7 = scmp.ne.s32.totalorder %s13147_s8, %s11273_s5  ;;  %p11278_p10 = scmp.lt.u32.totalorder %s13147_s8, %s11636_s27 }
0x4691   : > { %p11279_p11 = scmp.lt.u32.totalorder %s11277_s4, %s11273_s5  ;;  %p11281_p13 = scmp.lt.u32.totalorder %s11273_s5, %s13147_s8 }
0x4692   : > { %p11275_p8 = pnand %p11274_p7, %p11676_p5 }
0x4693   : > { %p11280_p12 = por %p11279_p11, %p11278_p10 }
0x4694   : > { %p11276_p9 = pneg %p11275_p8 }
0x4695   : > { %p11282_p1 = por %p11281_p13, %p11280_p12 }
0x4697   : > { %p11283_p0 = pnand %p11282_p1, %p11276_p9 }
0x4699   : > { %11286 = shalt.err (!%p11283_p0)
}
0x469a   : > { %10859 = dma.vmem_to_hbm [thread:$0]  (%p11676_p5), %s13149_s6, 16, %s13147_s8, %s9351_s15  }
0x469b PF: > { %p10865_p2 = scmp.ge.s32.totalorder %s11321_s7, 2  ;;  %s9375_s9 = sand.u32 1, %s11309_s28  }
0x469c   : > { %s9376_s12 = scalar_lea.sflag [#allocation3], %s9375_s9 }
0x469d   : > { %p10862_p3 = pnand %p10865_p2, %p11680_p6 }
0x469f   : > { %11304 = dma.done.wait (!%p10862_p3), %s9376_s12, 16  }
0x46a0   : > { %11306 = vsyncadd (!%p10862_p3), %s9376_s12, 4294967280  ;;  %p107_p4 = scmp.ge.s32.totalorder %s11663_s11, 4   ;;  %s13300_s28 = smov %s11313_s1 }
0x46a1   : > { %s13301_s1 = smov %s11317_s2  ;;  %s13302_s2 = smov %s11674_s18 }
0x46a2   : > { %s13303_s7 = smov %s11663_s11  ;;  %109 = sbr.rel (!%p107_p4) target bundleno = 97 (0x61), region = 315 }
0x46a9   :  { %9380 = vsyncpa [#allocation3], 1 }
0x46aa   :  { %9382 = vsyncpa [#allocation3 + $0x1], 1 }

</bundles_post_ra>
